<compile_context>
chip_gen: v7x
topology: tpu7x:2x2x1
jax: 0.10.0
libtpu: 0.0.40
codegen_flags: <defaults>
</compile_context>

<pallas_src>
import jax
import jax.numpy as jnp
from jax import lax
from jax.experimental import pallas as pl
from jax.experimental.pallas import tpu as pltpu

# ---------------------------------------------------------------- constants
SUBFRAME = 40                          # subframe_size
COND = 80
EXC_LEN = 256                          # excitation memory length
PRED_LEN = SUBFRAME + 4                # 44
PRED_READ = 48                         # gather read window (multiple of 8)
FWC_IN = 2 * SUBFRAME + COND + 4       # 164
FWC_OUT = 192
H1, H2, H3 = 160, 128, 128
SKIP_OUT = 128

# GRU1 gate stride padded so gate slices start on 128-lane boundaries
GS1 = 256
GI1_W = 3 * GS1                        # 768
# fused fwc0 projection layout: [wih1_a(768) | wskip_d(128) | gain(pad 128)]
FWC0_SKIP = GI1_W                      # 768
FWC0_GAIN = GI1_W + SKIP_OUT           # 896
FWC0_W = FWC0_GAIN + 128               # 1024
# fused pitch / prev projection layout: [gru1(768) | gru2(384) | gru3(384) | skip(128)]
P_G2 = GI1_W                           # 768
P_G3 = P_G2 + 3 * H2                   # 1152
P_SK = P_G3 + 3 * H3                   # 1536
P_W = P_SK + SKIP_OUT                  # 1664
# fused gru1_out / gru2_out layouts: [wih(384) | wskip(128)]
G1_SK = 3 * H2                         # 384
G2_SK = 3 * H3                         # 384

# noise layout for torch n(x): one lane-dense slab / sub-frame, segments
# padded to 128-lane multiples so every slice starts lane-aligned.
NOISE_OFF = {}
_o = 0
for _name, _w in [("cond", COND), ("pred", PRED_LEN), ("prev", SUBFRAME),
                  ("fwc0", FWC_OUT), ("g1", H1), ("glu1", H1),
                  ("g2", H2), ("glu2", H2), ("g3", H3), ("glu3", H3),
                  ("skip", SKIP_OUT)]:
    NOISE_OFF[_name] = _o
    _o += ((_w + 127) // 128) * 128
NOISE_TOT = _o                         # 1792

WEIGHT_ORDER = [
    "w_cg", "b_cg", "b_gain",
    "w_fwc_a", "w_fwc_b", "w_fwcglu",
    "W_fwc0", "whh1", "wglu1",
    "W_pitch", "W_prev",
    "W_g1", "whh2", "wglu2",
    "W_g2", "whh3", "wglu3",
    "wskip_c", "wskipglu", "wsig",
]
NW = len(WEIGHT_ORDER)


# ---------------------------------------------------------------- kernel
def fargan_sub_kernel(*refs):
    (period_ref, cond_ref, noise_ref, exc_in_ref,
     s1_in_ref, s2_in_ref, s3_in_ref, sfwc_in_ref) = refs[:8]
    w = dict(zip(WEIGHT_ORDER, refs[8:8 + NW]))
    (sig_ref, fpitch_ref, exc_ref, h1_ref, h2_ref, h3_ref, fwc_ref,
     exc_t_ref) = refs[8 + NW:]

    bt = pl.program_id(0)              # batch tile   (parallel)
    s = pl.program_id(1)               # sub-frame    (sequential / arbitrary)
    n_sub = pl.num_programs(1)
    BT = cond_ref.shape[1]
    f32, bf16 = jnp.float32, jnp.bfloat16

    # ---- initialize VMEM-resident carries on the first sub-frame ----------
    @pl.when(s == 0)
    def _init():
        h1_ref[...] = s1_in_ref[...]
        h2_ref[...] = s2_in_ref[...]
        h3_ref[...] = s3_in_ref[...]
        fwc_ref[...] = sfwc_in_ref[...]
        tail = exc_t_ref.shape[0] - EXC_LEN
        exc_t_ref[...] = jnp.concatenate(
            [exc_in_ref[...].T, jnp.zeros((tail, BT), f32)], axis=0)

    nz = noise_ref[0]                                   # (BT, NOISE_TOT)

    def nclamp(x, name):                                # torch n(x)
        lo = NOISE_OFF[name]
        return jnp.clip(x + nz[:, lo:lo + x.shape[-1]], -1.0, 1.0)

    def bdot(x_bf, name):                               # bf16 MXU matmul
        return jnp.dot(x_bf, w[name][...], preferred_element_type=f32)

    # ---- hoisted projections of carried state (overlap gather / FWConv) ---
    h1 = h1_ref[...]
    h2 = h2_ref[...]
    h3 = h3_ref[...]
    gh1 = bdot(h1.astype(bf16), "whh1")                 # (BT, 768)
    gh2 = bdot(h2.astype(bf16), "whh2")                 # (BT, 384)
    gh3 = bdot(h3.astype(bf16), "whh3")                 # (BT, 384)
    fwc_state = fwc_ref[...]                            # (BT, 164)
    fwc_a = bdot(fwc_state.astype(bf16), "w_fwc_a")     # (BT, 192)

    cond = nclamp(cond_ref[0], "cond")                  # (BT, 80)

    # cond_gain_dense: Linear(80 -> 1), then exp
    gain = jnp.exp(jnp.sum(cond * w["w_cg"][...], axis=-1, keepdims=True)
                   + w["b_cg"][...])                    # (BT, 1)
    inv_g = 1.0 / (1e-5 + gain)

    # ---- pitch-delayed excitation gather (transposed append-only buffer) --
    # logical exc_mem at step s == rows [base, base+256) of exc_t_ref
    base = s * SUBFRAME
    jj = lax.broadcasted_iota(jnp.int32, (PRED_READ, BT), 0)
    lane = lax.broadcasted_iota(jnp.int32, (PRED_READ, BT), 1)
    pred_t = jnp.zeros((PRED_READ, BT), f32)
    for b in range(BT):                                 # BT is small & static
        p = period_ref[s, bt * BT + b]                  # SMEM scalar
        st1 = jnp.maximum(base + EXC_LEN - 2 - p, 0)    # idx = 254 - p + j
        st2 = jnp.maximum(base + EXC_LEN - 2 - 2 * p, 0)  # wrapped branch
        r1 = exc_t_ref[pl.ds(st1, PRED_READ), :]        # (48, BT)
        r2 = exc_t_ref[pl.ds(st2, PRED_READ), :]
        sel = jnp.where(jj < p + 2, r1, r2)
        pred_t = jnp.where(lane == b, sel, pred_t)
    prev_start = pl.multiple_of(base + EXC_LEN - SUBFRAME, 8)
    prev_t = exc_t_ref[pl.ds(prev_start, SUBFRAME), :]  # (40, BT)

    stacked = jnp.concatenate([pred_t, prev_t], axis=0)  # (88, BT)
    row = stacked.T                                      # (BT, 88) one XLU xpose
    pred = nclamp(row[:, :PRED_LEN] * inv_g, "pred")     # (BT, 44)
    prev = nclamp(row[:, PRED_READ:PRED_READ + SUBFRAME] * inv_g, "prev")
    fpitch = pred[:, 2:2 + SUBFRAME]                     # (BT, 40)
    fpitch_ref[s] = fpitch

    # ---- wide early projections (pitch_gain applied post-matmul) ----------
    pitch_proj = bdot(fpitch.astype(bf16), "W_pitch")    # (BT, 1664)
    prev_proj = bdot(prev.astype(bf16), "W_prev")        # (BT, 1664)

    # ---- FWConv (kernel 2 => dot over [state, x]) + GLU -------------------
    tmp = jnp.concatenate([cond, pred, prev], axis=1)    # (BT, 164) new state
    fwc_pre = jnp.tanh(fwc_a + bdot(tmp.astype(bf16), "w_fwc_b"))
    fwc0 = fwc_pre * jax.nn.sigmoid(bdot(fwc_pre.astype(bf16), "w_fwcglu"))
    fwc0 = nclamp(fwc0, "fwc0")
    fwc_ref[...] = tmp

    fwc0_proj = bdot(fwc0.astype(bf16), "W_fwc0")        # (BT, 1024)
    pitch_gain = jax.nn.sigmoid(fwc0_proj[:, FWC0_GAIN:FWC0_GAIN + 4]
                                + w["b_gain"][...])      # (BT, 4)

    def gru_cell(gi, gh, h, hidden, stride):             # nn.GRUCell, bias=False
        r = jax.nn.sigmoid(gi[:, 0:hidden] + gh[:, 0:hidden])
        z = jax.nn.sigmoid(gi[:, stride:stride + hidden]
                           + gh[:, stride:stride + hidden])
        c = jnp.tanh(gi[:, 2 * stride:2 * stride + hidden]
                     + r * gh[:, 2 * stride:2 * stride + hidden])
        return (1.0 - z) * c + z * h

    # ---- GRU 1 -------------------------------------------------------------
    gi1 = (fwc0_proj[:, 0:GI1_W]
           + pitch_gain[:, 0:1] * pitch_proj[:, 0:GI1_W]
           + prev_proj[:, 0:GI1_W])
    g1 = gru_cell(gi1, gh1, h1, H1, GS1)
    h1_ref[...] = g1
    g1n = nclamp(g1, "g1")
    gru1_out = nclamp(g1n * jax.nn.sigmoid(bdot(g1n.astype(bf16), "wglu1")),
                      "glu1")
    g1_proj = bdot(gru1_out.astype(bf16), "W_g1")        # (BT, 512)

    # ---- GRU 2 -------------------------------------------------------------
    gi2 = (g1_proj[:, 0:3 * H2]
           + pitch_gain[:, 1:2] * pitch_proj[:, P_G2:P_G2 + 3 * H2]
           + prev_proj[:, P_G2:P_G2 + 3 * H2])
    g2 = gru_cell(gi2, gh2, h2, H2, H2)
    h2_ref[...] = g2
    g2n = nclamp(g2, "g2")
    gru2_out = nclamp(g2n * jax.nn.sigmoid(bdot(g2n.astype(bf16), "wglu2")),
                      "glu2")
    g2_proj = bdot(gru2_out.astype(bf16), "W_g2")        # (BT, 512)

    # ---- GRU 3 -------------------------------------------------------------
    gi3 = (g2_proj[:, 0:3 * H3]
           + pitch_gain[:, 2:3] * pitch_proj[:, P_G3:P_G3 + 3 * H3]
           + prev_proj[:, P_G3:P_G3 + 3 * H3])
    g3 = gru_cell(gi3, gh3, h3, H3, H3)
    h3_ref[...] = g3
    g3n = nclamp(g3, "g3")
    gru3_out = nclamp(g3n * jax.nn.sigmoid(bdot(g3n.astype(bf16), "wglu3")),
                      "glu3")

    # ---- skip dense + GLU + output -----------------------------------------
    skip_pre = jnp.tanh(
        g1_proj[:, G1_SK:G1_SK + SKIP_OUT]
        + g2_proj[:, G2_SK:G2_SK + SKIP_OUT]
        + bdot(gru3_out.astype(bf16), "wskip_c")
        + fwc0_proj[:, FWC0_SKIP:FWC0_SKIP + SKIP_OUT]
        + pitch_gain[:, 3:4] * pitch_proj[:, P_SK:P_SK + SKIP_OUT]
        + prev_proj[:, P_SK:P_SK + SKIP_OUT])
    skip_n = nclamp(skip_pre, "skip")
    skip_out = skip_n * jax.nn.sigmoid(bdot(skip_n.astype(bf16), "wskipglu"))

    sig = jnp.tanh(bdot(skip_out.astype(bf16), "wsig")) * gain    # (BT, 40)
    sig_ref[s] = sig

    # append sig to the transposed excitation buffer (no per-step roll)
    app_start = pl.multiple_of(base + EXC_LEN, 8)
    exc_t_ref[pl.ds(app_start, SUBFRAME), :] = sig.T

    # materialise the row-major (BT, 256) excitation state once, at the end
    @pl.when(s == n_sub - 1)
    def _finish():
        fin = pl.multiple_of(base + SUBFRAME, 8)
        exc_ref[...] = exc_t_ref[pl.ds(fin, EXC_LEN), :].T


# ---------------------------------------------------------------- wrapper
def fargan_sub_frames(params, cond, period, prev_pred, exc_mem, states, noise,
                      *, batch_tile=None):
    """Run FARGANSub for all sub-frames of one frame in a single pallas_call.

    cond:   (n_sub, B, 80)        period: (n_sub, B) int32
    noise:  (n_sub, B, NOISE_TOT) pre-scaled (u-0.5)/127 quantization noise
    prev_pred, exc_mem: (B, 256); states = (gru1, gru2, gru3, fwc_state)
    """
    n_sub, B, _ = cond.shape
    s1, s2, s3, sfwc = states
    pp_len = prev_pred.shape[1]
    if batch_tile is None:
        # >=2 tiles when possible so ("parallel", ...) can use both v7x cores
        batch_tile = 8 if (B % 8 == 0 and B > 8) else B
    BT = batch_tile
    assert B % BT == 0 and (BT == B or BT % 8 == 0)

    smem = pl.BlockSpec(memory_space=pltpu.MemorySpace.SMEM)

    def stream_spec(feat):
        return pl.BlockSpec((1, BT, feat), lambda bt, s: (s, bt, 0))

    def state_spec(feat):
        return pl.BlockSpec((BT, feat), lambda bt, s: (bt, 0))

    def weight_spec(arr):
        return pl.BlockSpec(arr.shape, lambda bt, s: (0, 0))

    in_specs = ([smem, stream_spec(COND), stream_spec(NOISE_TOT),
                 state_spec(EXC_LEN), state_spec(H1), state_spec(H2),
                 state_spec(H3), state_spec(FWC_IN)]
                + [weight_spec(params[k]) for k in WEIGHT_ORDER])

    out_shape = (
        jax.ShapeDtypeStruct((n_sub, B, SUBFRAME), jnp.float32),   # sig
        jax.ShapeDtypeStruct((n_sub, B, SUBFRAME), jnp.float32),   # fpitch
        jax.ShapeDtypeStruct((B, EXC_LEN), jnp.float32),           # exc_mem
        jax.ShapeDtypeStruct((B, H1), jnp.float32),                # gru1 state
        jax.ShapeDtypeStruct((B, H2), jnp.float32),                # gru2 state
        jax.ShapeDtypeStruct((B, H3), jnp.float32),                # gru3 state
        jax.ShapeDtypeStruct((B, FWC_IN), jnp.float32),            # fwc0 state
    )
    frame_spec = pl.BlockSpec((n_sub, BT, SUBFRAME), lambda bt, s: (0, bt, 0))
    out_specs = (frame_spec, frame_spec,
                 state_spec(EXC_LEN), state_spec(H1), state_spec(H2),
                 state_spec(H3), state_spec(FWC_IN))

    exc_rows = EXC_LEN + n_sub * SUBFRAME + 8            # append-only buffer

    outs = pl.pallas_call(
        fargan_sub_kernel,
        out_shape=out_shape,
        grid=(B // BT, n_sub),
        in_specs=in_specs,
        out_specs=out_specs,
        scratch_shapes=[pltpu.VMEM((exc_rows, BT), jnp.float32)],
        compiler_params=pltpu.CompilerParams(
            dimension_semantics=("parallel", "arbitrary")),
    )(period, cond, noise, exc_mem, s1, s2, s3, sfwc,
      *[params[k] for k in WEIGHT_ORDER])

    sig, fpitch, exc_out, g1, g2, g3, fwc_state = outs

    # prev_pred is never read by the compute -> roll it host-side
    roll = min(n_sub * SUBFRAME, pp_len)
    fp_flat = jnp.transpose(fpitch, (1, 0, 2)).reshape(B, n_sub * SUBFRAME)
    pp_out = jnp.concatenate([prev_pred[:, roll:], fp_flat[:, -roll:]], axis=1)
    return sig, exc_out, pp_out, (g1, g2, g3, fwc_state)


# ---------------------------------------------------------------- params
def init_raw_params(key):
    """Synthetic per-matrix weights, pre-transposed to (in, out), f32.

    Mapping to the torch module (weight_norm folded):
      w_fwc_[a|b]      : K-splits of fwc0.conv           ([state | x])
      wih*_[a|b|c]     : K-splits of GRUCell weight_ih   ([main | pitch | prev])
      wskip_[a..f]     : K-splits of skip_dense ([gru1|gru2|gru3|fwc0|pitch|prev])
    """
    ks = iter(jax.random.split(key, 32))

    def mat(n_in, n_out):
        return (jax.random.normal(next(ks), (n_in, n_out), jnp.float32)
                / jnp.sqrt(jnp.float32(n_in + n_out)))

    return {
        "w_cg": jax.random.normal(next(ks), (1, COND), jnp.float32) * 0.05,
        "b_cg": jnp.zeros((1, 1), jnp.float32),
        "w_fwc_a": mat(FWC_IN, FWC_OUT), "w_fwc_b": mat(FWC_IN, FWC_OUT),
        "w_fwcglu": mat(FWC_OUT, FWC_OUT),
        "w_gain": mat(FWC_OUT, 4), "b_gain": jnp.zeros((1, 4), jnp.float32),
        "wih1_a": mat(FWC_OUT, 3 * H1), "wih1_b": mat(SUBFRAME, 3 * H1),
        "wih1_c": mat(SUBFRAME, 3 * H1), "whh1": mat(H1, 3 * H1),
        "wglu1": mat(H1, H1),
        "wih2_a": mat(H1, 3 * H2), "wih2_b": mat(SUBFRAME, 3 * H2),
        "wih2_c": mat(SUBFRAME, 3 * H2), "whh2": mat(H2, 3 * H2),
        "wglu2": mat(H2, H2),
        "wih3_a": mat(H2, 3 * H3), "wih3_b": mat(SUBFRAME, 3 * H3),
        "wih3_c": mat(SUBFRAME, 3 * H3), "whh3": mat(H3, 3 * H3),
        "wglu3": mat(H3, H3),
        "wskip_a": mat(H1, SKIP_OUT), "wskip_b": mat(H2, SKIP_OUT),
        "wskip_c": mat(H3, SKIP_OUT), "wskip_d": mat(FWC_OUT, SKIP_OUT),
        "wskip_e": mat(SUBFRAME, SKIP_OUT), "wskip_f": mat(SUBFRAME, SKIP_OUT),
        "wskipglu": mat(SKIP_OUT, SKIP_OUT), "wsig": mat(SKIP_OUT, SUBFRAME),
    }


def pack_params(raw, dtype=jnp.bfloat16):
    """Pack raw matrices into the fused / lane-aligned kernel layout."""
    def gates_pad(w, hidden, stride):
        # (K, 3*hidden) -> (K, 3*stride) with each GRU gate block at g*stride
        if stride == hidden:
            return w
        k = w.shape[0]
        out = jnp.zeros((k, 3 * stride), w.dtype)
        for g in range(3):
            out = out.at[:, g * stride:g * stride + hidden].set(
                w[:, g * hidden:(g + 1) * hidden])
        return out

    def pad_cols(w, total):
        k, ncol = w.shape
        if ncol == total:
            return w
        return jnp.concatenate([w, jnp.zeros((k, total - ncol), w.dtype)], 1)

    def cat(*xs):
        return jnp.concatenate(xs, axis=1).astype(dtype)

    return {
        "w_cg": raw["w_cg"], "b_cg": raw["b_cg"], "b_gain": raw["b_gain"],
        "w_fwc_a": raw["w_fwc_a"].astype(dtype),
        "w_fwc_b": raw["w_fwc_b"].astype(dtype),
        "w_fwcglu": raw["w_fwcglu"].astype(dtype),
        "W_fwc0": cat(gates_pad(raw["wih1_a"], H1, GS1), raw["wskip_d"],
                      pad_cols(raw["w_gain"], 128)),                # (192,1024)
        "whh1": gates_pad(raw["whh1"], H1, GS1).astype(dtype),      # (160, 768)
        "wglu1": raw["wglu1"].astype(dtype),
        "W_pitch": cat(gates_pad(raw["wih1_b"], H1, GS1), raw["wih2_b"],
                       raw["wih3_b"], raw["wskip_e"]),              # (40, 1664)
        "W_prev": cat(gates_pad(raw["wih1_c"], H1, GS1), raw["wih2_c"],
                      raw["wih3_c"], raw["wskip_f"]),               # (40, 1664)
        "W_g1": cat(raw["wih2_a"], raw["wskip_a"]),                 # (160, 512)
        "whh2": raw["whh2"].astype(dtype), "wglu2": raw["wglu2"].astype(dtype),
        "W_g2": cat(raw["wih3_a"], raw["wskip_b"]),                 # (128, 512)
        "whh3": raw["whh3"].astype(dtype), "wglu3": raw["wglu3"].astype(dtype),
        "wskip_c": raw["wskip_c"].astype(dtype),
        "wskipglu": raw["wskipglu"].astype(dtype),
        "wsig": raw["wsig"].astype(dtype),
    }


# ---------------------------------------------------------------- main
if __name__ == "__main__":
    key = jax.random.PRNGKey(0)
    B, NSUB = 16, 4                 # 2 batch tiles of 8 -> both v7x cores busy
    k = jax.random.split(key, 10)

    cond = jax.random.normal(k[0], (NSUB, B, COND), jnp.float32) * 0.5
    period = jax.random.randint(k[1], (NSUB, B), 32, 250, dtype=jnp.int32)
    prev_pred = jax.random.normal(k[2], (B, EXC_LEN), jnp.float32) * 0.1
    exc_mem = jax.random.normal(k[3], (B, EXC_LEN), jnp.float32) * 0.1
    states = (
        jax.random.normal(k[4], (B, H1), jnp.float32) * 0.1,
        jax.random.normal(k[5], (B, H2), jnp.float32) * 0.1,
        jax.random.normal(k[6], (B, H3), jnp.float32) * 0.1,
        jax.random.normal(k[7], (B, FWC_IN), jnp.float32) * 0.1,
    )
    # host-side quantization noise for torch n(x): (rand-0.5)/127 per sub-frame
    noise = (jax.random.uniform(k[8], (NSUB, B, NOISE_TOT), jnp.float32)
             - 0.5) / 127.0
    params = pack_params(init_raw_params(k[9]))

    sig, exc_out, pp_out, (g1, g2, g3, fwc_state) = fargan_sub_frames(
        params, cond, period, prev_pred, exc_mem, states, noise, batch_tile=8)
    jax.block_until_ready((sig, exc_out, pp_out, g1, g2, g3, fwc_state))

    assert sig.shape == (NSUB, B, SUBFRAME)
    assert exc_out.shape == (B, EXC_LEN)
    assert pp_out.shape == (B, EXC_LEN)
    assert g1.shape == (B, H1) and g2.shape == (B, H2) and g3.shape == (B, H3)
    assert fwc_state.shape == (B, FWC_IN)
    for a in (sig, exc_out, pp_out, g1, g2, g3, fwc_state):
        assert bool(jnp.all(jnp.isfinite(a)))
    # last sub-frame's signal must be the tail of the rolled excitation memory
    assert bool(jnp.allclose(exc_out[:, -SUBFRAME:], sig[-1], atol=1e-5))

    print("KERNEL_OK")
</pallas_src>

<mosaic_0001>
module attributes {stable_mosaic.version = 11 : i64} {
  func.func @fargan_sub_kernel(%arg0: i32, %arg1: i32, %arg2: memref<4x16xi32, #tpu.memory_space<smem>>, %arg3: memref<1x8x80xf32, #tpu.memory_space<vmem>>, %arg4: memref<1x8x1792xf32, #tpu.memory_space<vmem>>, %arg5: memref<8x256xf32, #tpu.memory_space<vmem>>, %arg6: memref<8x160xf32, #tpu.memory_space<vmem>>, %arg7: memref<8x128xf32, #tpu.memory_space<vmem>>, %arg8: memref<8x128xf32, #tpu.memory_space<vmem>>, %arg9: memref<8x164xf32, #tpu.memory_space<vmem>>, %arg10: memref<1x80xf32, #tpu.memory_space<vmem>>, %arg11: memref<1x1xf32, #tpu.memory_space<vmem>>, %arg12: memref<1x4xf32, #tpu.memory_space<vmem>>, %arg13: memref<164x192xbf16, #tpu.memory_space<vmem>>, %arg14: memref<164x192xbf16, #tpu.memory_space<vmem>>, %arg15: memref<192x192xbf16, #tpu.memory_space<vmem>>, %arg16: memref<192x1024xbf16, #tpu.memory_space<vmem>>, %arg17: memref<160x768xbf16, #tpu.memory_space<vmem>>, %arg18: memref<160x160xbf16, #tpu.memory_space<vmem>>, %arg19: memref<40x1664xbf16, #tpu.memory_space<vmem>>, %arg20: memref<40x1664xbf16, #tpu.memory_space<vmem>>, %arg21: memref<160x512xbf16, #tpu.memory_space<vmem>>, %arg22: memref<128x384xbf16, #tpu.memory_space<vmem>>, %arg23: memref<128x128xbf16, #tpu.memory_space<vmem>>, %arg24: memref<128x512xbf16, #tpu.memory_space<vmem>>, %arg25: memref<128x384xbf16, #tpu.memory_space<vmem>>, %arg26: memref<128x128xbf16, #tpu.memory_space<vmem>>, %arg27: memref<128x128xbf16, #tpu.memory_space<vmem>>, %arg28: memref<128x128xbf16, #tpu.memory_space<vmem>>, %arg29: memref<128x40xbf16, #tpu.memory_space<vmem>>, %arg30: memref<4x8x40xf32, #tpu.memory_space<vmem>>, %arg31: memref<4x8x40xf32, #tpu.memory_space<vmem>>, %arg32: memref<8x256xf32, #tpu.memory_space<vmem>>, %arg33: memref<8x160xf32, #tpu.memory_space<vmem>>, %arg34: memref<8x128xf32, #tpu.memory_space<vmem>>, %arg35: memref<8x128xf32, #tpu.memory_space<vmem>>, %arg36: memref<8x164xf32, #tpu.memory_space<vmem>>, %arg37: memref<424x8xf32, #tpu.memory_space<vmem>>) attributes {dimension_semantics = [#tpu.dimension_semantics<parallel>, #tpu.dimension_semantics<arbitrary>], iteration_bounds = array<i64: 2, 4>, scalar_prefetch = 0 : i64, scratch_operands = 1 : i64, tpu.core_type = #tpu.core_type<tc>, window_params = [{transform_indices = @transform_0, window_bounds = array<i64: 4, 16>}, {transform_indices = @transform_1, window_bounds = array<i64: 1, 8, 80>}, {transform_indices = @transform_2, window_bounds = array<i64: 1, 8, 1792>}, {transform_indices = @transform_3, window_bounds = array<i64: 8, 256>}, {transform_indices = @transform_4, window_bounds = array<i64: 8, 160>}, {transform_indices = @transform_5, window_bounds = array<i64: 8, 128>}, {transform_indices = @transform_6, window_bounds = array<i64: 8, 128>}, {transform_indices = @transform_7, window_bounds = array<i64: 8, 164>}, {pipeline_mode = #tpu.pipeline_mode<synchronous>, transform_indices = @transform_8, window_bounds = array<i64: 1, 80>}, {pipeline_mode = #tpu.pipeline_mode<synchronous>, transform_indices = @transform_9, window_bounds = array<i64: 1, 1>}, {pipeline_mode = #tpu.pipeline_mode<synchronous>, transform_indices = @transform_10, window_bounds = array<i64: 1, 4>}, {pipeline_mode = #tpu.pipeline_mode<synchronous>, transform_indices = @transform_11, window_bounds = array<i64: 164, 192>}, {pipeline_mode = #tpu.pipeline_mode<synchronous>, transform_indices = @transform_12, window_bounds = array<i64: 164, 192>}, {pipeline_mode = #tpu.pipeline_mode<synchronous>, transform_indices = @transform_13, window_bounds = array<i64: 192, 192>}, {pipeline_mode = #tpu.pipeline_mode<synchronous>, transform_indices = @transform_14, window_bounds = array<i64: 192, 1024>}, {pipeline_mode = #tpu.pipeline_mode<synchronous>, transform_indices = @transform_15, window_bounds = array<i64: 160, 768>}, {pipeline_mode = #tpu.pipeline_mode<synchronous>, transform_indices = @transform_16, window_bounds = array<i64: 160, 160>}, {pipeline_mode = #tpu.pipeline_mode<synchronous>, transform_indices = @transform_17, window_bounds = array<i64: 40, 1664>}, {pipeline_mode = #tpu.pipeline_mode<synchronous>, transform_indices = @transform_18, window_bounds = array<i64: 40, 1664>}, {pipeline_mode = #tpu.pipeline_mode<synchronous>, transform_indices = @transform_19, window_bounds = array<i64: 160, 512>}, {pipeline_mode = #tpu.pipeline_mode<synchronous>, transform_indices = @transform_20, window_bounds = array<i64: 128, 384>}, {pipeline_mode = #tpu.pipeline_mode<synchronous>, transform_indices = @transform_21, window_bounds = array<i64: 128, 128>}, {pipeline_mode = #tpu.pipeline_mode<synchronous>, transform_indices = @transform_22, window_bounds = array<i64: 128, 512>}, {pipeline_mode = #tpu.pipeline_mode<synchronous>, transform_indices = @transform_23, window_bounds = array<i64: 128, 384>}, {pipeline_mode = #tpu.pipeline_mode<synchronous>, transform_indices = @transform_24, window_bounds = array<i64: 128, 128>}, {pipeline_mode = #tpu.pipeline_mode<synchronous>, transform_indices = @transform_25, window_bounds = array<i64: 128, 128>}, {pipeline_mode = #tpu.pipeline_mode<synchronous>, transform_indices = @transform_26, window_bounds = array<i64: 128, 128>}, {pipeline_mode = #tpu.pipeline_mode<synchronous>, transform_indices = @transform_27, window_bounds = array<i64: 128, 40>}, {transform_indices = @transform_28, window_bounds = array<i64: 4, 8, 40>}, {transform_indices = @transform_29, window_bounds = array<i64: 4, 8, 40>}, {transform_indices = @transform_30, window_bounds = array<i64: 8, 256>}, {transform_indices = @transform_31, window_bounds = array<i64: 8, 160>}, {transform_indices = @transform_32, window_bounds = array<i64: 8, 128>}, {transform_indices = @transform_33, window_bounds = array<i64: 8, 128>}, {transform_indices = @transform_34, window_bounds = array<i64: 8, 164>}]} {
    %c0_i32 = arith.constant 0 : i32
    %0 = arith.cmpi eq, %arg1, %c0_i32 : i32
    %1 = arith.extui %0 : i1 to i32
    %c0_i32_0 = arith.constant 0 : i32
    %2 = arith.cmpi ne, %1, %c0_i32_0 : i32
    scf.if %2 {
      %c0_225 = arith.constant 0 : index
      %c0_226 = arith.constant 0 : index
      %540 = vector.load %arg6[%c0_225, %c0_226] : memref<8x160xf32, #tpu.memory_space<vmem>>, vector<8x160xf32>
      %c0_227 = arith.constant 0 : index
      %c0_228 = arith.constant 0 : index
      %541 = vector.load %arg33[%c0_227, %c0_228] : memref<8x160xf32, #tpu.memory_space<vmem>>, vector<8x160xf32>
      tpu.vector_store %arg33[%c0_227, %c0_228], %540 {strides = array<i32>} : memref<8x160xf32, #tpu.memory_space<vmem>>, vector<8x160xf32>,
      %c0_229 = arith.constant 0 : index
      %c0_230 = arith.constant 0 : index
      %542 = vector.load %arg7[%c0_229, %c0_230] : memref<8x128xf32, #tpu.memory_space<vmem>>, vector<8x128xf32>
      %c0_231 = arith.constant 0 : index
      %c0_232 = arith.constant 0 : index
      %543 = vector.load %arg34[%c0_231, %c0_232] : memref<8x128xf32, #tpu.memory_space<vmem>>, vector<8x128xf32>
      tpu.vector_store %arg34[%c0_231, %c0_232], %542 {strides = array<i32>} : memref<8x128xf32, #tpu.memory_space<vmem>>, vector<8x128xf32>,
      %c0_233 = arith.constant 0 : index
      %c0_234 = arith.constant 0 : index
      %544 = vector.load %arg8[%c0_233, %c0_234] : memref<8x128xf32, #tpu.memory_space<vmem>>, vector<8x128xf32>
      %c0_235 = arith.constant 0 : index
      %c0_236 = arith.constant 0 : index
      %545 = vector.load %arg35[%c0_235, %c0_236] : memref<8x128xf32, #tpu.memory_space<vmem>>, vector<8x128xf32>
      tpu.vector_store %arg35[%c0_235, %c0_236], %544 {strides = array<i32>} : memref<8x128xf32, #tpu.memory_space<vmem>>, vector<8x128xf32>,
      %c0_237 = arith.constant 0 : index
      %c0_238 = arith.constant 0 : index
      %546 = vector.load %arg9[%c0_237, %c0_238] : memref<8x164xf32, #tpu.memory_space<vmem>>, vector<8x164xf32>
      %c0_239 = arith.constant 0 : index
      %c0_240 = arith.constant 0 : index
      %547 = vector.load %arg36[%c0_239, %c0_240] : memref<8x164xf32, #tpu.memory_space<vmem>>, vector<8x164xf32>
      tpu.vector_store %arg36[%c0_239, %c0_240], %546 {strides = array<i32>} : memref<8x164xf32, #tpu.memory_space<vmem>>, vector<8x164xf32>,
      %c0_241 = arith.constant 0 : index
      %c0_242 = arith.constant 0 : index
      %548 = vector.load %arg5[%c0_241, %c0_242] : memref<8x256xf32, #tpu.memory_space<vmem>>, vector<8x256xf32>
      %549 = tpu.transpose %548, [1, 0] : vector<8x256xf32> -> vector<256x8xf32>
      %cst_243 = arith.constant 0.000000e+00 : f32
      %550 = vector.broadcast %cst_243 : f32 to vector<168x8xf32>
      %551 = tpu.concatenate %549, %550 in 0 : vector<256x8xf32>, vector<168x8xf32> -> vector<424x8xf32>
      %c0_244 = arith.constant 0 : index
      %c0_245 = arith.constant 0 : index
      %552 = vector.load %arg37[%c0_244, %c0_245] : memref<424x8xf32, #tpu.memory_space<vmem>>, vector<424x8xf32>
      tpu.vector_store %arg37[%c0_244, %c0_245], %551 {strides = array<i32>} : memref<424x8xf32, #tpu.memory_space<vmem>>, vector<424x8xf32>,
    } else {
    }
    %c0 = arith.constant 0 : index
    %c0_1 = arith.constant 0 : index
    %c0_2 = arith.constant 0 : index
    %3 = vector.load %arg4[%c0, %c0_1, %c0_2] : memref<1x8x1792xf32, #tpu.memory_space<vmem>>, vector<1x8x1792xf32>
    %4 = vector.shape_cast %3 : vector<1x8x1792xf32> to vector<8x1792xf32>
    %c0_3 = arith.constant 0 : index
    %c0_4 = arith.constant 0 : index
    %5 = vector.load %arg33[%c0_3, %c0_4] : memref<8x160xf32, #tpu.memory_space<vmem>>, vector<8x160xf32>
    %c0_5 = arith.constant 0 : index
    %c0_6 = arith.constant 0 : index
    %6 = vector.load %arg34[%c0_5, %c0_6] : memref<8x128xf32, #tpu.memory_space<vmem>>, vector<8x128xf32>
    %c0_7 = arith.constant 0 : index
    %c0_8 = arith.constant 0 : index
    %7 = vector.load %arg35[%c0_7, %c0_8] : memref<8x128xf32, #tpu.memory_space<vmem>>, vector<8x128xf32>
    %8 = arith.truncf %5 : vector<8x160xf32> to vector<8x160xbf16>
    %c0_9 = arith.constant 0 : index
    %c0_10 = arith.constant 0 : index
    %9 = vector.load %arg17[%c0_9, %c0_10] : memref<160x768xbf16, #tpu.memory_space<vmem>>, vector<160x768xbf16>
    %cst = arith.constant dense<0.000000e+00> : vector<8x768xf32>
    %10 = tpu.matmul %8, %9, %cst {dimension_numbers = #tpu.dot_dimension_numbers<[1], [0], [0], [1], [0, 0, 1, 1], [], []>} : vector<8x160xbf16>, vector<160x768xbf16>, vector<8x768xf32> -> vector<8x768xf32>
    %11 = arith.truncf %6 : vector<8x128xf32> to vector<8x128xbf16>
    %c0_11 = arith.constant 0 : index
    %c0_12 = arith.constant 0 : index
    %12 = vector.load %arg22[%c0_11, %c0_12] : memref<128x384xbf16, #tpu.memory_space<vmem>>, vector<128x384xbf16>
    %cst_13 = arith.constant dense<0.000000e+00> : vector<8x384xf32>
    %13 = tpu.matmul %11, %12, %cst_13 {dimension_numbers = #tpu.dot_dimension_numbers<[1], [0], [0], [1], [0, 0, 1, 1], [], []>} : vector<8x128xbf16>, vector<128x384xbf16>, vector<8x384xf32> -> vector<8x384xf32>
    %14 = arith.truncf %7 : vector<8x128xf32> to vector<8x128xbf16>
    %c0_14 = arith.constant 0 : index
    %c0_15 = arith.constant 0 : index
    %15 = vector.load %arg25[%c0_14, %c0_15] : memref<128x384xbf16, #tpu.memory_space<vmem>>, vector<128x384xbf16>
    %cst_16 = arith.constant dense<0.000000e+00> : vector<8x384xf32>
    %16 = tpu.matmul %14, %15, %cst_16 {dimension_numbers = #tpu.dot_dimension_numbers<[1], [0], [0], [1], [0, 0, 1, 1], [], []>} : vector<8x128xbf16>, vector<128x384xbf16>, vector<8x384xf32> -> vector<8x384xf32>
    %c0_17 = arith.constant 0 : index
    %c0_18 = arith.constant 0 : index
    %17 = vector.load %arg36[%c0_17, %c0_18] : memref<8x164xf32, #tpu.memory_space<vmem>>, vector<8x164xf32>
    %18 = arith.truncf %17 : vector<8x164xf32> to vector<8x164xbf16>
    %c0_19 = arith.constant 0 : index
    %c0_20 = arith.constant 0 : index
    %19 = vector.load %arg13[%c0_19, %c0_20] : memref<164x192xbf16, #tpu.memory_space<vmem>>, vector<164x192xbf16>
    %cst_21 = arith.constant dense<0.000000e+00> : vector<8x192xf32>
    %20 = tpu.matmul %18, %19, %cst_21 {dimension_numbers = #tpu.dot_dimension_numbers<[1], [0], [0], [1], [0, 0, 1, 1], [], []>} : vector<8x164xbf16>, vector<164x192xbf16>, vector<8x192xf32> -> vector<8x192xf32>
    %c0_22 = arith.constant 0 : index
    %c0_23 = arith.constant 0 : index
    %c0_24 = arith.constant 0 : index
    %21 = vector.load %arg3[%c0_22, %c0_23, %c0_24] : memref<1x8x80xf32, #tpu.memory_space<vmem>>, vector<1x8x80xf32>
    %22 = vector.shape_cast %21 : vector<1x8x80xf32> to vector<8x80xf32>
    %23 = vector.extract_strided_slice %4 {offsets = [0, 0], sizes = [8, 80], strides = [1, 1]} : vector<8x1792xf32> to vector<8x80xf32>
    %24 = arith.addf %22, %23 : vector<8x80xf32>
    %cst_25 = arith.constant -1.000000e+00 : f32
    %cst_26 = arith.constant 1.000000e+00 : f32
    %25 = vector.broadcast %cst_25 : f32 to vector<8x80xf32>
    %26 = arith.maximumf %25, %24 : vector<8x80xf32>
    %27 = vector.broadcast %cst_26 : f32 to vector<8x80xf32>
    %28 = arith.minimumf %27, %26 : vector<8x80xf32>
    %c0_27 = arith.constant 0 : index
    %c0_28 = arith.constant 0 : index
    %29 = vector.load %arg10[%c0_27, %c0_28] : memref<1x80xf32, #tpu.memory_space<vmem>>, vector<1x80xf32>
    %30 = vector.broadcast %29 : vector<1x80xf32> to vector<8x80xf32>
    %31 = arith.mulf %28, %30 : vector<8x80xf32>
    %cst_29 = arith.constant dense<0.000000e+00> : vector<8xf32>
    %32 = vector.multi_reduction <add>, %31, %cst_29 [1] : vector<8x80xf32> to vector<8xf32>
    %33 = vector.shape_cast %32 : vector<8xf32> to vector<8x1xf32>
    %c0_30 = arith.constant 0 : index
    %c0_31 = arith.constant 0 : index
    %34 = vector.load %arg11[%c0_30, %c0_31] : memref<1x1xf32, #tpu.memory_space<vmem>>, vector<1x1xf32>
    %35 = vector.broadcast %34 : vector<1x1xf32> to vector<8x1xf32>
    %36 = arith.addf %33, %35 : vector<8x1xf32>
    %37 = math.exp %36 : vector<8x1xf32>
    %cst_32 = arith.constant 9.99999974E-6 : f32
    %38 = vector.broadcast %cst_32 : f32 to vector<8x1xf32>
    %39 = arith.addf %38, %37 : vector<8x1xf32>
    %cst_33 = arith.constant 1.000000e+00 : f32
    %40 = vector.broadcast %cst_33 : f32 to vector<8x1xf32>
    %41 = arith.divf %40, %39 : vector<8x1xf32>
    %c40_i32 = arith.constant 40 : i32
    %42 = arith.muli %arg1, %c40_i32 : i32
    %43 = tpu.iota {dimensions = array<i32: 0>} : vector<48x8xi32>
    %44 = tpu.iota {dimensions = array<i32: 1>} : vector<48x8xi32>
    %cst_34 = arith.constant 0.000000e+00 : f32
    %45 = vector.broadcast %cst_34 : f32 to vector<48x8xf32>
    %c8_i32 = arith.constant 8 : i32
    %46 = arith.muli %arg0, %c8_i32 : i32
    %c0_i32_35 = arith.constant 0 : i32
    %47 = arith.addi %46, %c0_i32_35 : i32
    %48 = arith.index_cast %arg1 : i32 to index
    %49 = arith.index_cast %47 : i32 to index
    %50 = memref.load %arg2[%48, %49] : memref<4x16xi32, #tpu.memory_space<smem>>
    %c256_i32 = arith.constant 256 : i32
    %51 = arith.addi %42, %c256_i32 : i32
    %c2_i32 = arith.constant 2 : i32
    %52 = arith.subi %51, %c2_i32 : i32
    %53 = arith.subi %52, %50 : i32
    %c0_i32_36 = arith.constant 0 : i32
    %54 = arith.maxsi %53, %c0_i32_36 : i32
    %c256_i32_37 = arith.constant 256 : i32
    %55 = arith.addi %42, %c256_i32_37 : i32
    %c2_i32_38 = arith.constant 2 : i32
    %56 = arith.subi %55, %c2_i32_38 : i32
    %c2_i32_39 = arith.constant 2 : i32
    %57 = arith.muli %c2_i32_39, %50 : i32
    %58 = arith.subi %56, %57 : i32
    %c0_i32_40 = arith.constant 0 : i32
    %59 = arith.maxsi %58, %c0_i32_40 : i32
    %60 = arith.index_cast %54 : i32 to index
    %c0_41 = arith.constant 0 : index
    %61 = vector.load %arg37[%60, %c0_41] : memref<424x8xf32, #tpu.memory_space<vmem>>, vector<48x8xf32>
    %62 = arith.index_cast %59 : i32 to index
    %c0_42 = arith.constant 0 : index
    %63 = vector.load %arg37[%62, %c0_42] : memref<424x8xf32, #tpu.memory_space<vmem>>, vector<48x8xf32>
    %c2_i32_43 = arith.constant 2 : i32
    %64 = arith.addi %50, %c2_i32_43 : i32
    %65 = vector.broadcast %64 : i32 to vector<48x8xi32>
    %66 = arith.cmpi slt, %43, %65 : vector<48x8xi32>
    %67 = arith.select %66, %61, %63 : vector<48x8xi1>, vector<48x8xf32>
    %c0_i32_44 = arith.constant 0 : i32
    %68 = vector.broadcast %c0_i32_44 : i32 to vector<48x8xi32>
    %69 = arith.cmpi eq, %44, %68 : vector<48x8xi32>
    %70 = arith.select %69, %67, %45 : vector<48x8xi1>, vector<48x8xf32>
    %c8_i32_45 = arith.constant 8 : i32
    %71 = arith.muli %arg0, %c8_i32_45 : i32
    %c1_i32 = arith.constant 1 : i32
    %72 = arith.addi %71, %c1_i32 : i32
    %73 = arith.index_cast %arg1 : i32 to index
    %74 = arith.index_cast %72 : i32 to index
    %75 = memref.load %arg2[%73, %74] : memref<4x16xi32, #tpu.memory_space<smem>>
    %c256_i32_46 = arith.constant 256 : i32
    %76 = arith.addi %42, %c256_i32_46 : i32
    %c2_i32_47 = arith.constant 2 : i32
    %77 = arith.subi %76, %c2_i32_47 : i32
    %78 = arith.subi %77, %75 : i32
    %c0_i32_48 = arith.constant 0 : i32
    %79 = arith.maxsi %78, %c0_i32_48 : i32
    %c256_i32_49 = arith.constant 256 : i32
    %80 = arith.addi %42, %c256_i32_49 : i32
    %c2_i32_50 = arith.constant 2 : i32
    %81 = arith.subi %80, %c2_i32_50 : i32
    %c2_i32_51 = arith.constant 2 : i32
    %82 = arith.muli %c2_i32_51, %75 : i32
    %83 = arith.subi %81, %82 : i32
    %c0_i32_52 = arith.constant 0 : i32
    %84 = arith.maxsi %83, %c0_i32_52 : i32
    %85 = arith.index_cast %79 : i32 to index
    %c0_53 = arith.constant 0 : index
    %86 = vector.load %arg37[%85, %c0_53] : memref<424x8xf32, #tpu.memory_space<vmem>>, vector<48x8xf32>
    %87 = arith.index_cast %84 : i32 to index
    %c0_54 = arith.constant 0 : index
    %88 = vector.load %arg37[%87, %c0_54] : memref<424x8xf32, #tpu.memory_space<vmem>>, vector<48x8xf32>
    %c2_i32_55 = arith.constant 2 : i32
    %89 = arith.addi %75, %c2_i32_55 : i32
    %90 = vector.broadcast %89 : i32 to vector<48x8xi32>
    %91 = arith.cmpi slt, %43, %90 : vector<48x8xi32>
    %92 = arith.select %91, %86, %88 : vector<48x8xi1>, vector<48x8xf32>
    %c1_i32_56 = arith.constant 1 : i32
    %93 = vector.broadcast %c1_i32_56 : i32 to vector<48x8xi32>
    %94 = arith.cmpi eq, %44, %93 : vector<48x8xi32>
    %95 = arith.select %94, %92, %70 : vector<48x8xi1>, vector<48x8xf32>
    %c8_i32_57 = arith.constant 8 : i32
    %96 = arith.muli %arg0, %c8_i32_57 : i32
    %c2_i32_58 = arith.constant 2 : i32
    %97 = arith.addi %96, %c2_i32_58 : i32
    %98 = arith.index_cast %arg1 : i32 to index
    %99 = arith.index_cast %97 : i32 to index
    %100 = memref.load %arg2[%98, %99] : memref<4x16xi32, #tpu.memory_space<smem>>
    %c256_i32_59 = arith.constant 256 : i32
    %101 = arith.addi %42, %c256_i32_59 : i32
    %c2_i32_60 = arith.constant 2 : i32
    %102 = arith.subi %101, %c2_i32_60 : i32
    %103 = arith.subi %102, %100 : i32
    %c0_i32_61 = arith.constant 0 : i32
    %104 = arith.maxsi %103, %c0_i32_61 : i32
    %c256_i32_62 = arith.constant 256 : i32
    %105 = arith.addi %42, %c256_i32_62 : i32
    %c2_i32_63 = arith.constant 2 : i32
    %106 = arith.subi %105, %c2_i32_63 : i32
    %c2_i32_64 = arith.constant 2 : i32
    %107 = arith.muli %c2_i32_64, %100 : i32
    %108 = arith.subi %106, %107 : i32
    %c0_i32_65 = arith.constant 0 : i32
    %109 = arith.maxsi %108, %c0_i32_65 : i32
    %110 = arith.index_cast %104 : i32 to index
    %c0_66 = arith.constant 0 : index
    %111 = vector.load %arg37[%110, %c0_66] : memref<424x8xf32, #tpu.memory_space<vmem>>, vector<48x8xf32>
    %112 = arith.index_cast %109 : i32 to index
    %c0_67 = arith.constant 0 : index
    %113 = vector.load %arg37[%112, %c0_67] : memref<424x8xf32, #tpu.memory_space<vmem>>, vector<48x8xf32>
    %c2_i32_68 = arith.constant 2 : i32
    %114 = arith.addi %100, %c2_i32_68 : i32
    %115 = vector.broadcast %114 : i32 to vector<48x8xi32>
    %116 = arith.cmpi slt, %43, %115 : vector<48x8xi32>
    %117 = arith.select %116, %111, %113 : vector<48x8xi1>, vector<48x8xf32>
    %c2_i32_69 = arith.constant 2 : i32
    %118 = vector.broadcast %c2_i32_69 : i32 to vector<48x8xi32>
    %119 = arith.cmpi eq, %44, %118 : vector<48x8xi32>
    %120 = arith.select %119, %117, %95 : vector<48x8xi1>, vector<48x8xf32>
    %c8_i32_70 = arith.constant 8 : i32
    %121 = arith.muli %arg0, %c8_i32_70 : i32
    %c3_i32 = arith.constant 3 : i32
    %122 = arith.addi %121, %c3_i32 : i32
    %123 = arith.index_cast %arg1 : i32 to index
    %124 = arith.index_cast %122 : i32 to index
    %125 = memref.load %arg2[%123, %124] : memref<4x16xi32, #tpu.memory_space<smem>>
    %c256_i32_71 = arith.constant 256 : i32
    %126 = arith.addi %42, %c256_i32_71 : i32
    %c2_i32_72 = arith.constant 2 : i32
    %127 = arith.subi %126, %c2_i32_72 : i32
    %128 = arith.subi %127, %125 : i32
    %c0_i32_73 = arith.constant 0 : i32
    %129 = arith.maxsi %128, %c0_i32_73 : i32
    %c256_i32_74 = arith.constant 256 : i32
    %130 = arith.addi %42, %c256_i32_74 : i32
    %c2_i32_75 = arith.constant 2 : i32
    %131 = arith.subi %130, %c2_i32_75 : i32
    %c2_i32_76 = arith.constant 2 : i32
    %132 = arith.muli %c2_i32_76, %125 : i32
    %133 = arith.subi %131, %132 : i32
    %c0_i32_77 = arith.constant 0 : i32
    %134 = arith.maxsi %133, %c0_i32_77 : i32
    %135 = arith.index_cast %129 : i32 to index
    %c0_78 = arith.constant 0 : index
    %136 = vector.load %arg37[%135, %c0_78] : memref<424x8xf32, #tpu.memory_space<vmem>>, vector<48x8xf32>
    %137 = arith.index_cast %134 : i32 to index
    %c0_79 = arith.constant 0 : index
    %138 = vector.load %arg37[%137, %c0_79] : memref<424x8xf32, #tpu.memory_space<vmem>>, vector<48x8xf32>
    %c2_i32_80 = arith.constant 2 : i32
    %139 = arith.addi %125, %c2_i32_80 : i32
    %140 = vector.broadcast %139 : i32 to vector<48x8xi32>
    %141 = arith.cmpi slt, %43, %140 : vector<48x8xi32>
    %142 = arith.select %141, %136, %138 : vector<48x8xi1>, vector<48x8xf32>
    %c3_i32_81 = arith.constant 3 : i32
    %143 = vector.broadcast %c3_i32_81 : i32 to vector<48x8xi32>
    %144 = arith.cmpi eq, %44, %143 : vector<48x8xi32>
    %145 = arith.select %144, %142, %120 : vector<48x8xi1>, vector<48x8xf32>
    %c8_i32_82 = arith.constant 8 : i32
    %146 = arith.muli %arg0, %c8_i32_82 : i32
    %c4_i32 = arith.constant 4 : i32
    %147 = arith.addi %146, %c4_i32 : i32
    %148 = arith.index_cast %arg1 : i32 to index
    %149 = arith.index_cast %147 : i32 to index
    %150 = memref.load %arg2[%148, %149] : memref<4x16xi32, #tpu.memory_space<smem>>
    %c256_i32_83 = arith.constant 256 : i32
    %151 = arith.addi %42, %c256_i32_83 : i32
    %c2_i32_84 = arith.constant 2 : i32
    %152 = arith.subi %151, %c2_i32_84 : i32
    %153 = arith.subi %152, %150 : i32
    %c0_i32_85 = arith.constant 0 : i32
    %154 = arith.maxsi %153, %c0_i32_85 : i32
    %c256_i32_86 = arith.constant 256 : i32
    %155 = arith.addi %42, %c256_i32_86 : i32
    %c2_i32_87 = arith.constant 2 : i32
    %156 = arith.subi %155, %c2_i32_87 : i32
    %c2_i32_88 = arith.constant 2 : i32
    %157 = arith.muli %c2_i32_88, %150 : i32
    %158 = arith.subi %156, %157 : i32
    %c0_i32_89 = arith.constant 0 : i32
    %159 = arith.maxsi %158, %c0_i32_89 : i32
    %160 = arith.index_cast %154 : i32 to index
    %c0_90 = arith.constant 0 : index
    %161 = vector.load %arg37[%160, %c0_90] : memref<424x8xf32, #tpu.memory_space<vmem>>, vector<48x8xf32>
    %162 = arith.index_cast %159 : i32 to index
    %c0_91 = arith.constant 0 : index
    %163 = vector.load %arg37[%162, %c0_91] : memref<424x8xf32, #tpu.memory_space<vmem>>, vector<48x8xf32>
    %c2_i32_92 = arith.constant 2 : i32
    %164 = arith.addi %150, %c2_i32_92 : i32
    %165 = vector.broadcast %164 : i32 to vector<48x8xi32>
    %166 = arith.cmpi slt, %43, %165 : vector<48x8xi32>
    %167 = arith.select %166, %161, %163 : vector<48x8xi1>, vector<48x8xf32>
    %c4_i32_93 = arith.constant 4 : i32
    %168 = vector.broadcast %c4_i32_93 : i32 to vector<48x8xi32>
    %169 = arith.cmpi eq, %44, %168 : vector<48x8xi32>
    %170 = arith.select %169, %167, %145 : vector<48x8xi1>, vector<48x8xf32>
    %c8_i32_94 = arith.constant 8 : i32
    %171 = arith.muli %arg0, %c8_i32_94 : i32
    %c5_i32 = arith.constant 5 : i32
    %172 = arith.addi %171, %c5_i32 : i32
    %173 = arith.index_cast %arg1 : i32 to index
    %174 = arith.index_cast %172 : i32 to index
    %175 = memref.load %arg2[%173, %174] : memref<4x16xi32, #tpu.memory_space<smem>>
    %c256_i32_95 = arith.constant 256 : i32
    %176 = arith.addi %42, %c256_i32_95 : i32
    %c2_i32_96 = arith.constant 2 : i32
    %177 = arith.subi %176, %c2_i32_96 : i32
    %178 = arith.subi %177, %175 : i32
    %c0_i32_97 = arith.constant 0 : i32
    %179 = arith.maxsi %178, %c0_i32_97 : i32
    %c256_i32_98 = arith.constant 256 : i32
    %180 = arith.addi %42, %c256_i32_98 : i32
    %c2_i32_99 = arith.constant 2 : i32
    %181 = arith.subi %180, %c2_i32_99 : i32
    %c2_i32_100 = arith.constant 2 : i32
    %182 = arith.muli %c2_i32_100, %175 : i32
    %183 = arith.subi %181, %182 : i32
    %c0_i32_101 = arith.constant 0 : i32
    %184 = arith.maxsi %183, %c0_i32_101 : i32
    %185 = arith.index_cast %179 : i32 to index
    %c0_102 = arith.constant 0 : index
    %186 = vector.load %arg37[%185, %c0_102] : memref<424x8xf32, #tpu.memory_space<vmem>>, vector<48x8xf32>
    %187 = arith.index_cast %184 : i32 to index
    %c0_103 = arith.constant 0 : index
    %188 = vector.load %arg37[%187, %c0_103] : memref<424x8xf32, #tpu.memory_space<vmem>>, vector<48x8xf32>
    %c2_i32_104 = arith.constant 2 : i32
    %189 = arith.addi %175, %c2_i32_104 : i32
    %190 = vector.broadcast %189 : i32 to vector<48x8xi32>
    %191 = arith.cmpi slt, %43, %190 : vector<48x8xi32>
    %192 = arith.select %191, %186, %188 : vector<48x8xi1>, vector<48x8xf32>
    %c5_i32_105 = arith.constant 5 : i32
    %193 = vector.broadcast %c5_i32_105 : i32 to vector<48x8xi32>
    %194 = arith.cmpi eq, %44, %193 : vector<48x8xi32>
    %195 = arith.select %194, %192, %170 : vector<48x8xi1>, vector<48x8xf32>
    %c8_i32_106 = arith.constant 8 : i32
    %196 = arith.muli %arg0, %c8_i32_106 : i32
    %c6_i32 = arith.constant 6 : i32
    %197 = arith.addi %196, %c6_i32 : i32
    %198 = arith.index_cast %arg1 : i32 to index
    %199 = arith.index_cast %197 : i32 to index
    %200 = memref.load %arg2[%198, %199] : memref<4x16xi32, #tpu.memory_space<smem>>
    %c256_i32_107 = arith.constant 256 : i32
    %201 = arith.addi %42, %c256_i32_107 : i32
    %c2_i32_108 = arith.constant 2 : i32
    %202 = arith.subi %201, %c2_i32_108 : i32
    %203 = arith.subi %202, %200 : i32
    %c0_i32_109 = arith.constant 0 : i32
    %204 = arith.maxsi %203, %c0_i32_109 : i32
    %c256_i32_110 = arith.constant 256 : i32
    %205 = arith.addi %42, %c256_i32_110 : i32
    %c2_i32_111 = arith.constant 2 : i32
    %206 = arith.subi %205, %c2_i32_111 : i32
    %c2_i32_112 = arith.constant 2 : i32
    %207 = arith.muli %c2_i32_112, %200 : i32
    %208 = arith.subi %206, %207 : i32
    %c0_i32_113 = arith.constant 0 : i32
    %209 = arith.maxsi %208, %c0_i32_113 : i32
    %210 = arith.index_cast %204 : i32 to index
    %c0_114 = arith.constant 0 : index
    %211 = vector.load %arg37[%210, %c0_114] : memref<424x8xf32, #tpu.memory_space<vmem>>, vector<48x8xf32>
    %212 = arith.index_cast %209 : i32 to index
    %c0_115 = arith.constant 0 : index
    %213 = vector.load %arg37[%212, %c0_115] : memref<424x8xf32, #tpu.memory_space<vmem>>, vector<48x8xf32>
    %c2_i32_116 = arith.constant 2 : i32
    %214 = arith.addi %200, %c2_i32_116 : i32
    %215 = vector.broadcast %214 : i32 to vector<48x8xi32>
    %216 = arith.cmpi slt, %43, %215 : vector<48x8xi32>
    %217 = arith.select %216, %211, %213 : vector<48x8xi1>, vector<48x8xf32>
    %c6_i32_117 = arith.constant 6 : i32
    %218 = vector.broadcast %c6_i32_117 : i32 to vector<48x8xi32>
    %219 = arith.cmpi eq, %44, %218 : vector<48x8xi32>
    %220 = arith.select %219, %217, %195 : vector<48x8xi1>, vector<48x8xf32>
    %c8_i32_118 = arith.constant 8 : i32
    %221 = arith.muli %arg0, %c8_i32_118 : i32
    %c7_i32 = arith.constant 7 : i32
    %222 = arith.addi %221, %c7_i32 : i32
    %223 = arith.index_cast %arg1 : i32 to index
    %224 = arith.index_cast %222 : i32 to index
    %225 = memref.load %arg2[%223, %224] : memref<4x16xi32, #tpu.memory_space<smem>>
    %c256_i32_119 = arith.constant 256 : i32
    %226 = arith.addi %42, %c256_i32_119 : i32
    %c2_i32_120 = arith.constant 2 : i32
    %227 = arith.subi %226, %c2_i32_120 : i32
    %228 = arith.subi %227, %225 : i32
    %c0_i32_121 = arith.constant 0 : i32
    %229 = arith.maxsi %228, %c0_i32_121 : i32
    %c256_i32_122 = arith.constant 256 : i32
    %230 = arith.addi %42, %c256_i32_122 : i32
    %c2_i32_123 = arith.constant 2 : i32
    %231 = arith.subi %230, %c2_i32_123 : i32
    %c2_i32_124 = arith.constant 2 : i32
    %232 = arith.muli %c2_i32_124, %225 : i32
    %233 = arith.subi %231, %232 : i32
    %c0_i32_125 = arith.constant 0 : i32
    %234 = arith.maxsi %233, %c0_i32_125 : i32
    %235 = arith.index_cast %229 : i32 to index
    %c0_126 = arith.constant 0 : index
    %236 = vector.load %arg37[%235, %c0_126] : memref<424x8xf32, #tpu.memory_space<vmem>>, vector<48x8xf32>
    %237 = arith.index_cast %234 : i32 to index
    %c0_127 = arith.constant 0 : index
    %238 = vector.load %arg37[%237, %c0_127] : memref<424x8xf32, #tpu.memory_space<vmem>>, vector<48x8xf32>
    %c2_i32_128 = arith.constant 2 : i32
    %239 = arith.addi %225, %c2_i32_128 : i32
    %240 = vector.broadcast %239 : i32 to vector<48x8xi32>
    %241 = arith.cmpi slt, %43, %240 : vector<48x8xi32>
    %242 = arith.select %241, %236, %238 : vector<48x8xi1>, vector<48x8xf32>
    %c7_i32_129 = arith.constant 7 : i32
    %243 = vector.broadcast %c7_i32_129 : i32 to vector<48x8xi32>
    %244 = arith.cmpi eq, %44, %243 : vector<48x8xi32>
    %245 = arith.select %244, %242, %220 : vector<48x8xi1>, vector<48x8xf32>
    %c256_i32_130 = arith.constant 256 : i32
    %246 = arith.addi %42, %c256_i32_130 : i32
    %c40_i32_131 = arith.constant 40 : i32
    %247 = arith.subi %246, %c40_i32_131 : i32
    %248 = tpu.assume_multiple %247, 8 : i32
    %249 = arith.index_cast %248 : i32 to index
    %c0_132 = arith.constant 0 : index
    %250 = vector.load %arg37[%249, %c0_132] : memref<424x8xf32, #tpu.memory_space<vmem>>, vector<40x8xf32>
    %251 = tpu.concatenate %245, %250 in 0 : vector<48x8xf32>, vector<40x8xf32> -> vector<88x8xf32>
    %252 = tpu.transpose %251, [1, 0] : vector<88x8xf32> -> vector<8x88xf32>
    %253 = vector.extract_strided_slice %252 {offsets = [0, 0], sizes = [8, 44], strides = [1, 1]} : vector<8x88xf32> to vector<8x44xf32>
    %254 = vector.broadcast %41 : vector<8x1xf32> to vector<8x44xf32>
    %255 = arith.mulf %253, %254 : vector<8x44xf32>
    %256 = vector.extract_strided_slice %4 {offsets = [0, 128], sizes = [8, 44], strides = [1, 1]} : vector<8x1792xf32> to vector<8x44xf32>
    %257 = arith.addf %255, %256 : vector<8x44xf32>
    %cst_133 = arith.constant -1.000000e+00 : f32
    %cst_134 = arith.constant 1.000000e+00 : f32
    %258 = vector.broadcast %cst_133 : f32 to vector<8x44xf32>
    %259 = arith.maximumf %258, %257 : vector<8x44xf32>
    %260 = vector.broadcast %cst_134 : f32 to vector<8x44xf32>
    %261 = arith.minimumf %260, %259 : vector<8x44xf32>
    %262 = vector.extract_strided_slice %252 {offsets = [0, 48], sizes = [8, 40], strides = [1, 1]} : vector<8x88xf32> to vector<8x40xf32>
    %263 = vector.broadcast %41 : vector<8x1xf32> to vector<8x40xf32>
    %264 = arith.mulf %262, %263 : vector<8x40xf32>
    %265 = vector.extract_strided_slice %4 {offsets = [0, 256], sizes = [8, 40], strides = [1, 1]} : vector<8x1792xf32> to vector<8x40xf32>
    %266 = arith.addf %264, %265 : vector<8x40xf32>
    %cst_135 = arith.constant -1.000000e+00 : f32
    %cst_136 = arith.constant 1.000000e+00 : f32
    %267 = vector.broadcast %cst_135 : f32 to vector<8x40xf32>
    %268 = arith.maximumf %267, %266 : vector<8x40xf32>
    %269 = vector.broadcast %cst_136 : f32 to vector<8x40xf32>
    %270 = arith.minimumf %269, %268 : vector<8x40xf32>
    %271 = vector.extract_strided_slice %261 {offsets = [0, 2], sizes = [8, 40], strides = [1, 1]} : vector<8x44xf32> to vector<8x40xf32>
    %272 = arith.index_cast %arg1 : i32 to index
    %c0_137 = arith.constant 0 : index
    %c0_138 = arith.constant 0 : index
    %273 = vector.load %arg31[%272, %c0_137, %c0_138] : memref<4x8x40xf32, #tpu.memory_space<vmem>>, vector<1x8x40xf32>
    %274 = vector.shape_cast %273 : vector<1x8x40xf32> to vector<8x40xf32>
    %275 = vector.shape_cast %271 : vector<8x40xf32> to vector<1x8x40xf32>
    tpu.vector_store %arg31[%272, %c0_137, %c0_138], %275 {strides = array<i32>} : memref<4x8x40xf32, #tpu.memory_space<vmem>>, vector<1x8x40xf32>,
    %276 = arith.truncf %271 : vector<8x40xf32> to vector<8x40xbf16>
    %c0_139 = arith.constant 0 : index
    %c0_140 = arith.constant 0 : index
    %277 = vector.load %arg19[%c0_139, %c0_140] : memref<40x1664xbf16, #tpu.memory_space<vmem>>, vector<40x1664xbf16>
    %cst_141 = arith.constant dense<0.000000e+00> : vector<8x1664xf32>
    %278 = tpu.matmul %276, %277, %cst_141 {dimension_numbers = #tpu.dot_dimension_numbers<[1], [0], [0], [1], [0, 0, 1, 1], [], []>} : vector<8x40xbf16>, vector<40x1664xbf16>, vector<8x1664xf32> -> vector<8x1664xf32>
    %279 = arith.truncf %270 : vector<8x40xf32> to vector<8x40xbf16>
    %c0_142 = arith.constant 0 : index
    %c0_143 = arith.constant 0 : index
    %280 = vector.load %arg20[%c0_142, %c0_143] : memref<40x1664xbf16, #tpu.memory_space<vmem>>, vector<40x1664xbf16>
    %cst_144 = arith.constant dense<0.000000e+00> : vector<8x1664xf32>
    %281 = tpu.matmul %279, %280, %cst_144 {dimension_numbers = #tpu.dot_dimension_numbers<[1], [0], [0], [1], [0, 0, 1, 1], [], []>} : vector<8x40xbf16>, vector<40x1664xbf16>, vector<8x1664xf32> -> vector<8x1664xf32>
    %282 = tpu.concatenate %28, %261, %270 in 1 : vector<8x80xf32>, vector<8x44xf32>, vector<8x40xf32> -> vector<8x164xf32>
    %283 = arith.truncf %282 : vector<8x164xf32> to vector<8x164xbf16>
    %c0_145 = arith.constant 0 : index
    %c0_146 = arith.constant 0 : index
    %284 = vector.load %arg14[%c0_145, %c0_146] : memref<164x192xbf16, #tpu.memory_space<vmem>>, vector<164x192xbf16>
    %cst_147 = arith.constant dense<0.000000e+00> : vector<8x192xf32>
    %285 = tpu.matmul %283, %284, %cst_147 {dimension_numbers = #tpu.dot_dimension_numbers<[1], [0], [0], [1], [0, 0, 1, 1], [], []>} : vector<8x164xbf16>, vector<164x192xbf16>, vector<8x192xf32> -> vector<8x192xf32>
    %286 = arith.addf %20, %285 : vector<8x192xf32>
    %287 = math.tanh %286 : vector<8x192xf32>
    %288 = arith.truncf %287 : vector<8x192xf32> to vector<8x192xbf16>
    %c0_148 = arith.constant 0 : index
    %c0_149 = arith.constant 0 : index
    %289 = vector.load %arg15[%c0_148, %c0_149] : memref<192x192xbf16, #tpu.memory_space<vmem>>, vector<192x192xbf16>
    %cst_150 = arith.constant dense<0.000000e+00> : vector<8x192xf32>
    %290 = tpu.matmul %288, %289, %cst_150 {dimension_numbers = #tpu.dot_dimension_numbers<[1], [0], [0], [1], [0, 0, 1, 1], [], []>} : vector<8x192xbf16>, vector<192x192xbf16>, vector<8x192xf32> -> vector<8x192xf32>
    %291 = arith.negf %290 : vector<8x192xf32>
    %292 = math.exp %291 : vector<8x192xf32>
    %cst_151 = arith.constant 1.000000e+00 : f32
    %293 = vector.broadcast %cst_151 : f32 to vector<8x192xf32>
    %294 = arith.addf %293, %292 : vector<8x192xf32>
    %295 = arith.divf %293, %294 : vector<8x192xf32>
    %296 = arith.mulf %287, %295 : vector<8x192xf32>
    %297 = vector.extract_strided_slice %4 {offsets = [0, 384], sizes = [8, 192], strides = [1, 1]} : vector<8x1792xf32> to vector<8x192xf32>
    %298 = arith.addf %296, %297 : vector<8x192xf32>
    %cst_152 = arith.constant -1.000000e+00 : f32
    %cst_153 = arith.constant 1.000000e+00 : f32
    %299 = vector.broadcast %cst_152 : f32 to vector<8x192xf32>
    %300 = arith.maximumf %299, %298 : vector<8x192xf32>
    %301 = vector.broadcast %cst_153 : f32 to vector<8x192xf32>
    %302 = arith.minimumf %301, %300 : vector<8x192xf32>
    %c0_154 = arith.constant 0 : index
    %c0_155 = arith.constant 0 : index
    %303 = vector.load %arg36[%c0_154, %c0_155] : memref<8x164xf32, #tpu.memory_space<vmem>>, vector<8x164xf32>
    tpu.vector_store %arg36[%c0_154, %c0_155], %282 {strides = array<i32>} : memref<8x164xf32, #tpu.memory_space<vmem>>, vector<8x164xf32>,
    %304 = arith.truncf %302 : vector<8x192xf32> to vector<8x192xbf16>
    %c0_156 = arith.constant 0 : index
    %c0_157 = arith.constant 0 : index
    %305 = vector.load %arg16[%c0_156, %c0_157] : memref<192x1024xbf16, #tpu.memory_space<vmem>>, vector<192x1024xbf16>
    %cst_158 = arith.constant dense<0.000000e+00> : vector<8x1024xf32>
    %306 = tpu.matmul %304, %305, %cst_158 {dimension_numbers = #tpu.dot_dimension_numbers<[1], [0], [0], [1], [0, 0, 1, 1], [], []>} : vector<8x192xbf16>, vector<192x1024xbf16>, vector<8x1024xf32> -> vector<8x1024xf32>
    %307 = vector.extract_strided_slice %306 {offsets = [0, 896], sizes = [8, 4], strides = [1, 1]} : vector<8x1024xf32> to vector<8x4xf32>
    %c0_159 = arith.constant 0 : index
    %c0_160 = arith.constant 0 : index
    %308 = vector.load %arg12[%c0_159, %c0_160] : memref<1x4xf32, #tpu.memory_space<vmem>>, vector<1x4xf32>
    %309 = vector.broadcast %308 : vector<1x4xf32> to vector<8x4xf32>
    %310 = arith.addf %307, %309 : vector<8x4xf32>
    %311 = arith.negf %310 : vector<8x4xf32>
    %312 = math.exp %311 : vector<8x4xf32>
    %cst_161 = arith.constant 1.000000e+00 : f32
    %313 = vector.broadcast %cst_161 : f32 to vector<8x4xf32>
    %314 = arith.addf %313, %312 : vector<8x4xf32>
    %315 = arith.divf %313, %314 : vector<8x4xf32>
    %316 = vector.extract_strided_slice %306 {offsets = [0, 0], sizes = [8, 768], strides = [1, 1]} : vector<8x1024xf32> to vector<8x768xf32>
    %317 = vector.extract_strided_slice %315 {offsets = [0, 0], sizes = [8, 1], strides = [1, 1]} : vector<8x4xf32> to vector<8x1xf32>
    %318 = vector.extract_strided_slice %278 {offsets = [0, 0], sizes = [8, 768], strides = [1, 1]} : vector<8x1664xf32> to vector<8x768xf32>
    %319 = vector.broadcast %317 : vector<8x1xf32> to vector<8x768xf32>
    %320 = arith.mulf %319, %318 : vector<8x768xf32>
    %321 = arith.addf %316, %320 : vector<8x768xf32>
    %322 = vector.extract_strided_slice %281 {offsets = [0, 0], sizes = [8, 768], strides = [1, 1]} : vector<8x1664xf32> to vector<8x768xf32>
    %323 = arith.addf %321, %322 : vector<8x768xf32>
    %324 = vector.extract_strided_slice %323 {offsets = [0, 0], sizes = [8, 160], strides = [1, 1]} : vector<8x768xf32> to vector<8x160xf32>
    %325 = vector.extract_strided_slice %10 {offsets = [0, 0], sizes = [8, 160], strides = [1, 1]} : vector<8x768xf32> to vector<8x160xf32>
    %326 = arith.addf %324, %325 : vector<8x160xf32>
    %327 = arith.negf %326 : vector<8x160xf32>
    %328 = math.exp %327 : vector<8x160xf32>
    %cst_162 = arith.constant 1.000000e+00 : f32
    %329 = vector.broadcast %cst_162 : f32 to vector<8x160xf32>
    %330 = arith.addf %329, %328 : vector<8x160xf32>
    %331 = arith.divf %329, %330 : vector<8x160xf32>
    %332 = vector.extract_strided_slice %323 {offsets = [0, 256], sizes = [8, 160], strides = [1, 1]} : vector<8x768xf32> to vector<8x160xf32>
    %333 = vector.extract_strided_slice %10 {offsets = [0, 256], sizes = [8, 160], strides = [1, 1]} : vector<8x768xf32> to vector<8x160xf32>
    %334 = arith.addf %332, %333 : vector<8x160xf32>
    %335 = arith.negf %334 : vector<8x160xf32>
    %336 = math.exp %335 : vector<8x160xf32>
    %cst_163 = arith.constant 1.000000e+00 : f32
    %337 = vector.broadcast %cst_163 : f32 to vector<8x160xf32>
    %338 = arith.addf %337, %336 : vector<8x160xf32>
    %339 = arith.divf %337, %338 : vector<8x160xf32>
    %340 = vector.extract_strided_slice %323 {offsets = [0, 512], sizes = [8, 160], strides = [1, 1]} : vector<8x768xf32> to vector<8x160xf32>
    %341 = vector.extract_strided_slice %10 {offsets = [0, 512], sizes = [8, 160], strides = [1, 1]} : vector<8x768xf32> to vector<8x160xf32>
    %342 = arith.mulf %331, %341 : vector<8x160xf32>
    %343 = arith.addf %340, %342 : vector<8x160xf32>
    %344 = math.tanh %343 : vector<8x160xf32>
    %cst_164 = arith.constant 1.000000e+00 : f32
    %345 = vector.broadcast %cst_164 : f32 to vector<8x160xf32>
    %346 = arith.subf %345, %339 : vector<8x160xf32>
    %347 = arith.mulf %346, %344 : vector<8x160xf32>
    %348 = arith.mulf %339, %5 : vector<8x160xf32>
    %349 = arith.addf %347, %348 : vector<8x160xf32>
    %c0_165 = arith.constant 0 : index
    %c0_166 = arith.constant 0 : index
    %350 = vector.load %arg33[%c0_165, %c0_166] : memref<8x160xf32, #tpu.memory_space<vmem>>, vector<8x160xf32>
    tpu.vector_store %arg33[%c0_165, %c0_166], %349 {strides = array<i32>} : memref<8x160xf32, #tpu.memory_space<vmem>>, vector<8x160xf32>,
    %351 = vector.extract_strided_slice %4 {offsets = [0, 640], sizes = [8, 160], strides = [1, 1]} : vector<8x1792xf32> to vector<8x160xf32>
    %352 = arith.addf %349, %351 : vector<8x160xf32>
    %cst_167 = arith.constant -1.000000e+00 : f32
    %cst_168 = arith.constant 1.000000e+00 : f32
    %353 = vector.broadcast %cst_167 : f32 to vector<8x160xf32>
    %354 = arith.maximumf %353, %352 : vector<8x160xf32>
    %355 = vector.broadcast %cst_168 : f32 to vector<8x160xf32>
    %356 = arith.minimumf %355, %354 : vector<8x160xf32>
    %357 = arith.truncf %356 : vector<8x160xf32> to vector<8x160xbf16>
    %c0_169 = arith.constant 0 : index
    %c0_170 = arith.constant 0 : index
    %358 = vector.load %arg18[%c0_169, %c0_170] : memref<160x160xbf16, #tpu.memory_space<vmem>>, vector<160x160xbf16>
    %cst_171 = arith.constant dense<0.000000e+00> : vector<8x160xf32>
    %359 = tpu.matmul %357, %358, %cst_171 {dimension_numbers = #tpu.dot_dimension_numbers<[1], [0], [0], [1], [0, 0, 1, 1], [], []>} : vector<8x160xbf16>, vector<160x160xbf16>, vector<8x160xf32> -> vector<8x160xf32>
    %360 = arith.negf %359 : vector<8x160xf32>
    %361 = math.exp %360 : vector<8x160xf32>
    %cst_172 = arith.constant 1.000000e+00 : f32
    %362 = vector.broadcast %cst_172 : f32 to vector<8x160xf32>
    %363 = arith.addf %362, %361 : vector<8x160xf32>
    %364 = arith.divf %362, %363 : vector<8x160xf32>
    %365 = arith.mulf %356, %364 : vector<8x160xf32>
    %366 = vector.extract_strided_slice %4 {offsets = [0, 896], sizes = [8, 160], strides = [1, 1]} : vector<8x1792xf32> to vector<8x160xf32>
    %367 = arith.addf %365, %366 : vector<8x160xf32>
    %cst_173 = arith.constant -1.000000e+00 : f32
    %cst_174 = arith.constant 1.000000e+00 : f32
    %368 = vector.broadcast %cst_173 : f32 to vector<8x160xf32>
    %369 = arith.maximumf %368, %367 : vector<8x160xf32>
    %370 = vector.broadcast %cst_174 : f32 to vector<8x160xf32>
    %371 = arith.minimumf %370, %369 : vector<8x160xf32>
    %372 = arith.truncf %371 : vector<8x160xf32> to vector<8x160xbf16>
    %c0_175 = arith.constant 0 : index
    %c0_176 = arith.constant 0 : index
    %373 = vector.load %arg21[%c0_175, %c0_176] : memref<160x512xbf16, #tpu.memory_space<vmem>>, vector<160x512xbf16>
    %cst_177 = arith.constant dense<0.000000e+00> : vector<8x512xf32>
    %374 = tpu.matmul %372, %373, %cst_177 {dimension_numbers = #tpu.dot_dimension_numbers<[1], [0], [0], [1], [0, 0, 1, 1], [], []>} : vector<8x160xbf16>, vector<160x512xbf16>, vector<8x512xf32> -> vector<8x512xf32>
    %375 = vector.extract_strided_slice %374 {offsets = [0, 0], sizes = [8, 384], strides = [1, 1]} : vector<8x512xf32> to vector<8x384xf32>
    %376 = vector.extract_strided_slice %315 {offsets = [0, 1], sizes = [8, 1], strides = [1, 1]} : vector<8x4xf32> to vector<8x1xf32>
    %377 = vector.extract_strided_slice %278 {offsets = [0, 768], sizes = [8, 384], strides = [1, 1]} : vector<8x1664xf32> to vector<8x384xf32>
    %378 = vector.broadcast %376 : vector<8x1xf32> to vector<8x384xf32>
    %379 = arith.mulf %378, %377 : vector<8x384xf32>
    %380 = arith.addf %375, %379 : vector<8x384xf32>
    %381 = vector.extract_strided_slice %281 {offsets = [0, 768], sizes = [8, 384], strides = [1, 1]} : vector<8x1664xf32> to vector<8x384xf32>
    %382 = arith.addf %380, %381 : vector<8x384xf32>
    %383 = vector.extract_strided_slice %382 {offsets = [0, 0], sizes = [8, 128], strides = [1, 1]} : vector<8x384xf32> to vector<8x128xf32>
    %384 = vector.extract_strided_slice %13 {offsets = [0, 0], sizes = [8, 128], strides = [1, 1]} : vector<8x384xf32> to vector<8x128xf32>
    %385 = arith.addf %383, %384 : vector<8x128xf32>
    %386 = arith.negf %385 : vector<8x128xf32>
    %387 = math.exp %386 : vector<8x128xf32>
    %cst_178 = arith.constant 1.000000e+00 : f32
    %388 = vector.broadcast %cst_178 : f32 to vector<8x128xf32>
    %389 = arith.addf %388, %387 : vector<8x128xf32>
    %390 = arith.divf %388, %389 : vector<8x128xf32>
    %391 = vector.extract_strided_slice %382 {offsets = [0, 128], sizes = [8, 128], strides = [1, 1]} : vector<8x384xf32> to vector<8x128xf32>
    %392 = vector.extract_strided_slice %13 {offsets = [0, 128], sizes = [8, 128], strides = [1, 1]} : vector<8x384xf32> to vector<8x128xf32>
    %393 = arith.addf %391, %392 : vector<8x128xf32>
    %394 = arith.negf %393 : vector<8x128xf32>
    %395 = math.exp %394 : vector<8x128xf32>
    %cst_179 = arith.constant 1.000000e+00 : f32
    %396 = vector.broadcast %cst_179 : f32 to vector<8x128xf32>
    %397 = arith.addf %396, %395 : vector<8x128xf32>
    %398 = arith.divf %396, %397 : vector<8x128xf32>
    %399 = vector.extract_strided_slice %382 {offsets = [0, 256], sizes = [8, 128], strides = [1, 1]} : vector<8x384xf32> to vector<8x128xf32>
    %400 = vector.extract_strided_slice %13 {offsets = [0, 256], sizes = [8, 128], strides = [1, 1]} : vector<8x384xf32> to vector<8x128xf32>
    %401 = arith.mulf %390, %400 : vector<8x128xf32>
    %402 = arith.addf %399, %401 : vector<8x128xf32>
    %403 = math.tanh %402 : vector<8x128xf32>
    %cst_180 = arith.constant 1.000000e+00 : f32
    %404 = vector.broadcast %cst_180 : f32 to vector<8x128xf32>
    %405 = arith.subf %404, %398 : vector<8x128xf32>
    %406 = arith.mulf %405, %403 : vector<8x128xf32>
    %407 = arith.mulf %398, %6 : vector<8x128xf32>
    %408 = arith.addf %406, %407 : vector<8x128xf32>
    %c0_181 = arith.constant 0 : index
    %c0_182 = arith.constant 0 : index
    %409 = vector.load %arg34[%c0_181, %c0_182] : memref<8x128xf32, #tpu.memory_space<vmem>>, vector<8x128xf32>
    tpu.vector_store %arg34[%c0_181, %c0_182], %408 {strides = array<i32>} : memref<8x128xf32, #tpu.memory_space<vmem>>, vector<8x128xf32>,
    %410 = vector.extract_strided_slice %4 {offsets = [0, 1152], sizes = [8, 128], strides = [1, 1]} : vector<8x1792xf32> to vector<8x128xf32>
    %411 = arith.addf %408, %410 : vector<8x128xf32>
    %cst_183 = arith.constant -1.000000e+00 : f32
    %cst_184 = arith.constant 1.000000e+00 : f32
    %412 = vector.broadcast %cst_183 : f32 to vector<8x128xf32>
    %413 = arith.maximumf %412, %411 : vector<8x128xf32>
    %414 = vector.broadcast %cst_184 : f32 to vector<8x128xf32>
    %415 = arith.minimumf %414, %413 : vector<8x128xf32>
    %416 = arith.truncf %415 : vector<8x128xf32> to vector<8x128xbf16>
    %c0_185 = arith.constant 0 : index
    %c0_186 = arith.constant 0 : index
    %417 = vector.load %arg23[%c0_185, %c0_186] : memref<128x128xbf16, #tpu.memory_space<vmem>>, vector<128x128xbf16>
    %cst_187 = arith.constant dense<0.000000e+00> : vector<8x128xf32>
    %418 = tpu.matmul %416, %417, %cst_187 {dimension_numbers = #tpu.dot_dimension_numbers<[1], [0], [0], [1], [0, 0, 1, 1], [], []>} : vector<8x128xbf16>, vector<128x128xbf16>, vector<8x128xf32> -> vector<8x128xf32>
    %419 = arith.negf %418 : vector<8x128xf32>
    %420 = math.exp %419 : vector<8x128xf32>
    %cst_188 = arith.constant 1.000000e+00 : f32
    %421 = vector.broadcast %cst_188 : f32 to vector<8x128xf32>
    %422 = arith.addf %421, %420 : vector<8x128xf32>
    %423 = arith.divf %421, %422 : vector<8x128xf32>
    %424 = arith.mulf %415, %423 : vector<8x128xf32>
    %425 = vector.extract_strided_slice %4 {offsets = [0, 1280], sizes = [8, 128], strides = [1, 1]} : vector<8x1792xf32> to vector<8x128xf32>
    %426 = arith.addf %424, %425 : vector<8x128xf32>
    %cst_189 = arith.constant -1.000000e+00 : f32
    %cst_190 = arith.constant 1.000000e+00 : f32
    %427 = vector.broadcast %cst_189 : f32 to vector<8x128xf32>
    %428 = arith.maximumf %427, %426 : vector<8x128xf32>
    %429 = vector.broadcast %cst_190 : f32 to vector<8x128xf32>
    %430 = arith.minimumf %429, %428 : vector<8x128xf32>
    %431 = arith.truncf %430 : vector<8x128xf32> to vector<8x128xbf16>
    %c0_191 = arith.constant 0 : index
    %c0_192 = arith.constant 0 : index
    %432 = vector.load %arg24[%c0_191, %c0_192] : memref<128x512xbf16, #tpu.memory_space<vmem>>, vector<128x512xbf16>
    %cst_193 = arith.constant dense<0.000000e+00> : vector<8x512xf32>
    %433 = tpu.matmul %431, %432, %cst_193 {dimension_numbers = #tpu.dot_dimension_numbers<[1], [0], [0], [1], [0, 0, 1, 1], [], []>} : vector<8x128xbf16>, vector<128x512xbf16>, vector<8x512xf32> -> vector<8x512xf32>
    %434 = vector.extract_strided_slice %433 {offsets = [0, 0], sizes = [8, 384], strides = [1, 1]} : vector<8x512xf32> to vector<8x384xf32>
    %435 = vector.extract_strided_slice %315 {offsets = [0, 2], sizes = [8, 1], strides = [1, 1]} : vector<8x4xf32> to vector<8x1xf32>
    %436 = vector.extract_strided_slice %278 {offsets = [0, 1152], sizes = [8, 384], strides = [1, 1]} : vector<8x1664xf32> to vector<8x384xf32>
    %437 = vector.broadcast %435 : vector<8x1xf32> to vector<8x384xf32>
    %438 = arith.mulf %437, %436 : vector<8x384xf32>
    %439 = arith.addf %434, %438 : vector<8x384xf32>
    %440 = vector.extract_strided_slice %281 {offsets = [0, 1152], sizes = [8, 384], strides = [1, 1]} : vector<8x1664xf32> to vector<8x384xf32>
    %441 = arith.addf %439, %440 : vector<8x384xf32>
    %442 = vector.extract_strided_slice %441 {offsets = [0, 0], sizes = [8, 128], strides = [1, 1]} : vector<8x384xf32> to vector<8x128xf32>
    %443 = vector.extract_strided_slice %16 {offsets = [0, 0], sizes = [8, 128], strides = [1, 1]} : vector<8x384xf32> to vector<8x128xf32>
    %444 = arith.addf %442, %443 : vector<8x128xf32>
    %445 = arith.negf %444 : vector<8x128xf32>
    %446 = math.exp %445 : vector<8x128xf32>
    %cst_194 = arith.constant 1.000000e+00 : f32
    %447 = vector.broadcast %cst_194 : f32 to vector<8x128xf32>
    %448 = arith.addf %447, %446 : vector<8x128xf32>
    %449 = arith.divf %447, %448 : vector<8x128xf32>
    %450 = vector.extract_strided_slice %441 {offsets = [0, 128], sizes = [8, 128], strides = [1, 1]} : vector<8x384xf32> to vector<8x128xf32>
    %451 = vector.extract_strided_slice %16 {offsets = [0, 128], sizes = [8, 128], strides = [1, 1]} : vector<8x384xf32> to vector<8x128xf32>
    %452 = arith.addf %450, %451 : vector<8x128xf32>
    %453 = arith.negf %452 : vector<8x128xf32>
    %454 = math.exp %453 : vector<8x128xf32>
    %cst_195 = arith.constant 1.000000e+00 : f32
    %455 = vector.broadcast %cst_195 : f32 to vector<8x128xf32>
    %456 = arith.addf %455, %454 : vector<8x128xf32>
    %457 = arith.divf %455, %456 : vector<8x128xf32>
    %458 = vector.extract_strided_slice %441 {offsets = [0, 256], sizes = [8, 128], strides = [1, 1]} : vector<8x384xf32> to vector<8x128xf32>
    %459 = vector.extract_strided_slice %16 {offsets = [0, 256], sizes = [8, 128], strides = [1, 1]} : vector<8x384xf32> to vector<8x128xf32>
    %460 = arith.mulf %449, %459 : vector<8x128xf32>
    %461 = arith.addf %458, %460 : vector<8x128xf32>
    %462 = math.tanh %461 : vector<8x128xf32>
    %cst_196 = arith.constant 1.000000e+00 : f32
    %463 = vector.broadcast %cst_196 : f32 to vector<8x128xf32>
    %464 = arith.subf %463, %457 : vector<8x128xf32>
    %465 = arith.mulf %464, %462 : vector<8x128xf32>
    %466 = arith.mulf %457, %7 : vector<8x128xf32>
    %467 = arith.addf %465, %466 : vector<8x128xf32>
    %c0_197 = arith.constant 0 : index
    %c0_198 = arith.constant 0 : index
    %468 = vector.load %arg35[%c0_197, %c0_198] : memref<8x128xf32, #tpu.memory_space<vmem>>, vector<8x128xf32>
    tpu.vector_store %arg35[%c0_197, %c0_198], %467 {strides = array<i32>} : memref<8x128xf32, #tpu.memory_space<vmem>>, vector<8x128xf32>,
    %469 = vector.extract_strided_slice %4 {offsets = [0, 1408], sizes = [8, 128], strides = [1, 1]} : vector<8x1792xf32> to vector<8x128xf32>
    %470 = arith.addf %467, %469 : vector<8x128xf32>
    %cst_199 = arith.constant -1.000000e+00 : f32
    %cst_200 = arith.constant 1.000000e+00 : f32
    %471 = vector.broadcast %cst_199 : f32 to vector<8x128xf32>
    %472 = arith.maximumf %471, %470 : vector<8x128xf32>
    %473 = vector.broadcast %cst_200 : f32 to vector<8x128xf32>
    %474 = arith.minimumf %473, %472 : vector<8x128xf32>
    %475 = arith.truncf %474 : vector<8x128xf32> to vector<8x128xbf16>
    %c0_201 = arith.constant 0 : index
    %c0_202 = arith.constant 0 : index
    %476 = vector.load %arg26[%c0_201, %c0_202] : memref<128x128xbf16, #tpu.memory_space<vmem>>, vector<128x128xbf16>
    %cst_203 = arith.constant dense<0.000000e+00> : vector<8x128xf32>
    %477 = tpu.matmul %475, %476, %cst_203 {dimension_numbers = #tpu.dot_dimension_numbers<[1], [0], [0], [1], [0, 0, 1, 1], [], []>} : vector<8x128xbf16>, vector<128x128xbf16>, vector<8x128xf32> -> vector<8x128xf32>
    %478 = arith.negf %477 : vector<8x128xf32>
    %479 = math.exp %478 : vector<8x128xf32>
    %cst_204 = arith.constant 1.000000e+00 : f32
    %480 = vector.broadcast %cst_204 : f32 to vector<8x128xf32>
    %481 = arith.addf %480, %479 : vector<8x128xf32>
    %482 = arith.divf %480, %481 : vector<8x128xf32>
    %483 = arith.mulf %474, %482 : vector<8x128xf32>
    %484 = vector.extract_strided_slice %4 {offsets = [0, 1536], sizes = [8, 128], strides = [1, 1]} : vector<8x1792xf32> to vector<8x128xf32>
    %485 = arith.addf %483, %484 : vector<8x128xf32>
    %cst_205 = arith.constant -1.000000e+00 : f32
    %cst_206 = arith.constant 1.000000e+00 : f32
    %486 = vector.broadcast %cst_205 : f32 to vector<8x128xf32>
    %487 = arith.maximumf %486, %485 : vector<8x128xf32>
    %488 = vector.broadcast %cst_206 : f32 to vector<8x128xf32>
    %489 = arith.minimumf %488, %487 : vector<8x128xf32>
    %490 = vector.extract_strided_slice %374 {offsets = [0, 384], sizes = [8, 128], strides = [1, 1]} : vector<8x512xf32> to vector<8x128xf32>
    %491 = vector.extract_strided_slice %433 {offsets = [0, 384], sizes = [8, 128], strides = [1, 1]} : vector<8x512xf32> to vector<8x128xf32>
    %492 = arith.addf %490, %491 : vector<8x128xf32>
    %493 = arith.truncf %489 : vector<8x128xf32> to vector<8x128xbf16>
    %c0_207 = arith.constant 0 : index
    %c0_208 = arith.constant 0 : index
    %494 = vector.load %arg27[%c0_207, %c0_208] : memref<128x128xbf16, #tpu.memory_space<vmem>>, vector<128x128xbf16>
    %cst_209 = arith.constant dense<0.000000e+00> : vector<8x128xf32>
    %495 = tpu.matmul %493, %494, %cst_209 {dimension_numbers = #tpu.dot_dimension_numbers<[1], [0], [0], [1], [0, 0, 1, 1], [], []>} : vector<8x128xbf16>, vector<128x128xbf16>, vector<8x128xf32> -> vector<8x128xf32>
    %496 = arith.addf %492, %495 : vector<8x128xf32>
    %497 = vector.extract_strided_slice %306 {offsets = [0, 768], sizes = [8, 128], strides = [1, 1]} : vector<8x1024xf32> to vector<8x128xf32>
    %498 = arith.addf %496, %497 : vector<8x128xf32>
    %499 = vector.extract_strided_slice %315 {offsets = [0, 3], sizes = [8, 1], strides = [1, 1]} : vector<8x4xf32> to vector<8x1xf32>
    %500 = vector.extract_strided_slice %278 {offsets = [0, 1536], sizes = [8, 128], strides = [1, 1]} : vector<8x1664xf32> to vector<8x128xf32>
    %501 = vector.broadcast %499 : vector<8x1xf32> to vector<8x128xf32>
    %502 = arith.mulf %501, %500 : vector<8x128xf32>
    %503 = arith.addf %498, %502 : vector<8x128xf32>
    %504 = vector.extract_strided_slice %281 {offsets = [0, 1536], sizes = [8, 128], strides = [1, 1]} : vector<8x1664xf32> to vector<8x128xf32>
    %505 = arith.addf %503, %504 : vector<8x128xf32>
    %506 = math.tanh %505 : vector<8x128xf32>
    %507 = vector.extract_strided_slice %4 {offsets = [0, 1664], sizes = [8, 128], strides = [1, 1]} : vector<8x1792xf32> to vector<8x128xf32>
    %508 = arith.addf %506, %507 : vector<8x128xf32>
    %cst_210 = arith.constant -1.000000e+00 : f32
    %cst_211 = arith.constant 1.000000e+00 : f32
    %509 = vector.broadcast %cst_210 : f32 to vector<8x128xf32>
    %510 = arith.maximumf %509, %508 : vector<8x128xf32>
    %511 = vector.broadcast %cst_211 : f32 to vector<8x128xf32>
    %512 = arith.minimumf %511, %510 : vector<8x128xf32>
    %513 = arith.truncf %512 : vector<8x128xf32> to vector<8x128xbf16>
    %c0_212 = arith.constant 0 : index
    %c0_213 = arith.constant 0 : index
    %514 = vector.load %arg28[%c0_212, %c0_213] : memref<128x128xbf16, #tpu.memory_space<vmem>>, vector<128x128xbf16>
    %cst_214 = arith.constant dense<0.000000e+00> : vector<8x128xf32>
    %515 = tpu.matmul %513, %514, %cst_214 {dimension_numbers = #tpu.dot_dimension_numbers<[1], [0], [0], [1], [0, 0, 1, 1], [], []>} : vector<8x128xbf16>, vector<128x128xbf16>, vector<8x128xf32> -> vector<8x128xf32>
    %516 = arith.negf %515 : vector<8x128xf32>
    %517 = math.exp %516 : vector<8x128xf32>
    %cst_215 = arith.constant 1.000000e+00 : f32
    %518 = vector.broadcast %cst_215 : f32 to vector<8x128xf32>
    %519 = arith.addf %518, %517 : vector<8x128xf32>
    %520 = arith.divf %518, %519 : vector<8x128xf32>
    %521 = arith.mulf %512, %520 : vector<8x128xf32>
    %522 = arith.truncf %521 : vector<8x128xf32> to vector<8x128xbf16>
    %c0_216 = arith.constant 0 : index
    %c0_217 = arith.constant 0 : index
    %523 = vector.load %arg29[%c0_216, %c0_217] : memref<128x40xbf16, #tpu.memory_space<vmem>>, vector<128x40xbf16>
    %cst_218 = arith.constant dense<0.000000e+00> : vector<8x40xf32>
    %524 = tpu.matmul %522, %523, %cst_218 {dimension_numbers = #tpu.dot_dimension_numbers<[1], [0], [0], [1], [0, 0, 1, 1], [], []>} : vector<8x128xbf16>, vector<128x40xbf16>, vector<8x40xf32> -> vector<8x40xf32>
    %525 = math.tanh %524 : vector<8x40xf32>
    %526 = vector.broadcast %37 : vector<8x1xf32> to vector<8x40xf32>
    %527 = arith.mulf %525, %526 : vector<8x40xf32>
    %528 = arith.index_cast %arg1 : i32 to index
    %c0_219 = arith.constant 0 : index
    %c0_220 = arith.constant 0 : index
    %529 = vector.load %arg30[%528, %c0_219, %c0_220] : memref<4x8x40xf32, #tpu.memory_space<vmem>>, vector<1x8x40xf32>
    %530 = vector.shape_cast %529 : vector<1x8x40xf32> to vector<8x40xf32>
    %531 = vector.shape_cast %527 : vector<8x40xf32> to vector<1x8x40xf32>
    tpu.vector_store %arg30[%528, %c0_219, %c0_220], %531 {strides = array<i32>} : memref<4x8x40xf32, #tpu.memory_space<vmem>>, vector<1x8x40xf32>,
    %c256_i32_221 = arith.constant 256 : i32
    %532 = arith.addi %42, %c256_i32_221 : i32
    %533 = tpu.assume_multiple %532, 8 : i32
    %534 = tpu.transpose %527, [1, 0] : vector<8x40xf32> -> vector<40x8xf32>
    %535 = arith.index_cast %533 : i32 to index
    %c0_222 = arith.constant 0 : index
    %536 = vector.load %arg37[%535, %c0_222] : memref<424x8xf32, #tpu.memory_space<vmem>>, vector<40x8xf32>
    tpu.vector_store %arg37[%535, %c0_222], %534 {strides = array<i32>} : memref<424x8xf32, #tpu.memory_space<vmem>>, vector<40x8xf32>,
    %c3_i32_223 = arith.constant 3 : i32
    %537 = arith.cmpi eq, %arg1, %c3_i32_223 : i32
    %538 = arith.extui %537 : i1 to i32
    %c0_i32_224 = arith.constant 0 : i32
    %539 = arith.cmpi ne, %538, %c0_i32_224 : i32
    scf.if %539 {
      %c40_i32_225 = arith.constant 40 : i32
      %540 = arith.addi %42, %c40_i32_225 : i32
      %541 = tpu.assume_multiple %540, 8 : i32
      %542 = arith.index_cast %541 : i32 to index
      %c0_226 = arith.constant 0 : index
      %543 = vector.load %arg37[%542, %c0_226] : memref<424x8xf32, #tpu.memory_space<vmem>>, vector<256x8xf32>
      %544 = tpu.transpose %543, [1, 0] : vector<256x8xf32> -> vector<8x256xf32>
      %c0_227 = arith.constant 0 : index
      %c0_228 = arith.constant 0 : index
      %545 = vector.load %arg32[%c0_227, %c0_228] : memref<8x256xf32, #tpu.memory_space<vmem>>, vector<8x256xf32>
      tpu.vector_store %arg32[%c0_227, %c0_228], %544 {strides = array<i32>} : memref<8x256xf32, #tpu.memory_space<vmem>>, vector<8x256xf32>,
    } else {
    }
    return
  }
  func.func @transform_0(%arg0: i32, %arg1: i32) -> (i32, i32) {
    %c0_i32 = arith.constant 0 : i32
    %c0_i32_0 = arith.constant 0 : i32
    %c0_i32_1 = arith.constant 0 : i32
    return %c0_i32, %c0_i32_0 : i32, i32
  }
  func.func @transform_1(%arg0: i32, %arg1: i32) -> (i32, i32, i32) {
    %c0_i32 = arith.constant 0 : i32
    %c0_i32_0 = arith.constant 0 : i32
    return %arg1, %arg0, %c0_i32 : i32, i32, i32
  }
  func.func @transform_2(%arg0: i32, %arg1: i32) -> (i32, i32, i32) {
    %c0_i32 = arith.constant 0 : i32
    %c0_i32_0 = arith.constant 0 : i32
    return %arg1, %arg0, %c0_i32 : i32, i32, i32
  }
  func.func @transform_3(%arg0: i32, %arg1: i32) -> (i32, i32) {
    %c0_i32 = arith.constant 0 : i32
    %c0_i32_0 = arith.constant 0 : i32
    return %arg0, %c0_i32 : i32, i32
  }
  func.func @transform_4(%arg0: i32, %arg1: i32) -> (i32, i32) {
    %c0_i32 = arith.constant 0 : i32
    %c0_i32_0 = arith.constant 0 : i32
    return %arg0, %c0_i32 : i32, i32
  }
  func.func @transform_5(%arg0: i32, %arg1: i32) -> (i32, i32) {
    %c0_i32 = arith.constant 0 : i32
    %c0_i32_0 = arith.constant 0 : i32
    return %arg0, %c0_i32 : i32, i32
  }
  func.func @transform_6(%arg0: i32, %arg1: i32) -> (i32, i32) {
    %c0_i32 = arith.constant 0 : i32
    %c0_i32_0 = arith.constant 0 : i32
    return %arg0, %c0_i32 : i32, i32
  }
  func.func @transform_7(%arg0: i32, %arg1: i32) -> (i32, i32) {
    %c0_i32 = arith.constant 0 : i32
    %c0_i32_0 = arith.constant 0 : i32
    return %arg0, %c0_i32 : i32, i32
  }
  func.func @transform_8(%arg0: i32, %arg1: i32) -> (i32, i32) {
    %c0_i32 = arith.constant 0 : i32
    %c0_i32_0 = arith.constant 0 : i32
    %c0_i32_1 = arith.constant 0 : i32
    return %c0_i32, %c0_i32_0 : i32, i32
  }
  func.func @transform_9(%arg0: i32, %arg1: i32) -> (i32, i32) {
    %c0_i32 = arith.constant 0 : i32
    %c0_i32_0 = arith.constant 0 : i32
    %c0_i32_1 = arith.constant 0 : i32
    return %c0_i32, %c0_i32_0 : i32, i32
  }
  func.func @transform_10(%arg0: i32, %arg1: i32) -> (i32, i32) {
    %c0_i32 = arith.constant 0 : i32
    %c0_i32_0 = arith.constant 0 : i32
    %c0_i32_1 = arith.constant 0 : i32
    return %c0_i32, %c0_i32_0 : i32, i32
  }
  func.func @transform_11(%arg0: i32, %arg1: i32) -> (i32, i32) {
    %c0_i32 = arith.constant 0 : i32
    %c0_i32_0 = arith.constant 0 : i32
    %c0_i32_1 = arith.constant 0 : i32
    return %c0_i32, %c0_i32_0 : i32, i32
  }
  func.func @transform_12(%arg0: i32, %arg1: i32) -> (i32, i32) {
    %c0_i32 = arith.constant 0 : i32
    %c0_i32_0 = arith.constant 0 : i32
    %c0_i32_1 = arith.constant 0 : i32
    return %c0_i32, %c0_i32_0 : i32, i32
  }
  func.func @transform_13(%arg0: i32, %arg1: i32) -> (i32, i32) {
    %c0_i32 = arith.constant 0 : i32
    %c0_i32_0 = arith.constant 0 : i32
    %c0_i32_1 = arith.constant 0 : i32
    return %c0_i32, %c0_i32_0 : i32, i32
  }
  func.func @transform_14(%arg0: i32, %arg1: i32) -> (i32, i32) {
    %c0_i32 = arith.constant 0 : i32
    %c0_i32_0 = arith.constant 0 : i32
    %c0_i32_1 = arith.constant 0 : i32
    return %c0_i32, %c0_i32_0 : i32, i32
  }
  func.func @transform_15(%arg0: i32, %arg1: i32) -> (i32, i32) {
    %c0_i32 = arith.constant 0 : i32
    %c0_i32_0 = arith.constant 0 : i32
    %c0_i32_1 = arith.constant 0 : i32
    return %c0_i32, %c0_i32_0 : i32, i32
  }
  func.func @transform_16(%arg0: i32, %arg1: i32) -> (i32, i32) {
    %c0_i32 = arith.constant 0 : i32
    %c0_i32_0 = arith.constant 0 : i32
    %c0_i32_1 = arith.constant 0 : i32
    return %c0_i32, %c0_i32_0 : i32, i32
  }
  func.func @transform_17(%arg0: i32, %arg1: i32) -> (i32, i32) {
    %c0_i32 = arith.constant 0 : i32
    %c0_i32_0 = arith.constant 0 : i32
    %c0_i32_1 = arith.constant 0 : i32
    return %c0_i32, %c0_i32_0 : i32, i32
  }
  func.func @transform_18(%arg0: i32, %arg1: i32) -> (i32, i32) {
    %c0_i32 = arith.constant 0 : i32
    %c0_i32_0 = arith.constant 0 : i32
    %c0_i32_1 = arith.constant 0 : i32
    return %c0_i32, %c0_i32_0 : i32, i32
  }
  func.func @transform_19(%arg0: i32, %arg1: i32) -> (i32, i32) {
    %c0_i32 = arith.constant 0 : i32
    %c0_i32_0 = arith.constant 0 : i32
    %c0_i32_1 = arith.constant 0 : i32
    return %c0_i32, %c0_i32_0 : i32, i32
  }
  func.func @transform_20(%arg0: i32, %arg1: i32) -> (i32, i32) {
    %c0_i32 = arith.constant 0 : i32
    %c0_i32_0 = arith.constant 0 : i32
    %c0_i32_1 = arith.constant 0 : i32
    return %c0_i32, %c0_i32_0 : i32, i32
  }
  func.func @transform_21(%arg0: i32, %arg1: i32) -> (i32, i32) {
    %c0_i32 = arith.constant 0 : i32
    %c0_i32_0 = arith.constant 0 : i32
    %c0_i32_1 = arith.constant 0 : i32
    return %c0_i32, %c0_i32_0 : i32, i32
  }
  func.func @transform_22(%arg0: i32, %arg1: i32) -> (i32, i32) {
    %c0_i32 = arith.constant 0 : i32
    %c0_i32_0 = arith.constant 0 : i32
    %c0_i32_1 = arith.constant 0 : i32
    return %c0_i32, %c0_i32_0 : i32, i32
  }
  func.func @transform_23(%arg0: i32, %arg1: i32) -> (i32, i32) {
    %c0_i32 = arith.constant 0 : i32
    %c0_i32_0 = arith.constant 0 : i32
    %c0_i32_1 = arith.constant 0 : i32
    return %c0_i32, %c0_i32_0 : i32, i32
  }
  func.func @transform_24(%arg0: i32, %arg1: i32) -> (i32, i32) {
    %c0_i32 = arith.constant 0 : i32
    %c0_i32_0 = arith.constant 0 : i32
    %c0_i32_1 = arith.constant 0 : i32
    return %c0_i32, %c0_i32_0 : i32, i32
  }
  func.func @transform_25(%arg0: i32, %arg1: i32) -> (i32, i32) {
    %c0_i32 = arith.constant 0 : i32
    %c0_i32_0 = arith.constant 0 : i32
    %c0_i32_1 = arith.constant 0 : i32
    return %c0_i32, %c0_i32_0 : i32, i32
  }
  func.func @transform_26(%arg0: i32, %arg1: i32) -> (i32, i32) {
    %c0_i32 = arith.constant 0 : i32
    %c0_i32_0 = arith.constant 0 : i32
    %c0_i32_1 = arith.constant 0 : i32
    return %c0_i32, %c0_i32_0 : i32, i32
  }
  func.func @transform_27(%arg0: i32, %arg1: i32) -> (i32, i32) {
    %c0_i32 = arith.constant 0 : i32
    %c0_i32_0 = arith.constant 0 : i32
    %c0_i32_1 = arith.constant 0 : i32
    return %c0_i32, %c0_i32_0 : i32, i32
  }
  func.func @transform_28(%arg0: i32, %arg1: i32) -> (i32, i32, i32) {
    %c0_i32 = arith.constant 0 : i32
    %c0_i32_0 = arith.constant 0 : i32
    %c0_i32_1 = arith.constant 0 : i32
    return %c0_i32, %arg0, %c0_i32_0 : i32, i32, i32
  }
  func.func @transform_29(%arg0: i32, %arg1: i32) -> (i32, i32, i32) {
    %c0_i32 = arith.constant 0 : i32
    %c0_i32_0 = arith.constant 0 : i32
    %c0_i32_1 = arith.constant 0 : i32
    return %c0_i32, %arg0, %c0_i32_0 : i32, i32, i32
  }
  func.func @transform_30(%arg0: i32, %arg1: i32) -> (i32, i32) {
    %c0_i32 = arith.constant 0 : i32
    %c0_i32_0 = arith.constant 0 : i32
    return %arg0, %c0_i32 : i32, i32
  }
  func.func @transform_31(%arg0: i32, %arg1: i32) -> (i32, i32) {
    %c0_i32 = arith.constant 0 : i32
    %c0_i32_0 = arith.constant 0 : i32
    return %arg0, %c0_i32 : i32, i32
  }
  func.func @transform_32(%arg0: i32, %arg1: i32) -> (i32, i32) {
    %c0_i32 = arith.constant 0 : i32
    %c0_i32_0 = arith.constant 0 : i32
    return %arg0, %c0_i32 : i32, i32
  }
  func.func @transform_33(%arg0: i32, %arg1: i32) -> (i32, i32) {
    %c0_i32 = arith.constant 0 : i32
    %c0_i32_0 = arith.constant 0 : i32
    return %arg0, %c0_i32 : i32, i32
  }
  func.func @transform_34(%arg0: i32, %arg1: i32) -> (i32, i32) {
    %c0_i32 = arith.constant 0 : i32
    %c0_i32_0 = arith.constant 0 : i32
    return %arg0, %c0_i32 : i32, i32
  }
}

</mosaic_0001>

<bundles_post_ra>
// kernel: tpu_custom_call.1
= control target key start
LH: loop header
LB: loop body
LE: loop exit
PB: predicated region body
PF: predicated region fallthrough
CT: control target
= control target key end

     0   :  { %s11095_s6 = smov 1   ;;  %s11096_s10 = smov 2   ;;  %s13456_s0 = inlined_call_operand.smem [shape: u32[35], index: -1, kind: input, shape index: {}] }
   0x1   :  { %s11196_s5 = sld [smem:[%s13456_s0]]   ;;  %s11097_s14 = smov 3  }
   0x2   :  { %s11201_s9 = sld [smem:[%s13456_s0 + %s11095_s6]]   ;;  %s11098_s18 = smov 4  }
   0x3   :  { %s11206_s13 = sld [smem:[%s13456_s0 + %s11096_s10]]   ;;  %s11099_s22 = smov 5  }
   0x4   :  { %s11211_s17 = sld [smem:[%s13456_s0 + %s11097_s14]]   ;;  %s11100_s26 = smov 6  }
   0x5   :  { %s11216_s21 = sld [smem:[%s13456_s0 + %s11098_s18]]   ;;  %s11101_s30 = smov 7  }
   0x6   :  { %s11221_s25 = sld [smem:[%s13456_s0 + %s11099_s22]]   ;;  %s11102_s4 = smov 8  }
   0x7   :  { %13563 = sst [smem:[#allocation70_spill]] %s11196_s5  ;;  %s11103_s10 = smov 9  }
   0x8   :  { %13564 = sst [smem:[#allocation71_spill]] %s11201_s9  ;;  %s11104_s15 = smov 10  }
   0x9   :  { %13565 = sst [smem:[#allocation72_spill]] %s11206_s13  ;;  %s11105_s20 = smov 11  }
   0xa   :  { %13566 = sst [smem:[#allocation73_spill]] %s11211_s17  ;;  %s11107_s1 = smov 13  }
   0xb   :  { %13567 = sst [smem:[#allocation74_spill]] %s11216_s21  ;;  %s11108_s7 = smov 14  }
   0xc   :  { %13568 = sst [smem:[#allocation75_spill]] %s11221_s25  ;;  %s11110_s22 = smov 16  }
   0xd   :  { %s11226_s29 = sld [smem:[%s13456_s0 + %s11100_s26]]   ;;  %s11106_s26 = smov 12  }
   0xe   :  { %s11231_s3 = sld [smem:[%s13456_s0 + %s11101_s30]]   ;;  %s11111_s28 = smov 17  }
   0xf   :  { %s11236_s8 = sld [smem:[%s13456_s0 + %s11102_s4]]   ;;  %s11118_s9 = smov 24  }
  0x10   :  { %s8035_s14 = sld [smem:[%s13456_s0 + %s11103_s10]]  }
  0x11   :  { %s11244_s19 = sld [smem:[%s13456_s0 + %s11104_s15]]   ;;  %s11109_s15 = smov 15  }
  0x12   :  { %s11249_s24 = sld [smem:[%s13456_s0 + %s11105_s20]]  }
  0x13   :  { %13569 = sst [smem:[#allocation76_spill]] %s11226_s29 }
  0x14   :  { %13570 = sst [smem:[#allocation77_spill]] %s11231_s3 }
  0x15   :  { %13571 = sst [smem:[#allocation78_spill]] %s11236_s8 }
  0x16   :  { %s11254_s30 = sld [smem:[%s13456_s0 + %s11106_s26]]   ;;  %v75_v0 = vstv %s8035_s14  ;;  %s11113_s14 = smov 19  }
  0x17   :  { %13572 = sst [smem:[#allocation79_spill]] %s11244_s19  ;;  %76 = vst [vmem:[#allocation3] sm:$0x1] %v75_v0 }
  0x18   :  { %13573 = sst [smem:[#allocation80_spill]] %s11249_s24 }
  0x19   :  { %s11259_s6 = sld [smem:[%s13456_s0 + %s11107_s1]]  }
  0x1a   :  { %s11264_s12 = sld [smem:[%s13456_s0 + %s11108_s7]]   ;;  %s11112_s7 = smov 18  }
  0x1b   :  { %s11269_s20 = sld [smem:[%s13456_s0 + %s11109_s15]]  }
  0x1c   :  { %13574 = sst [smem:[#allocation81_spill]] %s11254_s30 }
  0x1d   :  { %s11274_s27 = sld [smem:[%s13456_s0 + %s11110_s22]]   ;;  %s11114_s22 = smov 20  }
  0x1e   :  { %s11279_s4 = sld [smem:[%s13456_s0 + %s11111_s28]]   ;;  %s11115_s28 = smov 21  }
  0x1f   :  { %13575 = sst [smem:[#allocation82_spill]] %s11259_s6 }
  0x20   :  { %13576 = sst [smem:[#allocation83_spill]] %s11264_s12 }
  0x21   :  { %13577 = sst [smem:[#allocation84_spill]] %s11269_s20 }
  0x22   :  { %s11284_s15 = sld [smem:[%s13456_s0 + %s11112_s7]]   ;;  %s11116_s7 = smov 22  }
  0x23   :  { %13578 = sst [smem:[#allocation85_spill]] %s11274_s27 }
  0x24   :  { %13579 = sst [smem:[#allocation86_spill]] %s11279_s4 }
  0x25   :  { %s11289_s23 = sld [smem:[%s13456_s0 + %s11113_s14]]   ;;  %s11117_s14 = smov 23  }
  0x26   :  { %s11294_s3 = sld [smem:[%s13456_s0 + %s11114_s22]]  }
  0x27   :  { %s11299_s21 = sld [smem:[%s13456_s0 + %s11115_s28]]   ;;  %s11119_s28 = smov 25  }
  0x28   :  { %13580 = sst [smem:[#allocation87_spill]] %s11284_s15 }
  0x29   :  { %s11304_s13 = sld [smem:[%s13456_s0 + %s11116_s7]]   ;;  %s11120_s7 = smov 26  }
  0x2a   :  { %s11314_s4 = sld [smem:[%s13456_s0 + %s11118_s9]]   ;;  %s11122_s9 = smov 28  }
  0x2b   :  { %13581 = sst [smem:[#allocation88_spill]] %s11289_s23 }
  0x2c   :  { %13582 = sst [smem:[#allocation89_spill]] %s11294_s3 }
  0x2d   :  { %13583 = sst [smem:[#allocation90_spill]] %s11299_s21 }
  0x2e   :  { %s11309_s23 = sld [smem:[%s13456_s0 + %s11117_s14]]   ;;  %s11121_s14 = smov 27  }
  0x2f   :  { %13584 = sst [smem:[#allocation91_spill]] %s11304_s13 }
  0x30   :  { %13586 = sst [smem:[#allocation93_spill]] %s11314_s4 }
  0x31   :  { %s11319_s21 = sld [smem:[%s13456_s0 + %s11119_s28]]   ;;  %s11123_s28 = smov 29  }
  0x32   :  { %s11324_s13 = sld [smem:[%s13456_s0 + %s11120_s7]]   ;;  %s11124_s7 = smov 30  }
  0x33   :  { %s11329_s20 = sld [smem:[%s13456_s0 + %s11121_s14]]   ;;  %s11125_s14 = smov 31  }
  0x34   :  { %13585 = sst [smem:[#allocation92_spill]] %s11309_s23 }
  0x35   :  { %s11334_s4 = sld [smem:[%s13456_s0 + %s11122_s9]]   ;;  %s11126_s9 = smov 32  }
  0x36   :  { %s11339_s6 = sld [smem:[%s13456_s0 + %s11123_s28]]   ;;  %s11127_s28 = smov 33  }
  0x37   :  { %13587 = sst [smem:[#allocation94_spill]] %s11319_s21 }
  0x38   :  { %13588 = sst [smem:[#allocation95_spill]] %s11324_s13 }
  0x39   :  { %13589 = sst [smem:[#allocation96_spill]] %s11329_s20 }
  0x3a   :  { %s11344_s13 = sld [smem:[%s13456_s0 + %s11124_s7]]   ;;  %s11128_s7 = smov 34  }
  0x3b   :  { %13590 = sst [smem:[#allocation97_spill]] %s11334_s4 }
  0x3c   :  { %13591 = sst [smem:[#allocation98_spill]] %s11339_s6 }
  0x3d   :  { %s11349_s20 = sld [smem:[%s13456_s0 + %s11125_s14]]  }
  0x3e   :  { %s11354_s4 = sld [smem:[%s13456_s0 + %s11126_s9]]  }
  0x3f   :  { %s11359_s6 = sld [smem:[%s13456_s0 + %s11127_s28]]  }
  0x40   :  { %13592 = sst [smem:[#allocation99_spill]] %s11344_s13 }
  0x41   :  { %s11364_s13 = sld [smem:[%s13456_s0 + %s11128_s7]]  }
  0x43   :  { %13593 = sst [smem:[#allocation100_spill]] %s11349_s20 }
  0x44   :  { %13594 = sst [smem:[#allocation101_spill]] %s11354_s4 }
  0x45   :  { %13595 = sst [smem:[#allocation102_spill]] %s11359_s6 }
  0x47   :  { %13596 = sst [smem:[#allocation103_spill]] %s11364_s13 }
  0x48   :  { %77 = vsyncpa [#allocation7], 0 }
  0x49   :  { %78 = vsyncpa [#allocation5], 0 }
  0x4a   :  { %80 = vsyncpa [#allocation5 + $0x1], 0 }
  0x4b   :  { %81 = vsyncpa [#allocation10], 0 }
  0x4c   :  { %83 = vsyncpa [#allocation10 + $0x1], 0 }
  0x4d   :  { %84 = vsyncpa [#allocation13], 0 }
  0x4e   :  { %86 = vsyncpa [#allocation13 + $0x1], 0 }
  0x4f   :  { %87 = vsyncpa [#allocation16], 0 }
  0x50   :  { %89 = vsyncpa [#allocation16 + $0x1], 0 }
  0x51   :  { %90 = vsyncpa [#allocation19], 0 }
  0x52   :  { %91 = vsyncpa [#allocation22], 0 }
  0x53   :  { %92 = vsyncpa [#allocation25], 0 }
  0x54   :  { %93 = vsyncpa [#allocation28], 0 }
  0x55   :  { %94 = vsyncpa [#allocation31], 0 }
  0x56   :  { %95 = vsyncpa [#allocation34], 0 }
  0x57   :  { %96 = vsyncpa [#allocation37], 0 }
  0x58   :  { %97 = vsyncpa [#allocation40], 0 }
  0x59   :  { %98 = vsyncpa [#allocation6], 0 }
  0x5a   :  { %100 = vsyncpa [#allocation6 + $0x1], 0 }
  0x5b   :  { %101 = vsyncpa [#allocation44], 0 }
  0x5c   :  { %103 = vsyncpa [#allocation44 + $0x1], 0 }
  0x5d   :  { %104 = vsyncpa [#allocation47], 0 }
  0x5e   :  { %106 = vsyncpa [#allocation47 + $0x1], 0 }
  0x5f   :  { %107 = vsyncpa [#allocation50], 0 }
  0x60   :  { %109 = vsyncpa [#allocation50 + $0x1], 0  ;;  %s11366_s0 = smov 0   ;;  %s11368_s14 = smov 0  }
  0x61   :  { %s11370_s16 = smov 0   ;;  %s11372_s18 = smov 0  }
  0x62   :  { %s11374_s9 = smov 0   ;;  %s11376_s22 = smov 0  }
  0x63   :  { %s11378_s26 = smov 0   ;;  %s11380_s28 = smov 0  }
  0x64   :  { %s11382_s1 = smov 0   ;;  %s11384_s2 = smov 0  }
  0x65   :  { %s11386_s7 = smov 0  }
  0x66 LB: > { %s13597_s25 = sld [smem:[#allocation75_spill]]  ;;  %s13598_s24 = sld [smem:[#allocation80_spill]]  ;;  %s11057_s14 = sphi %s11368_s14, %s13771_s14   ;;  %s11053_s0 = sphi %s11366_s0, %s13770_s0   ;;  %s11093_s7 = sphi %s11386_s7, %s115_s7   ;;  %s11089_s2 = sphi %s11384_s2, %s13779_s2   ;;  %s11085_s1 = sphi %s11382_s1, %s13778_s1   ;;  %s11081_s28 = sphi %s11380_s28, %s13777_s28   ;;  %s11077_s26 = sphi %s11378_s26, %s13776_s26   ;;  %s11073_s22 = sphi %s11376_s22, %s13775_s22   ;;  %s11069_s9 = sphi %s11374_s9, %s13774_s9   ;;  %s11065_s18 = sphi %s11372_s18, %s13773_s18   ;;  %s11061_s16 = sphi %s11370_s16, %s13772_s16  }
  0x67   : > { %s13599_s5 = sld [smem:[#allocation70_spill]]  ;;  %s13600_s17 = sld [smem:[#allocation73_spill]] }
  0x68   : > { %s13601_s30 = sld [smem:[#allocation81_spill]]  ;;  %s13602_s27 = sld [smem:[#allocation85_spill]] }
  0x69   : > { %s13603_s23 = sld [smem:[#allocation92_spill]]  ;;  %s13604_s21 = sld [smem:[#allocation94_spill]] }
  0x6a   : > { %s13605_s15 = sld [smem:[#allocation87_spill]]  ;;  %s13606_s3 = sld [smem:[#allocation89_spill]] }
  0x6b   : > { %s13607_s19 = sld [smem:[#allocation79_spill]]  ;;  %s13608_s12 = sld [smem:[#allocation83_spill]] }
  0x6c   : > { %s13609_s8 = sld [smem:[#allocation78_spill]]  ;;  %13610 = sst [smem:[#allocation104_spill]] %s11053_s0 }
  0x6d   : > { %13611 = sst [smem:[#allocation105_spill]] %s11057_s14  ;;  %s11129_s10 = smov [#allocation17]  }
  0x6e   : > { %13612 = sst [smem:[#allocation106_spill]] %s11061_s16  ;;  %s963_s11 = sshll.u32 %s11129_s10, 4  ;;  %s964_s11 = int_to_ptr.vmem [resolvable:$true] %s963_s11 }
  0x6f   : > { %13613 = sst [smem:[#allocation107_spill]] %s11065_s18  ;;  %s11422_s13 = sadd.s32 4294967295, %s11093_s7  }
  0x70   : > { %13614 = sst [smem:[#allocation108_spill]] %s11069_s9  ;;  %p8063_p0 = scmp.ge.s32.totalorder %s11093_s7, 1 }
  0x71   : > { %13615 = sst [smem:[#allocation109_spill]] %s11073_s22  ;;  %p13481_p1 = scmp.eq.s32.totalorder %s11422_s13, 0 }
  0x72   : > { %13616 = sst [smem:[#allocation110_spill]] %s11077_s26  ;;  %p941_p2 = scmp.lt.s32.totalorder %s11093_s7, 9 }
  0x73   : > { %13617 = sst [smem:[#allocation111_spill]] %s11081_s28  ;;  %s11130_s6 = smov [#allocation18]  }
  0x74   : > { %13618 = sst [smem:[#allocation112_spill]] %s11085_s1  ;;  %p11427_p3 = pnand %p8063_p0, %p941_p2 }
  0x75   : > { %13619 = sst [smem:[#allocation113_spill]] %s11089_s2  ;;  %s977_s20 = sshll.u32 %s11130_s6, 4  ;;  %s11433_s20 = int_to_ptr.vmem [resolvable:$true] %s977_s20 }
  0x76   : > { %13620 = sst [smem:[#allocation114_spill]] %s11093_s7  ;;  %p9140_p4 = pneg %p11427_p3 }
  0x77   : > { %13621 = sst [smem:[#allocation115_spill]] %s11422_s13  ;;  %s11131_s28 = smov [#allocation21]  }
  0x78   : > { %s13622_s4 = scalar_select %p11427_p3, 1, 0 }
  0x79   : > { %p11437_p5 = pnand %p9140_p4, %p13481_p1  ;;  %s1000_s26 = sshll.u32 %s11131_s28, 4  ;;  %s11441_s26 = int_to_ptr.vmem [resolvable:$true] %s1000_s26 }
  0x7a   : > { %13623 = sst [smem:[#allocation116_spill]] %s13622_s4  ;;  %s10070_s18 = scalar_lea.hbm %s13609_s8, 16 }
  0x7b   : > { %s13624_s10 = scalar_select %p11437_p5, 1, 0 }
  0x7c   : > { %p10071_p6 = scmp.ne.s32.totalorder %s13609_s8, %s10070_s18  ;;  %p11447_p7 = pneg %p11437_p5 }
  0x7d   : > { %p10077_p10 = scmp.lt.u32.totalorder %s10070_s18, %s13609_s8 }
  0x7e   : > { %s13625_s4 = scalar_select %p11447_p7, 1, 0 }
  0x7f   : > { %p10073_p8 = pnand %p11447_p7, %p10071_p6 }
  0x81   : > { %p10074_p9 = pneg %p10073_p8 }
  0x83   : > { %p10079_p11 = pnand %p10077_p10, %p10074_p9 }
  0x85   : > { %10082 = shalt.err (!%p10079_p11)
}
  0x86   : > { %s10083_s6 = scalar_lea.vmem %s964_s11, 16  ;;  %s10090_s28 = scalar_lea.vmem %s964_s11, 32 }
  0x87   : > { %p10084_p12 = scmp.ne.s32.totalorder %s964_s11, %s10083_s6  ;;  %p10091_p2 = scmp.lt.s32.totalorder %s964_s11, %s964_s11 }
  0x88   : > { %p10092_p4 = scmp.lt.s32.totalorder %s10090_s28, %s10083_s6 }
  0x89   : > { %p10086_p13 = pnand %p10084_p12, %p11447_p7 }
  0x8a   : > { %p10093_p1 = por %p10092_p4, %p10091_p2 }
  0x8b   : > { %p10087_p0 = pneg %p10086_p13 }
  0x8d   : > { %p10094_p3 = pnand %p10093_p1, %p10087_p0 }
  0x8f   : > { %10097 = shalt.err (!%p10094_p3)
}
  0x90   : > { %9146 = dma.hbm_to_vmem [thread:$0]  (!%p11437_p5), %s13609_s8, 16, %s964_s11, [#allocation16]  }
  0x91   : > { %s10098_s18 = scalar_lea.hbm %s13607_s19, 16 }
  0x92   : > { %p10099_p6 = scmp.ne.s32.totalorder %s13607_s19, %s10098_s18  ;;  %p10105_p10 = scmp.lt.u32.totalorder %s10098_s18, %s13607_s19 }
  0x94   : > { %p10101_p8 = pnand %p10099_p6, %p11447_p7 }
  0x96   : > { %p10102_p9 = pneg %p10101_p8 }
  0x98   : > { %p10107_p11 = pnand %p10105_p10, %p10102_p9 }
  0x9a   : > { %10110 = shalt.err (!%p10107_p11)
}
  0x9b   : > { %s10111_s6 = scalar_lea.vmem %s11433_s20, 16  ;;  %s10118_s28 = scalar_lea.vmem %s11433_s20, 32 }
  0x9c   : > { %p10112_p1 = scmp.ne.s32.totalorder %s11433_s20, %s10111_s6  ;;  %p10119_p13 = scmp.lt.s32.totalorder %s11433_s20, %s11433_s20 }
  0x9d   : > { %p10120_p0 = scmp.lt.s32.totalorder %s10118_s28, %s10111_s6 }
  0x9e   : > { %p10114_p3 = pnand %p10112_p1, %p11447_p7 }
  0x9f   : > { %p10121_p2 = por %p10120_p0, %p10119_p13 }
  0xa0   : > { %p10115_p12 = pneg %p10114_p3 }
  0xa2   : > { %p10122_p4 = pnand %p10121_p2, %p10115_p12 }
  0xa4   : > { %10125 = shalt.err (!%p10122_p4)
}
  0xa5   : > { %9149 = dma.hbm_to_vmem [thread:$0]  (!%p11437_p5), %s13607_s19, 16, %s11433_s20, [#allocation19]  }
  0xa6   : > { %s10126_s11 = scalar_lea.hbm %s13601_s30, 2688 }
  0xa7   : > { %p10127_p6 = scmp.ne.s32.totalorder %s13601_s30, %s10126_s11  ;;  %p10133_p10 = scmp.lt.u32.totalorder %s10126_s11, %s13601_s30 }
  0xa9   : > { %p10129_p8 = pnand %p10127_p6, %p11447_p7 }
  0xab   : > { %p10130_p9 = pneg %p10129_p8 }
  0xad   : > { %p10135_p11 = pnand %p10133_p10, %p10130_p9 }
  0xaf   : > { %10138 = shalt.err (!%p10135_p11)
}
  0xb0   : > { %s10139_s18 = scalar_lea.vmem %s11441_s26, 2688  ;;  %p10147_p13 = scmp.lt.s32.totalorder %s11441_s26, %s11441_s26 }
  0xb1   : > { %p10140_p1 = scmp.ne.s32.totalorder %s11441_s26, %s10139_s18  ;;  %p10148_p0 = scmp.lt.s32.totalorder %s10139_s18, %s10139_s18 }
  0xb3   : > { %p10142_p3 = pnand %p10140_p1, %p11447_p7  ;;  %p10149_p2 = por %p10148_p0, %p10147_p13 }
  0xb5   : > { %p10143_p12 = pneg %p10142_p3 }
  0xb7   : > { %p10150_p4 = pnand %p10149_p2, %p10143_p12 }
  0xb9   : > { %10153 = shalt.err (!%p10150_p4)
}
  0xba   : > { %s13484_s20 = smov 128   ;;  %s13486_s6 = smov 8  }
  0xbb   : > { %9155 = dma.hbm_to_vmem [thread:$0]  (!%p11437_p5), %s13601_s30, 2688, %s11441_s26, [#allocation22], %s13484_s20, %s13484_s20, %s13486_s6  }
  0xbc   : > { %s11134_s28 = smov [#allocation24]   ;;  %s10154_s18 = scalar_lea.hbm %s13608_s12, 12288 }
  0xbd   : > { %s1026_s11 = sshll.u32 %s11134_s28, 4  ;;  %p10155_p6 = scmp.ne.s32.totalorder %s13608_s12, %s10154_s18  ;;  %s1027_s11 = int_to_ptr.vmem [resolvable:$true] %s1026_s11 }
  0xbe   : > { %p10161_p10 = scmp.lt.u32.totalorder %s10154_s18, %s13608_s12 }
  0xbf   : > { %p10157_p8 = pnand %p10155_p6, %p11447_p7 }
  0xc1   : > { %p10158_p9 = pneg %p10157_p8 }
  0xc3   : > { %p10163_p11 = pnand %p10161_p10, %p10158_p9 }
  0xc5   : > { %10166 = shalt.err (!%p10163_p11)
}
  0xc6   : > { %s10167_s8 = scalar_lea.vmem %s1027_s11, 12288  ;;  %p10175_p13 = scmp.lt.s32.totalorder %s1027_s11, %s1027_s11 }
  0xc7   : > { %p10168_p1 = scmp.ne.s32.totalorder %s1027_s11, %s10167_s8  ;;  %p10176_p0 = scmp.lt.s32.totalorder %s10167_s8, %s10167_s8 }
  0xc9   : > { %p10170_p3 = pnand %p10168_p1, %p11447_p7  ;;  %p10177_p2 = por %p10176_p0, %p10175_p13 }
  0xcb   : > { %p10171_p12 = pneg %p10170_p3 }
  0xcd   : > { %p10178_p4 = pnand %p10177_p2, %p10171_p12 }
  0xcf   : > { %10181 = shalt.err (!%p10178_p4)
}
  0xd0   : > { %s11135_s26 = smov 512   ;;  %s11136_s28 = smov 32  }
  0xd1   : > { %9161 = dma.hbm_to_vmem [thread:$0]  (!%p11437_p5), %s13608_s12, 12288, %s1027_s11, [#allocation25], %s11135_s26, %s11135_s26, %s11136_s28  }
  0xd2   : > { %s11137_s18 = smov [#allocation27]   ;;  %s10182_s6 = scalar_lea.hbm %s13602_s27, 2560 }
  0xd3   : > { %s1052_s20 = sshll.u32 %s11137_s18, 4  ;;  %p10183_p6 = scmp.ne.s32.totalorder %s13602_s27, %s10182_s6  ;;  %s1053_s20 = int_to_ptr.vmem [resolvable:$true] %s1052_s20 }
  0xd4   : > { %p10189_p10 = scmp.lt.u32.totalorder %s10182_s6, %s13602_s27 }
  0xd5   : > { %p10185_p8 = pnand %p10183_p6, %p11447_p7 }
  0xd7   : > { %p10186_p9 = pneg %p10185_p8 }
  0xd9   : > { %p10191_p11 = pnand %p10189_p10, %p10186_p9 }
  0xdb   : > { %10194 = shalt.err (!%p10191_p11)
}
  0xdc   : > { %s10195_s8 = scalar_lea.vmem %s1053_s20, 2560  ;;  %p10203_p13 = scmp.lt.s32.totalorder %s1053_s20, %s1053_s20 }
  0xdd   : > { %p10196_p1 = scmp.ne.s32.totalorder %s1053_s20, %s10195_s8  ;;  %p10204_p0 = scmp.lt.s32.totalorder %s10195_s8, %s10195_s8 }
  0xdf   : > { %p10198_p3 = pnand %p10196_p1, %p11447_p7  ;;  %p10205_p2 = por %p10204_p0, %p10203_p13 }
  0xe1   : > { %p10199_p12 = pneg %p10198_p3 }
  0xe3   : > { %p10206_p4 = pnand %p10205_p2, %p10199_p12 }
  0xe5   : > { %10209 = shalt.err (!%p10206_p4)
}
  0xe6   : > { %s13626_s11 = smov 8   ;;  %s13627_s26 = smov 128  }
  0xe7   : > { %9167 = dma.hbm_to_vmem [thread:$0]  (!%p11437_p5), %s13602_s27, 2560, %s1053_s20, [#allocation28], %s13627_s26, %s13627_s26, %s13626_s11  }
  0xe8   : > { %s11138_s6 = smov [#allocation30]   ;;  %s11139_s18 = smov [#allocation33]  }
  0xe9   : > { %s1078_s28 = sshll.u32 %s11138_s6, 4  ;;  %s1104_s12 = sshll.u32 %s11139_s18, 4  ;;  %s1079_s28 = int_to_ptr.vmem [resolvable:$true] %s1078_s28  ;;  %s1105_s12 = int_to_ptr.vmem [resolvable:$true] %s1104_s12 }
  0xea   : > { %s10210_s8 = scalar_lea.hbm %s13605_s15, 4160 }
  0xeb   : > { %p10211_p6 = scmp.ne.s32.totalorder %s13605_s15, %s10210_s8  ;;  %p10217_p10 = scmp.lt.u32.totalorder %s10210_s8, %s13605_s15 }
  0xed   : > { %p10213_p8 = pnand %p10211_p6, %p11447_p7 }
  0xef   : > { %p10214_p9 = pneg %p10213_p8 }
  0xf1   : > { %p10219_p11 = pnand %p10217_p10, %p10214_p9 }
  0xf3   : > { %10222 = shalt.err (!%p10219_p11)
}
  0xf4   : > { %s10223_s19 = scalar_lea.vmem %s1079_s28, 4160  ;;  %p10231_p13 = scmp.lt.s32.totalorder %s1079_s28, %s1079_s28 }
  0xf5   : > { %p10224_p1 = scmp.ne.s32.totalorder %s1079_s28, %s10223_s19  ;;  %p10232_p0 = scmp.lt.s32.totalorder %s10223_s19, %s10223_s19 }
  0xf7   : > { %p10226_p3 = pnand %p10224_p1, %p11447_p7  ;;  %p10233_p2 = por %p10232_p0, %p10231_p13 }
  0xf9   : > { %p10227_p12 = pneg %p10226_p3 }
  0xfb   : > { %p10234_p4 = pnand %p10233_p2, %p10227_p12 }
  0xfd   : > { %10237 = shalt.err (!%p10234_p4)
}
  0xfe   : > { %s13490_s20 = smov 832   ;;  %s13491_s6 = smov 52  }
  0xff   : > { %9173 = dma.hbm_to_vmem [thread:$0]  (!%p11437_p5), %s13605_s15, 4160, %s1079_s28, [#allocation31], %s13490_s20, %s13490_s20, %s13491_s6  }
 0x100   : > { %s10238_s18 = scalar_lea.hbm %s13606_s3, 3072 }
 0x101   : > { %p10239_p6 = scmp.ne.s32.totalorder %s13606_s3, %s10238_s18  ;;  %p10245_p10 = scmp.lt.u32.totalorder %s10238_s18, %s13606_s3 }
 0x103   : > { %p10241_p8 = pnand %p10239_p6, %p11447_p7 }
 0x105   : > { %p10242_p9 = pneg %p10241_p8 }
 0x107   : > { %p10247_p11 = pnand %p10245_p10, %p10242_p9 }
 0x109   : > { %10250 = shalt.err (!%p10247_p11)
}
 0x10a   : > { %s10251_s19 = scalar_lea.vmem %s1105_s12, 3072  ;;  %p10259_p13 = scmp.lt.s32.totalorder %s1105_s12, %s1105_s12 }
 0x10b   : > { %p10252_p1 = scmp.ne.s32.totalorder %s1105_s12, %s10251_s19  ;;  %p10260_p0 = scmp.lt.s32.totalorder %s10251_s19, %s10251_s19 }
 0x10d   : > { %p10254_p3 = pnand %p10252_p1, %p11447_p7  ;;  %p10261_p2 = por %p10260_p0, %p10259_p13 }
 0x10f   : > { %p10255_p12 = pneg %p10254_p3 }
 0x111   : > { %p10262_p4 = pnand %p10261_p2, %p10255_p12 }
 0x113   : > { %10265 = shalt.err (!%p10262_p4)
}
 0x114   : > { %s11142_s28 = smov 192   ;;  %s11143_s8 = smov 12  }
 0x115   : > { %9179 = dma.hbm_to_vmem [thread:$0]  (!%p11437_p5), %s13606_s3, 3072, %s1105_s12, [#allocation34], %s11142_s28, %s11142_s28, %s11143_s8  }
 0x116   : > { %s11144_s18 = smov [#allocation36]   ;;  %s10266_s6 = scalar_lea.hbm %s13603_s23, 3072 }
 0x117   : > { %s1133_s20 = sshll.u32 %s11144_s18, 4  ;;  %p10267_p6 = scmp.ne.s32.totalorder %s13603_s23, %s10266_s6  ;;  %s1134_s20 = int_to_ptr.vmem [resolvable:$true] %s1133_s20 }
 0x118   : > { %p10273_p10 = scmp.lt.u32.totalorder %s10266_s6, %s13603_s23 }
 0x119   : > { %p10269_p8 = pnand %p10267_p6, %p11447_p7 }
 0x11b   : > { %p10270_p9 = pneg %p10269_p8 }
 0x11d   : > { %p10275_p11 = pnand %p10273_p10, %p10270_p9 }
 0x11f   : > { %10278 = shalt.err (!%p10275_p11)
}
 0x120   : > { %s10279_s19 = scalar_lea.vmem %s1134_s20, 3072  ;;  %p10287_p13 = scmp.lt.s32.totalorder %s1134_s20, %s1134_s20 }
 0x121   : > { %p10280_p1 = scmp.ne.s32.totalorder %s1134_s20, %s10279_s19  ;;  %p10288_p0 = scmp.lt.s32.totalorder %s10279_s19, %s10279_s19 }
 0x123   : > { %p10282_p3 = pnand %p10280_p1, %p11447_p7  ;;  %p10289_p2 = por %p10288_p0, %p10287_p13 }
 0x125   : > { %p10283_p12 = pneg %p10282_p3 }
 0x127   : > { %p10290_p4 = pnand %p10289_p2, %p10283_p12 }
 0x129   : > { %10293 = shalt.err (!%p10290_p4)
}
 0x12a   : > { %9185 = dma.hbm_to_vmem [thread:$0]  (!%p11437_p5), %s13603_s23, 3072, %s1134_s20, [#allocation37], %s11142_s28, %s11142_s28, %s11143_s8  }
 0x12b   : > { %s11145_s12 = smov [#allocation39]   ;;  %s10294_s18 = scalar_lea.hbm %s13604_s21, 1024 }
 0x12c   : > { %s1159_s6 = sshll.u32 %s11145_s12, 4  ;;  %p10295_p6 = scmp.ne.s32.totalorder %s13604_s21, %s10294_s18  ;;  %s1160_s6 = int_to_ptr.vmem [resolvable:$true] %s1159_s6 }
 0x12d   : > { %p10301_p10 = scmp.lt.u32.totalorder %s10294_s18, %s13604_s21 }
 0x12e   : > { %p10297_p8 = pnand %p10295_p6, %p11447_p7 }
 0x130   : > { %p10298_p9 = pneg %p10297_p8 }
 0x132   : > { %p10303_p11 = pnand %p10301_p10, %p10298_p9 }
 0x134   : > { %10306 = shalt.err (!%p10303_p11)
}
 0x135   : > { %s10307_s19 = scalar_lea.vmem %s1160_s6, 1024  ;;  %p10315_p13 = scmp.lt.s32.totalorder %s1160_s6, %s1160_s6 }
 0x136   : > { %p10308_p1 = scmp.ne.s32.totalorder %s1160_s6, %s10307_s19  ;;  %p10316_p0 = scmp.lt.s32.totalorder %s10307_s19, %s10307_s19 }
 0x138   : > { %p10310_p3 = pnand %p10308_p1, %p11447_p7  ;;  %p10317_p2 = por %p10316_p0, %p10315_p13 }
 0x13a   : > { %p10311_p12 = pneg %p10310_p3 }
 0x13c   : > { %p10318_p4 = pnand %p10317_p2, %p10311_p12 }
 0x13e   : > { %10321 = shalt.err (!%p10318_p4)
}
 0x13f   : > { %s13493_s20 = smov 64   ;;  %s13495_s28 = smov 4  }
 0x140   : > { %9191 = dma.hbm_to_vmem [thread:$0]  (!%p11437_p5), %s13604_s21, 1024, %s1160_s6, [#allocation40], %s13493_s20, %s13493_s20, %s13495_s28  }
 0x141   : > { %s13492_s8 = sadd.s32 4294967294, %s11093_s7   ;;  %p13506_p6 = scmp.eq.s32.totalorder %s11093_s7, 0 }
 0x142   : > { %p218_p8 = scmp.ne.s32.totalorder %s11061_s16, %s11057_s14  ;;  %p224_p9 = scmp.ne.s32.totalorder %s11057_s14, %s11053_s0 }
 0x143   : > { %p772_p10 = scmp.eq.s32.totalorder %s11422_s13, 7  ;;  %p778_p11 = scmp.eq.s32.totalorder %s13492_s8, 7 }
 0x144   : > { %p220_p1 = por %p218_p8, %p13506_p6  ;;  %p13628_p3 = scmp.eq.s32.totalorder %s11422_s13, 0 }
 0x145   : > { %p11580_p13 = por %p772_p10, %p218_p8  ;;  %p11584_p0 = por %p778_p11, %p224_p9 }
 0x146   : > { %p11576_p12 = por %p224_p9, %p13628_p3  ;;  %p13505_p2 = scmp.lt.s32.totalorder %s11093_s7, 8 }
 0x147   : > { %s13631_s6 = scalar_select %p11580_p13, 1, 0 }
 0x148   : > { %s13629_s18 = scalar_select %p11576_p12, 1, 0 }
 0x149   : > { %13632 = sst [smem:[#allocation118_spill]] %s13631_s6  ;;  %s11590_s12 = sand.u32 1, %s11093_s7  }
 0x14a   : > { %13630 = sst [smem:[#allocation117_spill]] %s13629_s18  ;;  %s1223_s8 = sand.u32 1, %s11061_s16  }
 0x14b   : > { %s13633_s19 = scalar_select %p11584_p0, 1, 0 }
 0x14c   : > { %13635 = sst [smem:[#allocation120_spill]] %s11590_s12  ;;  %s11593_s20 = sshll.u32 %s1223_s8, 4 }
 0x14d   : > { %13634 = sst [smem:[#allocation119_spill]] %s13633_s19  ;;  %s11596_s28 = sshll.u32 %s11089_s2, 8 }
 0x14e   : > { %s11600_s3 = scalar_lea.hbm %s13600_s17, %s11596_s28  ;;  %s1225_s15 = scalar_lea.vmem [#allocation9], %s11593_s20 }
 0x14f   : > { %s1233_s21 = sshll.u32 %s1225_s15, 4  ;;  %p11605_p4 = pnand %p13505_p2, %p220_p1  ;;  %s11609_s21 = int_to_ptr.vmem [resolvable:$true] %s1233_s21 }
 0x150   : > { %s11611_s27 = sshll.u32 %s1223_s8, 3  ;;  %s10322_s19 = scalar_lea.hbm %s11600_s3, 256 }
 0x151   : > { %s13636_s23 = scalar_select %p11605_p4, 1, 0 }
 0x152   : > { %p10323_p8 = scmp.ne.s32.totalorder %s11600_s3, %s10322_s19  ;;  %p11618_p9 = pneg %p11605_p4 }
 0x153   : > { %s10327_s15 = scalar_lea.hbm %s13600_s17, 512  ;;  %p10328_p1 = scmp.lt.u32.totalorder %s11600_s3, %s13600_s17 }
 0x154   : > { %s13637_s0 = scalar_select %p11618_p9, 1, 0 }
 0x155   : > { %p10325_p10 = pnand %p11618_p9, %p10323_p8  ;;  %p10329_p3 = scmp.lt.u32.totalorder %s10327_s15, %s10322_s19 }
 0x156   : > { %p10331_p6 = scmp.lt.u32.totalorder %s10322_s19, %s11600_s3 }
 0x157   : > { %p10326_p11 = pneg %p10325_p10  ;;  %p10330_p2 = por %p10329_p3, %p10328_p1 }
 0x159   : > { %p10332_p0 = por %p10331_p6, %p10330_p2 }
 0x15b   : > { %p10333_p13 = pnand %p10332_p0, %p10326_p11 }
 0x15d   : > { %10336 = shalt.err (!%p10333_p13)
}
 0x15e   : > { %s10337_s8 = scalar_lea.vmem %s11609_s21, 256  ;;  %s11148_s30 = smov [#allocation9]  }
 0x15f   : > { %p10338_p12 = scmp.ne.s32.totalorder %s11609_s21, %s10337_s8  ;;  %s10342_s6 = sshll.u32 %s11148_s30, 4  ;;  %s10343_s6 = int_to_ptr.vmem [resolvable:$false] %s10342_s6 }
 0x160   : > { %s10344_s18 = scalar_lea.vmem %s10343_s6, 512  ;;  %p10345_p8 = scmp.lt.s32.totalorder %s11609_s21, %s10343_s6 }
 0x161   : > { %p10340_p5 = pnand %p10338_p12, %p11618_p9  ;;  %p10346_p10 = scmp.lt.s32.totalorder %s10344_s18, %s10337_s8 }
 0x163   : > { %p10341_p7 = pneg %p10340_p5  ;;  %p10347_p1 = por %p10346_p10, %p10345_p8 }
 0x165   : > { %p10348_p3 = pnand %p10347_p1, %p10341_p7 }
 0x167   : > { %10351 = shalt.err (!%p10348_p3)
}
 0x168   : > { %s13638_s19 = scalar_lea.sflag [#allocation10], %s11590_s12  ;;  %s8091_s30 = sshll.u32 %s11089_s2, 7 }
 0x169   : > { %9201 = dma.hbm_to_vmem [thread:$0]  (!%p11605_p4), %s11600_s3, 256, %s11609_s21, %s13638_s19  }
 0x16a   : > { %s11643_s18 = scalar_lea.hbm %s13597_s25, %s8091_s30  ;;  %s1263_s6 = scalar_lea.vmem [#allocation12], %s11611_s27 }
 0x16b   : > { %s1270_s15 = sshll.u32 %s1263_s6, 4  ;;  %s13523_s8 = scalar_lea.sflag [#allocation13], %s11590_s12  ;;  %s1271_s15 = int_to_ptr.vmem [resolvable:$true] %s1270_s15 }
 0x16c   : > { %s10352_s17 = scalar_lea.hbm %s11643_s18, 128  ;;  %s10357_s14 = scalar_lea.hbm %s13597_s25, 256 }
 0x16d   : > { %p10353_p5 = scmp.ne.s32.totalorder %s11643_s18, %s10352_s17  ;;  %p10358_p12 = scmp.lt.u32.totalorder %s11643_s18, %s13597_s25 }
 0x16e   : > { %p10359_p13 = scmp.lt.u32.totalorder %s10357_s14, %s10352_s17  ;;  %p10361_p2 = scmp.lt.u32.totalorder %s10352_s17, %s11643_s18 }
 0x16f   : > { %p10355_p7 = pnand %p10353_p5, %p11618_p9 }
 0x170   : > { %p10360_p0 = por %p10359_p13, %p10358_p12 }
 0x171   : > { %p10356_p6 = pneg %p10355_p7 }
 0x172   : > { %p10362_p11 = por %p10361_p2, %p10360_p0 }
 0x174   : > { %p10363_p8 = pnand %p10362_p11, %p10356_p6 }
 0x176   : > { %10366 = shalt.err (!%p10363_p8)
}
 0x177   : > { %s10367_s21 = scalar_lea.vmem %s1271_s15, 128  ;;  %s11149_s3 = smov [#allocation12]  }
 0x178   : > { %p10368_p10 = scmp.ne.s32.totalorder %s1271_s15, %s10367_s21  ;;  %s10372_s19 = sshll.u32 %s11149_s3, 4  ;;  %s10373_s19 = int_to_ptr.vmem [resolvable:$false] %s10372_s19 }
 0x179   : > { %s10374_s6 = scalar_lea.vmem %s10373_s19, 256  ;;  %p10375_p5 = scmp.lt.s32.totalorder %s1271_s15, %s10373_s19 }
 0x17a   : > { %p10370_p1 = pnand %p10368_p10, %p11618_p9  ;;  %p10376_p7 = scmp.lt.s32.totalorder %s10374_s6, %s10367_s21 }
 0x17c   : > { %p10371_p3 = pneg %p10370_p1  ;;  %p10377_p4 = por %p10376_p7, %p10375_p5 }
 0x17e   : > { %p10378_p12 = pnand %p10377_p4, %p10371_p3 }
 0x180   : > { %10381 = shalt.err (!%p10378_p12)
}
 0x181   : > { %p13639_p13 = scmp.ne.s32.totalorder %s13636_s23, 0  ;;  %s13640_s29 = sld [smem:[#allocation76_spill]] }
 0x182   : > { %s10382_s14 = scalar_lea.hbm %s13599_s5, 64  ;;  %p13642_p0 = scmp.ne.s32.totalorder %s13625_s4, 0 }
 0x183   : > { %9207 = dma.hbm_to_vmem [thread:$0]  (!%p13639_p13), %s11643_s18, 128, %s1271_s15, %s13523_s8  }
 0x184   : > { %p10383_p6 = scmp.ne.s32.totalorder %s13599_s5, %s10382_s14  ;;  %p10389_p11 = scmp.lt.u32.totalorder %s10382_s14, %s13599_s5 }
 0x186   : > { %p10385_p4 = pnand %p10383_p6, %p13642_p0 }
 0x187   : > { %s11665_s17 = scalar_lea.hbm %s13640_s29, %s8091_s30 }
 0x188   : > { %13641 = sst [smem:[#allocation121_spill]] %s11665_s17  ;;  %p10386_p2 = pneg %p10385_p4 }
 0x18a   : > { %p10391_p8 = pnand %p10389_p11, %p10386_p2 }
 0x18c   : > { %10394 = shalt.err (!%p10391_p8)
}
 0x18d   : > { %s11150_s21 = smov [#allocation4]   ;;  %p13643_p10 = scmp.ne.s32.totalorder %s13624_s10, 0 }
 0x18e   : > { %s11151_s18 = smov [#allocation20]   ;;  %s11152_s15 = smov [#allocation23]  }
 0x18f   : > { %9143 = dma.hbm_to_smem (!%p13643_p10), %s13599_s5, 64, %s11150_s21, [#allocation7]  }
 0x190   : > { %s987_s30 = sshll.u32 %s11151_s18, 4  ;;  %s1013_s3 = sshll.u32 %s11152_s15, 4  ;;  %s988_s30 = int_to_ptr.vmem [resolvable:$true] %s987_s30  ;;  %s11675_s3 = int_to_ptr.vmem [resolvable:$true] %s1013_s3 }
 0x191   : > { %s10395_s19 = scalar_lea.hbm %s13598_s24, 2688 }
 0x192   : > { %p10396_p1 = scmp.ne.s32.totalorder %s13598_s24, %s10395_s19  ;;  %p10402_p7 = scmp.lt.u32.totalorder %s10395_s19, %s13598_s24 }
 0x194   : > { %p10398_p3 = pnand %p10396_p1, %p13642_p0 }
 0x196   : > { %p10399_p5 = pneg %p10398_p3 }
 0x198   : > { %p10404_p12 = pnand %p10402_p7, %p10399_p5 }
 0x19a   : > { %10407 = shalt.err (!%p10404_p12)
}
 0x19b   : > { %s10408_s6 = scalar_lea.vmem %s988_s30, 2688  ;;  %p10416_p11 = scmp.lt.s32.totalorder %s988_s30, %s988_s30 }
 0x19c   : > { %p10409_p6 = scmp.ne.s32.totalorder %s988_s30, %s10408_s6  ;;  %p10417_p8 = scmp.lt.s32.totalorder %s10408_s6, %s10408_s6 }
 0x19e   : > { %p10411_p4 = pnand %p10409_p6, %p13642_p0  ;;  %p10418_p13 = por %p10417_p8, %p10416_p11 }
 0x1a0   : > { %p10412_p2 = pneg %p10411_p4 }
 0x1a2   : > { %p10419_p9 = pnand %p10418_p13, %p10412_p2 }
 0x1a4   : > { %10422 = shalt.err (!%p10419_p9)
}
 0x1a5   : > { %s13644_s14 = sld [smem:[#allocation82_spill]] }
 0x1a6   : > { %9152 = dma.hbm_to_vmem [thread:$0]  (!%p13643_p10), %s13598_s24, 2688, %s988_s30, [#allocation19], %s13627_s26, %s13627_s26, %s13626_s11  }
 0x1ab   : > { %s13645_s21 = smov %s13644_s14  ;;  %s10423_s18 = scalar_lea.hbm %s13644_s14, 3072 }
 0x1ac   : > { %p10424_p1 = scmp.ne.s32.totalorder %s13645_s21, %s10423_s18  ;;  %p10430_p7 = scmp.lt.u32.totalorder %s10423_s18, %s13645_s21 }
 0x1ae   : > { %p10426_p3 = pnand %p10424_p1, %p13642_p0 }
 0x1b0   : > { %p10427_p5 = pneg %p10426_p3 }
 0x1b2   : > { %p10432_p12 = pnand %p10430_p7, %p10427_p5 }
 0x1b4   : > { %10435 = shalt.err (!%p10432_p12)
}
 0x1b5   : > { %s10436_s15 = scalar_lea.vmem %s11675_s3, 3072  ;;  %p10444_p4 = scmp.lt.s32.totalorder %s11675_s3, %s11675_s3 }
 0x1b6   : > { %p10437_p9 = scmp.ne.s32.totalorder %s11675_s3, %s10436_s15  ;;  %p10445_p2 = scmp.lt.s32.totalorder %s10436_s15, %s10436_s15 }
 0x1b8   : > { %p10439_p13 = pnand %p10437_p9, %p13642_p0  ;;  %p10446_p11 = por %p10445_p2, %p10444_p4 }
 0x1ba   : > { %p10440_p6 = pneg %p10439_p13 }
 0x1bc   : > { %p10447_p8 = pnand %p10446_p11, %p10440_p6 }
 0x1be   : > { %10450 = shalt.err (!%p10447_p8)
}
 0x1bf   : > { %s13646_s30 = sld [smem:[#allocation84_spill]]  ;;  %s11153_s19 = smov [#allocation26]  }
 0x1c0   : > { %9158 = dma.hbm_to_vmem [thread:$0]  (!%p13643_p10), %s13645_s21, 3072, %s11675_s3, [#allocation22], %s13627_s26, %s13627_s26, %s13626_s11  }
 0x1c1   : > { %s1039_s6 = sshll.u32 %s11153_s19, 4  ;;  %s1040_s6 = int_to_ptr.vmem [resolvable:$true] %s1039_s6 }
 0x1c5   : > { %s10451_s14 = scalar_lea.hbm %s13646_s30, 7680 }
 0x1c6   : > { %p10452_p1 = scmp.ne.s32.totalorder %s13646_s30, %s10451_s14  ;;  %p10458_p7 = scmp.lt.u32.totalorder %s10451_s14, %s13646_s30 }
 0x1c8   : > { %p10454_p3 = pnand %p10452_p1, %p13642_p0 }
 0x1ca   : > { %p10455_p5 = pneg %p10454_p3 }
 0x1cc   : > { %p10460_p12 = pnand %p10458_p7, %p10455_p5 }
 0x1ce   : > { %10463 = shalt.err (!%p10460_p12)
}
 0x1cf   : > { %s10464_s18 = scalar_lea.vmem %s1040_s6, 7680  ;;  %p10472_p4 = scmp.lt.s32.totalorder %s1040_s6, %s1040_s6 }
 0x1d0   : > { %p10465_p9 = scmp.ne.s32.totalorder %s1040_s6, %s10464_s18  ;;  %p10473_p2 = scmp.lt.s32.totalorder %s10464_s18, %s10464_s18 }
 0x1d2   : > { %p10467_p13 = pnand %p10465_p9, %p13642_p0  ;;  %p10474_p11 = por %p10473_p2, %p10472_p4 }
 0x1d4   : > { %p10468_p6 = pneg %p10467_p13 }
 0x1d6   : > { %p10475_p8 = pnand %p10474_p11, %p10468_p6 }
 0x1d8   : > { %10478 = shalt.err (!%p10475_p8)
}
 0x1d9   : > { %s11154_s11 = smov 384   ;;  %s13647_s26 = sld [smem:[#allocation86_spill]] }
 0x1da   : > { %s11155_s15 = smov 24   ;;  %s11156_s19 = smov [#allocation29]  }
 0x1db   : > { %9164 = dma.hbm_to_vmem [thread:$0]  (!%p13643_p10), %s13646_s30, 7680, %s1040_s6, [#allocation25], %s11154_s11, %s11154_s11, %s11155_s15  }
 0x1dc   : > { %s1065_s14 = sshll.u32 %s11156_s19, 4  ;;  %s11157_s8 = smov [#allocation32]   ;;  %s1066_s14 = int_to_ptr.vmem [resolvable:$true] %s1065_s14 }
 0x1dd   : > { %s1091_s5 = sshll.u32 %s11157_s8, 4  ;;  %s1092_s5 = int_to_ptr.vmem [resolvable:$true] %s1091_s5 }
 0x1df   : > { %s13648_s3 = smov %s13647_s26  ;;  %s10479_s21 = scalar_lea.hbm %s13647_s26, 4160 }
 0x1e0   : > { %p10480_p1 = scmp.ne.s32.totalorder %s13648_s3, %s10479_s21  ;;  %p10486_p7 = scmp.lt.u32.totalorder %s10479_s21, %s13648_s3 }
 0x1e2   : > { %p10482_p3 = pnand %p10480_p1, %p13642_p0 }
 0x1e4   : > { %p10483_p5 = pneg %p10482_p3 }
 0x1e6   : > { %p10488_p12 = pnand %p10486_p7, %p10483_p5 }
 0x1e8   : > { %10491 = shalt.err (!%p10488_p12)
}
 0x1e9   : > { %s10492_s18 = scalar_lea.vmem %s1066_s14, 4160  ;;  %p10500_p4 = scmp.lt.s32.totalorder %s1066_s14, %s1066_s14 }
 0x1ea   : > { %p10493_p9 = scmp.ne.s32.totalorder %s1066_s14, %s10492_s18  ;;  %p10501_p2 = scmp.lt.s32.totalorder %s10492_s18, %s10492_s18 }
 0x1ec   : > { %p10495_p13 = pnand %p10493_p9, %p13642_p0  ;;  %p10502_p11 = por %p10501_p2, %p10500_p4 }
 0x1ee   : > { %p10496_p6 = pneg %p10495_p13 }
 0x1f0   : > { %p10503_p8 = pnand %p10502_p11, %p10496_p6 }
 0x1f2   : > { %10506 = shalt.err (!%p10503_p8)
}
 0x1f3   : > { %s13649_s8 = smov 52   ;;  %s13650_s6 = smov 832  }
 0x1f4   : > { %s13651_s21 = sld [smem:[#allocation88_spill]] }
 0x1f5   : > { %9170 = dma.hbm_to_vmem [thread:$0]  (!%p13643_p10), %s13648_s3, 4160, %s1066_s14, [#allocation28], %s13650_s6, %s13650_s6, %s13649_s8  }
 0x1fa   : > { %s10507_s11 = scalar_lea.hbm %s13651_s21, 5120 }
 0x1fb   : > { %p10508_p1 = scmp.ne.s32.totalorder %s13651_s21, %s10507_s11  ;;  %p10514_p7 = scmp.lt.u32.totalorder %s10507_s11, %s13651_s21 }
 0x1fd   : > { %p10510_p3 = pnand %p10508_p1, %p13642_p0 }
 0x1ff   : > { %p10511_p5 = pneg %p10510_p3 }
 0x201   : > { %p10516_p12 = pnand %p10514_p7, %p10511_p5 }
 0x203   : > { %10519 = shalt.err (!%p10516_p12)
}
 0x204   : > { %s10520_s26 = scalar_lea.vmem %s1092_s5, 5120  ;;  %p10528_p4 = scmp.lt.s32.totalorder %s1092_s5, %s1092_s5 }
 0x205   : > { %p10521_p9 = scmp.ne.s32.totalorder %s1092_s5, %s10520_s26  ;;  %p10529_p2 = scmp.lt.s32.totalorder %s10520_s26, %s10520_s26 }
 0x207   : > { %p10523_p13 = pnand %p10521_p9, %p13642_p0  ;;  %p10530_p11 = por %p10529_p2, %p10528_p4 }
 0x209   : > { %p10524_p6 = pneg %p10523_p13 }
 0x20b   : > { %p10531_p8 = pnand %p10530_p11, %p10524_p6 }
 0x20d   : > { %10534 = shalt.err (!%p10531_p8)
}
 0x20e   : > { %s11158_s15 = smov 256   ;;  %s13652_s19 = sld [smem:[#allocation91_spill]] }
 0x20f   : > { %s11159_s14 = smov 16   ;;  %s11160_s18 = smov [#allocation35]  }
 0x210   : > { %9176 = dma.hbm_to_vmem [thread:$0]  (!%p13643_p10), %s13651_s21, 5120, %s1092_s5, [#allocation31], %s11158_s15, %s11158_s15, %s11159_s14  }
 0x211   : > { %s1120_s8 = sshll.u32 %s11160_s18, 4  ;;  %s11161_s6 = smov [#allocation38]   ;;  %s1121_s8 = int_to_ptr.vmem [resolvable:$true] %s1120_s8 }
 0x212   : > { %s1146_s11 = sshll.u32 %s11161_s6, 4  ;;  %s1147_s11 = int_to_ptr.vmem [resolvable:$true] %s1146_s11 }
 0x214   : > { %s10535_s3 = scalar_lea.hbm %s13652_s19, 4096 }
 0x215   : > { %p10536_p1 = scmp.ne.s32.totalorder %s13652_s19, %s10535_s3  ;;  %p10542_p7 = scmp.lt.u32.totalorder %s10535_s3, %s13652_s19 }
 0x217   : > { %p10538_p3 = pnand %p10536_p1, %p13642_p0 }
 0x219   : > { %p10539_p5 = pneg %p10538_p3 }
 0x21b   : > { %p10544_p12 = pnand %p10542_p7, %p10539_p5 }
 0x21d   : > { %10547 = shalt.err (!%p10544_p12)
}
 0x21e   : > { %s10548_s26 = scalar_lea.vmem %s1121_s8, 4096  ;;  %p10556_p4 = scmp.lt.s32.totalorder %s1121_s8, %s1121_s8 }
 0x21f   : > { %p10549_p9 = scmp.ne.s32.totalorder %s1121_s8, %s10548_s26  ;;  %p10557_p2 = scmp.lt.s32.totalorder %s10548_s26, %s10548_s26 }
 0x221   : > { %p10551_p13 = pnand %p10549_p9, %p13642_p0  ;;  %p10558_p11 = por %p10557_p2, %p10556_p4 }
 0x223   : > { %p10552_p6 = pneg %p10551_p13 }
 0x225   : > { %p10559_p8 = pnand %p10558_p11, %p10552_p6 }
 0x227   : > { %10562 = shalt.err (!%p10559_p8)
}
 0x228   : > { %s13653_s5 = sld [smem:[#allocation93_spill]] }
 0x229   : > { %9182 = dma.hbm_to_vmem [thread:$0]  (!%p13643_p10), %s13652_s19, 4096, %s1121_s8, [#allocation34], %s11158_s15, %s11158_s15, %s11159_s14  }
 0x22e   : > { %s10563_s3 = scalar_lea.hbm %s13653_s5, 1024 }
 0x22f   : > { %p10564_p1 = scmp.ne.s32.totalorder %s13653_s5, %s10563_s3  ;;  %p10570_p7 = scmp.lt.u32.totalorder %s10563_s3, %s13653_s5 }
 0x231   : > { %p10566_p3 = pnand %p10564_p1, %p13642_p0 }
 0x233   : > { %p10567_p5 = pneg %p10566_p3 }
 0x235   : > { %p10572_p12 = pnand %p10570_p7, %p10567_p5 }
 0x237   : > { %10575 = shalt.err (!%p10572_p12)
}
 0x238   : > { %s10576_s18 = scalar_lea.vmem %s1147_s11, 1024  ;;  %p10584_p4 = scmp.lt.s32.totalorder %s1147_s11, %s1147_s11 }
 0x239   : > { %p10577_p9 = scmp.ne.s32.totalorder %s1147_s11, %s10576_s18  ;;  %p10585_p2 = scmp.lt.s32.totalorder %s10576_s18, %s10576_s18 }
 0x23b   : > { %p10579_p13 = pnand %p10577_p9, %p13642_p0  ;;  %p10586_p11 = por %p10585_p2, %p10584_p4 }
 0x23d   : > { %p10580_p6 = pneg %p10579_p13 }
 0x23f   : > { %p10587_p8 = pnand %p10586_p11, %p10580_p6 }
 0x241   : > { %10590 = shalt.err (!%p10587_p8)
}
 0x242   : > { %s13654_s15 = smov 4   ;;  %s13655_s14 = smov 64  }
 0x243   : > { %s13656_s8 = sld [smem:[#allocation95_spill]]  ;;  %s11162_s6 = smov [#allocation41]  }
 0x244   : > { %9188 = dma.hbm_to_vmem [thread:$0]  (!%p13643_p10), %s13653_s5, 1024, %s1147_s11, [#allocation37], %s13655_s14, %s13655_s14, %s13654_s15  }
 0x245   : > { %s1172_s26 = sshll.u32 %s11162_s6, 4  ;;  %s1173_s26 = int_to_ptr.vmem [resolvable:$true] %s1172_s26 }
 0x249   : > { %s10591_s3 = scalar_lea.hbm %s13656_s8, 1024 }
 0x24a   : > { %p10592_p1 = scmp.ne.s32.totalorder %s13656_s8, %s10591_s3  ;;  %p10598_p7 = scmp.lt.u32.totalorder %s10591_s3, %s13656_s8 }
 0x24c   : > { %p10594_p3 = pnand %p10592_p1, %p13642_p0 }
 0x24e   : > { %p10595_p5 = pneg %p10594_p3 }
 0x250   : > { %p10600_p12 = pnand %p10598_p7, %p10595_p5 }
 0x252   : > { %10603 = shalt.err (!%p10600_p12)
}
 0x253   : > { %s10604_s18 = scalar_lea.vmem %s1173_s26, 1024  ;;  %p10612_p4 = scmp.lt.s32.totalorder %s1173_s26, %s1173_s26 }
 0x254   : > { %p10605_p9 = scmp.ne.s32.totalorder %s1173_s26, %s10604_s18  ;;  %p10613_p2 = scmp.lt.s32.totalorder %s10604_s18, %s10604_s18 }
 0x256   : > { %p10607_p13 = pnand %p10605_p9, %p13642_p0  ;;  %p10614_p11 = por %p10613_p2, %p10612_p4 }
 0x258   : > { %p10608_p6 = pneg %p10607_p13 }
 0x25a   : > { %p10615_p8 = pnand %p10614_p11, %p10608_p6 }
 0x25c   : > { %10618 = shalt.err (!%p10615_p8)
}
 0x25d   : > { %s13657_s11 = sld [smem:[#allocation107_spill]]  ;;  %s124_s4 = sadd.s32 1, %s11085_s1 }
 0x25e   : > { %9194 = dma.hbm_to_vmem [thread:$0]  (!%p13643_p10), %s13656_s8, 1024, %s1173_s26, [#allocation40], %s13655_s14, %s13655_s14, %s13654_s15  }
 0x25f   : > { %s127_s10 = sadd.s32 1, %s11089_s2  ;;  %p125_p0 = scmp.ge.s32.totalorder %s124_s4, 4 }
 0x260   : > { %s185_s6 = sadd.s32 1, %s11073_s22  ;;  %p192_p1 = scmp.ne.s32.totalorder %s11073_s22, %s11069_s9 }
 0x261   : > { %s13781_s4 = smov (%p125_p0, %s124_s4), 0  ;;  %s13783_s10 = smov (!%p125_p0, %s127_s10), %s11089_s2 }
 0x262   : > { %13658 = sst [smem:[#allocation122_spill]] %s13781_s4  ;;  %s180_s3 = ssub.s32 %s11085_s1, %s13781_s4 }
 0x263   : > { %p198_p3 = scmp.ne.s32.totalorder %s11069_s9, %s13657_s11  ;;  %p13659_p5 = scmp.eq.s32.totalorder %s11093_s7, 0 }
 0x264   : > { %p129_p10 = scmp.ge.s32.totalorder %s13783_s10, 2  ;;  %p13661_p12 = scmp.eq.s32.totalorder %s11422_s13, 0 }
 0x265   : > { %p11791_p7 = por %p13659_p5, %p192_p1  ;;  %s1200_s14 = sand.u32 1, %s11073_s22  }
 0x266   : > { %p11797_p9 = por %p13661_p12, %p198_p3  ;;  %s13664_s26 = sld [smem:[#allocation72_spill]] }
 0x267   : > { %s9039_s5 = smul.u32 14, %s11089_s2  ;;  %s13785_s10 = smov (%p129_p10, %s13783_s10), 0 }
 0x268   : > { %s13662_s15 = scalar_select %p11797_p9, 1, 0 }
 0x269   : > { %13666 = sst [smem:[#allocation123_spill]] %s13785_s10  ;;  %s13667_s8 = sld [smem:[#allocation74_spill]] }
 0x26a   : > { %13663 = sst [smem:[#allocation107_spill]] %s13662_s15  ;;  %s9038_s19 = smul.u32 112, %s1200_s14 }
 0x26b   : > { %s181_s21 = ssub.s32 %s11089_s2, %s13785_s10  ;;  %s9040_s24 = smul.u32 28, %s11085_s1 }
 0x26c   : > { %s13665_s11 = smov %s13664_s26  ;;  %s182_s25 = sor.u32 %s181_s21, %s180_s3 }
 0x26d   : > { %p209_p13 = scmp.eq.s32.totalorder %s181_s21, 0  ;;  %p183_p6 = scmp.eq.s32.totalorder %s182_s25, 0 }
 0x26e   : > { %s13668_s30 = sadd.s32 1, %s11061_s16  ;;  %s1210_s9 = sadd.s32 %s9040_s24, %s9039_s5 }
 0x26f   : > { %s11811_s4 = scalar_select %p209_p13, %s11061_s16, %s13668_s30  }
 0x270   : > { %s11814_s15 = scalar_select %p183_p6, %s11073_s22, %s185_s6  }
 0x271   : > { %13669 = sst [smem:[#allocation124_spill]] %s11811_s4  ;;  %s1204_s13 = scalar_lea.vmem [#allocation8], %s9038_s19 }
 0x272   : > { %13670 = sst [smem:[#allocation125_spill]] %s11814_s15  ;;  %s1214_s29 = sshll.u32 %s1204_s13, 4  ;;  %s11816_s29 = int_to_ptr.vmem [resolvable:$true] %s1214_s29 }
 0x273   : > { %s8083_s17 = sshll.u32 %s1210_s9, 7  ;;  %p13671_p4 = scmp.lt.s32.totalorder %s11093_s7, 8 }
 0x274   : > { %s11819_s12 = scalar_lea.hbm %s13664_s26, %s8083_s17  ;;  %s11831_s24 = scalar_lea.hbm %s13667_s8, %s11596_s28 }
 0x275   : > { %p11825_p2 = pnand %p13671_p4, %p11791_p7  ;;  %s1244_s13 = scalar_lea.vmem [#allocation11], %s11593_s20 }
 0x276   : > { %s11834_s9 = sshll.u32 %s1244_s13, 4  ;;  %s1201_s30 = scalar_lea.sflag [#allocation5], %s1200_s14  ;;  %s11858_s9 = int_to_ptr.vmem [resolvable:$true] %s11834_s9 }
 0x277   : > { %s10619_s17 = scalar_lea.hbm %s11819_s12, 1792  ;;  %p10621_p8 = pneg %p11825_p2 }
 0x278   : > { %p10620_p11 = scmp.ne.s32.totalorder %s11819_s12, %s10619_s17  ;;  %s10624_s21 = scalar_lea.hbm %s13665_s11, 14336 }
 0x279   : > { %p10625_p3 = scmp.lt.u32.totalorder %s11819_s12, %s13665_s11  ;;  %p10626_p5 = scmp.lt.u32.totalorder %s10624_s21, %s10619_s17 }
 0x27a   : > { %p10622_p0 = pnand %p10621_p8, %p10620_p11  ;;  %p10628_p10 = scmp.lt.u32.totalorder %s10619_s17, %s11819_s12 }
 0x27b   : > { %p10627_p7 = por %p10626_p5, %p10625_p3 }
 0x27c   : > { %p10623_p1 = pneg %p10622_p0 }
 0x27d   : > { %p10629_p12 = por %p10628_p10, %p10627_p7 }
 0x27f   : > { %p10630_p13 = pnand %p10629_p12, %p10623_p1 }
 0x281   : > { %10633 = shalt.err (!%p10630_p13)
}
 0x282   : > { %s10634_s19 = scalar_lea.vmem %s11816_s29, 1792  ;;  %s11163_s5 = smov [#allocation8]  }
 0x283   : > { %p10635_p6 = scmp.ne.s32.totalorder %s11816_s29, %s10634_s19  ;;  %s10639_s6 = sshll.u32 %s11163_s5, 4  ;;  %s10640_s6 = int_to_ptr.vmem [resolvable:$false] %s10639_s6 }
 0x284   : > { %s10641_s3 = scalar_lea.vmem %s10640_s6, 3584  ;;  %p10642_p11 = scmp.lt.s32.totalorder %s11816_s29, %s10640_s6 }
 0x285   : > { %p10637_p4 = pnand %p10635_p6, %p10621_p8  ;;  %p10643_p0 = scmp.lt.s32.totalorder %s10641_s3, %s10634_s19 }
 0x287   : > { %p10638_p9 = pneg %p10637_p4  ;;  %p10644_p3 = por %p10643_p0, %p10642_p11 }
 0x289   : > { %p10645_p5 = pnand %p10644_p3, %p10638_p9 }
 0x28b   : > { %10648 = shalt.err (!%p10645_p5)
}
 0x28c   : > { %9198 = dma.hbm_to_vmem [thread:$0]  (!%p11825_p2), %s11819_s12, 1792, %s11816_s29, %s1201_s30  }
 0x28d   : > { %s1281_s18 = scalar_lea.vmem [#allocation14], %s11611_s27  ;;  %s10649_s26 = scalar_lea.hbm %s11831_s24, 256 }
 0x28e   : > { %s1288_s14 = sshll.u32 %s1281_s18, 4  ;;  %p10650_p9 = scmp.ne.s32.totalorder %s11831_s24, %s10649_s26  ;;  %s1289_s14 = int_to_ptr.vmem [resolvable:$true] %s1288_s14 }
 0x28f   : > { %p13673_p8 = scmp.ne.s32.totalorder %s13637_s0, 0  ;;  %s10654_s25 = scalar_lea.hbm %s13667_s8, 512 }
 0x290   : > { %p10655_p10 = scmp.lt.u32.totalorder %s11831_s24, %s13667_s8  ;;  %p10656_p12 = scmp.lt.u32.totalorder %s10654_s25, %s10649_s26 }
 0x291   : > { %p10652_p1 = pnand %p10650_p9, %p13673_p8  ;;  %p10658_p6 = scmp.lt.u32.totalorder %s10649_s26, %s11831_s24 }
 0x292   : > { %p10657_p13 = por %p10656_p12, %p10655_p10 }
 0x293   : > { %p10653_p7 = pneg %p10652_p1 }
 0x294   : > { %p10659_p4 = por %p10658_p6, %p10657_p13 }
 0x296   : > { %p10660_p11 = pnand %p10659_p4, %p10653_p7 }
 0x298   : > { %10663 = shalt.err (!%p10660_p11)
}
 0x299   : > { %s10664_s29 = scalar_lea.vmem %s11858_s9, 256  ;;  %s11164_s27 = smov [#allocation11]  }
 0x29a   : > { %p10665_p2 = scmp.ne.s32.totalorder %s11858_s9, %s10664_s29  ;;  %s10669_s12 = sshll.u32 %s11164_s27, 4  ;;  %s10670_s12 = int_to_ptr.vmem [resolvable:$false] %s10669_s12 }
 0x29b   : > { %s10671_s13 = scalar_lea.vmem %s10670_s12, 512  ;;  %p10672_p5 = scmp.lt.s32.totalorder %s11858_s9, %s10670_s12 }
 0x29c   : > { %p10667_p0 = pnand %p10665_p2, %p13673_p8  ;;  %p10673_p9 = scmp.lt.s32.totalorder %s10671_s13, %s10664_s29 }
 0x29e   : > { %p10668_p3 = pneg %p10667_p0  ;;  %p10674_p1 = por %p10673_p9, %p10672_p5 }
 0x2a0   : > { %p10675_p10 = pnand %p10674_p1, %p10668_p3 }
 0x2a2   : > { %10678 = shalt.err (!%p10675_p10)
}
 0x2a3   : > { %p13674_p7 = scmp.ne.s32.totalorder %s13636_s23, 0  ;;  %s13675_s30 = sld [smem:[#allocation120_spill]] }
 0x2a4   : > { %s13677_s21 = sld [smem:[#allocation121_spill]]  ;;  %s13678_s19 = sld [smem:[#allocation76_spill]] }
 0x2a9   : > { %s13676_s17 = scalar_lea.sflag [#allocation10], %s13675_s30 }
 0x2aa   : > { %9204 = dma.hbm_to_vmem [thread:$0]  (!%p13674_p7), %s11831_s24, 256, %s11858_s9, %s13676_s17  }
 0x2ab   : > { %s10679_s5 = scalar_lea.hbm %s13677_s21, 128  ;;  %s10684_s6 = scalar_lea.hbm %s13678_s19, 256 }
 0x2ac   : > { %p10680_p12 = scmp.ne.s32.totalorder %s13677_s21, %s10679_s5  ;;  %p10685_p4 = scmp.lt.u32.totalorder %s13677_s21, %s13678_s19 }
 0x2ad   : > { %p10686_p11 = scmp.lt.u32.totalorder %s10684_s6, %s10679_s5  ;;  %p10688_p0 = scmp.lt.u32.totalorder %s10679_s5, %s13677_s21 }
 0x2ae   : > { %p10682_p13 = pnand %p10680_p12, %p13673_p8 }
 0x2af   : > { %p10687_p2 = por %p10686_p11, %p10685_p4 }
 0x2b0   : > { %p10683_p6 = pneg %p10682_p13 }
 0x2b1   : > { %p10689_p3 = por %p10688_p0, %p10687_p2 }
 0x2b3   : > { %p10690_p5 = pnand %p10689_p3, %p10683_p6 }
 0x2b5   : > { %10693 = shalt.err (!%p10690_p5)
}
 0x2b6   : > { %s10694_s3 = scalar_lea.vmem %s1289_s14, 128  ;;  %s11165_s24 = smov [#allocation14]  }
 0x2b7   : > { %p10695_p9 = scmp.ne.s32.totalorder %s1289_s14, %s10694_s3  ;;  %s10699_s9 = sshll.u32 %s11165_s24, 4  ;;  %s10700_s9 = int_to_ptr.vmem [resolvable:$false] %s10699_s9 }
 0x2b8   : > { %s10701_s18 = scalar_lea.vmem %s10700_s9, 256  ;;  %p10702_p12 = scmp.lt.s32.totalorder %s1289_s14, %s10700_s9 }
 0x2b9   : > { %p10697_p1 = pnand %p10695_p9, %p13673_p8  ;;  %p10703_p13 = scmp.lt.s32.totalorder %s10701_s18, %s10694_s3 }
 0x2bb   : > { %p10698_p10 = pneg %p10697_p1  ;;  %p10704_p7 = por %p10703_p13, %p10702_p12 }
 0x2bd   : > { %p10705_p4 = pnand %p10704_p7, %p10698_p10 }
 0x2bf   : > { %10708 = shalt.err (!%p10705_p4)
}
 0x2c0   : > { %p13679_p11 = scmp.ne.s32.totalorder %s13636_s23, 0  ;;  %s13680_s26 = scalar_lea.sflag [#allocation13], %s13675_s30 }
 0x2c1   : > { %s13681_s25 = sld [smem:[#allocation77_spill]]  ;;  %s1299_s27 = scalar_lea.vmem [#allocation15], %s11593_s20 }
 0x2c2   : > { %9210 = dma.hbm_to_vmem [thread:$0]  (!%p13679_p11), %s13677_s21, 128, %s1289_s14, %s13680_s26  }
 0x2c3   : > { %s1307_s12 = sshll.u32 %s1299_s27, 4  ;;  %s1296_s13 = scalar_lea.sflag [#allocation16], %s13675_s30  ;;  %s1308_s12 = int_to_ptr.vmem [resolvable:$true] %s1307_s12 }
 0x2c7   : > { %s11897_s29 = scalar_lea.hbm %s13681_s25, %s11596_s28  ;;  %s10714_s19 = scalar_lea.hbm %s13681_s25, 512 }
 0x2c8   : > { %s10709_s17 = scalar_lea.hbm %s11897_s29, 256  ;;  %p10715_p0 = scmp.lt.u32.totalorder %s11897_s29, %s13681_s25 }
 0x2c9   : > { %p10710_p7 = scmp.ne.s32.totalorder %s11897_s29, %s10709_s17  ;;  %p10716_p3 = scmp.lt.u32.totalorder %s10714_s19, %s10709_s17 }
 0x2ca   : > { %p10718_p9 = scmp.lt.u32.totalorder %s10709_s17, %s11897_s29 }
 0x2cb   : > { %p10712_p6 = pnand %p10710_p7, %p13673_p8  ;;  %p10717_p5 = por %p10716_p3, %p10715_p0 }
 0x2cd   : > { %p10713_p2 = pneg %p10712_p6  ;;  %p10719_p1 = por %p10718_p9, %p10717_p5 }
 0x2cf   : > { %p10720_p10 = pnand %p10719_p1, %p10713_p2 }
 0x2d1   : > { %10723 = shalt.err (!%p10720_p10)
}
 0x2d2   : > { %s10724_s28 = scalar_lea.vmem %s1308_s12, 256  ;;  %s11166_s20 = smov [#allocation15]  }
 0x2d3   : > { %p10725_p12 = scmp.ne.s32.totalorder %s1308_s12, %s10724_s28  ;;  %s10729_s14 = sshll.u32 %s11166_s20, 4  ;;  %s10730_s14 = int_to_ptr.vmem [resolvable:$false] %s10729_s14 }
 0x2d4   : > { %s10731_s30 = scalar_lea.vmem %s10730_s14, 512  ;;  %p10732_p7 = scmp.lt.s32.totalorder %s1308_s12, %s10730_s14 }
 0x2d5   : > { %p10727_p13 = pnand %p10725_p12, %p13673_p8  ;;  %p10733_p6 = scmp.lt.s32.totalorder %s10731_s30, %s10724_s28 }
 0x2d7   : > { %p10728_p4 = pneg %p10727_p13  ;;  %p10734_p11 = por %p10733_p6, %p10732_p7 }
 0x2d9   : > { %p10735_p0 = pnand %p10734_p11, %p10728_p4 }
 0x2db   : > { %10738 = shalt.err (!%p10735_p0)
}
 0x2dc   : > { %p13682_p3 = scmp.ne.s32.totalorder %s13636_s23, 0  ;;  %s13683_s21 = sld [smem:[#allocation116_spill]] }
 0x2de   : > { %9213 = dma.hbm_to_vmem [thread:$0]  (!%p13682_p3), %s11897_s29, 256, %s1308_s12, %s1296_s13  }
 0x2e2   : > { %p13684_p2 = scmp.ne.s32.totalorder %s13683_s21, 0 }
 0x2e4   : > { %1316 = sbr.rel (%p13684_p2) target bundleno = 5009 (0x1391), region = 132 }
 0x2eb   : > { %s13685_s5 = sld [smem:[#allocation115_spill]] }
 0x2f1   : > { %p13686_p5 = scmp.eq.s32.totalorder %s13685_s5, 0 }
 0x2f3   : > { %10980 = dma.done.wait (%p13686_p5), [#allocation7], 64   ;;  %p13687_p8 = pmov %p13686_p5 }
 0x2f4   : > { %s13688_s0 = sld [smem:[#allocation108_spill]]  ;;  %s13689_s6 = sld [smem:[#allocation107_spill]] }
 0x2f5   : > { %10982 = vsyncadd (%p13687_p8), [#allocation7], 4294967232 }
 0x2fa   : > { %s1322_s3 = sand.u32 1, %s13688_s0   ;;  %p13690_p11 = scmp.ne.s32.totalorder %s13689_s6, 0 }
 0x2fb   : > { %s9041_s24 = smul.u32 112, %s1322_s3  ;;  %s1323_s9 = scalar_lea.sflag [#allocation5], %s1322_s3 }
 0x2fd   : > { %s11921_s18 = scalar_lea.vmem [#allocation8], %s9041_s24 }
 0x2fe   : > { %10984 = dma.done.wait (%p13690_p11), %s1323_s9, 1792  }
 0x2ff   : > { %10986 = vsyncadd (%p13690_p11), %s1323_s9, 4294965504  ;;  %s13691_s23 = sld [smem:[#allocation105_spill]]  ;;  %s13692_s26 = sld [smem:[#allocation117_spill]] }
 0x300   : > { %s11928_s29 = sand.u32 1, %s13685_s5  }
 0x301   : > { %13693 = sst [smem:[#allocation126_spill]] %s11928_s29  ;;  %s1332_s13 = scalar_lea.sflag [#allocation10], %s11928_s29 }
 0x305   : > { %s11931_s27 = sand.u32 1, %s13691_s23   ;;  %p13695_p9 = scmp.ne.s32.totalorder %s13692_s26, 0 }
 0x306   : > { %13694 = sst [smem:[#allocation127_spill]] %s11931_s27  ;;  %s11934_s12 = sshll.u32 %s11931_s27, 4 }
 0x307   : > { %10988 = dma.done.wait (%p13695_p9), %s1332_s13, 512  }
 0x308   : > { %10990 = vsyncadd (%p13695_p9), %s1332_s13, 4294966784  ;;  %s11943_s19 = sshll.u32 %s11931_s27, 3  ;;  %s1350_s20 = scalar_lea.sflag [#allocation13], %s11928_s29 }
 0x309   : > { %10992 = dma.done.wait (%p13695_p9), %s1350_s20, 256  }
 0x30a   : > { %10994 = vsyncadd (%p13695_p9), %s1350_s20, 4294967040  ;;  %s1368_s21 = scalar_lea.sflag [#allocation16], %s11928_s29 }
 0x30b   : > { %10996 = dma.done.wait (%p13695_p9), %s1368_s21, 256  }
 0x30c   : > { %10998 = vsyncadd (%p13695_p9), %s1368_s21, 4294967040  ;;  %p13696_p1 = pmov %p13686_p5 }
 0x30e   : > { %11000 = dma.done.wait (%p13696_p1), [#allocation16], 16   ;;  %p13697_p10 = pmov %p13696_p1 }
 0x30f   : > { %p13698_p12 = pmov %p13696_p1 }
 0x310   : > { %11002 = vsyncadd (%p13697_p10), [#allocation16], 4294967280 }
 0x311   : > { %11004 = dma.done.wait (%p13698_p12), [#allocation19], 2704   ;;  %p13699_p13 = pmov %p13696_p1 }
 0x312   : > { %p13700_p4 = pmov %p13696_p1 }
 0x313   : > { %11006 = vsyncadd (%p13699_p13), [#allocation19], 4294964592 }
 0x314   : > { %11008 = dma.done.wait (%p13700_p4), [#allocation22], 5760   ;;  %p13701_p7 = pmov %p13696_p1 }
 0x315   : > { %p13702_p6 = pmov %p13696_p1 }
 0x316   : > { %11010 = vsyncadd (%p13701_p7), [#allocation22], 4294961536 }
 0x317   : > { %11012 = dma.done.wait (%p13702_p6), [#allocation25], 19968   ;;  %p13703_p0 = pmov %p13696_p1 }
 0x319   : > { %11014 = vsyncadd (%p13703_p0), [#allocation25], 4294947328  ;;  %p13704_p3 = pmov %p13703_p0 }
 0x31a   : > { %p13705_p2 = pmov %p13703_p0 }
 0x31b   : > { %11016 = dma.done.wait (%p13704_p3), [#allocation28], 6720  }
 0x31c   : > { %11018 = vsyncadd (%p13705_p2), [#allocation28], 4294960576  ;;  %p13706_p5 = pmov %p13703_p0 }
 0x31d   : > { %p13707_p8 = pmov %p13703_p0 }
 0x31e   : > { %11020 = dma.done.wait (%p13706_p5), [#allocation31], 9280  }
 0x31f   : > { %11022 = vsyncadd (%p13707_p8), [#allocation31], 4294958016  ;;  %p13708_p11 = pmov %p13703_p0 }
 0x320   : > { %p13709_p9 = pmov %p13703_p0 }
 0x321   : > { %11024 = dma.done.wait (%p13708_p11), [#allocation34], 7168  }
 0x322   : > { %11026 = vsyncadd (%p13709_p9), [#allocation34], 4294960128  ;;  %p13710_p1 = pmov %p13703_p0 }
 0x323   : > { %p13711_p10 = pmov %p13703_p0 }
 0x324   : > { %11028 = dma.done.wait (%p13710_p1), [#allocation37], 4096  }
 0x325   : > { %11030 = vsyncadd (%p13711_p10), [#allocation37], 4294963200  ;;  %p13712_p12 = pmov %p13703_p0 }
 0x326   : > { %p13713_p13 = pmov %p13703_p0 }
 0x327   : > { %11032 = dma.done.wait (%p13712_p12), [#allocation40], 2048  }
 0x328   : > { %11034 = vsyncadd (%p13713_p13), [#allocation40], 4294965248 }
 0x329   : > { %1444 = sfence }
 0x32a   : > { %s13714_s6 = sld [smem:[#allocation110_spill]]  ;;  %s13715_s3 = sld [smem:[#allocation111_spill]] }
 0x32b   : > { %s13716_s24 = sld [smem:[#allocation71_spill]]  ;;  %s8121_s9 = sshll.u32 %s11931_s27, 5 }
 0x32c   : > { %s12003_s21 = scalar_lea.vmem [#allocation42], %s8121_s9  ;;  %s12005_s0 = scalar_lea.vmem [#allocation43], %s8121_s9 }
 0x32d   : > { %13717 = sst [smem:[#allocation128_spill]] %s12003_s21  ;;  %s12008_s30 = scalar_lea.vmem [#allocation45], %s11934_s12 }
 0x32e   : > { %13718 = sst [smem:[#allocation129_spill]] %s12005_s0  ;;  %s12011_s14 = scalar_lea.vmem [#allocation46], %s11934_s12 }
 0x32f   : > { %13719 = sst [smem:[#allocation130_spill]] %s12008_s30  ;;  %s12014_s28 = scalar_lea.vmem [#allocation48], %s11943_s19 }
 0x330   : > { %p1588_p4 = scmp.lt.s32.totalorder %s13714_s6, 3  ;;  %p1590_p7 = scmp.lt.s32.totalorder %s13715_s3, 1 }
 0x331   : > { %s12017_s17 = scalar_lea.vmem [#allocation49], %s11943_s19  ;;  %s12020_s8 = scalar_lea.vmem [#allocation51], %s11934_s12 }
 0x332   : > { %s1589_s23 = scalar_select %p1588_p4, %s13714_s6, 3 }
 0x333   : > { %s13787_s3 = smov (!%p1590_p7, %s13715_s3), 1  ;;  %13720 = sst [smem:[#allocation131_spill]] %s12020_s8 }
 0x334   : > { %s8128_s26 = sshll.u32 %s1589_s23, 1  ;;  %p8130_p6 = scmp.ne.s32.totalorder %s13714_s6, 0 }
 0x335   : > { %s1593_s5 = sadd.s32 %s8128_s26, %s13787_s3  ;;  %s13721_s3 = scalar_lea.vmem (!%p8130_p6), [#allocation9], %s11934_s12  ;;  %vm1681_vm0 = vcmask (!%p8130_p6), 64512   ;;  %vm1604_vm1 = vcmask (!%p8130_p6), 261120   ;;  %vm1613_vm2 = vcmask (!%p8130_p6), 293888   ;;  %v11167_v9 = vmov (!%p8130_p6), 0.0  }
 0x336   : > { %s8129_s13 = sshll.u32 %s1593_s5, 3  ;;  %1600 = sbr.rel (%p8130_p6) target bundleno = 1077 (0x435), region = 232  ;;  %v1615_v1 = vld [vmem:[%s13721_s3] sm:$0xff] (!%p8130_p6)  ;;  %1714 = vst.msk [vmem:[#allocation2 + $0x100] sm:$0xff] (!%p8130_p6), %vm1681_vm0, %v11167_v9  ;;  %1715 = vst.msk [vmem:[#allocation2 + $0x108] sm:$0xff] (!%p8130_p6), %vm1681_vm0, %v11167_v9 }
 0x337   : > { %s12001_s20 = scalar_lea.vmem %s13716_s24, %s8129_s13  ;;  %1617 = vxpose.xlu0.b32.start.end [1/1] (short) (!%p8130_p6), %v1615_v1, 128  ;;  %s13722_s24 = smov (!%p8130_p6), %s13721_s3  ;;  %1716 = vst.msk [vmem:[#allocation2 + $0x110] sm:$0xff] (!%p8130_p6), %vm1681_vm0, %v11167_v9  ;;  %1717 = vst.msk [vmem:[#allocation2 + $0x118] sm:$0xff] (!%p8130_p6), %vm1681_vm0, %v11167_v9 }
 0x338   : > { %v1616_v2 = vld [vmem:[%s13722_s24 + $0x8] sm:$0xff] (!%p8130_p6)  ;;  %s13723_s6 = scalar_lea.vmem (!%p8130_p6), [#allocation11], %s11934_s12  ;;  %s13725_s23 = scalar_lea.vmem (!%p8130_p6), [#allocation12], %s11943_s19  ;;  %1718 = vst.msk [vmem:[#allocation2 + $0x120] sm:$0xff] (!%p8130_p6), %vm1681_vm0, %v11167_v9  ;;  %1719 = vst.msk [vmem:[#allocation2 + $0x128] sm:$0xff] (!%p8130_p6), %vm1681_vm0, %v11167_v9 }
 0x339   : > { %v1601_v3 = vld [vmem:[%s13723_s6] sm:$0xff] (!%p8130_p6)  ;;  %s13724_s9 = smov (!%p8130_p6), %s13723_s6  ;;  %s13726_s26 = scalar_lea.vmem (!%p8130_p6), [#allocation14], %s11943_s19  ;;  %1720 = vst.msk [vmem:[#allocation2 + $0x130] sm:$0xff] (!%p8130_p6), %vm1681_vm0, %v11167_v9  ;;  %1721 = vst.msk [vmem:[#allocation2 + $0x138] sm:$0xff] (!%p8130_p6), %vm1681_vm0, %v11167_v9 }
 0x33a   : > { %v1602_v4 = vld [vmem:[%s13724_s9 + $0x8] sm:$0xff] (!%p8130_p6)  ;;  %1603 = vst [vmem:[%s12011_s14] sm:$0xff] (!%p8130_p6), %v1601_v3  ;;  %s13727_s5 = scalar_lea.vmem (!%p8130_p6), [#allocation15], %s11934_s12  ;;  %1722 = vst.msk [vmem:[#allocation2 + $0x140] sm:$0xff] (!%p8130_p6), %vm1681_vm0, %v11167_v9 }
 0x33b   : > { %v1606_v5 = vld [vmem:[%s13725_s23] sm:$0xff] (!%p8130_p6)  ;;  %1605 = vst.msk [vmem:[%s12011_s14 + $0x8] sm:$0xff] (!%p8130_p6), %vm1604_vm1, %v1602_v4  ;;  %v1608_v6 = vld [vmem:[%s13726_s26] sm:$0xff] (!%p8130_p6)  ;;  %s13728_s13 = smov (!%p8130_p6), %s13727_s5 }
 0x33c   : > { %1607 = vst [vmem:[%s12014_s28] sm:$0xff] (!%p8130_p6), %v1606_v5  ;;  %v1610_v7 = vld [vmem:[%s13727_s5] sm:$0xff] (!%p8130_p6)  ;;  %1723 = vst.msk [vmem:[#allocation2 + $0x148] sm:$0xff] (!%p8130_p6), %vm1681_vm0, %v11167_v9 }
 0x33d   : > { %v1611_v8 = vld [vmem:[%s13728_s13 + $0x8] sm:$0xff]  ;;  %1724 = vst.msk [vmem:[#allocation2 + $0x150] sm:$0xff] %vm1681_vm0, %v11167_v9  ;;  %1725 = vst.msk [vmem:[#allocation2 + $0x158] sm:$0xff] %vm1681_vm0, %v11167_v9 }
 0x33e   : > { %1726 = vst.msk [vmem:[#allocation2 + $0x160] sm:$0xff] %vm1681_vm0, %v11167_v9  ;;  %1727 = vst.msk [vmem:[#allocation2 + $0x168] sm:$0xff] %vm1681_vm0, %v11167_v9 }
 0x33f   : > { %1728 = vst.msk [vmem:[#allocation2 + $0x170] sm:$0xff] %vm1681_vm0, %v11167_v9  ;;  %1729 = vst.msk [vmem:[#allocation2 + $0x178] sm:$0xff] %vm1681_vm0, %v11167_v9 }
 0x340   : > { %1730 = vst.msk [vmem:[#allocation2 + $0x180] sm:$0xff] %vm1681_vm0, %v11167_v9  ;;  %1731 = vst.msk [vmem:[#allocation2 + $0x188] sm:$0xff] %vm1681_vm0, %v11167_v9 }
 0x341   : > { %1732 = vst.msk [vmem:[#allocation2 + $0x190] sm:$0xff] %vm1681_vm0, %v11167_v9  ;;  %1733 = vst.msk [vmem:[#allocation2 + $0x198] sm:$0xff] %vm1681_vm0, %v11167_v9 }
 0x342   : > { %1734 = vst.msk [vmem:[#allocation2 + $0x1a0] sm:$0xff] %vm1681_vm0, %v11167_v9  ;;  %1609 = vst [vmem:[%s12017_s17] sm:$0xff] %v1608_v6 }
 0x343   : > { %1612 = vst [vmem:[%s12020_s8] sm:$0xff] %v1610_v7  ;;  %1614 = vst.msk [vmem:[%s12020_s8 + $0x8] sm:$0xff] %vm1613_vm2, %v1611_v8 }
 0x374   : > { %1649 = vxpose.xlu0.b32.start.end [1/1] (short) %v1616_v2, 128 }
 0x3b7   : > { %v1633_v10 = vpop.trf.xlu0 }
 0x3b8   : > { %1682 = vst.msk [vmem:[#allocation2] sm:$0xff] %vm1681_vm0, %v1633_v10 }
 0x3bb   : > { %v1634_v11 = vpop.trf.xlu0 }
 0x3bc   : > { %1683 = vst.msk [vmem:[#allocation2 + $0x8] sm:$0xff] %vm1681_vm0, %v1634_v11 }
 0x3bf   : > { %v1635_v12 = vpop.trf.xlu0 }
 0x3c0   : > { %1684 = vst.msk [vmem:[#allocation2 + $0x10] sm:$0xff] %vm1681_vm0, %v1635_v12 }
 0x3c3   : > { %v1636_v13 = vpop.trf.xlu0 }
 0x3c4   : > { %1685 = vst.msk [vmem:[#allocation2 + $0x18] sm:$0xff] %vm1681_vm0, %v1636_v13 }
 0x3c7   : > { %v1637_v14 = vpop.trf.xlu0 }
 0x3c8   : > { %1686 = vst.msk [vmem:[#allocation2 + $0x20] sm:$0xff] %vm1681_vm0, %v1637_v14 }
 0x3cb   : > { %v1638_v15 = vpop.trf.xlu0 }
 0x3cc   : > { %1687 = vst.msk [vmem:[#allocation2 + $0x28] sm:$0xff] %vm1681_vm0, %v1638_v15 }
 0x3cf   : > { %v1639_v16 = vpop.trf.xlu0 }
 0x3d0   : > { %1688 = vst.msk [vmem:[#allocation2 + $0x30] sm:$0xff] %vm1681_vm0, %v1639_v16 }
 0x3d3   : > { %v1640_v17 = vpop.trf.xlu0 }
 0x3d4   : > { %1689 = vst.msk [vmem:[#allocation2 + $0x38] sm:$0xff] %vm1681_vm0, %v1640_v17 }
 0x3d7   : > { %v1641_v18 = vpop.trf.xlu0 }
 0x3d8   : > { %1690 = vst.msk [vmem:[#allocation2 + $0x40] sm:$0xff] %vm1681_vm0, %v1641_v18 }
 0x3db   : > { %v1642_v19 = vpop.trf.xlu0 }
 0x3dc   : > { %1691 = vst.msk [vmem:[#allocation2 + $0x48] sm:$0xff] %vm1681_vm0, %v1642_v19 }
 0x3df   : > { %v1643_v20 = vpop.trf.xlu0 }
 0x3e0   : > { %1692 = vst.msk [vmem:[#allocation2 + $0x50] sm:$0xff] %vm1681_vm0, %v1643_v20 }
 0x3e3   : > { %v1644_v21 = vpop.trf.xlu0 }
 0x3e4   : > { %1693 = vst.msk [vmem:[#allocation2 + $0x58] sm:$0xff] %vm1681_vm0, %v1644_v21 }
 0x3e7   : > { %v1645_v22 = vpop.trf.xlu0 }
 0x3e8   : > { %1694 = vst.msk [vmem:[#allocation2 + $0x60] sm:$0xff] %vm1681_vm0, %v1645_v22 }
 0x3eb   : > { %v1646_v23 = vpop.trf.xlu0 }
 0x3ec   : > { %1695 = vst.msk [vmem:[#allocation2 + $0x68] sm:$0xff] %vm1681_vm0, %v1646_v23 }
 0x3ef   : > { %v1647_v24 = vpop.trf.xlu0 }
 0x3f0   : > { %1696 = vst.msk [vmem:[#allocation2 + $0x70] sm:$0xff] %vm1681_vm0, %v1647_v24 }
 0x3f3   : > { %v1648_v25 = vpop.trf.xlu0 }
 0x3f4   : > { %1697 = vst.msk [vmem:[#allocation2 + $0x78] sm:$0xff] %vm1681_vm0, %v1648_v25 }
 0x3f7   : > { %v1665_v26 = vpop.trf.xlu0 }
 0x3f8   : > { %1698 = vst.msk [vmem:[#allocation2 + $0x80] sm:$0xff] %vm1681_vm0, %v1665_v26 }
 0x3fb   : > { %v1666_v27 = vpop.trf.xlu0 }
 0x3fc   : > { %1699 = vst.msk [vmem:[#allocation2 + $0x88] sm:$0xff] %vm1681_vm0, %v1666_v27 }
 0x3ff   : > { %v1667_v28 = vpop.trf.xlu0 }
 0x400   : > { %1700 = vst.msk [vmem:[#allocation2 + $0x90] sm:$0xff] %vm1681_vm0, %v1667_v28 }
 0x403   : > { %v1668_v29 = vpop.trf.xlu0 }
 0x404   : > { %1701 = vst.msk [vmem:[#allocation2 + $0x98] sm:$0xff] %vm1681_vm0, %v1668_v29 }
 0x407   : > { %v1669_v30 = vpop.trf.xlu0 }
 0x408   : > { %1702 = vst.msk [vmem:[#allocation2 + $0xa0] sm:$0xff] %vm1681_vm0, %v1669_v30 }
 0x40b   : > { %v1670_v31 = vpop.trf.xlu0 }
 0x40c   : > { %1703 = vst.msk [vmem:[#allocation2 + $0xa8] sm:$0xff] %vm1681_vm0, %v1670_v31 }
 0x40f   : > { %v1671_v32 = vpop.trf.xlu0 }
 0x410   : > { %1704 = vst.msk [vmem:[#allocation2 + $0xb0] sm:$0xff] %vm1681_vm0, %v1671_v32 }
 0x413   : > { %v1672_v33 = vpop.trf.xlu0 }
 0x414   : > { %1705 = vst.msk [vmem:[#allocation2 + $0xb8] sm:$0xff] %vm1681_vm0, %v1672_v33 }
 0x417   : > { %v1673_v34 = vpop.trf.xlu0 }
 0x418   : > { %1706 = vst.msk [vmem:[#allocation2 + $0xc0] sm:$0xff] %vm1681_vm0, %v1673_v34 }
 0x41b   : > { %v1674_v35 = vpop.trf.xlu0 }
 0x41c   : > { %1707 = vst.msk [vmem:[#allocation2 + $0xc8] sm:$0xff] %vm1681_vm0, %v1674_v35 }
 0x41f   : > { %v1675_v36 = vpop.trf.xlu0 }
 0x420   : > { %1708 = vst.msk [vmem:[#allocation2 + $0xd0] sm:$0xff] %vm1681_vm0, %v1675_v36 }
 0x423   : > { %v1676_v37 = vpop.trf.xlu0 }
 0x424   : > { %1709 = vst.msk [vmem:[#allocation2 + $0xd8] sm:$0xff] %vm1681_vm0, %v1676_v37 }
 0x427   : > { %v1677_v38 = vpop.trf.xlu0 }
 0x428   : > { %1710 = vst.msk [vmem:[#allocation2 + $0xe0] sm:$0xff] %vm1681_vm0, %v1677_v38 }
 0x42b   : > { %v1678_v39 = vpop.trf.xlu0 }
 0x42c   : > { %1711 = vst.msk [vmem:[#allocation2 + $0xe8] sm:$0xff] %vm1681_vm0, %v1678_v39 }
 0x42f   : > { %v1679_v40 = vpop.trf.xlu0 }
 0x430   : > { %1712 = vst.msk [vmem:[#allocation2 + $0xf0] sm:$0xff] %vm1681_vm0, %v1679_v40 }
 0x433   : > { %v1680_v41 = vpop.trf.xlu0 }
 0x434   : > { %1713 = vst.msk [vmem:[#allocation2 + $0xf8] sm:$0xff] %vm1681_vm0, %v1680_v41 }
 0x435 PF: > { %s13729_s12 = sld [smem:[#allocation111_spill]]  ;;  %s13730_s19 = sld [smem:[#allocation110_spill]]  ;;  %v1735_v42 = vld [vmem:[%s11921_s18] sm:$0xff]  ;;  %vm2763_vm3 = vcmask 654336   ;;  %v2781_v49 = vlaneseq  ;;  %v11168_v51 = vmov 0  }
 0x436   : > { %v2751_v43 = vld [vmem:[%s12001_s20] sm:$0xff]  ;;  %v8243_v45 = vld [vmem:[#allocation17] ss:$0 sm:$0xff]  ;;  %9442 = vset.pattern.permute.xlu0 %v11168_v51  ;;  %v9451_v62 = vld [vmem:[#allocation26 + $0x3c] ss:$24 sps:$4 sm:$0xff]  }
 0x437   : > { %v12101_v44 = vadd.f32 %v2751_v43, %v1735_v42  ;;  %v12169_v50 = vshrl.u32 %v2781_v49, 7  ;;  %v9448_v57 = vld [vmem:[#allocation26 + $0xc] ss:$24 sps:$4 sm:$0xff]   ;;  %v9450_v58 = vld [vmem:[#allocation26 + $0x8] ss:$24 sps:$4 sm:$0xff]   ;;  %v12205_v59 = vand.u32 127, %v2781_v49 }
 0x438   : > { %2160 = vmatprep.subr.bf16.mxu1 %v9448_v57  ;;  %v9453_v3 = vld [vmem:[#allocation26 + $0x38] ss:$24 sps:$4 sm:$0xff]   ;;  %v9454_v6 = vld [vmem:[#allocation26 + $0x6c] ss:$24 sps:$4 sm:$0xff]   ;;  %v9456_v16 = vld [vmem:[#allocation26 + $0x68] ss:$24 sps:$4 sm:$0xff]  }
 0x439   : > { %v8242_v46 = vclamps-f32 %v12101_v44, 1.0  ;;  %v12178_v52 = vadd.s32 8, %v12169_v50  ;;  %v12182_v53 = vadd.s32 16, %v12169_v50  ;;  %v12198_v55 = vadd.s32 24, %v12169_v50  ;;  %2161 = vmatpush1.bf16.msra.mxu1 %v9450_v58  ;;  %v9457_v20 = vld [vmem:[#allocation26 + $0x9c] ss:$24 sps:$4 sm:$0xff]  }
 0x43a   : > { %v12234_v5 = vadd.s32 32, %v12169_v50  ;;  %2162 = vmatprep.subr.bf16.mxu1 %v9451_v62  ;;  %vm2835_vm8 = vcmp.eq.s32.totalorder %v12205_v59, 0  ;;  %v12241_v8 = vadd.s32 40, %v12169_v50  ;;  %vm2886_vm9 = vcmp.eq.s32.totalorder %v12205_v59, 1  ;;  %v9459_v37 = vld [vmem:[#allocation26 + $0x98] ss:$24 sps:$4 sm:$0xff]  }
 0x43b   : > { %s12104_s3 = sshll.u32 %s13729_s12, 3  ;;  %v2762_v47 = vmul.f32 %v8243_v45, %v8242_v46  ;;  %vm2937_vm11 = vcmp.eq.s32.totalorder %v12205_v59, 2  ;;  %v9460_v38 = vld [vmem:[#allocation26 + $0xcc] ss:$24 sps:$4 sm:$0xff]   ;;  %vm2988_vm15 = vcmp.eq.s32.totalorder %v12205_v59, 3 }
 0x43c   : > { %s2791_s24 = sshra.s32 %s12104_s3, 7  ;;  %s2796_s6 = sand.u32 127, %s12104_s3  ;;  %v9466_v40 = vld [vmem:[#allocation26 + $0x4] ss:$24 sps:$4 sm:$0xff]  }
 0x43d   : > { %s2793_s23 = sadd.s32 %s13730_s19, %s2791_s24  ;;  %s2842_s20 = sadd.s32 1, %s12104_s3  ;;  %v2764_v48 = vsel %vm2763_vm3, %v2762_v47, 0.0  ;;  %2163 = vmatpush1.bf16.msra.mxu1 %v9453_v3  ;;  %2119 = vmatprep.subr.bf16.mxu0 %v9466_v40  ;;  %v9640_v44 = vld [vmem:[#allocation29 + $0x88] ss:$52 sps:$4 sm:$0xff]  }
 0x43e   : > { %s8246_s26 = sshll.u32 %s2793_s23, 7  ;;  %s2843_s13 = sshra.s32 %s2842_s20, 7  ;;  %2765 = vadd.xlane.f32.xlu0 %v2764_v48  ;;  %2164 = vmatprep.subr.bf16.mxu1 %v9454_v6 }
 0x43f   : > { %s2797_s5 = sadd.s32 %s8246_s26, %s2796_s6  ;;  %s2845_s11 = sadd.s32 %s13730_s19, %s2843_s13 }
 0x440   : > { %s12114_s12 = sld [smem:[#allocation4 + %s2797_s5]]  ;;  %s8248_s25 = sshll.u32 %s2845_s11, 7 }
 0x441   : > { %s2848_s9 = sand.u32 127, %s2842_s20  ;;  %s2893_s10 = sadd.s32 2, %s12104_s3  ;;  %2165 = vmatpush1.bf16.msra.mxu1 %v9456_v16 }
 0x442   : > { %s2849_s24 = sadd.s32 %s8248_s25, %s2848_s9  ;;  %s13731_s23 = smul.u32 40, %s13730_s19  ;;  %2166 = vmatprep.subr.bf16.mxu1 %v9457_v20 }
 0x443   : > { %s12123_s6 = sld [smem:[#allocation4 + %s2849_s24]]  ;;  %s2894_s26 = sshra.s32 %s2893_s10, 7 }
 0x444   : > { %s12121_s2 = sadd.s32 254, %s13731_s23  ;;  %s2896_s25 = sadd.s32 %s13730_s19, %s2894_s26 }
 0x445   : > { %s2899_s20 = sand.u32 127, %s2893_s10  ;;  %s8250_s24 = sshll.u32 %s2896_s25, 7  ;;  %2167 = vmatpush1.bf16.msra.mxu1 %v9459_v37 }
 0x446   : > { %s2800_s5 = ssub.s32 %s12121_s2, %s12114_s12  ;;  %s8247_s13 = sshll.u32 %s12114_s12, 1  ;;  %2168 = vmatprep.subr.bf16.mxu1 %v9460_v38 }
 0x447   : > { %p2801_p0 = scmp.gt.s32.totalorder %s2800_s5, 0  ;;  %s2804_s11 = ssub.s32 %s12121_s2, %s8247_s13 }
 0x448   : > { %p2805_p3 = scmp.gt.s32.totalorder %s2804_s11, 0  ;;  %s2944_s1 = sadd.s32 3, %s12104_s3 }
 0x449   : > { %s13789_s5 = smov (!%p2801_p0, %s2800_s5), 0  ;;  %s2851_s9 = ssub.s32 %s12121_s2, %s12123_s6 }
 0x44a   : > { %s13791_s11 = smov (!%p2805_p3, %s2804_s11), 0  ;;  %p2852_p2 = scmp.gt.s32.totalorder %s2851_s9, 0 }
 0x44b   : > { %s8249_s23 = sshll.u32 %s12123_s6, 1  ;;  %s2900_s13 = sadd.s32 %s8250_s24, %s2899_s20 }
 0x44c   : > { %s13793_s9 = smov (!%p2852_p2, %s2851_s9), 0  ;;  %s2855_s15 = ssub.s32 %s12121_s2, %s8249_s23 }
 0x44d   : > { %p2856_p5 = scmp.gt.s32.totalorder %s2855_s15, 0  ;;  %s12142_s26 = sld [smem:[#allocation4 + %s2900_s13]] }
 0x44e   : > { %s2945_s4 = sshra.s32 %s2944_s1, 7  ;;  %s2950_s25 = sand.u32 127, %s2944_s1 }
 0x44f   : > { %s13795_s15 = smov (!%p2856_p5, %s2855_s15), 0  ;;  %s2947_s10 = sadd.s32 %s13730_s19, %s2945_s4 }
 0x450   : > { %s8252_s16 = sshll.u32 %s2947_s10, 7  ;;  %s2995_s22 = sadd.s32 4, %s12104_s3 }
 0x451   : > { %s2951_s7 = sadd.s32 %s8252_s16, %s2950_s25  ;;  %s2996_s1 = sshra.s32 %s2995_s22, 7 }
 0x452   : > { %s12148_s23 = sld [smem:[#allocation4 + %s2951_s7]]  ;;  %s2998_s10 = sadd.s32 %s13730_s19, %s2996_s1 }
 0x453   : > { %s2902_s20 = ssub.s32 %s12121_s2, %s12142_s26  ;;  %s8251_s24 = sshll.u32 %s12142_s26, 1 }
 0x454   : > { %p2903_p8 = scmp.gt.s32.totalorder %s2902_s20, 0  ;;  %s2906_s13 = ssub.s32 %s12121_s2, %s8251_s24 }
 0x455   : > { %p2907_p11 = scmp.gt.s32.totalorder %s2906_s13, 0  ;;  %s8254_s24 = sshll.u32 %s2998_s10, 7 }
 0x456   : > { %s13797_s20 = smov (!%p2903_p8, %s2902_s20), 0  ;;  %s3001_s27 = sand.u32 127, %s2995_s22 }
 0x457   : > { %s13799_s13 = smov (!%p2907_p11, %s2906_s13), 0  ;;  %s3002_s29 = sadd.s32 %s8254_s24, %s3001_s27 }
 0x458   : > { %s2953_s16 = ssub.s32 %s12121_s2, %s12148_s23  ;;  %s8253_s7 = sshll.u32 %s12148_s23, 1 }
 0x459   : > { %p2954_p9 = scmp.gt.s32.totalorder %s2953_s16, 0  ;;  %s2957_s4 = ssub.s32 %s12121_s2, %s8253_s7 }
 0x45a   : > { %p2958_p1 = scmp.gt.s32.totalorder %s2957_s4, 0  ;;  %s3046_s30 = sadd.s32 5, %s12104_s3 }
 0x45b   : > { %s13801_s16 = smov (!%p2954_p9, %s2953_s16), 0  ;;  %s12173_s7 = sld [smem:[#allocation4 + %s3002_s29]] }
 0x45c   : > { %s13803_s4 = smov (!%p2958_p1, %s2957_s4), 0  ;;  %s3047_s1 = sshra.s32 %s3046_s30, 7 }
 0x45d   : > { %s3052_s10 = sand.u32 127, %s3046_s30  ;;  %s3049_s22 = sadd.s32 %s13730_s19, %s3047_s1 }
 0x45e   : > { %s3097_s25 = sadd.s32 6, %s12104_s3  ;;  %s8256_s27 = sshll.u32 %s3049_s22, 7 }
 0x45f   : > { %s2974_s24 = sadd.s32 2, %s12148_s23  ;;  %s3053_s21 = sadd.s32 %s8256_s27, %s3052_s10 }
 0x460   : > { %s12184_s29 = sld [smem:[#allocation4 + %s3053_s21]]  ;;  %s12188_s0 = sshra.s32 %s3097_s25, 7  ;;  %v12352_v45 = vstv %s2974_s24 }
 0x461   : > { %s13732_s30 = sadd.s32 2, %s12114_s12  ;;  %s3004_s1 = ssub.s32 %s12121_s2, %s12173_s7 }
 0x462   : > { %v12192_v54 = vstv %s13732_s30  ;;  %s8255_s8 = sshll.u32 %s12173_s7, 1  ;;  %s12201_s22 = scalar_lea.vmem [#allocation2], %s13789_s5 }
 0x463   : > { %v2808_v56 = vld [vmem:[%s12201_s22] sm:$0xff]  ;;  %p3005_p10 = scmp.gt.s32.totalorder %s3004_s1, 0  ;;  %s3008_s21 = ssub.s32 %s12121_s2, %s8255_s8  ;;  %v2809_v61 = vld [vmem:[%s12201_s22 + $0x8] sm:$0xff]  ;;  %vm2823_vm4 = vcmp.lt.s32.totalorder %v12169_v50, %v12192_v54  ;;  %v2810_v0 = vld [vmem:[%s12201_s22 + $0x10] sm:$0xff]  ;;  %vm2824_vm5 = vcmp.lt.s32.totalorder %v12178_v52, %v12192_v54  ;;  %vm2825_vm6 = vcmp.lt.s32.totalorder %v12182_v53, %v12192_v54  ;;  %vm2826_vm7 = vcmp.lt.s32.totalorder %v12198_v55, %v12192_v54 }
 0x464   : > { %s12208_s12 = scalar_lea.vmem [#allocation2], %s13791_s11  ;;  %p3009_p12 = scmp.gt.s32.totalorder %s3008_s21, 0  ;;  %v2811_v2 = vld [vmem:[%s12201_s22 + $0x18] sm:$0xff]  ;;  %v2812_v10 = vld [vmem:[%s12201_s22 + $0x20] sm:$0xff]  ;;  %v2813_v15 = vld [vmem:[%s12201_s22 + $0x28] sm:$0xff]  ;;  %vm2827_vm10 = vcmp.lt.s32.totalorder %v12234_v5, %v12192_v54  ;;  %vm2828_vm12 = vcmp.lt.s32.totalorder %v12241_v8, %v12192_v54 }
 0x465   : > { %v2815_v60 = vld [vmem:[%s12208_s12] sm:$0xff]  ;;  %s3100_s5 = sadd.s32 %s13730_s19, %s12188_s0  ;;  %s13805_s1 = smov (!%p3005_p10, %s3004_s1), 0  ;;  %v2816_v63 = vld [vmem:[%s12208_s12 + $0x8] sm:$0xff]  ;;  %v2817_v1 = vld [vmem:[%s12208_s12 + $0x10] sm:$0xff] }
 0x466   : > { %s13807_s21 = smov (!%p3009_p12, %s3008_s21), 0  ;;  %s3055_s8 = ssub.s32 %s12121_s2, %s12184_s29  ;;  %v2818_v4 = vld [vmem:[%s12208_s12 + $0x18] sm:$0xff]  ;;  %v2829_v7 = vsel %vm2823_vm4, %v2808_v56, %v2815_v60  ;;  %v2830_v9 = vsel %vm2824_vm5, %v2809_v61, %v2816_v63  ;;  %v2831_v12 = vsel %vm2825_vm6, %v2810_v0, %v2817_v1  ;;  %v2819_v14 = vld [vmem:[%s12208_s12 + $0x20] sm:$0xff]  ;;  %v2820_v19 = vld [vmem:[%s12208_s12 + $0x28] sm:$0xff]  ;;  %vm3039_vm6 = vcmp.eq.s32.totalorder %v12205_v59, 4 }
 0x467   : > { %p3056_p13 = scmp.gt.s32.totalorder %s3055_s8, 0  ;;  %s8257_s0 = sshll.u32 %s12184_s29, 1  ;;  %v2832_v13 = vsel %vm2826_vm7, %v2811_v2, %v2818_v4  ;;  %v12267_v17 = vsel %vm2835_vm8, %v2829_v7, 0.0  ;;  %v12286_v22 = vsel %vm2835_vm8, %v2830_v9, 0.0  ;;  %v12298_v25 = vsel %vm2835_vm8, %v2831_v12, 0.0 }
 0x468   : > { %s12244_s11 = sshll.u32 %s3100_s5, 7  ;;  %s13733_s10 = sadd.s32 2, %s12123_s6  ;;  %v12303_v28 = vsel %vm2835_vm8, %v2832_v13, 0.0  ;;  %v2833_v34 = vsel %vm2827_vm10, %v2812_v10, %v2819_v14  ;;  %v2834_v39 = vsel %vm2828_vm12, %v2813_v15, %v2820_v19  ;;  %v9462_v61 = vld [vmem:[#allocation26 + $0xc8] ss:$24 sps:$4 sm:$0xff]   ;;  %vm3090_vm10 = vcmp.eq.s32.totalorder %v12205_v59, 5 }
 0x469   : > { %v12252_v11 = vstv %s13733_s10  ;;  %s13809_s8 = smov (!%p3056_p13, %s3055_s8), 0  ;;  %s12270_s6 = scalar_lea.vmem [#allocation2], %s13793_s9  ;;  %v2840_v48 = vsel %vm2835_vm8, %v2833_v34, 0.0  ;;  %v2841_v60 = vsel %vm2835_vm8, %v2834_v39, 0.0  ;;  %v9463_v4 = vld [vmem:[#allocation26 + $0xfc] ss:$24 sps:$4 sm:$0xff]   ;;  %vm2976_vm8 = vcmp.lt.s32.totalorder %v12169_v50, %v12352_v45  ;;  %2169 = vmatpush1.bf16.msra.mxu1 %v9462_v61 }
 0x46a   : > { %v2859_v18 = vld [vmem:[%s12270_s6] sm:$0xff]  ;;  %s3059_s27 = ssub.s32 %s12121_s2, %s8257_s0  ;;  %s12276_s30 = sand.u32 127, %s3097_s25  ;;  %v2860_v23 = vld [vmem:[%s12270_s6 + $0x8] sm:$0xff]  ;;  %vm2874_vm13 = vcmp.lt.s32.totalorder %v12169_v50, %v12252_v11  ;;  %v2861_v26 = vld [vmem:[%s12270_s6 + $0x10] sm:$0xff]  ;;  %vm2875_vm14 = vcmp.lt.s32.totalorder %v12178_v52, %v12252_v11  ;;  %vm2876_vm0 = vcmp.lt.s32.totalorder %v12182_v53, %v12252_v11  ;;  %vm2877_vm1 = vcmp.lt.s32.totalorder %v12198_v55, %v12252_v11  ;;  %2170 = vmatprep.subr.bf16.mxu1 %v9463_v4 }
 0x46b   : > { %s2865_s22 = scalar_lea.vmem [#allocation2], %s13795_s15  ;;  %s3025_s9 = sadd.s32 2, %s12173_s7  ;;  %v2862_v29 = vld [vmem:[%s12270_s6 + $0x18] sm:$0xff]  ;;  %v2863_v31 = vld [vmem:[%s12270_s6 + $0x20] sm:$0xff]  ;;  %v2864_v35 = vld [vmem:[%s12270_s6 + $0x28] sm:$0xff]  ;;  %vm2878_vm2 = vcmp.lt.s32.totalorder %v12234_v5, %v12252_v11  ;;  %vm2879_vm4 = vcmp.lt.s32.totalorder %v12241_v8, %v12252_v11 }
 0x46c   : > { %v2866_v21 = vld [vmem:[%s2865_s22] sm:$0xff]  ;;  %p3060_p4 = scmp.gt.s32.totalorder %s3059_s27, 0  ;;  %v2867_v24 = vld [vmem:[%s2865_s22 + $0x8] sm:$0xff]  ;;  %s3104_s15 = sadd.s32 %s12244_s11, %s12276_s30  ;;  %v2868_v27 = vld [vmem:[%s2865_s22 + $0x10] sm:$0xff]  ;;  %v12403_v7 = vstv %s3025_s9 }
 0x46d   : > { %s3148_s25 = sadd.s32 7, %s12104_s3  ;;  %v2869_v30 = vld [vmem:[%s2865_s22 + $0x18] sm:$0xff]  ;;  %v2870_v32 = vld [vmem:[%s2865_s22 + $0x20] sm:$0xff]  ;;  %s13734_s12 = sadd.s32 2, %s12142_s26  ;;  %v2871_v36 = vld [vmem:[%s2865_s22 + $0x28] sm:$0xff]  ;;  %v2880_v41 = vsel %vm2874_vm13, %v2859_v18, %v2866_v21  ;;  %v2881_v47 = vsel %vm2875_vm14, %v2860_v23, %v2867_v24  ;;  %v2882_v56 = vsel %vm2876_vm0, %v2861_v26, %v2868_v27  ;;  %vm2977_vm13 = vcmp.lt.s32.totalorder %v12178_v52, %v12352_v45 }
 0x46e   : > { %v12309_v33 = vstv %s13734_s12  ;;  %s13811_s27 = smov (!%p3060_p4, %s3059_s27), 0  ;;  %s12321_s26 = sld [smem:[#allocation4 + %s3104_s15]]  ;;  %v2883_v57 = vsel %vm2877_vm1, %v2862_v29, %v2869_v30  ;;  %v2884_v58 = vsel %vm2878_vm2, %v2863_v31, %v2870_v32  ;;  %v2887_v62 = vsel %vm2886_vm9, %v2880_v41, %v12267_v17  ;;  %v9465_v14 = vld [vmem:[#allocation26 + $0xf8] ss:$24 sps:$4 sm:$0xff]  }
 0x46f   : > { %s3149_s5 = sshra.s32 %s3148_s25, 7  ;;  %s12341_s11 = scalar_lea.vmem [#allocation2], %s13797_s20  ;;  %vm2925_vm5 = vcmp.lt.s32.totalorder %v12169_v50, %v12309_v33  ;;  %vm2926_vm7 = vcmp.lt.s32.totalorder %v12178_v52, %v12309_v33  ;;  %v2885_v3 = vsel %vm2879_vm4, %v2864_v35, %v2871_v36  ;;  %v2888_v9 = vsel %vm2886_vm9, %v2881_v47, %v12286_v22  ;;  %2171 = vmatpush1.bf16.msra.mxu1 %v9465_v14 }
 0x470   : > { %s3151_s0 = sadd.s32 %s13730_s19, %s3149_s5  ;;  %v2910_v42 = vld [vmem:[%s12341_s11] sm:$0xff]  ;;  %s12345_s10 = scalar_lea.vmem [#allocation2], %s13799_s13  ;;  %v2911_v49 = vld [vmem:[%s12341_s11 + $0x8] sm:$0xff]  ;;  %v2912_v1 = vld [vmem:[%s12341_s11 + $0x10] sm:$0xff]  ;;  %v2889_v17 = vsel %vm2886_vm9, %v2882_v56, %v12298_v25  ;;  %vm2927_vm12 = vcmp.lt.s32.totalorder %v12182_v53, %v12309_v33  ;;  %v2890_v18 = vsel %vm2886_vm9, %v2883_v57, %v12303_v28  ;;  %v12436_v19 = vsel %vm2886_vm9, %v2884_v58, %v2840_v48 }
 0x471   : > { %v2917_v43 = vld [vmem:[%s12345_s10] sm:$0xff]  ;;  %s8260_s6 = sshll.u32 %s3151_s0, 7  ;;  %s3154_s30 = sand.u32 127, %s3148_s25  ;;  %v2918_v54 = vld [vmem:[%s12345_s10 + $0x8] sm:$0xff]  ;;  %v2919_v2 = vld [vmem:[%s12345_s10 + $0x10] sm:$0xff]  ;;  %vm2928_vm14 = vcmp.lt.s32.totalorder %v12198_v55, %v12309_v33  ;;  %v12453_v25 = vsel %vm2886_vm9, %v2885_v3, %v2841_v60  ;;  %vm3027_vm0 = vcmp.lt.s32.totalorder %v12169_v50, %v12403_v7  ;;  %vm3141_vm9 = vcmp.eq.s32.totalorder %v12205_v59, 6 }
 0x472   : > { %s3155_s20 = sadd.s32 %s8260_s6, %s3154_s30  ;;  %s12379_s3 = scalar_lea.vmem [#allocation2], %s13801_s16  ;;  %v2931_v6 = vsel %vm2925_vm5, %v2910_v42, %v2917_v43  ;;  %v2913_v12 = vld [vmem:[%s12341_s11 + $0x18] sm:$0xff]  ;;  %v2932_v20 = vsel %vm2926_vm7, %v2911_v49, %v2918_v54  ;;  %v2914_v23 = vld [vmem:[%s12341_s11 + $0x20] sm:$0xff]  ;;  %v2933_v34 = vsel %vm2927_vm12, %v2912_v1, %v2919_v2  ;;  %vm2978_vm1 = vcmp.lt.s32.totalorder %v12182_v53, %v12352_v45  ;;  %v2915_v47 = vld [vmem:[%s12341_s11 + $0x28] sm:$0xff] }
 0x473   : > { %v2961_v63 = vld [vmem:[%s12379_s3] sm:$0xff]  ;;  %s12383_s23 = scalar_lea.vmem [#allocation2], %s13803_s4  ;;  %s3076_s13 = sadd.s32 2, %s12184_s29  ;;  %v2962_v10 = vld [vmem:[%s12379_s3 + $0x8] sm:$0xff]  ;;  %v2920_v13 = vld [vmem:[%s12345_s10 + $0x18] sm:$0xff]  ;;  %v2938_v26 = vsel %vm2937_vm11, %v2931_v6, %v2887_v62  ;;  %vm2929_vm2 = vcmp.lt.s32.totalorder %v12234_v5, %v12309_v33  ;;  %vm2930_vm4 = vcmp.lt.s32.totalorder %v12241_v8, %v12309_v33  ;;  %v2939_v35 = vsel %vm2937_vm11, %v2932_v20, %v2888_v9 }
 0x474   : > { %v2968_v0 = vld [vmem:[%s12383_s23] sm:$0xff]  ;;  %s12387_s24 = sld [smem:[#allocation4 + %s3155_s20]]  ;;  %v2969_v11 = vld [vmem:[%s12383_s23 + $0x8] sm:$0xff]  ;;  %s12413_s16 = scalar_lea.vmem [#allocation2], %s13805_s1  ;;  %v2963_v21 = vld [vmem:[%s12379_s3 + $0x10] sm:$0xff]  ;;  %v12464_v28 = vstv %s3076_s13  ;;  %vm3028_vm5 = vcmp.lt.s32.totalorder %v12178_v52, %v12403_v7  ;;  %v2934_v37 = vsel %vm2928_vm14, %v2913_v12, %v2920_v13  ;;  %v2940_v41 = vsel %vm2937_vm11, %v2933_v34, %v2889_v17 }
 0x475   : > { %v3012_v15 = vld [vmem:[%s12413_s16] sm:$0xff]  ;;  %s12417_s4 = scalar_lea.vmem [#allocation2], %s13807_s21  ;;  %s12423_s7 = ssub.s32 %s12121_s2, %s12321_s26  ;;  %v2970_v22 = vld [vmem:[%s12383_s23 + $0x10] sm:$0xff]  ;;  %v2982_v27 = vsel %vm2976_vm8, %v2961_v63, %v2968_v0  ;;  %v3013_v29 = vld [vmem:[%s12413_s16 + $0x8] sm:$0xff]  ;;  %v2983_v36 = vsel %vm2977_vm13, %v2962_v10, %v2969_v11  ;;  %vm3078_vm7 = vcmp.lt.s32.totalorder %v12169_v50, %v12464_v28  ;;  %vm3192_vm8 = vcmp.eq.s32.totalorder %v12205_v59, 7 }
 0x476   : > { %v3019_v16 = vld [vmem:[%s12417_s4] sm:$0xff]  ;;  %s8259_s22 = sshll.u32 %s12321_s26, 1  ;;  %p3107_p7 = scmp.gt.s32.totalorder %s12423_s7, 0  ;;  %v3020_v30 = vld [vmem:[%s12417_s4 + $0x8] sm:$0xff]  ;;  %v2989_v38 = vsel %vm2988_vm15, %v2982_v27, %v2938_v26  ;;  %v2984_v42 = vsel %vm2978_vm1, %v2963_v21, %v2970_v22  ;;  %vm2979_vm12 = vcmp.lt.s32.totalorder %v12198_v55, %v12352_v45  ;;  %v2990_v49 = vsel %vm2988_vm15, %v2983_v36, %v2939_v35  ;;  %v3014_v58 = vld [vmem:[%s12413_s16 + $0x10] sm:$0xff] }
 0x477   : > { %s3110_s1 = ssub.s32 %s12121_s2, %s8259_s22  ;;  %v2921_v24 = vld [vmem:[%s12345_s10 + $0x20] sm:$0xff]  ;;  %s3127_s21 = sadd.s32 2, %s12321_s26  ;;  %v3033_v39 = vsel %vm3027_vm0, %v3012_v15, %v3019_v16  ;;  %v2922_v48 = vld [vmem:[%s12345_s10 + $0x28] sm:$0xff]  ;;  %v3034_v54 = vsel %vm3028_vm5, %v3013_v29, %v3020_v30  ;;  %vm3079_vm13 = vcmp.lt.s32.totalorder %v12178_v52, %v12464_v28  ;;  %v2941_v60 = vsel %vm2937_vm11, %v2934_v37, %v2890_v18  ;;  %v2964_v61 = vld [vmem:[%s12379_s3 + $0x18] sm:$0xff] }
 0x478   : > { %p3111_p6 = scmp.gt.s32.totalorder %s3110_s1, 0  ;;  %s12470_s9 = scalar_lea.vmem [#allocation2], %s13809_s8  ;;  %v12512_v40 = vstv %s3127_s21  ;;  %v2935_v43 = vsel %vm2929_vm2, %v2914_v23, %v2921_v24  ;;  %v3040_v62 = vsel %vm3039_vm6, %v3033_v39, %v2989_v38  ;;  %v3021_v2 = vld [vmem:[%s12417_s4 + $0x10] sm:$0xff]  ;;  %vm3029_vm0 = vcmp.lt.s32.totalorder %v12182_v53, %v12403_v7  ;;  %v2971_v9 = vld [vmem:[%s12383_s23 + $0x18] sm:$0xff]  ;;  %v2965_v16 = vld [vmem:[%s12379_s3 + $0x20] sm:$0xff] }
 0x479   : > { %v3063_v31 = vld [vmem:[%s12470_s9] sm:$0xff]  ;;  %s12474_s15 = scalar_lea.vmem [#allocation2], %s13811_s27  ;;  %s13813_s7 = smov (!%p3107_p7, %s12423_s7), 0  ;;  %v3064_v56 = vld [vmem:[%s12470_s9 + $0x8] sm:$0xff]  ;;  %vm3129_vm14 = vcmp.lt.s32.totalorder %v12169_v50, %v12512_v40  ;;  %v2991_v6 = vsel %vm2988_vm15, %v2984_v42, %v2940_v41  ;;  %v12572_v10 = vsel %vm2937_vm11, %v2935_v43, %v12436_v19  ;;  %vm2980_vm1 = vcmp.lt.s32.totalorder %v12234_v5, %v12352_v45  ;;  %v3015_v15 = vld [vmem:[%s12413_s16 + $0x18] sm:$0xff] }
 0x47a   : > { %v3070_v32 = vld [vmem:[%s12474_s15] sm:$0xff]  ;;  %s13815_s1 = smov (!%p3111_p6, %s3110_s1), 0  ;;  %s3157_s29 = ssub.s32 %s12121_s2, %s12387_s24  ;;  %v3071_v57 = vld [vmem:[%s12474_s15 + $0x8] sm:$0xff]  ;;  %v2936_v11 = vsel %vm2930_vm4, %v2915_v47, %v2922_v48  ;;  %v3041_v13 = vsel %vm3039_vm6, %v3034_v54, %v2990_v49  ;;  %vm3130_vm2 = vcmp.lt.s32.totalorder %v12178_v52, %v12512_v40  ;;  %v3035_v19 = vsel %vm3029_vm0, %v3014_v58, %v3021_v2  ;;  %v3065_v20 = vld [vmem:[%s12470_s9 + $0x10] sm:$0xff] }
 0x47b   : > { %p3158_p0 = scmp.gt.s32.totalorder %s3157_s29, 0  ;;  %s8261_s8 = sshll.u32 %s12387_s24, 1  ;;  %v3084_v63 = vsel %vm3078_vm7, %v3063_v31, %v3070_v32  ;;  %v3085_v14 = vsel %vm3079_vm13, %v3064_v56, %v3071_v57  ;;  %v2972_v33 = vld [vmem:[%s12383_s23 + $0x20] sm:$0xff]  ;;  %v3072_v21 = vld [vmem:[%s12474_s15 + $0x10] sm:$0xff]  ;;  %vm3080_vm4 = vcmp.lt.s32.totalorder %v12182_v53, %v12464_v28  ;;  %v3022_v22 = vld [vmem:[%s12417_s4 + $0x18] sm:$0xff]  ;;  %v2985_v29 = vsel %vm2979_vm12, %v2964_v61, %v2971_v9 }
 0x47c   : > { %s3178_s27 = sadd.s32 2, %s12387_s24  ;;  %s12550_s25 = scalar_lea.vmem [#allocation2], %s13813_s7  ;;  %v3091_v17 = vsel %vm3090_vm10, %v3084_v63, %v3040_v62  ;;  %vm3030_vm5 = vcmp.lt.s32.totalorder %v12198_v55, %v12403_v7  ;;  %v12619_v30 = vsel %vm2937_vm11, %v2936_v11, %v12453_v25  ;;  %vm2981_vm7 = vcmp.lt.s32.totalorder %v12241_v8, %v12352_v45  ;;  %v3066_v34 = vld [vmem:[%s12470_s9 + $0x18] sm:$0xff]  ;;  %v2966_v25 = vld [vmem:[%s12379_s3 + $0x28] sm:$0xff]  ;;  %v3016_v39 = vld [vmem:[%s12413_s16 + $0x20] sm:$0xff] }
 0x47d   : > { %v3114_v0 = vld [vmem:[%s12550_s25] sm:$0xff]  ;;  %s12554_s12 = scalar_lea.vmem [#allocation2], %s13815_s1  ;;  %s13817_s29 = smov (!%p3158_p0, %s3157_s29), 0  ;;  %v3115_v3 = vld [vmem:[%s12550_s25 + $0x8] sm:$0xff]  ;;  %v12579_v12 = vstv %s3178_s27  ;;  %v3116_v26 = vld [vmem:[%s12550_s25 + $0x10] sm:$0xff]  ;;  %v3092_v31 = vsel %vm3090_vm10, %v3085_v14, %v3041_v13  ;;  %v3042_v37 = vsel %vm3039_vm6, %v3035_v19, %v2991_v6  ;;  %v3086_v38 = vsel %vm3080_vm4, %v3065_v20, %v3072_v21 }
 0x47e   : > { %v3121_v1 = vld [vmem:[%s12554_s12] sm:$0xff]  ;;  %s3161_s26 = ssub.s32 %s12121_s2, %s8261_s8  ;;  %v3122_v4 = vld [vmem:[%s12554_s12 + $0x8] sm:$0xff]  ;;  %s12605_s2 = scalar_lea.vmem [#allocation2], %s13817_s29  ;;  %v3123_v27 = vld [vmem:[%s12554_s12 + $0x10] sm:$0xff]  ;;  %vm3180_vm13 = vcmp.lt.s32.totalorder %v12169_v50, %v12579_v12  ;;  %vm3181_vm12 = vcmp.lt.s32.totalorder %v12178_v52, %v12579_v12  ;;  %vm3131_vm11 = vcmp.lt.s32.totalorder %v12182_v53, %v12512_v40  ;;  %v2992_v47 = vsel %vm2988_vm15, %v2985_v29, %v2941_v60 }
 0x47f   : > { %p3162_p3 = scmp.gt.s32.totalorder %s3161_s26, 0  ;;  %v3135_v18 = vsel %vm3129_vm14, %v3114_v0, %v3121_v1  ;;  %v3165_v23 = vld [vmem:[%s12605_s2] sm:$0xff]  ;;  %v3166_v24 = vld [vmem:[%s12605_s2 + $0x8] sm:$0xff]  ;;  %v3136_v32 = vsel %vm3130_vm2, %v3115_v3, %v3122_v4  ;;  %v3036_v48 = vsel %vm3030_vm5, %v3015_v15, %v3022_v22  ;;  %v3073_v49 = vld [vmem:[%s12474_s15 + $0x18] sm:$0xff]  ;;  %vm3081_vm14 = vcmp.lt.s32.totalorder %v12198_v55, %v12464_v28  ;;  %s13735_s0 = smul.u32 40, %s13730_s19 }
 0x480   : > { %v2973_v35 = vld [vmem:[%s12383_s23 + $0x28] sm:$0xff]  ;;  %v3142_v36 = vsel %vm3141_vm9, %v3135_v18, %v3091_v17  ;;  %v3023_v41 = vld [vmem:[%s12417_s4 + $0x20] sm:$0xff]  ;;  %v2986_v54 = vsel %vm2980_vm1, %v2965_v16, %v2972_v33  ;;  %v3143_v57 = vsel %vm3141_vm9, %v3136_v32, %v3092_v31  ;;  %v3167_v60 = vld [vmem:[%s12605_s2 + $0x10] sm:$0xff]  ;;  %vm3031_vm0 = vcmp.lt.s32.totalorder %v12234_v5, %v12403_v7  ;;  %s11169_s10 = smov 48   ;;  %s11172_s6 = smov 126  }
 0x481   : > { %s13819_s26 = smov (!%p3162_p3, %s3161_s26), 0  ;;  %v3117_v62 = vld [vmem:[%s12550_s25 + $0x18] sm:$0xff]  ;;  %v3093_v63 = vsel %vm3090_vm10, %v3086_v38, %v3042_v37  ;;  %v3137_v52 = vsel %vm3131_vm11, %v3116_v26, %v3123_v27  ;;  %vm3182_vm1 = vcmp.lt.s32.totalorder %v12182_v53, %v12579_v12  ;;  %v3067_v0 = vld [vmem:[%s12470_s9 + $0x20] sm:$0xff]  ;;  %v3043_v2 = vsel %vm3039_vm6, %v3036_v48, %v2992_v47  ;;  %v3017_v9 = vld [vmem:[%s12413_s16 + $0x28] sm:$0xff]  ;;  %s12777_s11 = scalar_lea.vmem [#allocation2], %s13735_s0 }
 0x482   : > { %s12646_s5 = scalar_lea.vmem [#allocation2], %s13819_s26  ;;  %v3074_v1 = vld [vmem:[%s12474_s15 + $0x20] sm:$0xff]  ;;  %v3087_v3 = vsel %vm3081_vm14, %v3066_v34, %v3073_v49  ;;  %v3124_v4 = vld [vmem:[%s12554_s12 + $0x18] sm:$0xff]  ;;  %vm3132_vm2 = vcmp.lt.s32.totalorder %v12198_v55, %v12512_v40  ;;  %v2987_v6 = vsel %vm2981_vm7, %v2966_v25, %v2973_v35  ;;  %v3024_v11 = vld [vmem:[%s12417_s4 + $0x28] sm:$0xff]  ;;  %v2993_v17 = vsel %vm2988_vm15, %v2986_v54, %v12572_v10  ;;  %s11173_s30 = smov 80  }
 0x483   : > { %v3172_v42 = vld [vmem:[%s12646_s5] sm:$0xff]  ;;  %v3173_v43 = vld [vmem:[%s12646_s5 + $0x8] sm:$0xff]  ;;  %v3174_v61 = vld [vmem:[%s12646_s5 + $0x10] sm:$0xff]  ;;  %v3037_v45 = vsel %vm3031_vm0, %v3016_v39, %v3023_v41  ;;  %vm3082_vm4 = vcmp.lt.s32.totalorder %v12234_v5, %v12464_v28  ;;  %v3144_v19 = vsel %vm3141_vm9, %v3137_v52, %v3093_v63  ;;  %vm3032_vm5 = vcmp.lt.s32.totalorder %v12241_v8, %v12403_v7  ;;  %s11174_s20 = smov 76   ;;  %s13736_s3 = sld [smem:[#allocation131_spill]] }
 0x484   : > { %v3186_v56 = vsel %vm3180_vm13, %v3165_v23, %v3172_v42  ;;  %v3187_v58 = vsel %vm3181_vm12, %v3166_v24, %v3173_v43  ;;  %v9468_v13 = vld [vmem:[#allocation26] ss:$24 sps:$4 sm:$0xff]   ;;  %v9469_v14 = vld [vmem:[#allocation26 + $0x12c] ss:$24 sps:$4 sm:$0xff]   ;;  %v3188_v20 = vsel %vm3182_vm1, %v3167_v60, %v3174_v61  ;;  %v3094_v10 = vsel %vm3090_vm10, %v3087_v3, %v3043_v2  ;;  %v8244_v59 = vld [vmem:[#allocation3] ss:$0 sm:$0xff] }
 0x485   : > { %v3193_v50 = vsel %vm3192_vm8, %v3186_v56, %v3142_v36  ;;  %v3194_v15 = vsel %vm3192_vm8, %v3187_v58, %v3143_v57  ;;  %v3168_v16 = vld [vmem:[%s12605_s2 + $0x18] sm:$0xff]  ;;  %v3118_v21 = vld [vmem:[%s12550_s25 + $0x20] sm:$0xff]  ;;  %2120 = vmatpush1.bf16.msra.mxu0 %v9468_v13  ;;  %2172 = vmatprep.subr.bf16.mxu1 %v9469_v14  ;;  %v3138_v23 = vsel %vm3132_vm2, %v3117_v62, %v3124_v4  ;;  %v3068_v53 = vld [vmem:[%s12470_s9 + $0x28] sm:$0xff]  ;;  %vm3260_vm14 = vcmask 326656   ;;  %s13737_s23 = sld [smem:[#allocation129_spill]]  ;;  %s8269_s13 = sshll.u32 %s13730_s19, 3 }
 0x486   : > { %3206 = vxpose.xlu1.b32.start [1/11] (short) (narrow) %v3193_v50, 8  ;;  %v3175_v33 = vld [vmem:[%s12646_s5 + $0x18] sm:$0xff]  ;;  %v3125_v22 = vld [vmem:[%s12554_s12 + $0x20] sm:$0xff]  ;;  %vm3183_vm7 = vcmp.lt.s32.totalorder %v12198_v55, %v12579_v12  ;;  %v3075_v24 = vld [vmem:[%s12474_s15 + $0x28] sm:$0xff]  ;;  %v3044_v26 = vsel %vm3039_vm6, %v3037_v45, %v2993_v17  ;;  %v3088_v27 = vsel %vm3082_vm4, %v3067_v0, %v3074_v1  ;;  %vm3133_vm13 = vcmp.lt.s32.totalorder %v12234_v5, %v12512_v40  ;;  %s13738_s16 = sld [smem:[#allocation90_spill]]  ;;  %s13740_s7 = sld [smem:[#allocation96_spill]] }
 0x487   : > { %v9471_v18 = vld [vmem:[#allocation26 + $0x128] ss:$24 sps:$4 sm:$0xff]   ;;  %v3195_v29 = vsel %vm3192_vm8, %v3188_v20, %v3144_v19  ;;  %v2994_v32 = vsel %vm2988_vm15, %v2987_v6, %v12619_v30  ;;  %v3038_v34 = vsel %vm3032_vm5, %v3017_v9, %v3024_v11  ;;  %vm3083_vm12 = vcmp.lt.s32.totalorder %v12241_v8, %v12464_v28  ;;  %v8265_v58 = vld [vmem:[%s12777_s11 + $0xf0] sm:$0xff]  ;;  %v9478_v9 = vld [vmem:[#allocation26 + $0x64] ss:$24 sps:$4 sm:$0xff]   ;;  %p8715_p2 = scmp.ne.s32.totalorder %s13730_s19, 3 }
 0x488   : > { %2173 = vmatpush1.bf16.msra.mxu1 %v9471_v18  ;;  %v3169_v55 = vld [vmem:[%s12605_s2 + $0x20] sm:$0xff]  ;;  %v3145_v25 = vsel %vm3141_vm9, %v3138_v23, %v3094_v10  ;;  %v3189_v35 = vsel %vm3183_vm7, %v3168_v16, %v3175_v33  ;;  %v3119_v36 = vld [vmem:[%s12550_s25 + $0x28] sm:$0xff]  ;;  %v3095_v38 = vsel %vm3090_vm10, %v3088_v27, %v3044_v26  ;;  %v3139_v39 = vsel %vm3133_vm13, %v3118_v21, %v3125_v22  ;;  %v8266_v60 = vld [vmem:[%s12777_s11 + $0xf8] sm:$0xff]  ;;  %s13743_s19 = sld [smem:[#allocation130_spill]] (!%p8715_p2) }
 0x489   : > { %v3176_v31 = vld [vmem:[%s12646_s5 + $0x20] sm:$0xff]  ;;  %v3126_v37 = vld [vmem:[%s12554_s12 + $0x28] sm:$0xff]  ;;  %vm3184_vm15 = vcmp.lt.s32.totalorder %v12234_v5, %v12579_v12  ;;  %v3045_v7 = vsel %vm3039_vm6, %v3038_v34, %v2994_v32  ;;  %v3089_v30 = vsel %vm3083_vm12, %v3068_v53, %v3075_v24  ;;  %vm3134_vm11 = vcmp.lt.s32.totalorder %v12241_v8, %v12512_v40  ;;  %v9475_v4 = vld [vmem:[#allocation26 + $0x15c] ss:$24 sps:$4 sm:$0xff]  }
 0x48a   : > { %3207 = vxpose.xlu1.b32.cont [2/11] (short) (narrow) %v3194_v15, 8  ;;  %v3196_v28 = vsel %vm3192_vm8, %v3189_v35, %v3145_v25  ;;  %v3170_v41 = vld [vmem:[%s12605_s2 + $0x28] sm:$0xff]  ;;  %v3146_v43 = vsel %vm3141_vm9, %v3139_v39, %v3095_v38  ;;  %v3190_v47 = vsel %vm3184_vm15, %v3169_v55, %v3176_v31  ;;  %v3096_v5 = vsel %vm3090_vm10, %v3089_v30, %v3045_v7  ;;  %v9480_v11 = vld [vmem:[#allocation26 + $0x60] ss:$24 sps:$4 sm:$0xff]   ;;  %v9487_v33 = vld [vmem:[#allocation26 + $0x1bc] ss:$24 sps:$4 sm:$0xff]  }
 0x48b   : > { %v3177_v42 = vld [vmem:[%s12646_s5 + $0x28] sm:$0xff]  ;;  %v3140_v48 = vsel %vm3134_vm11, %v3119_v36, %v3126_v37  ;;  %vm3185_vm6 = vcmp.lt.s32.totalorder %v12241_v8, %v12579_v12  ;;  %v3197_v40 = vsel %vm3192_vm8, %v3190_v47, %v3146_v43  ;;  %v8262_v8 = vld [vmem:[%s12777_s11 + $0xd8] sm:$0xff]  ;;  %v8263_v12 = vld [vmem:[%s12777_s11 + $0xe0] sm:$0xff]  ;;  %2174 = vmatprep.subr.bf16.mxu1 %v9475_v4  ;;  %vm2115_vm10 = vcmask 261120   ;;  %s3259_s24 = scalar_lea.vmem %s13737_s23, %s8269_s13 }
 0x48c   : > { %v3147_v49 = vsel %vm3141_vm9, %v3140_v48, %v3096_v5  ;;  %v3191_v54 = vsel %vm3185_vm6, %v3170_v41, %v3177_v42  ;;  %v8264_v57 = vld [vmem:[%s12777_s11 + $0xe8] sm:$0xff]  ;;  %v9490_v45 = vld [vmem:[#allocation26 + $0xc4] ss:$24 sps:$4 sm:$0xff]   ;;  %v9492_v18 = vld [vmem:[#allocation26 + $0xc0] ss:$24 sps:$4 sm:$0xff]   ;;  %vm11171_vm9 = vmmov 0   ;;  %s13739_s4 = smov %s13738_s16  ;;  %s13741_s21 = smov %s13740_s7 }
 0x48d   : > { %v3198_v56 = vsel %vm3192_vm8, %v3191_v54, %v3147_v49  ;;  %v1737_v50 = vld [vmem:[%s11921_s18 + $0x10] sm:$0xff]  ;;  %v1750_v19 = vld [vmem:[%s12011_s14 + $0x8] sm:$0xff]  ;;  %v1749_v10 = vld [vmem:[%s12011_s14] sm:$0xff]  ;;  %vm3469_vm8 = vcmask 1043456   ;;  %vm4335_vm0 = vcmask 1014784   ;;  %vm4465_vm1 = vcmask 293888  }
 0x48e   : > { %3208 = vxpose.xlu1.b32.cont [3/11] (short) (narrow) %v3195_v29, 8  ;;  %v9472_v1 = vld [vmem:[#allocation26 + $0x34] ss:$24 sps:$4 sm:$0xff]   ;;  %v9474_v3 = vld [vmem:[#allocation26 + $0x30] ss:$24 sps:$4 sm:$0xff]   ;;  %v12789_v20 = vpack.c.bf16 %v1750_v19, %v1750_v19  ;;  %v12792_v23 = vpack.c.bf16 %v1749_v10, %v1749_v10  ;;  %vm4820_vm2 = vcmask 523264  }
 0x48f   : > { %2121 = vmatprep.subr.bf16.mxu0 %v9472_v1  ;;  %v9477_v6 = vld [vmem:[#allocation26 + $0x158] ss:$24 sps:$4 sm:$0xff]   ;;  %v9481_v13 = vld [vmem:[#allocation26 + $0x18c] ss:$24 sps:$4 sm:$0xff]   ;;  %v9483_v14 = vld [vmem:[#allocation26 + $0x188] ss:$24 sps:$4 sm:$0xff]  }
 0x490   : > { %2122 = vmatpush1.bf16.msra.mxu0 %v9474_v3  ;;  %2175 = vmatpush1.bf16.msra.mxu1 %v9477_v6  ;;  %v9484_v15 = vld [vmem:[#allocation26 + $0x94] ss:$24 sps:$4 sm:$0xff]   ;;  %v9486_v16 = vld [vmem:[#allocation26 + $0x90] ss:$24 sps:$4 sm:$0xff]   ;;  %v9502_v29 = vld [vmem:[#allocation26 + $0x124] ss:$24 sps:$4 sm:$0xff]  }
 0x491   : > { %2123 = vmatprep.subr.bf16.mxu0 %v9478_v9  ;;  %2176 = vmatprep.subr.bf16.mxu1 %v9481_v13  ;;  %v9489_v17 = vld [vmem:[#allocation26 + $0x1b8] ss:$24 sps:$4 sm:$0xff]   ;;  %v9493_v21 = vld [vmem:[#allocation33] ss:$12 sps:$4 sm:$0xff]   ;;  %v9499_v26 = vld [vmem:[#allocation33 + $0x18] ss:$12 sps:$4 sm:$0xff]  }
 0x492   : > { %3209 = vxpose.xlu1.b32.cont [4/11] (short) (narrow) %v3196_v28, 8  ;;  %v9495_v22 = vld [vmem:[#allocation33 + $0x4] ss:$12 sps:$4 sm:$0xff]   ;;  %8192 = vmatprep.mubr.msk.bf16.mxu1 %vm2115_vm10, %v12789_v20  ;;  %v9498_v24 = vld [vmem:[#allocation26 + $0xf0] ss:$24 sps:$4 sm:$0xff]   ;;  %vm7192_vm4 = vcmask 64512  }
 0x493   : > { %v9496_v53 = vld [vmem:[#allocation26 + $0xf4] ss:$24 sps:$4 sm:$0xff]   ;;  %v9501_v27 = vld [vmem:[#allocation33 + $0x1c] ss:$12 sps:$4 sm:$0xff]   ;;  %8191 = vmatprep.mubr.msk.bf16.mxu0 %vm2115_vm10, %v12789_v20  ;;  %v9504_v55 = vld [vmem:[#allocation26 + $0x120] ss:$24 sps:$4 sm:$0xff]  }
 0x494   : > { %2124 = vmatpush1.bf16.msra.mxu0 %v9480_v11  ;;  %2177 = vmatpush1.bf16.msra.mxu1 %v9483_v14  ;;  %v9505_v31 = vld [vmem:[#allocation33 + $0x30] ss:$12 sps:$4 sm:$0xff]   ;;  %v9507_v32 = vld [vmem:[#allocation33 + $0x34] ss:$12 sps:$4 sm:$0xff]   ;;  %v9508_v34 = vld [vmem:[#allocation26 + $0x154] ss:$24 sps:$4 sm:$0xff]  }
 0x495   : > { %2125 = vmatprep.subr.bf16.mxu0 %v9484_v15  ;;  %2178 = vmatprep.subr.bf16.mxu1 %v9487_v33  ;;  %v9510_v25 = vld [vmem:[#allocation26 + $0x150] ss:$24 sps:$4 sm:$0xff]   ;;  %v9513_v35 = vld [vmem:[#allocation33 + $0x4c] ss:$12 sps:$4 sm:$0xff]   ;;  %v9514_v36 = vld [vmem:[#allocation26 + $0x184] ss:$24 sps:$4 sm:$0xff]  }
 0x496   : > { %3210 = vxpose.xlu1.b32.cont [5/11] (short) (narrow) %v3197_v40, 8  ;;  %v9511_v37 = vld [vmem:[#allocation33 + $0x48] ss:$12 sps:$4 sm:$0xff]   ;;  %v9516_v38 = vld [vmem:[#allocation26 + $0x180] ss:$24 sps:$4 sm:$0xff]  }
 0x497   : > { %v9519_v39 = vld [vmem:[#allocation33 + $0x64] ss:$12 sps:$4 sm:$0xff]   ;;  %v9517_v30 = vld [vmem:[#allocation33 + $0x60] ss:$12 sps:$4 sm:$0xff]   ;;  %v9525_v41 = vld [vmem:[#allocation33 + $0x7c] ss:$12 sps:$4 sm:$0xff]  }
 0x498   : > { %2126 = vmatpush1.bf16.msra.mxu0 %v9486_v16  ;;  %2179 = vmatpush1.bf16.msra.mxu1 %v9489_v17  ;;  %v9520_v7 = vld [vmem:[#allocation26 + $0x1b4] ss:$24 sps:$4 sm:$0xff]   ;;  %v9522_v28 = vld [vmem:[#allocation26 + $0x1b0] ss:$24 sps:$4 sm:$0xff]   ;;  %v9534_v48 = vld [vmem:[#allocation26 + $0x44] ss:$24 sps:$4 sm:$0xff]  }
 0x499   : > { %2127 = vmatprep.subr.bf16.mxu0 %v9490_v45  ;;  %2403 = vmatprep.subr.bf16.mxu1 %v9495_v22  ;;  %v9528_v42 = vld [vmem:[#allocation26 + $0x14] ss:$24 sps:$4 sm:$0xff]   ;;  %v9526_v47 = vld [vmem:[#allocation26 + $0x10] ss:$24 sps:$4 sm:$0xff]   ;;  %v9529_v40 = vld [vmem:[#allocation33 + $0x90] ss:$12 sps:$4 sm:$0xff]  }
 0x49a   : > { %3211 = vxpose.xlu1.b32.cont [6/11] (short) (narrow) %v3198_v56, 8  ;;  %v9523_v43 = vld [vmem:[#allocation33 + $0x78] ss:$12 sps:$4 sm:$0xff]   ;;  %v9531_v5 = vld [vmem:[#allocation33 + $0x94] ss:$12 sps:$4 sm:$0xff]  }
 0x49b   : > { %2193 = vmatmul.mubr.bf16.vlgmr.msra.gmra.mrb[0].mxu1 %v12792_v23  ;;  %v9532_v49 = vld [vmem:[#allocation26 + $0x40] ss:$24 sps:$4 sm:$0xff]   ;;  %v9540_v56 = vld [vmem:[#allocation26 + $0x74] ss:$24 sps:$4 sm:$0xff]   ;;  %v9552_v1 = vld [vmem:[#allocation26 + $0x104] ss:$24 sps:$4 sm:$0xff]  }
 0x49c   : > { %2128 = vmatpush1.bf16.msra.mxu0 %v9492_v18  ;;  %2404 = vmatpush1.bf16.msra.mxu1 %v9493_v21  ;;  %v9537_v54 = vld [vmem:[#allocation33 + $0xac] ss:$12 sps:$4 sm:$0xff]   ;;  %v9553_v6 = vld [vmem:[#allocation33 + $0x50] ss:$12 sps:$4 sm:$0xff]   ;;  %v9554_v9 = vld [vmem:[#allocation26 + $0x130] ss:$24 sps:$4 sm:$0xff]  }
 0x49d   : > { %2129 = vmatprep.subr.bf16.mxu0 %v9496_v53  ;;  %2435 = vmatprep.mubr.bf16.mxu1 %v11168_v51  ;;  %v9550_v3 = vld [vmem:[#allocation26 + $0x100] ss:$24 sps:$4 sm:$0xff]   ;;  %v9556_v4 = vld [vmem:[#allocation26 + $0x134] ss:$24 sps:$4 sm:$0xff]   ;;  %v9560_v11 = vld [vmem:[#allocation26 + $0x164] ss:$24 sps:$4 sm:$0xff]  }
 0x49e   : > { %3212 = vxpose.xlu1.b32.cont [7/11] (short) (narrow) %v8262_v8, 8  ;;  %2405 = vmatprep.subr.bf16.mxu1 %v9501_v27  ;;  %v9535_v8 = vld [vmem:[#allocation33 + $0xa8] ss:$12 sps:$4 sm:$0xff]   ;;  %v9558_v14 = vld [vmem:[#allocation26 + $0x160] ss:$24 sps:$4 sm:$0xff]  }
 0x49f   : > { %v9557_v13 = vld [vmem:[#allocation33 + $0x68] ss:$12 sps:$4 sm:$0xff]   ;;  %v9564_v15 = vld [vmem:[#allocation26 + $0x194] ss:$24 sps:$4 sm:$0xff]   ;;  %v9566_v18 = vld [vmem:[#allocation26 + $0x1c0] ss:$24 sps:$4 sm:$0xff]  }
 0x4a0   : > { %2130 = vmatpush1.bf16.msra.mxu0 %v9498_v24  ;;  %2406 = vmatpush1.bf16.msra.mxu1 %v9499_v26  ;;  %v9561_v16 = vld [vmem:[#allocation33 + $0x80] ss:$12 sps:$4 sm:$0xff]   ;;  %v9568_v17 = vld [vmem:[#allocation26 + $0x1c4] ss:$24 sps:$4 sm:$0xff]   ;;  %v9565_v45 = vld [vmem:[#allocation33 + $0x98] ss:$12 sps:$4 sm:$0xff]  }
 0x4a1   : > { %2131 = vmatprep.subr.bf16.mxu0 %v9502_v29  ;;  %2407 = vmatprep.subr.bf16.mxu1 %v9507_v32  ;;  %v9562_v33 = vld [vmem:[#allocation26 + $0x190] ss:$24 sps:$4 sm:$0xff]   ;;  %v9572_v19 = vld [vmem:[#allocation36 + $0x4] ss:$12 sps:$4 sm:$0xff]   ;;  %v9584_v27 = vld [vmem:[#allocation36 + $0x4c] ss:$12 sps:$4 sm:$0xff]  }
 0x4a2   : > { %3213 = vxpose.xlu1.b32.cont [8/11] (short) (narrow) %v8263_v12, 8  ;;  %v1751_v12 = vld [vmem:[%s12014_s28] sm:$0xff]  ;;  %v9585_v32 = vld [vmem:[#allocation36 + $0x50] ss:$12 sps:$4 sm:$0xff]  }
 0x4a3   : > { %v9570_v21 = vld [vmem:[#allocation36] ss:$12 sps:$4 sm:$0xff]   ;;  %v9576_v22 = vld [vmem:[#allocation36 + $0x1c] ss:$12 sps:$4 sm:$0xff]   ;;  %v9574_v53 = vld [vmem:[#allocation36 + $0x18] ss:$12 sps:$4 sm:$0xff]  }
 0x4a4   : > { %2132 = vmatpush1.bf16.msra.mxu0 %v9504_v55  ;;  %2408 = vmatpush1.bf16.msra.mxu1 %v9505_v31  ;;  %v9573_v10 = vld [vmem:[#allocation36 + $0x8] ss:$12 sps:$4 sm:$0xff]   ;;  %v9577_v26 = vld [vmem:[#allocation36 + $0x20] ss:$12 sps:$4 sm:$0xff]   ;;  %v9581_v29 = vld [vmem:[#allocation36 + $0x38] ss:$12 sps:$4 sm:$0xff]  }
 0x4a5   : > { %2133 = vmatprep.subr.bf16.mxu0 %v9508_v34  ;;  %2409 = vmatprep.subr.bf16.mxu1 %v9513_v35  ;;  %v9580_v24 = vld [vmem:[#allocation36 + $0x34] ss:$12 sps:$4 sm:$0xff]   ;;  %v9588_v31 = vld [vmem:[#allocation36 + $0x64] ss:$12 sps:$4 sm:$0xff]  }
 0x4a6   : > { %3214 = vxpose.xlu1.b32.cont [9/11] (short) (narrow) %v8264_v57, 8  ;;  %v9538_v57 = vld [vmem:[#allocation26 + $0x70] ss:$24 sps:$4 sm:$0xff]  }
 0x4a7   : > { %v9582_v55 = vld [vmem:[#allocation36 + $0x48] ss:$12 sps:$4 sm:$0xff]   ;;  %v9586_v34 = vld [vmem:[#allocation36 + $0x60] ss:$12 sps:$4 sm:$0xff]  }
 0x4a8   : > { %2134 = vmatpush1.bf16.msra.mxu0 %v9510_v25  ;;  %2410 = vmatpush1.bf16.msra.mxu1 %v9511_v37  ;;  %v9592_v25 = vld [vmem:[#allocation36 + $0x7c] ss:$12 sps:$4 sm:$0xff]   ;;  %v9596_v37 = vld [vmem:[#allocation36 + $0x94] ss:$12 sps:$4 sm:$0xff]  }
 0x4a9   : > { %2135 = vmatprep.subr.bf16.mxu0 %v9514_v36  ;;  %2411 = vmatprep.subr.bf16.mxu1 %v9519_v39  ;;  %v9589_v35 = vld [vmem:[#allocation36 + $0x68] ss:$12 sps:$4 sm:$0xff]   ;;  %v9590_v36 = vld [vmem:[#allocation36 + $0x78] ss:$12 sps:$4 sm:$0xff]   ;;  %v9594_v39 = vld [vmem:[#allocation36 + $0x90] ss:$12 sps:$4 sm:$0xff]  }
 0x4aa   : > { %3215 = vxpose.xlu1.b32.cont [10/11] (short) (narrow) %v8265_v58, 8  ;;  %v9544_v58 = vld [vmem:[#allocation26 + $0xa4] ss:$24 sps:$4 sm:$0xff]  }
 0x4ac   : > { %2136 = vmatpush1.bf16.msra.mxu0 %v9516_v38  ;;  %2412 = vmatpush1.bf16.msra.mxu1 %v9517_v30  ;;  %v9593_v38 = vld [vmem:[#allocation36 + $0x80] ss:$12 sps:$4 sm:$0xff]   ;;  %v9597_v30 = vld [vmem:[#allocation36 + $0x98] ss:$12 sps:$4 sm:$0xff]  }
 0x4ad   : > { %2137 = vmatprep.subr.bf16.mxu0 %v9520_v7  ;;  %2413 = vmatprep.subr.bf16.mxu1 %v9525_v41  ;;  %v9600_v7 = vld [vmem:[#allocation36 + $0xac] ss:$12 sps:$4 sm:$0xff]  }
 0x4ae   : > { %3216 = vxpose.xlu1.b32.end [11/11] (short) (narrow) %v8266_v60, 8  ;;  %v12804_v60 = vpack.c.bf16 %v1751_v12, %v1751_v12  ;;  %v1752_v41 = vld [vmem:[%s12017_s17] sm:$0xff]  ;;  %v3291_v12 = vld [vmem:[#allocation29 + $0xd0] sm:$0xff] }
 0x4b0   : > { %2138 = vmatpush1.bf16.msra.mxu0 %v9522_v28  ;;  %2414 = vmatpush1.bf16.msra.mxu1 %v9523_v43  ;;  %v9598_v28 = vld [vmem:[#allocation36 + $0xa8] ss:$12 sps:$4 sm:$0xff]   ;;  %v9601_v43 = vld [vmem:[#allocation36 + $0xb0] ss:$12 sps:$4 sm:$0xff]  }
 0x4b1   : > { %2201 = vmatprep.subr.bf16.mxu0 %v9528_v42  ;;  %2415 = vmatprep.subr.bf16.mxu1 %v9531_v5  ;;  %v9607_v42 = vld [vmem:[#allocation29 + $0xc] ss:$52 sps:$4 sm:$0xff]   ;;  %v9604_v5 = vld [vmem:[#allocation29 + $0x4] ss:$52 sps:$4 sm:$0xff]  }
 0x4b3   : > { %2152 = vmatmul.mubr.bf16.vlgmr.msra.gmra.mrb[0].mxu0 %v12792_v23 }
 0x4b4   : > { %2202 = vmatpush1.bf16.msra.mxu0 %v9526_v47  ;;  %8193 = vmatprep.mubr.msk.bf16.mxu0 %vm2115_vm10, %v12789_v20  ;;  %v9569_v20 = vld [vmem:[#allocation33 + $0xb0] ss:$12 sps:$4 sm:$0xff]   ;;  %v2484_v47 = vpack.c.bf16 %v1752_v41, %v1752_v41 }
 0x4b5   : > { %2203 = vmatprep.subr.bf16.mxu0 %v9534_v48  ;;  %2416 = vmatpush1.bf16.msra.mxu1 %v9529_v40  ;;  %v9605_v48 = vld [vmem:[#allocation29 + $0x8] ss:$52 sps:$4 sm:$0xff]  }
 0x4b6   : > { %2417 = vmatprep.subr.bf16.mxu1 %v9537_v54  ;;  %v9613_v40 = vld [vmem:[#allocation29 + $0x74] ss:$52 sps:$4 sm:$0xff]  }
 0x4b7   : > { %v9602_v54 = vld [vmem:[#allocation29] ss:$52 sps:$4 sm:$0xff]  }
 0x4b8   : > { %2204 = vmatpush1.bf16.msra.mxu0 %v9532_v49  ;;  %v3292_v49 = vld [vmem:[#allocation29 + $0xd8] sm:$0xff] }
 0x4b9   : > { %2205 = vmatprep.subr.bf16.mxu0 %v9540_v56  ;;  %2418 = vmatpush1.bf16.msra.mxu1 %v9535_v8  ;;  %v9610_v56 = vld [vmem:[#allocation29 + $0x6c] ss:$52 sps:$4 sm:$0xff]   ;;  %v9611_v8 = vld [vmem:[#allocation29 + $0x70] ss:$52 sps:$4 sm:$0xff]  }
 0x4bc   : > { %2206 = vmatpush1.bf16.msra.mxu0 %v9538_v57  ;;  %2436 = vmatmul.mubr.bf16.vlgmr.msra.gmra.mrb[4].mxu1 %v12804_v60  ;;  %v8299_v57 = vcombine.high %v3292_v49, %v3292_v49 }
 0x4bd   : > { %2207 = vmatprep.subr.bf16.mxu0 %v9544_v58  ;;  %v8298_v58 = vcombine.low %v3292_v49, %v3292_v49 }
 0x4cb   : > { %v2766_v61 = vpop.xlane.xlu0 %2765 }
 0x4cc   : > { %v2774_v62 = vadd.f32 %v8244_v59, %v2766_v61  ;;  %3248 = vrot.lane.b32.xlu1 %v1737_v50, %s11169_s10  ;;  %v9541_v59 = vld [vmem:[#allocation33 + $0x8] ss:$12 sps:$4 sm:$0xff]   ;;  %v11170_v61 = vmov 0.0   ;;  %v9548_v50 = vld [vmem:[#allocation26 + $0xd4] ss:$24 sps:$4 sm:$0xff]  }
 0x4cd   : > { %8844 = vmatprep.subr.bf16.mxu1 %v11170_v61  ;;  %8860 = vmatprep.mubr.msk.bf16.mxu1 %vm11171_vm9, %v11170_v61 }
 0x4ce   : > { %v2775_v63 = vmul.f32 1.442695, %v2774_v62  ;;  %v9542_v62 = vld [vmem:[#allocation26 + $0xa0] ss:$24 sps:$4 sm:$0xff]   ;;  %8845 = vmatpush3.bf16.msra.mxu1 %v9541_v59  ;;  %v8297_v59 = vcombine.high %v3291_v12, %v3291_v12 }
 0x4cf   : > { %2208 = vmatpush1.bf16.msra.mxu0 %v9542_v62  ;;  %8846 = vmatprep.subr.bf16.mxu1 %v11170_v61  ;;  %v8296_v62 = vcombine.low %v3291_v12, %v3291_v12  ;;  %v9653_v12 = vld [vmem:[#allocation29 + $0x30] ss:$52 sps:$4 sm:$0xff]  }
 0x4d0   : > { %9982 = vpow2.f32 %v2775_v63  ;;  %v9545_v63 = vld [vmem:[#allocation33 + $0x20] ss:$12 sps:$4 sm:$0xff]   ;;  %2209 = vmatprep.subr.bf16.mxu0 %v9548_v50  ;;  %v3477_v50 = vsel %vm3469_vm8, %v8298_v58, 0  ;;  %v3825_v58 = vld [vmem:[#allocation30 + $0xd8] sm:$0xff] }
 0x4d2   : > { %8847 = vmatpush3.bf16.msra.mxu1 %v9545_v63  ;;  %v9620_v63 = vld [vmem:[#allocation29 + $0x14] ss:$52 sps:$4 sm:$0xff]  }
 0x4d3   : > { %8848 = vmatprep.subr.bf16.mxu1 %v11170_v61 }
 0x4da   : > { %v12785_v52 = vpop.eup %9982 }
 0x4db   : > { %v2777_v0 = vadd.f32 1e-05, %v12785_v52 }
 0x4dd   : > { %9984 = vrcp.f32 %v2777_v0  ;;  %v9546_v0 = vld [vmem:[#allocation26 + $0xd0] ss:$24 sps:$4 sm:$0xff]  }
 0x4de   : > { %2210 = vmatpush1.bf16.msra.mxu0 %v9546_v0  ;;  %v3471_v0 = vsel %vm3469_vm8, %v8296_v62, 0  ;;  %v8351_v62 = vcombine.high %v3825_v58, %v3825_v58 }
 0x4df   : > { %2211 = vmatprep.subr.bf16.mxu0 %v9552_v1  ;;  %v9623_v1 = vld [vmem:[#allocation29 + $0x1c] ss:$52 sps:$4 sm:$0xff]  }
 0x4e2   : > { %2212 = vmatpush1.bf16.msra.mxu0 %v9550_v3  ;;  %v1736_v3 = vld [vmem:[%s11921_s18 + $0x8] sm:$0xff] }
 0x4e3   : > { %2213 = vmatprep.subr.bf16.mxu0 %v9556_v4 }
 0x4e6   : > { %2214 = vmatpush1.bf16.msra.mxu0 %v9554_v9 }
 0x4e7   : > { %v9985_v2 = vpop.eup %9984  ;;  %2215 = vmatprep.subr.bf16.mxu0 %v9560_v11 }
 0x4e8   : > { %3240 = vperm.xlu0 %9442, %v9985_v2   ;;  %v9549_v2 = vld [vmem:[#allocation33 + $0x38] ss:$12 sps:$4 sm:$0xff]  }
 0x4e9   : > { %8849 = vmatpush3.bf16.msra.mxu1 %v9549_v2 }
 0x4ea   : > { %8850 = vmatprep.subr.bf16.mxu1 %v11170_v61  ;;  %2216 = vmatpush1.bf16.msra.mxu0 %v9558_v14 }
 0x4eb   : > { %2217 = vmatprep.subr.bf16.mxu0 %v9564_v15 }
 0x4ed   : > { %8851 = vmatpush3.bf16.msra.mxu1 %v9553_v6 }
 0x4ee   : > { %8852 = vmatprep.subr.bf16.mxu1 %v11170_v61  ;;  %2218 = vmatpush1.bf16.msra.mxu0 %v9562_v33 }
 0x4ef   : > { %2219 = vmatprep.subr.bf16.mxu0 %v9568_v17  ;;  %v9618_v17 = vld [vmem:[#allocation29 + $0x10] ss:$52 sps:$4 sm:$0xff]  }
 0x4f1   : > { %8853 = vmatpush3.bf16.msra.mxu1 %v9557_v13 }
 0x4f2   : > { %8854 = vmatprep.subr.bf16.mxu1 %v11170_v61  ;;  %2220 = vmatpush1.bf16.msra.mxu0 %v9566_v18  ;;  %v9626_v18 = vld [vmem:[#allocation29 + $0x7c] ss:$52 sps:$4 sm:$0xff]  }
 0x4f3   : > { %2645 = vmatprep.subr.bf16.mxu0 %v9572_v19  ;;  %v9629_v19 = vld [vmem:[#allocation29 + $0x84] ss:$52 sps:$4 sm:$0xff]  }
 0x4f5   : > { %8855 = vmatpush3.bf16.msra.mxu1 %v9561_v16  ;;  %2234 = vmatmul.mubr.bf16.vlgmr.msra.gmra.mrb[4].mxu0 %v12792_v23  ;;  %v9578_v23 = vld [vmem:[#allocation36 + $0x30] ss:$12 sps:$4 sm:$0xff]  }
 0x4f6   : > { %8856 = vmatprep.subr.bf16.mxu1 %v11170_v61  ;;  %2646 = vmatpush1.bf16.msra.mxu0 %v9570_v21 }
 0x4f7   : > { %2647 = vmatprep.subr.bf16.mxu0 %v9576_v22  ;;  %2677 = vmatprep.mubr.bf16.mxu0 %v11168_v51  ;;  %v3294_v22 = vld [vmem:[#allocation29 + $0xe8] sm:$0xff] }
 0x4f9   : > { %8857 = vmatpush3.bf16.msra.mxu1 %v9565_v45  ;;  %v9621_v45 = vld [vmem:[#allocation29 + $0x18] ss:$52 sps:$4 sm:$0xff]  }
 0x4fa   : > { %8858 = vmatprep.subr.bf16.mxu1 %v11170_v61  ;;  %2648 = vmatpush1.bf16.msra.mxu0 %v9574_v53  ;;  %v9627_v53 = vld [vmem:[#allocation29 + $0x80] ss:$52 sps:$4 sm:$0xff]  }
 0x4fb   : > { %2649 = vmatprep.subr.bf16.mxu0 %v9580_v24 }
 0x4fd   : > { %8859 = vmatpush3.bf16.msra.mxu1 %v9569_v20  ;;  %v3293_v20 = vld [vmem:[#allocation29 + $0xe0] sm:$0xff] }
 0x4fe   : > { %8864 = vmatprep.subr.bf16.mxu1 %v11170_v61  ;;  %2650 = vmatpush1.bf16.msra.mxu0 %v9578_v23  ;;  %v8301_v24 = vcombine.high %v3293_v20, %v3293_v20  ;;  %v8300_v23 = vcombine.low %v3293_v20, %v3293_v20 }
 0x4ff   : > { %2651 = vmatprep.subr.bf16.mxu0 %v9584_v27  ;;  %v8302_v27 = vcombine.low %v3294_v22, %v3294_v22 }
 0x500   : > { %8861 = vmatmul.mubr.bf16.vlgmr.msra.gmra.mrb[8].mxu1 %v12804_v60  ;;  %v9608_v60 = vld [vmem:[#allocation29 + $0x68] ss:$52 sps:$4 sm:$0xff]  }
 0x501   : > { %8865 = vmatpush3.bf16.msra.mxu1 %v9573_v10  ;;  %8880 = vmatprep.mubr.msk.bf16.mxu1 %vm11171_vm9, %v11170_v61  ;;  %v9624_v10 = vld [vmem:[#allocation29 + $0x78] ss:$52 sps:$4 sm:$0xff]  }
 0x502   : > { %8866 = vmatprep.subr.bf16.mxu1 %v11170_v61  ;;  %2652 = vmatpush1.bf16.msra.mxu0 %v9582_v55  ;;  %v3483_v55 = vsel %vm3469_vm8, %v8300_v23, 0 }
 0x503   : > { %2653 = vmatprep.subr.bf16.mxu0 %v9588_v31  ;;  %v3489_v31 = vsel %vm3469_vm8, %v8302_v27, 0 }
 0x505   : > { %8867 = vmatpush3.bf16.msra.mxu1 %v9577_v26  ;;  %v8303_v26 = vcombine.high %v3294_v22, %v3294_v22 }
 0x506   : > { %8868 = vmatprep.subr.bf16.mxu1 %v11170_v61  ;;  %2654 = vmatpush1.bf16.msra.mxu0 %v9586_v34  ;;  %v3222_v2 = vpop.trf.xlu1  ;;  %v9639_v34 = vld [vmem:[#allocation29 + $0x2c] ss:$52 sps:$4 sm:$0xff]  }
 0x507   : > { %2655 = vmatprep.subr.bf16.mxu0 %v9592_v25 }
 0x509   : > { %8869 = vmatpush3.bf16.msra.mxu1 %v9581_v29 }
 0x50a   : > { %8870 = vmatprep.subr.bf16.mxu1 %v11170_v61  ;;  %2656 = vmatpush1.bf16.msra.mxu0 %v9590_v36  ;;  %v9637_v36 = vld [vmem:[#allocation29 + $0x28] ss:$52 sps:$4 sm:$0xff]  }
 0x50b   : > { %2657 = vmatprep.subr.bf16.mxu0 %v9596_v37  ;;  %v12859_v37 = vld [vmem:[%s13736_s3] sm:$0xff] }
 0x50d   : > { %8871 = vmatpush3.bf16.msra.mxu1 %v9585_v32  ;;  %v9636_v32 = vld [vmem:[#allocation29 + $0x24] ss:$52 sps:$4 sm:$0xff]  }
 0x50e   : > { %8872 = vmatprep.subr.bf16.mxu1 %v11170_v61  ;;  %2658 = vmatpush1.bf16.msra.mxu0 %v9594_v39  ;;  %v9642_v39 = vld [vmem:[#allocation29 + $0x8c] ss:$52 sps:$4 sm:$0xff]  }
 0x50f   : > { %2659 = vmatprep.subr.bf16.mxu0 %v9600_v7  ;;  %v9645_v7 = vld [vmem:[#allocation29 + $0x94] ss:$52 sps:$4 sm:$0xff]  }
 0x511   : > { %8873 = vmatpush3.bf16.msra.mxu1 %v9589_v35  ;;  %v9634_v35 = vld [vmem:[#allocation29 + $0x20] ss:$52 sps:$4 sm:$0xff]  }
 0x512   : > { %8874 = vmatprep.subr.bf16.mxu1 %v11170_v61  ;;  %2660 = vmatpush1.bf16.msra.mxu0 %v9598_v28 }
 0x513   : > { %3550 = vmatprep.subr.bf16.mxu0 %v9607_v42  ;;  %v3296_v42 = vld [vmem:[#allocation29 + $0xf8] sm:$0xff] }
 0x515   : > { %8875 = vmatpush3.bf16.msra.mxu1 %v9593_v38  ;;  %2678 = vmatmul.mubr.bf16.vlgmr.msra.gmra.mrb[8].mxu0 %v2484_v47  ;;  %v12862_v38 = vld [vmem:[%s13736_s3 + $0x8] sm:$0xff] }
 0x516   : > { %8876 = vmatprep.subr.bf16.mxu1 %v11170_v61  ;;  %3551 = vmatpush1.bf16.msra.mxu0 %v9605_v48 }
 0x517   : > { %3552 = vmatprep.subr.bf16.mxu0 %v9613_v40  ;;  %3582 = vmatprep.mubr.bf16.mxu0 %v11168_v51  ;;  %v8306_v40 = vcombine.low %v3296_v42, %v3296_v42 }
 0x519   : > { %8877 = vmatpush3.bf16.msra.mxu1 %v9597_v30  ;;  %v3295_v30 = vld [vmem:[#allocation29 + $0xf0] sm:$0xff] }
 0x51a   : > { %8878 = vmatprep.subr.bf16.mxu1 %v11170_v61  ;;  %3553 = vmatpush1.bf16.msra.mxu0 %v9611_v8  ;;  %v8304_v48 = vcombine.low %v3295_v30, %v3295_v30  ;;  %v9650_v8 = vld [vmem:[#allocation30 + $0x8] ss:$52 sps:$4 sm:$0xff]  }
 0x51b   : > { %8311 = vmatprep.subr.msk.bf16.mxu0 %vm3469_vm8, %v8299_v57  ;;  %v9656_v57 = vld [vmem:[#allocation30 + $0x74] ss:$52 sps:$4 sm:$0xff]  }
 0x51c   : > { %v3495_v49 = vsel %vm3469_vm8, %v8304_v48, 0 }
 0x51d   : > { %8879 = vmatpush3.bf16.msra.mxu1 %v9601_v43 }
 0x51e   : > { %3509 = vmatprep.subr.bf16.mxu1 %v9604_v5  ;;  %3555 = vmatpush1.bf16.msra.mxu0 %v3477_v50  ;;  %v8307_v5 = vcombine.high %v3296_v42, %v3296_v42  ;;  %v9659_v50 = vld [vmem:[#allocation29 + $0x100] ss:$0 sps:$4 sm:$0xff]  }
 0x51f   : > { %3591 = vmatprep.subr.bf16.mxu0 %v9620_v63  ;;  %v8350_v63 = vcombine.low %v3825_v58, %v3825_v58 }
 0x520   : > { %8881 = vmatmul.mubr.bf16.vlgmr.msra.gmra.mrb[12].mxu1 %v2484_v47  ;;  %v8305_v47 = vcombine.high %v3295_v30, %v3295_v30  ;;  %v9683_v30 = vld [vmem:[#allocation30 + $0x80] ss:$52 sps:$4 sm:$0xff]  }
 0x521   : > { %3510 = vmatpush1.bf16.msra.mxu1 %v9602_v54  ;;  %3541 = vmatprep.mubr.bf16.mxu1 %v11168_v51  ;;  %v3501_v54 = vsel %vm3469_vm8, %v8306_v40, 0  ;;  %v9695_v40 = vld [vmem:[#allocation30 + $0x2c] ss:$52 sps:$4 sm:$0xff]  }
 0x522   : > { %3511 = vmatprep.subr.bf16.mxu1 %v9610_v56  ;;  %v9652_v56 = vld [vmem:[#allocation30 + $0xc] ss:$52 sps:$4 sm:$0xff]  }
 0x525   : > { %3512 = vmatpush1.bf16.msra.mxu1 %v9608_v60  ;;  %v9654_v60 = vld [vmem:[#allocation30 + $0x70] ss:$52 sps:$4 sm:$0xff]  }
 0x526   : > { %8309 = vmatprep.subr.msk.bf16.mxu1 %vm3469_vm8, %v8297_v59  ;;  %v9657_v59 = vld [vmem:[#allocation29 + $0x98] ss:$52 sps:$4 sm:$0xff]  }
 0x529   : > { %3514 = vmatpush1.bf16.msra.mxu1 %v3471_v0  ;;  %v3507_v0 = vsel %vm3469_vm8, %v9659_v50, 0 }
 0x52a   : > { %3632 = vmatprep.subr.bf16.mxu1 %v9623_v1  ;;  %v4009_v1 = vsel %vm3469_vm8, %v8350_v63, 0  ;;  %v9706_v63 = vld [vmem:[#allocation21 + $0x4] ss:$8 sps:$4 sm:$0xff]  }
 0x53e   : > { %v3249_v6 = vpop.permute.xlu1 %3248 }
 0x567   : > { %v3241_v4 = vpop.permute.xlu0 %3240 }
 0x568   : > { %v3243_v9 = vmul.f32 %v3241_v4, %v3222_v2  ;;  %v9663_v2 = vld [vmem:[#allocation30 + $0x4] ss:$52 sps:$4 sm:$0xff]   ;;  %v9661_v4 = vld [vmem:[#allocation30] ss:$52 sps:$4 sm:$0xff]  }
 0x56a   : > { %v3244_v11 = vadd.f32 %v3243_v9, %v1736_v3  ;;  %v3251_v13 = vadd.f32 %v3249_v6, %v3243_v9  ;;  %v9666_v3 = vld [vmem:[#allocation30 + $0x14] ss:$52 sps:$4 sm:$0xff]   ;;  %v9664_v6 = vld [vmem:[#allocation30 + $0x10] ss:$52 sps:$4 sm:$0xff]   ;;  %v9669_v9 = vld [vmem:[#allocation30 + $0x6c] ss:$52 sps:$4 sm:$0xff]  }
 0x56c   : > { %v12838_v14 = vclamps-f32 %v3244_v11, 1.0  ;;  %v8268_v15 = vclamps-f32 %v3251_v13, 1.0  ;;  %v9672_v11 = vld [vmem:[#allocation30 + $0x7c] ss:$52 sps:$4 sm:$0xff]  }
 0x56d   : > { %v3824_v13 = vld [vmem:[#allocation30 + $0xd0] sm:$0xff] }
 0x56e   : > { %v3262_v16 = vpack.c.bf16 %v12838_v14, %v12838_v14  ;;  %v3795_v33 = vpack.c.bf16 %v8268_v15, %v8268_v15 }
 0x570   : > { %3299 = vrot.lane.b32.xlu0 %v3262_v16, %s11172_s6 }
 0x574   : > { %3832 = vrot.lane.b32.xlu0 %v3795_v33, %s11173_s30  ;;  %v9667_v33 = vld [vmem:[#allocation30 + $0x68] ss:$52 sps:$4 sm:$0xff]  }
 0x578   : > { %4327 = vrot.lane.b32.xlu0 %v12838_v14, %s11173_s30 }
 0x57c   : > { %4331 = vrot.lane.b32.xlu0 %v8268_v15, %s11174_s20  ;;  %v3826_v15 = vld [vmem:[#allocation30 + $0xe0] sm:$0xff] }
 0x57d   : > { %v8353_v20 = vcombine.high %v3826_v15, %v3826_v15  ;;  %v8352_v22 = vcombine.low %v3826_v15, %v3826_v15  ;;  %v9707_v15 = vld [vmem:[#allocation21 + $0x10] ss:$8 sps:$4 sm:$0xff]  }
 0x57f   : > { %v4015_v27 = vsel %vm3469_vm8, %v8352_v22, 0  ;;  %v9718_v22 = vld [vmem:[#allocation21 + $0x44] ss:$8 sps:$4 sm:$0xff]  }
 0x5c8   : > { %v12904_v16 = vpop.f32.mrb[4].mxu0 }
 0x5e2   : > { %v12844_v21 = vpop.permute.xlu0 %3299 }
 0x5e3   : > { %8310 = vmatmul.mubr.msk.bf16.vlgmr.msra.gmra.mrb[16].mxu1 %vm3260_vm14, %v12844_v21  ;;  %8312 = vmatmul.mubr.msk.bf16.vlgmr.msra.gmra.mrb[12].mxu0 %vm3260_vm14, %v12844_v21 }
 0x5e4   : > { %3592 = vmatpush1.bf16.msra.mxu0 %v9618_v17  ;;  %3633 = vmatpush1.bf16.msra.mxu1 %v9621_v45  ;;  %v9670_v17 = vld [vmem:[#allocation30 + $0x78] ss:$52 sps:$4 sm:$0xff]   ;;  %v8348_v45 = vcombine.low %v3824_v13, %v3824_v13 }
 0x5e5   : > { %3593 = vmatprep.subr.bf16.mxu0 %v9626_v18  ;;  %3634 = vmatprep.subr.bf16.mxu1 %v9629_v19  ;;  %v12906_v18 = vpop.f32.mrb[5].mxu0  ;;  %v8349_v19 = vcombine.high %v3824_v13, %v3824_v13 }
 0x5e6   : > { %v12850_v29 = vpop.permute.xlu0 %3832  ;;  %3623 = vmatprep.mubr.bf16.mxu0 %v11168_v51  ;;  %3664 = vmatprep.mubr.bf16.mxu1 %v11168_v51 }
 0x5e8   : > { %3594 = vmatpush1.bf16.msra.mxu0 %v9624_v10  ;;  %3635 = vmatpush1.bf16.msra.mxu1 %v9627_v53  ;;  %v2239_v10 = vpop.f32.mrb[6].mxu0  ;;  %v12910_v53 = vpop.f32.mrb[8].mxu1 }
 0x5e9   : > { %8313 = vmatprep.subr.msk.bf16.mxu0 %vm3469_vm8, %v8301_v24  ;;  %8315 = vmatprep.subr.msk.bf16.mxu1 %vm3469_vm8, %v8303_v26  ;;  %v8862_v24 = vpop.f32.mrb[9].mxu1  ;;  %v4003_v26 = vsel %vm3469_vm8, %v8348_v45, 0  ;;  %v9716_v10 = vld [vmem:[#allocation21 + $0x40] ss:$8 sps:$4 sm:$0xff]  }
 0x5ea   : > { %v4328_v25 = vpop.permute.xlu0 %4327  ;;  %v2481_v23 = vpop.f32.mrb[10].mxu1  ;;  %v9724_v24 = vld [vmem:[#allocation21 + $0x64] ss:$8 sps:$4 sm:$0xff]  }
 0x5eb   : > { %v4334_v28 = vsel %vm2763_vm3, %v8242_v46, %v4328_v25  ;;  %v9643_v46 = vld [vmem:[#allocation29 + $0x90] ss:$52 sps:$4 sm:$0xff]   ;;  %v9727_v23 = vld [vmem:[#allocation21 + $0x74] ss:$8 sps:$4 sm:$0xff]   ;;  %vm4469_vm3 = vcmask 1041408  }
 0x5ec   : > { %3596 = vmatpush1.bf16.msra.mxu0 %v3483_v55  ;;  %3637 = vmatpush1.bf16.msra.mxu1 %v3489_v31  ;;  %v9679_v55 = vld [vmem:[#allocation30 + $0x1c] ss:$52 sps:$4 sm:$0xff]   ;;  %v9682_v31 = vld [vmem:[#allocation30 + $0x24] ss:$52 sps:$4 sm:$0xff]   ;;  %v9680_v25 = vld [vmem:[#allocation30 + $0x20] ss:$52 sps:$4 sm:$0xff]  }
 0x5ed   : > { %3673 = vmatprep.subr.bf16.mxu0 %v9636_v32  ;;  %3714 = vmatprep.subr.bf16.mxu1 %v9639_v34  ;;  %v8863_v32 = vpop.f32.mrb[11].mxu1  ;;  %v9677_v34 = vld [vmem:[#allocation30 + $0x18] ss:$52 sps:$4 sm:$0xff]  }
 0x5ee   : > { %v12867_v41 = vpop.permute.xlu0 %4331  ;;  %v9733_v32 = vld [vmem:[#allocation21 + $0x94] ss:$8 sps:$4 sm:$0xff]  }
 0x5ef   : > { %8314 = vmatmul.mubr.msk.bf16.vlgmr.msra.gmra.mrb[16].mxu0 %vm3260_vm14, %v12844_v21  ;;  %8316 = vmatmul.mubr.msk.bf16.vlgmr.msra.gmra.mrb[20].mxu1 %vm3260_vm14, %v12844_v21  ;;  %v12874_v43 = vsel %vm4335_vm0, %v4334_v28, %v12867_v41  ;;  %4886 = vst.msk [vmem:[%s13736_s3 + $0x8] sm:$0xff] %vm4465_vm1, %v12867_v41  ;;  %v9686_v28 = vld [vmem:[#allocation30 + $0x88] ss:$52 sps:$4 sm:$0xff]  }
 0x5f0   : > { %4885 = vst [vmem:[%s13736_s3] sm:$0xff] %v12874_v43  ;;  %3674 = vmatpush1.bf16.msra.mxu0 %v9634_v35  ;;  %3715 = vmatpush1.bf16.msra.mxu1 %v9637_v36  ;;  %v9685_v35 = vld [vmem:[#allocation30 + $0x84] ss:$52 sps:$4 sm:$0xff]   ;;  %v9688_v36 = vld [vmem:[#allocation30 + $0x8c] ss:$52 sps:$4 sm:$0xff]  }
 0x5f1   : > { %3675 = vmatprep.subr.bf16.mxu0 %v9642_v39  ;;  %3716 = vmatprep.subr.bf16.mxu1 %v9645_v7  ;;  %v3827_v39 = vld [vmem:[#allocation30 + $0xe8] sm:$0xff]  ;;  %v3828_v7 = vld [vmem:[#allocation30 + $0xf0] sm:$0xff] }
 0x5f2   : > { %3705 = vmatprep.mubr.bf16.mxu0 %v11168_v51  ;;  %3746 = vmatprep.mubr.bf16.mxu1 %v11168_v51  ;;  %v8355_v42 = vcombine.high %v3827_v39, %v3827_v39 }
 0x5f4   : > { %3676 = vmatpush1.bf16.msra.mxu0 %v9640_v44  ;;  %3717 = vmatpush1.bf16.msra.mxu1 %v9643_v46  ;;  %v8357_v44 = vcombine.high %v3828_v7, %v3828_v7  ;;  %v8354_v46 = vcombine.low %v3827_v39, %v3827_v39 }
 0x5f5   : > { %8317 = vmatprep.subr.msk.bf16.mxu0 %vm3469_vm8, %v8305_v47  ;;  %8319 = vmatprep.subr.msk.bf16.mxu1 %vm3469_vm8, %v8307_v5  ;;  %v8356_v47 = vcombine.low %v3828_v7, %v3828_v7  ;;  %v9738_v7 = vld [vmem:[#allocation20 + $0x4] ss:$8 sps:$4 sm:$0xff]  }
 0x5f6   : > { %v4021_v5 = vsel %vm3469_vm8, %v8354_v46, 0  ;;  %v9739_v46 = vld [vmem:[#allocation20 + $0x10] ss:$8 sps:$4 sm:$0xff]  }
 0x5f7   : > { %v4027_v48 = vsel %vm3469_vm8, %v8356_v47, 0  ;;  %v9744_v47 = vld [vmem:[#allocation20 + $0x24] ss:$8 sps:$4 sm:$0xff]  }
 0x5f8   : > { %3678 = vmatpush1.bf16.msra.mxu0 %v3495_v49  ;;  %3719 = vmatpush1.bf16.msra.mxu1 %v3501_v54  ;;  %v9693_v49 = vld [vmem:[#allocation30 + $0x28] ss:$52 sps:$4 sm:$0xff]   ;;  %v9696_v54 = vld [vmem:[#allocation30 + $0x30] ss:$52 sps:$4 sm:$0xff]  }
 0x5f9   : > { %8884 = vmatprep.subr.bf16.mxu0 %v11170_v61  ;;  %4082 = vmatprep.subr.bf16.mxu1 %v9652_v56  ;;  %v9699_v56 = vld [vmem:[#allocation30 + $0x94] ss:$52 sps:$4 sm:$0xff]  }
 0x5fb   : > { %8318 = vmatmul.mubr.msk.bf16.vlgmr.msra.gmra.mrb[20].mxu0 %vm3260_vm14, %v12844_v21  ;;  %8320 = vmatmul.mubr.msk.bf16.vlgmr.msra.gmra.mrb[24].mxu1 %vm3260_vm14, %v12844_v21 }
 0x5fc   : > { %8885 = vmatpush3.bf16.msra.mxu0 %v9653_v12  ;;  %4083 = vmatpush1.bf16.msra.mxu1 %v9650_v8  ;;  %v3829_v8 = vld [vmem:[#allocation30 + $0xf8] sm:$0xff]  ;;  %v9697_v12 = vld [vmem:[#allocation30 + $0x90] ss:$52 sps:$4 sm:$0xff]  }
 0x5fd   : > { %8886 = vmatprep.subr.bf16.mxu0 %v11170_v61  ;;  %4084 = vmatprep.subr.bf16.mxu1 %v9656_v57  ;;  %v9700_v57 = vld [vmem:[#allocation30 + $0x98] ss:$52 sps:$4 sm:$0xff]   ;;  %v8359_v58 = vcombine.high %v3829_v8, %v3829_v8 }
 0x5fe   : > { %8890 = vmatprep.mubr.msk.bf16.mxu0 %vm11171_vm9, %v11170_v61  ;;  %4114 = vmatprep.mubr.bf16.mxu1 %v11168_v51 }
 0x600   : > { %8887 = vmatpush3.bf16.msra.mxu0 %v9657_v59  ;;  %4085 = vmatpush1.bf16.msra.mxu1 %v9654_v60  ;;  %v8358_v60 = vcombine.low %v3829_v8, %v3829_v8  ;;  %v9703_v59 = vld [vmem:[#allocation30 + $0x100] ss:$0 sps:$4 sm:$0xff]   ;;  %v9754_v8 = vld [vmem:[#allocation20 + $0x60] ss:$8 sps:$4 sm:$0xff]  }
 0x601   : > { %8888 = vmatprep.subr.bf16.mxu0 %v11170_v61  ;;  %8363 = vmatprep.subr.msk.bf16.mxu1 %vm3469_vm8, %v8351_v62  ;;  %v4039_v50 = vsel %vm3469_vm8, %v9703_v59, 0  ;;  %v9765_v59 = vld [vmem:[#allocation20 + $0x94] ss:$8 sps:$4 sm:$0xff]  }
 0x602   : > { %v4033_v62 = vsel %vm3469_vm8, %v8358_v60, 0  ;;  %v9760_v60 = vld [vmem:[#allocation20 + $0x80] ss:$8 sps:$4 sm:$0xff]  }
 0x604   : > { %8889 = vmatpush3.bf16.msra.mxu0 %v3507_v0  ;;  %4087 = vmatpush1.bf16.msra.mxu1 %v4009_v1  ;;  %v9704_v1 = vld [vmem:[#allocation21] ss:$8 sps:$4 sm:$0xff]  }
 0x605   : > { %4041 = vmatprep.subr.bf16.mxu0 %v9663_v2  ;;  %4123 = vmatprep.subr.bf16.mxu1 %v9666_v3  ;;  %v9709_v3 = vld [vmem:[#allocation21 + $0x14] ss:$8 sps:$4 sm:$0xff]  }
 0x607   : > { %8891 = vmatmul.mubr.msk.bf16.vlgmr.msra.gmra.mrb[24].mxu0 %vm3260_vm14, %v12844_v21  ;;  %8364 = vmatmul.mubr.msk.bf16.vlgmr.msra.gmra.mrb[0].mxu1 %vm3260_vm14, %v12850_v29  ;;  %v2240_v21 = vpop.f32.mrb[7].mxu0 }
 0x608   : > { %4042 = vmatpush1.bf16.msra.mxu0 %v9661_v4  ;;  %4124 = vmatpush1.bf16.msra.mxu1 %v9664_v6  ;;  %v12939_v0 = vpop.f32.mrb[8].mxu0  ;;  %v4338_v6 = vpack.c.bf16 %v12867_v41, %v12867_v41  ;;  %v9710_v41 = vld [vmem:[#allocation21 + $0x20] ss:$8 sps:$4 sm:$0xff]   ;;  %v9719_v21 = vld [vmem:[#allocation21 + $0x50] ss:$8 sps:$4 sm:$0xff]  }
 0x609   : > { %4043 = vmatprep.subr.bf16.mxu0 %v9669_v9  ;;  %4125 = vmatprep.subr.bf16.mxu1 %v9672_v11  ;;  %v12941_v2 = vpop.f32.mrb[9].mxu0  ;;  %v12945_v11 = vpop.f32.mrb[12].mxu1 }
 0x60a   : > { %4073 = vmatprep.mubr.bf16.mxu0 %v11168_v51  ;;  %4155 = vmatprep.mubr.bf16.mxu1 %v11168_v51  ;;  %v2683_v4 = vpop.f32.mrb[10].mxu0  ;;  %v8882_v13 = vpop.f32.mrb[13].mxu1 }
 0x60b   : > { %v2684_v9 = vpop.f32.mrb[11].mxu0  ;;  %v2728_v4 = vpack.c.bf16 %v12859_v37, %v12859_v37  ;;  %v9773_v13 = vld [vmem:[#allocation23 + $0x14] ss:$8 sps:$4 sm:$0xff]   ;;  %v9780_v37 = vld [vmem:[#allocation23 + $0x40] ss:$8 sps:$4 sm:$0xff]  }
 0x60c   : > { %4044 = vmatpush1.bf16.msra.mxu0 %v9667_v33  ;;  %4126 = vmatpush1.bf16.msra.mxu1 %v9670_v17  ;;  %v2723_v33 = vpop.f32.mrb[14].mxu1  ;;  %v9712_v17 = vld [vmem:[#allocation21 + $0x24] ss:$8 sps:$4 sm:$0xff]  }
 0x60d   : > { %8361 = vmatprep.subr.msk.bf16.mxu0 %vm3469_vm8, %v8349_v19  ;;  %8365 = vmatprep.subr.msk.bf16.mxu1 %vm3469_vm8, %v8353_v20  ;;  %v8883_v45 = vpop.f32.mrb[15].mxu1  ;;  %v9715_v19 = vld [vmem:[#allocation21 + $0x34] ss:$8 sps:$4 sm:$0xff]   ;;  %v9713_v20 = vld [vmem:[#allocation21 + $0x30] ss:$8 sps:$4 sm:$0xff]  }
 0x60e   : > { %v9770_v9 = vld [vmem:[#allocation23 + $0x4] ss:$8 sps:$4 sm:$0xff]   ;;  %v9779_v45 = vld [vmem:[#allocation23 + $0x34] ss:$8 sps:$4 sm:$0xff]  }
 0x60f   : > { %v9776_v33 = vld [vmem:[#allocation23 + $0x24] ss:$8 sps:$4 sm:$0xff]  }
 0x610   : > { %4046 = vmatpush1.bf16.msra.mxu0 %v4003_v26  ;;  %4128 = vmatpush1.bf16.msra.mxu1 %v4015_v27  ;;  %v9722_v26 = vld [vmem:[#allocation21 + $0x60] ss:$8 sps:$4 sm:$0xff]   ;;  %v9725_v27 = vld [vmem:[#allocation21 + $0x70] ss:$8 sps:$4 sm:$0xff]  }
 0x611   : > { %4164 = vmatprep.subr.bf16.mxu1 %v9679_v55  ;;  %4205 = vmatprep.subr.bf16.mxu0 %v9682_v31  ;;  %v9730_v55 = vld [vmem:[#allocation21 + $0x84] ss:$8 sps:$4 sm:$0xff]   ;;  %v9728_v31 = vld [vmem:[#allocation21 + $0x80] ss:$8 sps:$4 sm:$0xff]  }
 0x613   : > { %8362 = vmatmul.mubr.msk.bf16.vlgmr.msra.gmra.mrb[0].mxu0 %vm3260_vm14, %v12850_v29  ;;  %8366 = vmatmul.mubr.msk.bf16.vlgmr.msra.gmra.mrb[28].mxu1 %vm3260_vm14, %v12850_v29 }
 0x614   : > { %4165 = vmatpush1.bf16.msra.mxu1 %v9677_v34  ;;  %4206 = vmatpush1.bf16.msra.mxu0 %v9680_v25  ;;  %v4359_v34 = vld [vmem:[#allocation21 + $0xa0] sm:$0x33]  ;;  %v9731_v25 = vld [vmem:[#allocation21 + $0x90] ss:$8 sps:$4 sm:$0xff]  }
 0x615   : > { %4166 = vmatprep.subr.bf16.mxu1 %v9685_v35  ;;  %4207 = vmatprep.subr.bf16.mxu0 %v9688_v36  ;;  %v8395_v35 = vcombine.high %v4359_v34, %v4359_v34  ;;  %v8394_v36 = vcombine.low %v4359_v34, %v4359_v34 }
 0x616   : > { %4196 = vmatprep.mubr.bf16.mxu1 %v11168_v51  ;;  %4237 = vmatprep.mubr.bf16.mxu0 %v11168_v51 }
 0x617   : > { %v4471_v39 = vsel %vm4469_vm3, %v8394_v36, 0 }
 0x618   : > { %4167 = vmatpush1.bf16.msra.mxu1 %v9683_v30  ;;  %4208 = vmatpush1.bf16.msra.mxu0 %v9686_v28  ;;  %v2729_v30 = vpack.c.bf16 %v12862_v38, %v12862_v38  ;;  %v9736_v28 = vld [vmem:[#allocation20] ss:$8 sps:$4 sm:$0xff]   ;;  %v9745_v38 = vld [vmem:[#allocation20 + $0x30] ss:$8 sps:$4 sm:$0xff]  }
 0x619   : > { %8367 = vmatprep.subr.msk.bf16.mxu1 %vm3469_vm8, %v8355_v42  ;;  %8369 = vmatprep.subr.msk.bf16.mxu0 %vm3469_vm8, %v8357_v44  ;;  %v4337_v42 = vpack.c.bf16 %v12874_v43, %v12874_v43  ;;  %v9741_v44 = vld [vmem:[#allocation20 + $0x14] ss:$8 sps:$4 sm:$0xff]  }
 0x61a   : > { %v9753_v43 = vld [vmem:[#allocation20 + $0x54] ss:$8 sps:$4 sm:$0xff]  }
 0x61c   : > { %4169 = vmatpush1.bf16.msra.mxu1 %v4021_v5  ;;  %4210 = vmatpush1.bf16.msra.mxu0 %v4027_v48  ;;  %v9742_v5 = vld [vmem:[#allocation20 + $0x20] ss:$8 sps:$4 sm:$0xff]   ;;  %v9747_v48 = vld [vmem:[#allocation20 + $0x34] ss:$8 sps:$4 sm:$0xff]  }
 0x61d   : > { %4246 = vmatprep.subr.bf16.mxu0 %v9695_v40  ;;  %8894 = vmatprep.subr.bf16.mxu1 %v11170_v61  ;;  %v9750_v40 = vld [vmem:[#allocation20 + $0x44] ss:$8 sps:$4 sm:$0xff]  }
 0x61f   : > { %8368 = vmatmul.mubr.msk.bf16.vlgmr.msra.gmra.mrb[4].mxu1 %vm3260_vm14, %v12850_v29  ;;  %8370 = vmatmul.mubr.msk.bf16.vlgmr.msra.gmra.mrb[28].mxu0 %vm3260_vm14, %v12850_v29 }
 0x620   : > { %4247 = vmatpush1.bf16.msra.mxu0 %v9693_v49  ;;  %8895 = vmatpush3.bf16.msra.mxu1 %v9696_v54  ;;  %v9748_v49 = vld [vmem:[#allocation20 + $0x40] ss:$8 sps:$4 sm:$0xff]   ;;  %v9751_v54 = vld [vmem:[#allocation20 + $0x50] ss:$8 sps:$4 sm:$0xff]  }
 0x621   : > { %4248 = vmatprep.subr.bf16.mxu0 %v9699_v56  ;;  %8896 = vmatprep.subr.bf16.mxu1 %v11170_v61  ;;  %v9756_v56 = vld [vmem:[#allocation20 + $0x64] ss:$8 sps:$4 sm:$0xff]  }
 0x622   : > { %4278 = vmatprep.mubr.bf16.mxu0 %v11168_v51  ;;  %8900 = vmatprep.mubr.msk.bf16.mxu1 %vm11171_vm9, %v11170_v61 }
 0x624   : > { %4249 = vmatpush1.bf16.msra.mxu0 %v9697_v12  ;;  %8897 = vmatpush3.bf16.msra.mxu1 %v9700_v57  ;;  %v9759_v12 = vld [vmem:[#allocation20 + $0x74] ss:$8 sps:$4 sm:$0xff]   ;;  %v9757_v57 = vld [vmem:[#allocation20 + $0x70] ss:$8 sps:$4 sm:$0xff]  }
 0x625   : > { %8371 = vmatprep.subr.msk.bf16.mxu0 %vm3469_vm8, %v8359_v58  ;;  %8898 = vmatprep.subr.bf16.mxu1 %v11170_v61  ;;  %v9762_v58 = vld [vmem:[#allocation20 + $0x84] ss:$8 sps:$4 sm:$0xff]  }
 0x628   : > { %4251 = vmatpush1.bf16.msra.mxu0 %v4033_v62  ;;  %8899 = vmatpush3.bf16.msra.mxu1 %v4039_v50  ;;  %v2750_v62 = vld [vmem:[#allocation20 + $0xa0] sm:$0x33]  ;;  %v9763_v50 = vld [vmem:[#allocation20 + $0x90] ss:$8 sps:$4 sm:$0xff]  }
 0x629   : > { %4476 = vmatprep.subr.bf16.mxu0 %v9706_v63  ;;  %v8419_v63 = vcombine.high %v2750_v62, %v2750_v62  ;;  %4824 = vmatprep.subr.bf16.mxu1 %v9770_v9  ;;  %v4890_v9 = vld [vmem:[#allocation24 + $0x8] sm:$0xff] }
 0x62b   : > { %8372 = vmatmul.mubr.msk.bf16.vlgmr.msra.gmra.mrb[32].mxu0 %vm3260_vm14, %v12850_v29  ;;  %8901 = vmatmul.mubr.msk.bf16.vlgmr.msra.gmra.mrb[32].mxu1 %vm3260_vm14, %v12850_v29  ;;  %v9721_v29 = vld [vmem:[#allocation21 + $0x54] ss:$8 sps:$4 sm:$0xff]  }
 0x62c   : > { %4477 = vmatpush1.bf16.msra.mxu0 %v9704_v1  ;;  %8397 = vmatprep.mubr.msk.bf16.mxu0 %vm4465_vm1, %v4338_v6  ;;  %v8418_v1 = vcombine.low %v2750_v62, %v2750_v62  ;;  %v9768_v6 = vld [vmem:[#allocation23] ss:$8 sps:$4 sm:$0xff]  }
 0x62d   : > { %4478 = vmatprep.subr.bf16.mxu0 %v9709_v3  ;;  %4825 = vmatpush1.bf16.msra.mxu1 %v9768_v6  ;;  %v4893_v6 = vld [vmem:[#allocation24 + $0x20] sm:$0xff] }
 0x62e   : > { %v4626_v3 = vsel %vm4469_vm3, %v8418_v1, 0  ;;  %4826 = vmatprep.subr.bf16.mxu1 %v9773_v13  ;;  %v9801_v1 = vld [vmem:[#allocation23 + $0xb0] ss:$8 sps:$4 sm:$0xff]  }
 0x630   : > { %4479 = vmatpush1.bf16.msra.mxu0 %v9707_v15  ;;  %v9771_v15 = vld [vmem:[#allocation23 + $0x10] ss:$8 sps:$4 sm:$0xff]  }
 0x631   : > { %4480 = vmatprep.subr.bf16.mxu0 %v9712_v17  ;;  %4827 = vmatpush1.bf16.msra.mxu1 %v9771_v15  ;;  %v9774_v17 = vld [vmem:[#allocation23 + $0x20] ss:$8 sps:$4 sm:$0xff]  }
 0x632   : > { %4828 = vmatprep.subr.bf16.mxu1 %v9776_v33 }
 0x634   : > { %4481 = vmatpush1.bf16.msra.mxu0 %v9710_v41  ;;  %v9777_v41 = vld [vmem:[#allocation23 + $0x30] ss:$8 sps:$4 sm:$0xff]  }
 0x635   : > { %4482 = vmatprep.subr.bf16.mxu0 %v9715_v19  ;;  %4829 = vmatpush1.bf16.msra.mxu1 %v9774_v17  ;;  %v9782_v19 = vld [vmem:[#allocation23 + $0x44] ss:$8 sps:$4 sm:$0xff]  }
 0x636   : > { %4830 = vmatprep.subr.bf16.mxu1 %v9779_v45  ;;  %v4894_v17 = vld [vmem:[#allocation24 + $0x28] sm:$0xff]  ;;  %v4897_v45 = vld [vmem:[#allocation24 + $0x40] sm:$0xff] }
 0x638   : > { %4483 = vmatpush1.bf16.msra.mxu0 %v9713_v20  ;;  %v9785_v20 = vld [vmem:[#allocation23 + $0x54] ss:$8 sps:$4 sm:$0xff]  }
 0x639   : > { %4484 = vmatprep.subr.bf16.mxu0 %v9718_v22  ;;  %4831 = vmatpush1.bf16.msra.mxu1 %v9777_v41  ;;  %v9783_v22 = vld [vmem:[#allocation23 + $0x50] ss:$8 sps:$4 sm:$0xff]   ;;  %v4901_v41 = vld [vmem:[#allocation24 + $0x60] sm:$0xff] }
 0x63a   : > { %4832 = vmatprep.subr.bf16.mxu1 %v9782_v19 }
 0x63c   : > { %4485 = vmatpush1.bf16.msra.mxu0 %v9716_v10  ;;  %v9788_v10 = vld [vmem:[#allocation23 + $0x64] ss:$8 sps:$4 sm:$0xff]  }
 0x63d   : > { %4486 = vmatprep.subr.bf16.mxu0 %v9721_v29  ;;  %4833 = vmatpush1.bf16.msra.mxu1 %v9780_v37  ;;  %v9786_v29 = vld [vmem:[#allocation23 + $0x60] ss:$8 sps:$4 sm:$0xff]   ;;  %v8453_v37 = vcombine.low %v4890_v9, %v4894_v17 }
 0x63e   : > { %4834 = vmatprep.subr.bf16.mxu1 %v9785_v20  ;;  %v8454_v20 = vcombine.high %v4890_v9, %v4894_v17  ;;  %v4906_v9 = vld [vmem:[#allocation24 + $0x88] sm:$0xff] }
 0x640   : > { %4487 = vmatpush1.bf16.msra.mxu0 %v9719_v21  ;;  %v9791_v21 = vld [vmem:[#allocation23 + $0x74] ss:$8 sps:$4 sm:$0xff]  }
 0x641   : > { %4488 = vmatprep.subr.bf16.mxu0 %v9724_v24  ;;  %4835 = vmatpush1.bf16.msra.mxu1 %v9783_v22  ;;  %v9789_v24 = vld [vmem:[#allocation23 + $0x70] ss:$8 sps:$4 sm:$0xff]   ;;  %v8460_v22 = vcombine.high %v4897_v45, %v4901_v41 }
 0x642   : > { %4836 = vmatprep.subr.bf16.mxu1 %v9788_v10 }
 0x644   : > { %4489 = vmatpush1.bf16.msra.mxu0 %v9722_v26 }
 0x645   : > { %4490 = vmatprep.subr.bf16.mxu0 %v9727_v23  ;;  %4837 = vmatpush1.bf16.msra.mxu1 %v9786_v29  ;;  %v8459_v29 = vcombine.low %v4897_v45, %v4901_v41  ;;  %v4913_v41 = vld [vmem:[#allocation24 + $0xc0] sm:$0xff] }
 0x646   : > { %4838 = vmatprep.subr.bf16.mxu1 %v9791_v21  ;;  %v4905_v21 = vld [vmem:[#allocation24 + $0x80] sm:$0xff] }
 0x648   : > { %4491 = vmatpush1.bf16.msra.mxu0 %v9725_v27 }
 0x649   : > { %4492 = vmatprep.subr.bf16.mxu0 %v9730_v55  ;;  %4839 = vmatpush1.bf16.msra.mxu1 %v9789_v24  ;;  %v4909_v24 = vld [vmem:[#allocation24 + $0xa0] sm:$0xff] }
 0x64c   : > { %4493 = vmatpush1.bf16.msra.mxu0 %v9728_v31 }
 0x64d   : > { %4494 = vmatprep.subr.bf16.mxu0 %v9733_v32 }
 0x650   : > { %4495 = vmatpush1.bf16.msra.mxu0 %v9731_v25 }
 0x651   : > { %8396 = vmatprep.subr.msk.bf16.mxu0 %vm4469_vm3, %v8395_v35 }
 0x654   : > { %4497 = vmatpush1.bf16.msra.mxu0 %v4471_v39 }
 0x655   : > { %4631 = vmatprep.subr.bf16.mxu0 %v9738_v7 }
 0x657   : > { %4509 = vmatmul.mubr.bf16.vlgmr.msra.gmra.mrb[36].mxu0 %v4337_v42 }
 0x658   : > { %4632 = vmatpush1.bf16.msra.mxu0 %v9736_v28  ;;  %8421 = vmatprep.mubr.msk.bf16.mxu0 %vm4465_vm1, %v2729_v30 }
 0x659   : > { %4633 = vmatprep.subr.bf16.mxu0 %v9741_v44 }
 0x65c   : > { %4634 = vmatpush1.bf16.msra.mxu0 %v9739_v46 }
 0x65d   : > { %4635 = vmatprep.subr.bf16.mxu0 %v9744_v47 }
 0x660   : > { %4636 = vmatpush1.bf16.msra.mxu0 %v9742_v5 }
 0x661   : > { %4637 = vmatprep.subr.bf16.mxu0 %v9747_v48 }
 0x664   : > { %4638 = vmatpush1.bf16.msra.mxu0 %v9745_v38 }
 0x665   : > { %4639 = vmatprep.subr.bf16.mxu0 %v9750_v40 }
 0x668   : > { %4640 = vmatpush1.bf16.msra.mxu0 %v9748_v49 }
 0x669   : > { %4641 = vmatprep.subr.bf16.mxu0 %v9753_v43 }
 0x66c   : > { %4642 = vmatpush1.bf16.msra.mxu0 %v9751_v54  ;;  %v9794_v54 = vld [vmem:[#allocation23 + $0x84] ss:$8 sps:$4 sm:$0xff]  }
 0x66d   : > { %4643 = vmatprep.subr.bf16.mxu0 %v9756_v56  ;;  %v9792_v56 = vld [vmem:[#allocation23 + $0x80] ss:$8 sps:$4 sm:$0xff]   ;;  %4840 = vmatprep.subr.bf16.mxu1 %v9794_v54 }
 0x66e   : > { %4841 = vmatpush1.bf16.msra.mxu1 %v9792_v56 }
 0x670   : > { %4644 = vmatpush1.bf16.msra.mxu0 %v9754_v8  ;;  %v9797_v8 = vld [vmem:[#allocation23 + $0x94] ss:$8 sps:$4 sm:$0xff]  }
 0x671   : > { %4645 = vmatprep.subr.bf16.mxu0 %v9759_v12  ;;  %v9795_v12 = vld [vmem:[#allocation23 + $0x90] ss:$8 sps:$4 sm:$0xff]   ;;  %4842 = vmatprep.subr.bf16.mxu1 %v9797_v8 }
 0x672   : > { %4843 = vmatpush1.bf16.msra.mxu1 %v9795_v12 }
 0x674   : > { %4646 = vmatpush1.bf16.msra.mxu0 %v9757_v57  ;;  %v9800_v57 = vld [vmem:[#allocation23 + $0xa4] ss:$8 sps:$4 sm:$0xff]  }
 0x675   : > { %4647 = vmatprep.subr.bf16.mxu0 %v9762_v58  ;;  %4844 = vmatprep.subr.bf16.mxu1 %v9800_v57 }
 0x678   : > { %4648 = vmatpush1.bf16.msra.mxu0 %v9760_v60 }
 0x679   : > { %4649 = vmatprep.subr.bf16.mxu0 %v9765_v59  ;;  %v9798_v59 = vld [vmem:[#allocation23 + $0xa0] ss:$8 sps:$4 sm:$0xff]  }
 0x67a   : > { %4845 = vmatpush1.bf16.msra.mxu1 %v9798_v59 }
 0x67c   : > { %4650 = vmatpush1.bf16.msra.mxu0 %v9763_v50  ;;  %v9803_v50 = vld [vmem:[#allocation23 + $0xb4] ss:$8 sps:$4 sm:$0xff]  }
 0x67d   : > { %8420 = vmatprep.subr.msk.bf16.mxu0 %vm4469_vm3, %v8419_v63  ;;  %4846 = vmatprep.subr.bf16.mxu1 %v9803_v50  ;;  %v4902_v50 = vld [vmem:[#allocation24 + $0x68] sm:$0xff] }
 0x67e   : > { %4847 = vmatpush1.bf16.msra.mxu1 %v9801_v1 }
 0x67f   : > { %5509 = vmatprep.subr.bf16.mxu1 %v8454_v20  ;;  %v4914_v20 = vld [vmem:[#allocation24 + $0xc8] sm:$0xff] }
 0x680   : > { %4652 = vmatpush1.bf16.msra.mxu0 %v4626_v3 }
 0x683   : > { %4664 = vmatmul.mubr.bf16.vlgmr.msra.gmra.mrb[36].mxu0 %v2728_v4  ;;  %v4889_v4 = vld [vmem:[#allocation24] sm:$0xff] }
 0x684   : > { %v8451_v15 = vcombine.low %v4889_v4, %v4893_v6  ;;  %v8452_v33 = vcombine.high %v4889_v4, %v4893_v6 }
 0x686   : > { %5468 = vmatprep.subr.bf16.mxu0 %v8452_v33 }
 0x687   : > { %5469 = vmatpush1.bf16.msra.mxu0 %v8451_v15  ;;  %v4910_v15 = vld [vmem:[#allocation24 + $0xa8] sm:$0xff] }
 0x688   : > { %5470 = vmatprep.subr.bf16.mxu0 %v8460_v22  ;;  %v8470_v17 = vcombine.high %v4906_v9, %v4910_v15  ;;  %v8469_v45 = vcombine.low %v4906_v9, %v4910_v15  ;;  %v4942_v15 = vld [vmem:[#allocation24 + $0x1a8] sm:$0xff] }
 0x68b   : > { %5471 = vmatpush1.bf16.msra.mxu0 %v8459_v29 }
 0x6b6   : > { %v12963_v26 = vpop.f32.mrb[16].mxu1  ;;  %v12965_v23 = vpop.f32.mrb[12].mxu0 }
 0x6b7   : > { %v12967_v27 = vpop.f32.mrb[17].mxu1  ;;  %v12969_v55 = vpop.f32.mrb[13].mxu0 }
 0x6b8   : > { %v3547_v31 = vpop.f32.mrb[18].mxu1  ;;  %v3588_v32 = vpop.f32.mrb[14].mxu0 }
 0x6b9   : > { %v3548_v34 = vpop.f32.mrb[19].mxu1  ;;  %v3589_v25 = vpop.f32.mrb[15].mxu0  ;;  %v8468_v31 = vcombine.high %v4905_v21, %v4909_v24  ;;  %v8467_v32 = vcombine.low %v4905_v21, %v4909_v24 }
 0x6bb   : > { %5472 = vmatprep.subr.bf16.mxu0 %v8468_v31  ;;  %v4921_v31 = vld [vmem:[#allocation24 + $0x100] sm:$0xff] }
 0x6bc   : > { %5473 = vmatpush1.bf16.msra.mxu0 %v8467_v32  ;;  %v4922_v32 = vld [vmem:[#allocation24 + $0x108] sm:$0xff] }
 0x6c2   : > { %v12971_v35 = vpop.f32.mrb[16].mxu0  ;;  %v12973_v36 = vpop.f32.mrb[20].mxu1 }
 0x6c3   : > { %v12975_v39 = vpop.f32.mrb[17].mxu0  ;;  %v12977_v7 = vpop.f32.mrb[21].mxu1 }
 0x6c4   : > { %v3629_v30 = vpop.f32.mrb[18].mxu0  ;;  %v3670_v28 = vpop.f32.mrb[22].mxu1 }
 0x6c5   : > { %v3630_v42 = vpop.f32.mrb[19].mxu0  ;;  %v3671_v44 = vpop.f32.mrb[23].mxu1 }
 0x6ce   : > { %v12979_v46 = vpop.f32.mrb[20].mxu0  ;;  %v12981_v47 = vpop.f32.mrb[24].mxu1 }
 0x6cf   : > { %v12983_v5 = vpop.f32.mrb[21].mxu0  ;;  %v12985_v48 = vpop.f32.mrb[25].mxu1 }
 0x6d0   : > { %v3711_v38 = vpop.f32.mrb[22].mxu0  ;;  %v3752_v40 = vpop.f32.mrb[26].mxu1 }
 0x6d1   : > { %v3712_v49 = vpop.f32.mrb[23].mxu0  ;;  %v3753_v43 = vpop.f32.mrb[27].mxu1 }
 0x6da   : > { %v12987_v58 = vpop.f32.mrb[24].mxu0 }
 0x6db   : > { %v8892_v60 = vpop.f32.mrb[25].mxu0 }
 0x6dc   : > { %v3792_v62 = vpop.f32.mrb[26].mxu0 }
 0x6dd   : > { %v8893_v63 = vpop.f32.mrb[27].mxu0  ;;  %v4898_v62 = vld [vmem:[#allocation24 + $0x48] sm:$0xff] }
 0x6de   : > { %v8462_v6 = vcombine.high %v4898_v62, %v4902_v50  ;;  %v8461_v33 = vcombine.low %v4898_v62, %v4902_v50 }
 0x6e6   : > { %v12989_v3 = vpop.f32.mrb[28].mxu1 }
 0x6e7   : > { %v12991_v13 = vpop.f32.mrb[29].mxu1 }
 0x6e8   : > { %v4161_v19 = vpop.f32.mrb[30].mxu1 }
 0x6e9   : > { %v4162_v10 = vpop.f32.mrb[31].mxu1  ;;  %v4917_v19 = vld [vmem:[#allocation24 + $0xe0] sm:$0xff] }
 0x6ea   : > { %v8476_v22 = vcombine.high %v4913_v41, %v4917_v19  ;;  %v4918_v10 = vld [vmem:[#allocation24 + $0xe8] sm:$0xff]  ;;  %v8475_v29 = vcombine.low %v4913_v41, %v4917_v19  ;;  %v4945_v41 = vld [vmem:[#allocation24 + $0x1c0] sm:$0xff] }
 0x6eb   : > { %v8477_v21 = vcombine.low %v4914_v20, %v4918_v10  ;;  %v8478_v24 = vcombine.high %v4914_v20, %v4918_v10  ;;  %v4949_v19 = vld [vmem:[#allocation24 + $0x1e0] sm:$0xff]  ;;  %v4946_v20 = vld [vmem:[#allocation24 + $0x1c8] sm:$0xff] }
 0x6ec   : > { %5474 = vmatprep.subr.bf16.mxu0 %v8476_v22  ;;  %v8508_v22 = vcombine.high %v4945_v41, %v4949_v19  ;;  %v4950_v10 = vld [vmem:[#allocation24 + $0x1e8] sm:$0xff] }
 0x6ed   : > { %5475 = vmatpush1.bf16.msra.mxu0 %v8475_v29  ;;  %v8507_v29 = vcombine.low %v4945_v41, %v4949_v19  ;;  %v4978_v41 = vld [vmem:[#allocation24 + $0x2c8] sm:$0xff] }
 0x6ee   : > { %v4982_v19 = vld [vmem:[#allocation24 + $0x2e8] sm:$0xff] }
 0x6f2   : > { %v12993_v34 = vpop.f32.mrb[28].mxu0 }
 0x6f3   : > { %v12995_v25 = vpop.f32.mrb[29].mxu0 }
 0x6f4   : > { %v4243_v30 = vpop.f32.mrb[30].mxu0 }
 0x6f5   : > { %v4244_v28 = vpop.f32.mrb[31].mxu0 }
 0x6f6   : > { %v4926_v28 = vld [vmem:[#allocation24 + $0x128] sm:$0xff] }
 0x6fe   : > { %v12997_v42 = vpop.f32.mrb[32].mxu0  ;;  %v12999_v44 = vpop.f32.mrb[32].mxu1 }
 0x6ff   : > { %v13001_v38 = vpop.f32.mrb[33].mxu0  ;;  %v8902_v40 = vpop.f32.mrb[33].mxu1 }
 0x700   : > { %v4284_v49 = vpop.f32.mrb[34].mxu0  ;;  %v4324_v43 = vpop.f32.mrb[34].mxu1 }
 0x701   : > { %v4285_v54 = vpop.f32.mrb[35].mxu0  ;;  %v8903_v56 = vpop.f32.mrb[35].mxu1  ;;  %v8485_v49 = vcombine.low %v4922_v32, %v4926_v28  ;;  %v8486_v43 = vcombine.high %v4922_v32, %v4926_v28  ;;  %v4954_v32 = vld [vmem:[#allocation24 + $0x208] sm:$0xff] }
 0x702   : > { %v4929_v54 = vld [vmem:[#allocation24 + $0x140] sm:$0xff] }
 0x703   : > { %v4933_v56 = vld [vmem:[#allocation24 + $0x160] sm:$0xff] }
 0x756   : > { %v4665_v8 = vpop.f32.mrb[36].mxu0 }
 0x757   : > { %9986 = vtanh.f32 %v4665_v8  ;;  %v4667_v12 = vpop.f32.mrb[37].mxu0  ;;  %v4930_v8 = vld [vmem:[#allocation24 + $0x148] sm:$0xff] }
 0x758   : > { %9988 = vtanh.f32 %v4667_v12  ;;  %v4669_v57 = vpop.f32.mrb[38].mxu0  ;;  %v8492_v12 = vcombine.high %v4929_v54, %v4933_v56 }
 0x759   : > { %v4670_v60 = vpop.f32.mrb[39].mxu0  ;;  %v4934_v57 = vld [vmem:[#allocation24 + $0x168] sm:$0xff] }
 0x75a   : > { %v8491_v60 = vcombine.low %v4929_v54, %v4933_v56  ;;  %v8493_v62 = vcombine.low %v4930_v8, %v4934_v57  ;;  %v8494_v50 = vcombine.high %v4930_v8, %v4934_v57  ;;  %v4966_v57 = vld [vmem:[#allocation24 + $0x268] sm:$0xff] }
 0x761   : > { %v13003_v59 = vpop.eup %9986 }
 0x762   : > { %v13005_v63 = vpop.eup %9988  ;;  %v4674_v4 = vpack.c.bf16 %v13003_v59, %v13003_v59 }
 0x763   : > { %v4675_v1 = vpack.c.bf16 %v13005_v63, %v13005_v63 }
 0x765   : > { %8446 = vmatprep.mubr.msk.bf16.mxu1 %vm4820_vm2, %v4675_v1  ;;  %v4937_v1 = vld [vmem:[#allocation24 + $0x180] sm:$0xff] }
 0x766   : > { %4857 = vmatmul.mubr.bf16.vlgmr.msra.gmra.mrb[36].mxu1 %v4674_v4  ;;  %v4941_v4 = vld [vmem:[#allocation24 + $0x1a0] sm:$0xff] }
 0x767   : > { %5510 = vmatpush1.bf16.msra.mxu1 %v8453_v37  ;;  %v4925_v37 = vld [vmem:[#allocation24 + $0x120] sm:$0xff]  ;;  %v8500_v9 = vcombine.high %v4937_v1, %v4941_v4 }
 0x768   : > { %5511 = vmatprep.subr.bf16.mxu1 %v8462_v6  ;;  %v8484_v30 = vcombine.high %v4921_v31, %v4925_v37  ;;  %v8483_v40 = vcombine.low %v4921_v31, %v4925_v37  ;;  %v4938_v6 = vld [vmem:[#allocation24 + $0x188] sm:$0xff]  ;;  %v4953_v31 = vld [vmem:[#allocation24 + $0x200] sm:$0xff] }
 0x769   : > { %v4957_v37 = vld [vmem:[#allocation24 + $0x220] sm:$0xff] }
 0x76a   : > { %5476 = vmatprep.subr.bf16.mxu0 %v8484_v30  ;;  %v8515_v30 = vcombine.low %v4953_v31, %v4957_v37  ;;  %v8516_v28 = vcombine.high %v4953_v31, %v4957_v37  ;;  %v4891_v31 = vld [vmem:[#allocation24 + $0x10] sm:$0xff] }
 0x76b   : > { %5512 = vmatpush1.bf16.msra.mxu1 %v8461_v33  ;;  %5477 = vmatpush1.bf16.msra.mxu0 %v8483_v40  ;;  %v8499_v33 = vcombine.low %v4937_v1, %v4941_v4  ;;  %v4958_v40 = vld [vmem:[#allocation24 + $0x228] sm:$0xff]  ;;  %v4895_v37 = vld [vmem:[#allocation24 + $0x30] sm:$0xff] }
 0x76c   : > { %5513 = vmatprep.subr.bf16.mxu1 %v8470_v17  ;;  %5478 = vmatprep.subr.bf16.mxu0 %v8492_v12  ;;  %v8501_v17 = vcombine.low %v4938_v6, %v4942_v15  ;;  %v8517_v54 = vcombine.low %v4954_v32, %v4958_v40  ;;  %v8518_v56 = vcombine.high %v4954_v32, %v4958_v40  ;;  %v4962_v12 = vld [vmem:[#allocation24 + $0x248] sm:$0xff]  ;;  %v4892_v32 = vld [vmem:[#allocation24 + $0x18] sm:$0xff] }
 0x76d   : > { %v4970_v1 = vld [vmem:[#allocation24 + $0x288] sm:$0xff]  ;;  %v8455_v40 = vcombine.low %v4891_v31, %v4895_v37 }
 0x76e   : > { %v4974_v4 = vld [vmem:[#allocation24 + $0x2a8] sm:$0xff] }
 0x76f   : > { %5514 = vmatpush1.bf16.msra.mxu1 %v8469_v45  ;;  %5479 = vmatpush1.bf16.msra.mxu0 %v8491_v60  ;;  %v8502_v45 = vcombine.high %v4938_v6, %v4942_v15  ;;  %v4969_v60 = vld [vmem:[#allocation24 + $0x280] sm:$0xff] }
 0x770   : > { %5515 = vmatprep.subr.bf16.mxu1 %v8478_v24  ;;  %5480 = vmatprep.subr.bf16.mxu0 %v8500_v9  ;;  %v8510_v24 = vcombine.high %v4946_v20, %v4950_v10  ;;  %v8525_v9 = vcombine.low %v4962_v12, %v4966_v57 }
 0x773   : > { %5516 = vmatpush1.bf16.msra.mxu1 %v8477_v21  ;;  %5481 = vmatpush1.bf16.msra.mxu0 %v8499_v33  ;;  %v8509_v21 = vcombine.low %v4946_v20, %v4950_v10  ;;  %v8534_v33 = vcombine.high %v4970_v1, %v4974_v4 }
 0x774   : > { %5517 = vmatprep.subr.bf16.mxu1 %v8486_v43  ;;  %5482 = vmatprep.subr.bf16.mxu0 %v8508_v22  ;;  %v4965_v43 = vld [vmem:[#allocation24 + $0x260] sm:$0xff]  ;;  %v8533_v22 = vcombine.low %v4970_v1, %v4974_v4 }
 0x777   : > { %5518 = vmatpush1.bf16.msra.mxu1 %v8485_v49  ;;  %5483 = vmatpush1.bf16.msra.mxu0 %v8507_v29  ;;  %v4961_v49 = vld [vmem:[#allocation24 + $0x240] sm:$0xff]  ;;  %v8542_v29 = vcombine.high %v4978_v41, %v4982_v19 }
 0x778   : > { %5519 = vmatprep.subr.bf16.mxu1 %v8494_v50  ;;  %v8524_v8 = vcombine.high %v4961_v49, %v4965_v43  ;;  %5484 = vmatprep.subr.bf16.mxu0 %v8516_v28  ;;  %v4973_v50 = vld [vmem:[#allocation24 + $0x2a0] sm:$0xff]  ;;  %v8523_v6 = vcombine.low %v4961_v49, %v4965_v43  ;;  %v4896_v28 = vld [vmem:[#allocation24 + $0x38] sm:$0xff] }
 0x779   : > { %v8532_v15 = vcombine.high %v4969_v60, %v4973_v50  ;;  %v8531_v20 = vcombine.low %v4969_v60, %v4973_v50  ;;  %v8457_v49 = vcombine.low %v4892_v32, %v4896_v28  ;;  %v8458_v43 = vcombine.high %v4892_v32, %v4896_v28  ;;  %v4907_v32 = vld [vmem:[#allocation24 + $0x90] sm:$0xff] }
 0x77a   : > { %v4911_v28 = vld [vmem:[#allocation24 + $0xb0] sm:$0xff] }
 0x77b   : > { %5520 = vmatpush1.bf16.msra.mxu1 %v8493_v62  ;;  %v8526_v62 = vcombine.high %v4962_v12, %v4966_v57  ;;  %5485 = vmatpush1.bf16.msra.mxu0 %v8515_v30  ;;  %v8456_v30 = vcombine.high %v4891_v31, %v4895_v37 }
 0x77c   : > { %5521 = vmatprep.subr.bf16.mxu1 %v8502_v45  ;;  %5486 = vmatprep.subr.bf16.mxu0 %v8524_v8  ;;  %v4981_v45 = vld [vmem:[#allocation24 + $0x2e0] sm:$0xff] }
 0x77f   : > { %5522 = vmatpush1.bf16.msra.mxu1 %v8501_v17  ;;  %v4977_v17 = vld [vmem:[#allocation24 + $0x2c0] sm:$0xff]  ;;  %5487 = vmatpush1.bf16.msra.mxu0 %v8523_v6 }
 0x780   : > { %5523 = vmatprep.subr.bf16.mxu1 %v8510_v24  ;;  %5488 = vmatprep.subr.bf16.mxu0 %v8532_v15  ;;  %v8540_v10 = vcombine.high %v4977_v17, %v4981_v45  ;;  %v8541_v24 = vcombine.low %v4978_v41, %v4982_v19 }
 0x783   : > { %5524 = vmatpush1.bf16.msra.mxu1 %v8509_v21  ;;  %5489 = vmatpush1.bf16.msra.mxu0 %v8531_v20  ;;  %v8539_v21 = vcombine.low %v4977_v17, %v4981_v45 }
 0x784   : > { %5525 = vmatprep.subr.bf16.mxu1 %v8518_v56  ;;  %5490 = vmatprep.subr.bf16.mxu0 %v8540_v10  ;;  %v4899_v10 = vld [vmem:[#allocation24 + $0x50] sm:$0xff] }
 0x787   : > { %5526 = vmatpush1.bf16.msra.mxu1 %v8517_v54  ;;  %5491 = vmatpush1.bf16.msra.mxu0 %v8539_v21  ;;  %v4900_v21 = vld [vmem:[#allocation24 + $0x58] sm:$0xff] }
 0x788   : > { %5527 = vmatprep.subr.bf16.mxu1 %v8526_v62  ;;  %5591 = vmatprep.subr.bf16.mxu0 %v8458_v43  ;;  %v4912_v43 = vld [vmem:[#allocation24 + $0xb8] sm:$0xff] }
 0x78b   : > { %5528 = vmatpush1.bf16.msra.mxu1 %v8525_v9  ;;  %v1738_v9 = vld [vmem:[%s11921_s18 + $0x18] sm:$0xff] }
 0x78c   : > { %5529 = vmatprep.subr.bf16.mxu1 %v8534_v33  ;;  %v1739_v33 = vld [vmem:[%s11921_s18 + $0x20] sm:$0xff] }
 0x78f   : > { %5530 = vmatpush1.bf16.msra.mxu1 %v8533_v22 }
 0x790   : > { %5531 = vmatprep.subr.bf16.mxu1 %v8542_v29  ;;  %v4903_v29 = vld [vmem:[#allocation24 + $0x70] sm:$0xff] }
 0x793   : > { %5532 = vmatpush1.bf16.msra.mxu1 %v8541_v24  ;;  %v4904_v24 = vld [vmem:[#allocation24 + $0x78] sm:$0xff] }
 0x794   : > { %5550 = vmatprep.subr.bf16.mxu1 %v8456_v30  ;;  %v8464_v30 = vcombine.high %v4899_v10, %v4903_v29 }
 0x839   : > { %v4858_v54 = vpop.f32.mrb[36].mxu1 }
 0x83a   : > { %v8447_v56 = vmul.f32 -1.442695, %v4858_v54  ;;  %v4860_v8 = vpop.f32.mrb[37].mxu1  ;;  %v8463_v54 = vcombine.low %v4899_v10, %v4903_v29  ;;  %v4932_v10 = vld [vmem:[#allocation24 + $0x158] sm:$0xff] }
 0x83b   : > { %v8448_v12 = vmul.f32 -1.442695, %v4860_v8  ;;  %v4862_v57 = vpop.f32.mrb[38].mxu1  ;;  %v8472_v8 = vcombine.high %v4907_v32, %v4911_v28  ;;  %v4936_v29 = vld [vmem:[#allocation24 + $0x178] sm:$0xff] }
 0x83c   : > { %9990 = vpow2.f32 %v8447_v56  ;;  %v4863_v60 = vpop.f32.mrb[39].mxu1  ;;  %v8465_v56 = vcombine.low %v4900_v21, %v4904_v24  ;;  %v4915_v57 = vld [vmem:[#allocation24 + $0xd0] sm:$0xff] }
 0x83d   : > { %9992 = vpow2.f32 %v8448_v12  ;;  %v4919_v60 = vld [vmem:[#allocation24 + $0xf0] sm:$0xff] }
 0x846   : > { %v9991_v62 = vpop.eup %9990 }
 0x847   : > { %v9993_v50 = vpop.eup %9992  ;;  %v4871_v1 = vadd.f32 1.0, %v9991_v62  ;;  %v4916_v62 = vld [vmem:[#allocation24 + $0xd8] sm:$0xff] }
 0x848   : > { %v4872_v4 = vadd.f32 1.0, %v9993_v50  ;;  %v4920_v50 = vld [vmem:[#allocation24 + $0xf8] sm:$0xff] }
 0x849   : > { %9994 = vrcp.f32 %v4871_v1  ;;  %v8471_v1 = vcombine.low %v4907_v32, %v4911_v28  ;;  %v8498_v32 = vcombine.high %v4932_v10, %v4936_v29  ;;  %v4940_v28 = vld [vmem:[#allocation24 + $0x198] sm:$0xff] }
 0x84a   : > { %9996 = vrcp.f32 %v4872_v4 }
 0x853   : > { %v9995_v6 = vpop.eup %9994 }
 0x854   : > { %v9997_v15 = vpop.eup %9996  ;;  %v4877_v17 = vmul.f32 %v9995_v6, %v13003_v59  ;;  %v8466_v59 = vcombine.high %v4900_v21, %v4904_v24  ;;  %v4923_v6 = vld [vmem:[#allocation24 + $0x110] sm:$0xff] }
 0x855   : > { %v4878_v45 = vmul.f32 %v9997_v15, %v13005_v63  ;;  %v4908_v63 = vld [vmem:[#allocation24 + $0x98] sm:$0xff] }
 0x856   : > { %v4879_v41 = vadd.f32 %v4877_v17, %v1738_v9  ;;  %v8474_v12 = vcombine.high %v4908_v63, %v4912_v43  ;;  %v8473_v4 = vcombine.low %v4908_v63, %v4912_v43  ;;  %v4927_v9 = vld [vmem:[#allocation24 + $0x130] sm:$0xff]  ;;  %v4924_v15 = vld [vmem:[#allocation24 + $0x118] sm:$0xff]  ;;  %v8479_v17 = vcombine.low %v4915_v57, %v4919_v60 }
 0x857   : > { %v4880_v19 = vadd.f32 %v4878_v45, %v1739_v33  ;;  %v4928_v33 = vld [vmem:[#allocation24 + $0x138] sm:$0xff]  ;;  %v8481_v45 = vcombine.low %v4916_v62, %v4920_v50  ;;  %v8487_v21 = vcombine.low %v4923_v6, %v4927_v9 }
 0x858   : > { %v8449_v20 = vclamps-f32 %v4879_v41, 1.0  ;;  %v8488_v41 = vcombine.high %v4923_v6, %v4927_v9  ;;  %v8489_v24 = vcombine.low %v4924_v15, %v4928_v33  ;;  %v4944_v63 = vld [vmem:[#allocation24 + $0x1b8] sm:$0xff]  ;;  %v4959_v6 = vld [vmem:[#allocation24 + $0x230] sm:$0xff] }
 0x859   : > { %v8450_v22 = vclamps-f32 %v4880_v19, 1.0  ;;  %v8490_v19 = vcombine.high %v4924_v15, %v4928_v33  ;;  %v4956_v9 = vld [vmem:[#allocation24 + $0x218] sm:$0xff] }
 0x85a   : > { %v13016_v37 = vpack.c.bf16 %v8449_v20, %v8449_v20  ;;  %v4931_v20 = vld [vmem:[#allocation24 + $0x150] sm:$0xff]  ;;  %v4960_v15 = vld [vmem:[#allocation24 + $0x238] sm:$0xff] }
 0x85b   : > { %v4888_v31 = vpack.c.bf16 %v8450_v22, %v8450_v22  ;;  %v4935_v22 = vld [vmem:[#allocation24 + $0x170] sm:$0xff] }
 0x85c   : > { %v8495_v43 = vcombine.low %v4931_v20, %v4935_v22 }
 0x85d   : > { %8547 = vmatprep.mubr.msk.bf16.mxu0 %vm4820_vm2, %v4888_v31  ;;  %8548 = vmatprep.mubr.msk.bf16.mxu1 %vm4820_vm2, %v4888_v31 }
 0x85e   : > { %5501 = vmatmul.mubr.bf16.vlgmr.msra.gmra.mrb[0].mxu0 %v13016_v37  ;;  %5542 = vmatmul.mubr.bf16.vlgmr.msra.gmra.mrb[0].mxu1 %v13016_v37 }
 0x85f   : > { %5551 = vmatpush1.bf16.msra.mxu1 %v8455_v40  ;;  %5592 = vmatpush1.bf16.msra.mxu0 %v8457_v49  ;;  %v8480_v40 = vcombine.high %v4915_v57, %v4919_v60  ;;  %v8482_v49 = vcombine.high %v4916_v62, %v4920_v50  ;;  %v4951_v57 = vld [vmem:[#allocation24 + $0x1f0] sm:$0xff]  ;;  %v4948_v60 = vld [vmem:[#allocation24 + $0x1d8] sm:$0xff] }
 0x860   : > { %8549 = vmatprep.mubr.msk.bf16.mxu1 %vm4820_vm2, %v4888_v31  ;;  %8550 = vmatprep.mubr.msk.bf16.mxu0 %vm4820_vm2, %v4888_v31  ;;  %v8496_v31 = vcombine.high %v4931_v20, %v4935_v22  ;;  %v4952_v62 = vld [vmem:[#allocation24 + $0x1f8] sm:$0xff]  ;;  %v4967_v20 = vld [vmem:[#allocation24 + $0x270] sm:$0xff] }
 0x861   : > { %5552 = vmatprep.subr.bf16.mxu1 %v8464_v30  ;;  %5593 = vmatprep.subr.bf16.mxu0 %v8466_v59  ;;  %v4939_v30 = vld [vmem:[#allocation24 + $0x190] sm:$0xff]  ;;  %v4964_v22 = vld [vmem:[#allocation24 + $0x258] sm:$0xff] }
 0x862   : > { %v4943_v59 = vld [vmem:[#allocation24 + $0x1b0] sm:$0xff] }
 0x863   : > { %5553 = vmatpush1.bf16.msra.mxu1 %v8463_v54  ;;  %5594 = vmatpush1.bf16.msra.mxu0 %v8465_v56  ;;  %v8497_v54 = vcombine.low %v4932_v10, %v4936_v29  ;;  %v8504_v56 = vcombine.high %v4939_v30, %v4943_v59  ;;  %v8503_v50 = vcombine.low %v4939_v30, %v4943_v59  ;;  %v4968_v10 = vld [vmem:[#allocation24 + $0x278] sm:$0xff]  ;;  %v4975_v30 = vld [vmem:[#allocation24 + $0x2b0] sm:$0xff] }
 0x864   : > { %5554 = vmatprep.subr.bf16.mxu1 %v8472_v8  ;;  %5595 = vmatprep.subr.bf16.mxu0 %v8474_v12  ;;  %v8506_v8 = vcombine.high %v4940_v28, %v4944_v63  ;;  %v4947_v12 = vld [vmem:[#allocation24 + $0x1d0] sm:$0xff]  ;;  %v4972_v59 = vld [vmem:[#allocation24 + $0x298] sm:$0xff] }
 0x865   : > { %v8511_v33 = vcombine.low %v4947_v12, %v4951_v57 }
 0x867   : > { %5555 = vmatpush1.bf16.msra.mxu1 %v8471_v1  ;;  %5596 = vmatpush1.bf16.msra.mxu0 %v8473_v4  ;;  %v8505_v1 = vcombine.low %v4940_v28, %v4944_v63  ;;  %v8512_v4 = vcombine.high %v4947_v12, %v4951_v57  ;;  %v4976_v28 = vld [vmem:[#allocation24 + $0x2b8] sm:$0xff]  ;;  %v4983_v12 = vld [vmem:[#allocation24 + $0x2f0] sm:$0xff] }
 0x868   : > { %5556 = vmatprep.subr.bf16.mxu1 %v8480_v40  ;;  %5597 = vmatprep.subr.bf16.mxu0 %v8482_v49  ;;  %v8514_v40 = vcombine.high %v4948_v60, %v4952_v62  ;;  %v4955_v49 = vld [vmem:[#allocation24 + $0x210] sm:$0xff]  ;;  %v4980_v57 = vld [vmem:[#allocation24 + $0x2d8] sm:$0xff] }
 0x869   : > { %v8519_v29 = vcombine.low %v4955_v49, %v4959_v6 }
 0x86b   : > { %5557 = vmatpush1.bf16.msra.mxu1 %v8479_v17  ;;  %5598 = vmatpush1.bf16.msra.mxu0 %v8481_v45  ;;  %v8513_v17 = vcombine.low %v4948_v60, %v4952_v62  ;;  %v8520_v45 = vcombine.high %v4955_v49, %v4959_v6  ;;  %v4984_v60 = vld [vmem:[#allocation24 + $0x2f8] sm:$0xff]  ;;  %v11175_v6 = vmov 2  }
 0x86c   : > { %5558 = vmatprep.subr.bf16.mxu1 %v8488_v41  ;;  %5599 = vmatprep.subr.bf16.mxu0 %v8490_v19  ;;  %v8522_v41 = vcombine.high %v4956_v9, %v4960_v15  ;;  %v4963_v19 = vld [vmem:[#allocation24 + $0x250] sm:$0xff]  ;;  %v8545_v49 = vcombine.low %v4980_v57, %v4984_v60 }
 0x86d   : > { %v8527_v63 = vcombine.low %v4963_v19, %v4967_v20  ;;  %9444 = vset.pattern.permute.xlu1 %v11175_v6  ;;  %v9819_v6 = vld [vmem:[#allocation27 + $0x50] ss:$8 sps:$4 sm:$0xff]  }
 0x86f   : > { %5559 = vmatpush1.bf16.msra.mxu1 %v8487_v21  ;;  %5600 = vmatpush1.bf16.msra.mxu0 %v8489_v24  ;;  %v8521_v21 = vcombine.low %v4956_v9, %v4960_v15  ;;  %v8528_v24 = vcombine.high %v4963_v19, %v4967_v20 }
 0x870   : > { %5560 = vmatprep.subr.bf16.mxu1 %v8496_v31  ;;  %5601 = vmatprep.subr.bf16.mxu0 %v8498_v32  ;;  %v8530_v31 = vcombine.high %v4964_v22, %v4968_v10  ;;  %v4971_v32 = vld [vmem:[#allocation24 + $0x290] sm:$0xff] }
 0x871   : > { %v8535_v62 = vcombine.low %v4971_v32, %v4975_v30 }
 0x873   : > { %5561 = vmatpush1.bf16.msra.mxu1 %v8495_v43  ;;  %5602 = vmatpush1.bf16.msra.mxu0 %v8497_v54  ;;  %v8529_v43 = vcombine.low %v4964_v22, %v4968_v10  ;;  %v8536_v54 = vcombine.high %v4971_v32, %v4975_v30  ;;  %v8551_v22 = vld [vmem:[#allocation18] ss:$0 sm:$0xff] }
 0x874   : > { %5562 = vmatprep.subr.bf16.mxu1 %v8504_v56  ;;  %5603 = vmatprep.subr.bf16.mxu0 %v8506_v8  ;;  %v8538_v56 = vcombine.high %v4972_v59, %v4976_v28  ;;  %v4979_v8 = vld [vmem:[#allocation24 + $0x2d0] sm:$0xff] }
 0x877   : > { %5563 = vmatpush1.bf16.msra.mxu1 %v8503_v50  ;;  %5604 = vmatpush1.bf16.msra.mxu0 %v8505_v1  ;;  %v8537_v50 = vcombine.low %v4972_v59, %v4976_v28  ;;  %v8544_v1 = vcombine.high %v4979_v8, %v4983_v12 }
 0x878   : > { %5564 = vmatprep.subr.bf16.mxu1 %v8512_v4  ;;  %5605 = vmatprep.subr.bf16.mxu0 %v8514_v40  ;;  %v8546_v4 = vcombine.high %v4980_v57, %v4984_v60  ;;  %v8543_v40 = vcombine.low %v4979_v8, %v4983_v12  ;;  %v11177_v8 = vmov 3   ;;  %v9806_v12 = vld [vmem:[#allocation27 + $0x4] ss:$8 sps:$4 sm:$0xff]   ;;  %v9804_v57 = vld [vmem:[#allocation27] ss:$8 sps:$4 sm:$0xff]  }
 0x879   : > { %v9809_v60 = vld [vmem:[#allocation27 + $0x14] ss:$8 sps:$4 sm:$0xff]  }
 0x87b   : > { %5565 = vmatpush1.bf16.msra.mxu1 %v8511_v33  ;;  %5606 = vmatpush1.bf16.msra.mxu0 %v8513_v17 }
 0x87c   : > { %5566 = vmatprep.subr.bf16.mxu1 %v8520_v45  ;;  %5607 = vmatprep.subr.bf16.mxu0 %v8522_v41 }
 0x87f   : > { %5567 = vmatpush1.bf16.msra.mxu1 %v8519_v29  ;;  %5608 = vmatpush1.bf16.msra.mxu0 %v8521_v21 }
 0x880   : > { %5568 = vmatprep.subr.bf16.mxu1 %v8528_v24  ;;  %5609 = vmatprep.subr.bf16.mxu0 %v8530_v31 }
 0x883   : > { %5569 = vmatpush1.bf16.msra.mxu1 %v8527_v63  ;;  %5610 = vmatpush1.bf16.msra.mxu0 %v8529_v43 }
 0x884   : > { %5570 = vmatprep.subr.bf16.mxu1 %v8536_v54  ;;  %5611 = vmatprep.subr.bf16.mxu0 %v8538_v56  ;;  %v11176_v56 = vmov 1  }
 0x887   : > { %5571 = vmatpush1.bf16.msra.mxu1 %v8535_v62  ;;  %5612 = vmatpush1.bf16.msra.mxu0 %v8537_v50  ;;  %v9807_v62 = vld [vmem:[#allocation27 + $0x10] ss:$8 sps:$4 sm:$0xff]   ;;  %v9812_v50 = vld [vmem:[#allocation27 + $0x24] ss:$8 sps:$4 sm:$0xff]  }
 0x888   : > { %5572 = vmatprep.subr.bf16.mxu1 %v8544_v1  ;;  %5613 = vmatprep.subr.bf16.mxu0 %v8546_v4  ;;  %v9810_v1 = vld [vmem:[#allocation27 + $0x20] ss:$8 sps:$4 sm:$0xff]   ;;  %v9813_v4 = vld [vmem:[#allocation27 + $0x30] ss:$8 sps:$4 sm:$0xff]  }
 0x88b   : > { %5573 = vmatpush1.bf16.msra.mxu1 %v8543_v40  ;;  %5614 = vmatpush1.bf16.msra.mxu0 %v8545_v49  ;;  %v9816_v40 = vld [vmem:[#allocation27 + $0x40] ss:$8 sps:$4 sm:$0xff]   ;;  %v9821_v49 = vld [vmem:[#allocation27 + $0x54] ss:$8 sps:$4 sm:$0xff]  }
 0x88c   : > { %5844 = vmatprep.subr.bf16.mxu1 %v9806_v12 }
 0x88e   : > { %5583 = vmatmul.mubr.bf16.vlgmr.msra.gmra.mrb[40].mxu1 %v13016_v37  ;;  %5624 = vmatmul.mubr.bf16.vlgmr.msra.gmra.mrb[40].mxu0 %v13016_v37 }
 0x88f   : > { %5845 = vmatpush1.bf16.msra.mxu1 %v9804_v57 }
 0x890   : > { %5846 = vmatprep.subr.bf16.mxu1 %v9809_v60 }
 0x893   : > { %5847 = vmatpush1.bf16.msra.mxu1 %v9807_v62 }
 0x894   : > { %5848 = vmatprep.subr.bf16.mxu1 %v9812_v50 }
 0x897   : > { %5849 = vmatpush1.bf16.msra.mxu1 %v9810_v1 }
 0x931   : > { %v13026_v9 = vpop.f32.mrb[0].mxu0  ;;  %v13028_v15 = vpop.f32.mrb[0].mxu1 }
 0x932   : > { %v13030_v33 = vpop.f32.mrb[1].mxu0  ;;  %v13032_v17 = vpop.f32.mrb[1].mxu1 }
 0x933   : > { %v5506_v45 = vpop.f32.mrb[2].mxu0  ;;  %v5547_v41 = vpop.f32.mrb[2].mxu1 }
 0x934   : > { %v5507_v19 = vpop.f32.mrb[3].mxu0  ;;  %v5548_v20 = vpop.f32.mrb[3].mxu1  ;;  %v9824_v45 = vld [vmem:[#allocation27 + $0x64] ss:$8 sps:$4 sm:$0xff]   ;;  %v9822_v41 = vld [vmem:[#allocation27 + $0x60] ss:$8 sps:$4 sm:$0xff]  }
 0x935   : > { %v9827_v19 = vld [vmem:[#allocation27 + $0x74] ss:$8 sps:$4 sm:$0xff]   ;;  %v9825_v20 = vld [vmem:[#allocation27 + $0x70] ss:$8 sps:$4 sm:$0xff]  }
 0x961   : > { %v13034_v10 = vpop.f32.mrb[40].mxu1  ;;  %v13036_v29 = vpop.f32.mrb[40].mxu0 }
 0x962   : > { %v13038_v37 = vpop.f32.mrb[41].mxu1  ;;  %v5627_v21 = vpop.f32.mrb[41].mxu0 }
 0x963   : > { %v5639_v24 = vadd.f32 %v8551_v22, %v5627_v21  ;;  %v5588_v31 = vpop.f32.mrb[42].mxu1  ;;  %v5629_v32 = vpop.f32.mrb[42].mxu0  ;;  %v9830_v22 = vld [vmem:[#allocation27 + $0x84] ss:$8 sps:$4 sm:$0xff]   ;;  %v9828_v21 = vld [vmem:[#allocation27 + $0x80] ss:$8 sps:$4 sm:$0xff]  }
 0x964   : > { %v5589_v30 = vpop.f32.mrb[43].mxu1  ;;  %v5630_v59 = vpop.f32.mrb[43].mxu0  ;;  %v9831_v31 = vld [vmem:[#allocation27 + $0x90] ss:$8 sps:$4 sm:$0xff]   ;;  %v9836_v32 = vld [vmem:[#allocation32 + $0x4] ss:$16 sps:$4 sm:$0xff]  }
 0x965   : > { %v8552_v28 = vmul.f32 -1.442695, %v5639_v24  ;;  %v9833_v24 = vld [vmem:[#allocation27 + $0x94] ss:$8 sps:$4 sm:$0xff]   ;;  %v9837_v30 = vld [vmem:[#allocation32 + $0x8] ss:$16 sps:$4 sm:$0xff]  }
 0x966   : > { %v9839_v59 = vld [vmem:[#allocation32 + $0xc] ss:$16 sps:$4 sm:$0xff]  }
 0x967   : > { %9998 = vpow2.f32 %v8552_v28  ;;  %6191 = vmatprep.subr.bf16.mxu0 %v9839_v59 }
 0x968   : > { %6192 = vmatpush1.bf16.msra.mxu0 %v9837_v30 }
 0x971   : > { %v9999_v63 = vpop.eup %9998 }
 0x972   : > { %v5643_v43 = vadd.f32 1.0, %v9999_v63 }
 0x974   : > { %10000 = vrcp.f32 %v5643_v43 }
 0x97e   : > { %v10001_v54 = vpop.eup %10000 }
 0x97f   : > { %6661 = vperm.xlu1 %9444, %v10001_v54   ;;  %5648 = vperm.xlu0 %9442, %v10001_v54  }
 0x983   : > { %9446 = vset.pattern.permute.xlu1 %v11168_v51  ;;  %9443 = vset.pattern.permute.xlu0 %v11176_v56 }
 0x984   : > { %7152 = vperm.xlu1 %9446, %v12785_v52   ;;  %6233 = vperm.xlu0 %9443, %v10001_v54   ;;  %v9815_v52 = vld [vmem:[#allocation27 + $0x34] ss:$8 sps:$4 sm:$0xff]  }
 0x985   : > { %5850 = vmatprep.subr.bf16.mxu1 %v9815_v52 }
 0x986   : > { %5851 = vmatpush1.bf16.msra.mxu1 %v9813_v4 }
 0x988   : > { %3255 = vrot.lane.b32.xlu1 %v12838_v14, %s11172_s6  ;;  %9445 = vset.pattern.permute.xlu0 %v11177_v8  ;;  %v9818_v14 = vld [vmem:[#allocation27 + $0x44] ss:$8 sps:$4 sm:$0xff]  }
 0x989   : > { %6922 = vperm.xlu0 %9445, %v10001_v54   ;;  %5852 = vmatprep.subr.bf16.mxu1 %v9818_v14 }
 0x98a   : > { %5853 = vmatpush1.bf16.msra.mxu1 %v9816_v40 }
 0x98b   : > { %5854 = vmatprep.subr.bf16.mxu1 %v9821_v49 }
 0x98e   : > { %5855 = vmatpush1.bf16.msra.mxu1 %v9819_v6 }
 0x98f   : > { %5856 = vmatprep.subr.bf16.mxu1 %v9824_v45 }
 0x992   : > { %5857 = vmatpush1.bf16.msra.mxu1 %v9822_v41 }
 0x993   : > { %5858 = vmatprep.subr.bf16.mxu1 %v9827_v19 }
 0x996   : > { %5859 = vmatpush1.bf16.msra.mxu1 %v9825_v20 }
 0x997   : > { %5860 = vmatprep.subr.bf16.mxu1 %v9830_v22 }
 0x99a   : > { %5861 = vmatpush1.bf16.msra.mxu1 %v9828_v21 }
 0x99b   : > { %5862 = vmatprep.subr.bf16.mxu1 %v9833_v24 }
 0x99e   : > { %5863 = vmatpush1.bf16.msra.mxu1 %v9831_v31 }
 0x99f   : > { %6150 = vmatprep.subr.bf16.mxu1 %v9836_v32 }
 0x9fe   : > { %v6662_v28 = vpop.permute.xlu1 %6661  ;;  %v5649_v63 = vpop.permute.xlu0 %5648 }
 0x9ff   : > { %v5651_v43 = vmul.f32 %v5649_v63, %v12963_v26  ;;  %v5652_v54 = vmul.f32 %v5649_v63, %v12967_v27  ;;  %v5653_v56 = vmul.f32 %v5649_v63, %v12965_v23  ;;  %v5654_v8 = vmul.f32 %v5649_v63, %v12969_v55 }
 0xa00   : > { %v5655_v12 = vmul.f32 %v5649_v63, %v12971_v35  ;;  %v5656_v57 = vmul.f32 %v5649_v63, %v12975_v39  ;;  %v13051_v60 = vmul.f32 %v6662_v28, %v12983_v5  ;;  %v13054_v62 = vmul.f32 %v6662_v28, %v12985_v48 }
 0xa01   : > { %v5657_v26 = vadd.f32 %v5651_v43, %v13026_v9  ;;  %v5658_v27 = vadd.f32 %v5652_v54, %v13030_v33  ;;  %v5659_v23 = vadd.f32 %v5653_v56, %v13028_v15  ;;  %v5660_v55 = vadd.f32 %v5654_v8, %v13032_v17  ;;  %v10067_v43 = vld [vmem:[%s12011_s14 + $0x8] sm:$0xff]  ;;  %v1741_v56 = vld [vmem:[%s11921_s18 + $0x30] sm:$0xff] }
 0xa02   : > { %v5661_v35 = vadd.f32 %v5655_v12, %v13034_v10  ;;  %v5662_v39 = vadd.f32 %v5656_v57, %v13038_v37  ;;  %v13064_v5 = vmul.f32 %v6662_v28, %v12981_v47  ;;  %v1740_v54 = vld [vmem:[%s11921_s18 + $0x28] sm:$0xff] }
 0xa03   : > { %v8553_v50 = vmul.f32 -1.442695, %v5657_v26  ;;  %v8554_v1 = vmul.f32 -1.442695, %v5658_v27  ;;  %v13066_v48 = vpop.permute.xlu1 %7152  ;;  %v8555_v17 = vmul.f32 -1.442695, %v5659_v23 }
 0xa04   : > { %v5667_v9 = vadd.f32 %v5661_v35, %v12989_v3  ;;  %v5668_v33 = vadd.f32 %v5662_v39, %v12991_v13  ;;  %v8556_v10 = vmul.f32 -1.442695, %v5660_v55  ;;  %v9834_v39 = vld [vmem:[#allocation32] ss:$16 sps:$4 sm:$0xff]  }
 0xa05   : > { %10002 = vpow2.f32 %v8553_v50  ;;  %v9842_v50 = vld [vmem:[#allocation32 + $0x24] ss:$16 sps:$4 sm:$0xff]  }
 0xa06   : > { %10004 = vpow2.f32 %v8554_v1  ;;  %v9845_v1 = vld [vmem:[#allocation32 + $0x2c] ss:$16 sps:$4 sm:$0xff]  }
 0xa07   : > { %v3256_v15 = vpop.permute.xlu1 %3255  ;;  %10006 = vpow2.f32 %v8555_v17  ;;  %6193 = vmatprep.subr.bf16.mxu0 %v9845_v1  ;;  %v9851_v17 = vld [vmem:[#allocation32 + $0x4c] ss:$16 sps:$4 sm:$0xff]  }
 0xa08   : > { %3261 = vst.msk [vmem:[%s3259_s24] sm:$0xff] %vm3260_vm14, %v3256_v15  ;;  %10008 = vpow2.f32 %v8556_v10  ;;  %v9848_v15 = vld [vmem:[#allocation32 + $0x44] ss:$16 sps:$4 sm:$0xff]   ;;  %v9846_v10 = vld [vmem:[#allocation32 + $0x40] ss:$16 sps:$4 sm:$0xff]  }
 0xa0f   : > { %v10003_v47 = vpop.eup %10002 }
 0xa10   : > { %v10005_v37 = vpop.eup %10004  ;;  %v5677_v52 = vadd.f32 1.0, %v10003_v47  ;;  %v9849_v47 = vld [vmem:[#allocation32 + $0x48] ss:$16 sps:$4 sm:$0xff]  }
 0xa11   : > { %v5678_v4 = vadd.f32 1.0, %v10005_v37  ;;  %v10007_v3 = vpop.eup %10006  ;;  %v9854_v37 = vld [vmem:[#allocation32 + $0x64] ss:$16 sps:$4 sm:$0xff]  }
 0xa12   : > { %10010 = vrcp.f32 %v5677_v52  ;;  %v10009_v14 = vpop.eup %10008  ;;  %v5691_v13 = vadd.f32 1.0, %v10007_v3  ;;  %v9857_v52 = vld [vmem:[#allocation32 + $0x6c] ss:$16 sps:$4 sm:$0xff]   ;;  %v9855_v3 = vld [vmem:[#allocation32 + $0x68] ss:$16 sps:$4 sm:$0xff]  }
 0xa13   : > { %10012 = vrcp.f32 %v5678_v4  ;;  %v5692_v40 = vadd.f32 1.0, %v10009_v14  ;;  %v9852_v4 = vld [vmem:[#allocation32 + $0x60] ss:$16 sps:$4 sm:$0xff]   ;;  %v9860_v14 = vld [vmem:[#allocation32 + $0x84] ss:$16 sps:$4 sm:$0xff]  }
 0xa14   : > { %10014 = vrcp.f32 %v5691_v13  ;;  %v9863_v13 = vld [vmem:[#allocation32 + $0x8c] ss:$16 sps:$4 sm:$0xff]  }
 0xa15   : > { %10016 = vrcp.f32 %v5692_v40  ;;  %v9858_v40 = vld [vmem:[#allocation32 + $0x80] ss:$16 sps:$4 sm:$0xff]  }
 0xa1c   : > { %v10011_v49 = vpop.eup %10010 }
 0xa1d   : > { %v10013_v6 = vpop.eup %10012  ;;  %v5697_v45 = vmul.f32 %v10011_v49, %v12904_v16  ;;  %v10066_v16 = vld [vmem:[%s12011_s14] sm:$0xff]  ;;  %v9861_v49 = vld [vmem:[#allocation32 + $0x88] ss:$16 sps:$4 sm:$0xff]  }
 0xa1e   : > { %v5698_v41 = vmul.f32 %v10013_v6, %v12906_v18  ;;  %v10015_v22 = vpop.eup %10014  ;;  %v9864_v6 = vld [vmem:[#allocation32 + $0xa0] ss:$16 sps:$4 sm:$0xff]  }
 0xa1f   : > { %v5699_v19 = vadd.f32 %v5697_v45, %v5667_v9  ;;  %v10017_v21 = vpop.eup %10016  ;;  %v5703_v24 = vsub.f32 1.0, %v10015_v22  ;;  %v5707_v28 = vmul.f32 %v10066_v16, %v10015_v22  ;;  %v9840_v9 = vld [vmem:[#allocation32 + $0x20] ss:$16 sps:$4 sm:$0xff]   ;;  %v9866_v45 = vld [vmem:[#allocation32 + $0xa4] ss:$16 sps:$4 sm:$0xff]  }
 0xa20   : > { %v5700_v20 = vadd.f32 %v5698_v41, %v5668_v33  ;;  %v5704_v32 = vsub.f32 1.0, %v10017_v21  ;;  %v5708_v18 = vmul.f32 %v10067_v43, %v10017_v21  ;;  %v9843_v33 = vld [vmem:[#allocation32 + $0x28] ss:$16 sps:$4 sm:$0xff]   ;;  %v9875_v22 = vld [vmem:[#allocation32 + $0xcc] ss:$16 sps:$4 sm:$0xff]  }
 0xa21   : > { %10018 = vtanh.f32 %v5699_v19  ;;  %6194 = vmatpush1.bf16.msra.mxu0 %v9843_v33  ;;  %v9867_v41 = vld [vmem:[#allocation32 + $0xa8] ss:$16 sps:$4 sm:$0xff]   ;;  %v9869_v19 = vld [vmem:[#allocation32 + $0xac] ss:$16 sps:$4 sm:$0xff]   ;;  %v9870_v21 = vld [vmem:[#allocation32 + $0xc0] ss:$16 sps:$4 sm:$0xff]  }
 0xa22   : > { %10020 = vtanh.f32 %v5700_v20  ;;  %6195 = vmatprep.subr.bf16.mxu0 %v9851_v17  ;;  %v9872_v20 = vld [vmem:[#allocation32 + $0xc4] ss:$16 sps:$4 sm:$0xff]   ;;  %v9885_v43 = vld [vmem:[#allocation32 + $0x108] ss:$16 sps:$4 sm:$0xff]   ;;  %v1742_v17 = vld [vmem:[%s11921_s18 + $0x38] sm:$0xff] }
 0xa23   : > { %v9884_v16 = vld [vmem:[#allocation32 + $0x104] ss:$16 sps:$4 sm:$0xff]  }
 0xa25   : > { %6196 = vmatpush1.bf16.msra.mxu0 %v9849_v47  ;;  %v1743_v47 = vld [vmem:[%s11921_s18 + $0x40] sm:$0xff] }
 0xa26   : > { %6197 = vmatprep.subr.bf16.mxu0 %v9857_v52 }
 0xa29   : > { %6198 = vmatpush1.bf16.msra.mxu0 %v9855_v3 }
 0xa2a   : > { %6199 = vmatprep.subr.bf16.mxu0 %v9863_v13 }
 0xa2b   : > { %v10019_v31 = vpop.eup %10018 }
 0xa2c   : > { %v10021_v30 = vpop.eup %10020  ;;  %v5705_v59 = vmul.f32 %v10019_v31, %v5703_v24  ;;  %v9873_v24 = vld [vmem:[#allocation32 + $0xc8] ss:$16 sps:$4 sm:$0xff]   ;;  %v9878_v31 = vld [vmem:[#allocation32 + $0xe4] ss:$16 sps:$4 sm:$0xff]  }
 0xa2d   : > { %v5706_v63 = vmul.f32 %v10021_v30, %v5704_v32  ;;  %6200 = vmatpush1.bf16.msra.mxu0 %v9861_v49  ;;  %v9881_v32 = vld [vmem:[#allocation32 + $0xec] ss:$16 sps:$4 sm:$0xff]   ;;  %v9876_v30 = vld [vmem:[#allocation32 + $0xe0] ss:$16 sps:$4 sm:$0xff]  }
 0xa2e   : > { %v5709_v8 = vadd.f32 %v5707_v28, %v5705_v59  ;;  %6201 = vmatprep.subr.bf16.mxu0 %v9869_v19  ;;  %v9879_v59 = vld [vmem:[#allocation32 + $0xe8] ss:$16 sps:$4 sm:$0xff]   ;;  %v9887_v28 = vld [vmem:[#allocation32 + $0x10c] ss:$16 sps:$4 sm:$0xff]  }
 0xa2f   : > { %v5710_v12 = vadd.f32 %v5708_v18, %v5706_v63  ;;  %v9882_v63 = vld [vmem:[#allocation32 + $0x100] ss:$16 sps:$4 sm:$0xff]   ;;  %v9890_v18 = vld [vmem:[#allocation32 + $0x124] ss:$16 sps:$4 sm:$0xff]  }
 0xa30   : > { %5711 = vst [vmem:[%s12011_s14] sm:$0xff] %v5709_v8  ;;  %v5713_v57 = vadd.f32 %v5709_v8, %v1740_v54  ;;  %v9893_v54 = vld [vmem:[#allocation32 + $0x12c] ss:$16 sps:$4 sm:$0xff]   ;;  %v9891_v8 = vld [vmem:[#allocation32 + $0x128] ss:$16 sps:$4 sm:$0xff]  }
 0xa31   : > { %5712 = vst.msk [vmem:[%s12011_s14 + $0x8] sm:$0xff] %vm2115_vm10, %v5710_v12  ;;  %v5714_v26 = vadd.f32 %v5710_v12, %v1741_v56  ;;  %6202 = vmatpush1.bf16.msra.mxu0 %v9867_v41  ;;  %v9888_v56 = vld [vmem:[#allocation32 + $0x120] ss:$16 sps:$4 sm:$0xff]  }
 0xa32   : > { %v13083_v27 = vclamps-f32 %v5713_v57, 1.0  ;;  %6203 = vmatprep.subr.bf16.mxu0 %v9875_v22  ;;  %v9898_v41 = vld [vmem:[%s13739_s4 + $0x20] sm:$0xff]   ;;  %v9899_v19 = vld [vmem:[%s13739_s4 + $0x28] sm:$0xff]   ;;  %v9901_v22 = vld [vmem:[%s13739_s4 + $0x38] sm:$0xff]  }
 0xa33   : > { %v13085_v23 = vclamps-f32 %v5714_v26, 1.0 }
 0xa34   : > { %v5719_v55 = vpack.c.bf16 %v13083_v27, %v13083_v27 }
 0xa35   : > { %v5720_v35 = vpack.c.bf16 %v13085_v23, %v13085_v23  ;;  %6204 = vmatpush1.bf16.msra.mxu0 %v9873_v24 }
 0xa36   : > { %6205 = vmatprep.subr.bf16.mxu0 %v9881_v32 }
 0xa37   : > { %8579 = vmatprep.mubr.msk.bf16.mxu1 %vm2115_vm10, %v5720_v35 }
 0xa38   : > { %5877 = vmatmul.mubr.bf16.vlgmr.msra.gmra.mrb[44].mxu1 %v5719_v55 }
 0xa39   : > { %6151 = vmatpush1.bf16.msra.mxu1 %v9834_v39  ;;  %6206 = vmatpush1.bf16.msra.mxu0 %v9879_v59 }
 0xa3a   : > { %6152 = vmatprep.subr.bf16.mxu1 %v9842_v50  ;;  %6207 = vmatprep.subr.bf16.mxu0 %v9887_v28 }
 0xa3d   : > { %6153 = vmatpush1.bf16.msra.mxu1 %v9840_v9  ;;  %6208 = vmatpush1.bf16.msra.mxu0 %v9885_v43 }
 0xa3e   : > { %6154 = vmatprep.subr.bf16.mxu1 %v9848_v15  ;;  %6209 = vmatprep.subr.bf16.mxu0 %v9893_v54 }
 0xa41   : > { %6155 = vmatpush1.bf16.msra.mxu1 %v9846_v10  ;;  %6210 = vmatpush1.bf16.msra.mxu0 %v9891_v8 }
 0xa42   : > { %6156 = vmatprep.subr.bf16.mxu1 %v9854_v37  ;;  %8904 = vmatprep.subr.bf16.mxu0 %v11170_v61 }
 0xa45   : > { %6157 = vmatpush1.bf16.msra.mxu1 %v9852_v4 }
 0xa46   : > { %6158 = vmatprep.subr.bf16.mxu1 %v9860_v14 }
 0xa49   : > { %6159 = vmatpush1.bf16.msra.mxu1 %v9858_v40 }
 0xa4a   : > { %6160 = vmatprep.subr.bf16.mxu1 %v9866_v45  ;;  %v9897_v45 = vld [vmem:[%s13739_s4 + $0x18] sm:$0xff]  }
 0xa4d   : > { %6161 = vmatpush1.bf16.msra.mxu1 %v9864_v6  ;;  %v9896_v6 = vld [vmem:[%s13739_s4 + $0x10] sm:$0xff]  }
 0xa4e   : > { %6162 = vmatprep.subr.bf16.mxu1 %v9872_v20  ;;  %v9900_v20 = vld [vmem:[%s13739_s4 + $0x30] sm:$0xff]  }
 0xa51   : > { %6163 = vmatpush1.bf16.msra.mxu1 %v9870_v21  ;;  %v6234_v21 = vpop.permute.xlu0 %6233 }
 0xa52   : > { %6164 = vmatprep.subr.bf16.mxu1 %v9878_v31  ;;  %v6236_v24 = vmul.f32 %v6234_v21, %v12973_v36  ;;  %v6238_v31 = vmul.f32 %v6234_v21, %v12979_v46  ;;  %v6237_v59 = vmul.f32 %v6234_v21, %v12977_v7  ;;  %v9925_v21 = vld [vmem:[#allocation35 + $0x6c] ss:$16 sps:$4 sm:$0xff]  }
 0xa55   : > { %6165 = vmatpush1.bf16.msra.mxu1 %v9876_v30 }
 0xa56   : > { %6166 = vmatprep.subr.bf16.mxu1 %v9884_v16 }
 0xa59   : > { %6167 = vmatpush1.bf16.msra.mxu1 %v9882_v63 }
 0xa5a   : > { %6168 = vmatprep.subr.bf16.mxu1 %v9890_v18 }
 0xa5d   : > { %6169 = vmatpush1.bf16.msra.mxu1 %v9888_v56 }
 0xb0b   : > { %v5878_v12 = vpop.f32.mrb[44].mxu1 }
 0xb0c   : > { %v8580_v57 = vmul.f32 -1.442695, %v5878_v12  ;;  %v5880_v26 = vpop.f32.mrb[45].mxu1 }
 0xb0d   : > { %v8581_v55 = vmul.f32 -1.442695, %v5880_v26  ;;  %v5882_v35 = vpop.f32.mrb[46].mxu1 }
 0xb0e   : > { %10022 = vpow2.f32 %v8580_v57  ;;  %v5883_v39 = vpop.f32.mrb[47].mxu1 }
 0xb0f   : > { %10024 = vpow2.f32 %v8581_v55 }
 0xb18   : > { %v10023_v50 = vpop.eup %10022 }
 0xb19   : > { %v10025_v1 = vpop.eup %10024  ;;  %v5891_v9 = vadd.f32 1.0, %v10023_v50 }
 0xb1a   : > { %v5892_v33 = vadd.f32 1.0, %v10025_v1 }
 0xb1b   : > { %10026 = vrcp.f32 %v5891_v9 }
 0xb1c   : > { %10028 = vrcp.f32 %v5892_v33 }
 0xb25   : > { %v10027_v15 = vpop.eup %10026 }
 0xb26   : > { %v10029_v10 = vpop.eup %10028  ;;  %v5897_v37 = vmul.f32 %v10027_v15, %v13083_v27  ;;  %v9894_v27 = vld [vmem:[%s13738_s16] sm:$0xff]  }
 0xb27   : > { %v5898_v52 = vmul.f32 %v10029_v10, %v13085_v23  ;;  %v9895_v23 = vld [vmem:[%s13739_s4 + $0x8] sm:$0xff]  }
 0xb28   : > { %v5899_v4 = vadd.f32 %v5897_v37, %v1742_v17  ;;  %v10068_v17 = vld [vmem:[%s12014_s28] sm:$0xff] }
 0xb29   : > { %v5900_v3 = vadd.f32 %v5898_v52, %v1743_v47  ;;  %v1744_v47 = vld [vmem:[%s11921_s18 + $0x48] sm:$0xff] }
 0xb2a   : > { %v8582_v14 = vclamps-f32 %v5899_v4, 1.0 }
 0xb2b   : > { %v8583_v13 = vclamps-f32 %v5900_v3, 1.0 }
 0xb2c   : > { %v5905_v49 = vpack.c.bf16 %v8582_v14, %v8582_v14  ;;  %v9907_v14 = vld [vmem:[#allocation35 + $0xc] ss:$16 sps:$4 sm:$0xff]  }
 0xb2d   : > { %v5906_v40 = vpack.c.bf16 %v8583_v13, %v8583_v13  ;;  %v9902_v13 = vld [vmem:[#allocation35] ss:$16 sps:$4 sm:$0xff]  }
 0xb2f   : > { %8624 = vmatprep.mubr.msk.bf16.mxu1 %vm2115_vm10, %v5906_v40  ;;  %8625 = vmatprep.mubr.msk.bf16.mxu0 %vm2115_vm10, %v5906_v40  ;;  %v9905_v40 = vld [vmem:[#allocation35 + $0x8] ss:$16 sps:$4 sm:$0xff]  }
 0xb30   : > { %6183 = vmatmul.mubr.bf16.vlgmr.msra.gmra.mrb[4].mxu1 %v5905_v49  ;;  %6224 = vmatmul.mubr.bf16.vlgmr.msra.gmra.mrb[44].mxu0 %v5905_v49  ;;  %v9910_v49 = vld [vmem:[#allocation35 + $0x24] ss:$16 sps:$4 sm:$0xff]  }
 0xb31   : > { %8920 = vmatprep.mubr.msk.bf16.mxu0 %vm11171_vm9, %v11170_v61  ;;  %6610 = vmatprep.mubr.bf16.mxu1 %v11168_v51 }
 0xb32   : > { %8905 = vmatpush3.bf16.msra.mxu0 %v9894_v27  ;;  %v9913_v27 = vld [vmem:[#allocation35 + $0x2c] ss:$16 sps:$4 sm:$0xff]  }
 0xb33   : > { %8906 = vmatprep.subr.bf16.mxu0 %v11170_v61 }
 0xb36   : > { %8907 = vmatpush3.bf16.msra.mxu0 %v9895_v23  ;;  %v9908_v23 = vld [vmem:[#allocation35 + $0x20] ss:$16 sps:$4 sm:$0xff]  }
 0xb37   : > { %8908 = vmatprep.subr.bf16.mxu0 %v11170_v61 }
 0xb3a   : > { %8909 = vmatpush3.bf16.msra.mxu0 %v9896_v6  ;;  %v9911_v6 = vld [vmem:[#allocation35 + $0x28] ss:$16 sps:$4 sm:$0xff]  }
 0xb3b   : > { %8910 = vmatprep.subr.bf16.mxu0 %v11170_v61 }
 0xb3e   : > { %8911 = vmatpush3.bf16.msra.mxu0 %v9897_v45  ;;  %v9916_v45 = vld [vmem:[#allocation35 + $0x44] ss:$16 sps:$4 sm:$0xff]  }
 0xb3f   : > { %8912 = vmatprep.subr.bf16.mxu0 %v11170_v61 }
 0xb42   : > { %8913 = vmatpush3.bf16.msra.mxu0 %v9898_v41  ;;  %v9919_v41 = vld [vmem:[#allocation35 + $0x4c] ss:$16 sps:$4 sm:$0xff]  }
 0xb43   : > { %8914 = vmatprep.subr.bf16.mxu0 %v11170_v61 }
 0xb46   : > { %8915 = vmatpush3.bf16.msra.mxu0 %v9899_v19  ;;  %v9914_v19 = vld [vmem:[#allocation35 + $0x40] ss:$16 sps:$4 sm:$0xff]  }
 0xb47   : > { %8916 = vmatprep.subr.bf16.mxu0 %v11170_v61 }
 0xb4a   : > { %8917 = vmatpush3.bf16.msra.mxu0 %v9900_v20  ;;  %v9917_v20 = vld [vmem:[#allocation35 + $0x48] ss:$16 sps:$4 sm:$0xff]  }
 0xb4b   : > { %8918 = vmatprep.subr.bf16.mxu0 %v11170_v61 }
 0xb4e   : > { %8919 = vmatpush3.bf16.msra.mxu0 %v9901_v22  ;;  %v9922_v22 = vld [vmem:[#allocation35 + $0x64] ss:$16 sps:$4 sm:$0xff]  }
 0xb4f   : > { %6619 = vmatprep.subr.bf16.mxu0 %v9907_v14  ;;  %v9954_v14 = vld [vmem:[#allocation38 + $0x20] sm:$0xff]  }
 0xc03   : > { %v6184_v32 = vpop.f32.mrb[4].mxu1  ;;  %v6225_v30 = vpop.f32.mrb[44].mxu0 }
 0xc04   : > { %v6239_v16 = vadd.f32 %v6236_v24, %v6184_v32  ;;  %v6241_v28 = vadd.f32 %v6238_v31, %v6225_v30  ;;  %v6186_v63 = vpop.f32.mrb[5].mxu1  ;;  %v13120_v43 = vpop.f32.mrb[45].mxu0  ;;  %v9920_v24 = vld [vmem:[#allocation35 + $0x60] ss:$16 sps:$4 sm:$0xff]   ;;  %v9923_v31 = vld [vmem:[#allocation35 + $0x68] ss:$16 sps:$4 sm:$0xff]  }
 0xc05   : > { %v6240_v18 = vadd.f32 %v6237_v59, %v6186_v63  ;;  %v6188_v54 = vpop.f32.mrb[6].mxu1  ;;  %v6229_v56 = vpop.f32.mrb[46].mxu0  ;;  %v9928_v32 = vld [vmem:[#allocation35 + $0x84] ss:$16 sps:$4 sm:$0xff]   ;;  %v9931_v30 = vld [vmem:[#allocation35 + $0x8c] ss:$16 sps:$4 sm:$0xff]  }
 0xc06   : > { %v8626_v8 = vmul.f32 -1.442695, %v6239_v16  ;;  %v6244_v12 = vadd.f32 %v6241_v28, %v12993_v34  ;;  %v6189_v57 = vpop.f32.mrb[7].mxu1  ;;  %v6230_v26 = vpop.f32.mrb[47].mxu0  ;;  %v9926_v59 = vld [vmem:[#allocation35 + $0x80] ss:$16 sps:$4 sm:$0xff]  }
 0xc07   : > { %v8627_v36 = vmul.f32 -1.442695, %v6240_v18  ;;  %v9929_v16 = vld [vmem:[#allocation35 + $0x88] ss:$16 sps:$4 sm:$0xff]   ;;  %v9934_v28 = vld [vmem:[#allocation35 + $0xa4] ss:$16 sps:$4 sm:$0xff]  }
 0xc08   : > { %10030 = vpow2.f32 %v8626_v8  ;;  %v9937_v63 = vld [vmem:[#allocation35 + $0xac] ss:$16 sps:$4 sm:$0xff]   ;;  %v9932_v18 = vld [vmem:[#allocation35 + $0xa0] ss:$16 sps:$4 sm:$0xff]   ;;  %v9935_v54 = vld [vmem:[#allocation35 + $0xa8] ss:$16 sps:$4 sm:$0xff]  }
 0xc09   : > { %10032 = vpow2.f32 %v8627_v36  ;;  %v9940_v56 = vld [vmem:[#allocation35 + $0xc4] ss:$16 sps:$4 sm:$0xff]   ;;  %v9943_v8 = vld [vmem:[#allocation35 + $0xcc] ss:$16 sps:$4 sm:$0xff]   ;;  %v9941_v57 = vld [vmem:[#allocation35 + $0xc8] ss:$16 sps:$4 sm:$0xff]  }
 0xc0a   : > { %v9946_v26 = vld [vmem:[#allocation35 + $0xe4] ss:$16 sps:$4 sm:$0xff]   ;;  %v9949_v36 = vld [vmem:[#allocation35 + $0xec] ss:$16 sps:$4 sm:$0xff]  }
 0xc12   : > { %v10031_v46 = vpop.eup %10030 }
 0xc13   : > { %v6249_v7 = vadd.f32 1.0, %v10031_v46  ;;  %v10033_v55 = vpop.eup %10032  ;;  %v9944_v46 = vld [vmem:[#allocation35 + $0xe0] ss:$16 sps:$4 sm:$0xff]  }
 0xc14   : > { %v6256_v35 = vadd.f32 1.0, %v10033_v55 }
 0xc15   : > { %10034 = vrcp.f32 %v6249_v7  ;;  %v9947_v7 = vld [vmem:[#allocation35 + $0xe8] ss:$16 sps:$4 sm:$0xff]  }
 0xc16   : > { %10036 = vrcp.f32 %v6256_v35 }
 0xc1f   : > { %v10035_v39 = vpop.eup %10034 }
 0xc20   : > { %v6259_v50 = vmul.f32 %v10035_v39, %v12910_v53  ;;  %v10037_v34 = vpop.eup %10036  ;;  %v9904_v53 = vld [vmem:[#allocation35 + $0x4] ss:$16 sps:$4 sm:$0xff]  }
 0xc21   : > { %v6262_v9 = vsub.f32 1.0, %v10037_v34  ;;  %v6264_v10 = vmul.f32 %v10068_v17, %v10037_v34  ;;  %6578 = vmatprep.subr.bf16.mxu1 %v9904_v53  ;;  %v9953_v53 = vld [vmem:[#allocation38 + $0x18] sm:$0xff]  }
 0xc22   : > { %v6260_v1 = vadd.f32 %v6259_v50, %v6244_v12  ;;  %6579 = vmatpush1.bf16.msra.mxu1 %v9902_v13  ;;  %v9938_v12 = vld [vmem:[#allocation35 + $0xc0] ss:$16 sps:$4 sm:$0xff]   ;;  %v9955_v13 = vld [vmem:[#allocation38 + $0x28] sm:$0xff]  }
 0xc23   : > { %6580 = vmatprep.subr.bf16.mxu1 %v9910_v49  ;;  %v9957_v49 = vld [vmem:[#allocation38 + $0x38] sm:$0xff]  }
 0xc24   : > { %10038 = vtanh.f32 %v6260_v1 }
 0xc26   : > { %6581 = vmatpush1.bf16.msra.mxu1 %v9908_v23 }
 0xc27   : > { %6582 = vmatprep.subr.bf16.mxu1 %v9916_v45 }
 0xc2a   : > { %6583 = vmatpush1.bf16.msra.mxu1 %v9914_v19 }
 0xc2b   : > { %6584 = vmatprep.subr.bf16.mxu1 %v9922_v22 }
 0xc2e   : > { %v10039_v33 = vpop.eup %10038  ;;  %6585 = vmatpush1.bf16.msra.mxu1 %v9920_v24 }
 0xc2f   : > { %v6263_v15 = vmul.f32 %v10039_v33, %v6262_v9  ;;  %6586 = vmatprep.subr.bf16.mxu1 %v9928_v32 }
 0xc31   : > { %v6265_v37 = vadd.f32 %v6264_v10, %v6263_v15  ;;  %v1745_v15 = vld [vmem:[%s11921_s18 + $0x50] sm:$0xff] }
 0xc32   : > { %6587 = vmatpush1.bf16.msra.mxu1 %v9926_v59 }
 0xc33   : > { %6266 = vst [vmem:[%s12014_s28] sm:$0xff] %v6265_v37  ;;  %v6267_v52 = vadd.f32 %v6265_v37, %v1744_v47  ;;  %6588 = vmatprep.subr.bf16.mxu1 %v9934_v28 }
 0xc35   : > { %v13127_v4 = vclamps-f32 %v6267_v52, 1.0  ;;  %v9950_v52 = vld [vmem:[#allocation38] sm:$0xff]  }
 0xc36   : > { %6589 = vmatpush1.bf16.msra.mxu1 %v9932_v18 }
 0xc37   : > { %v6270_v3 = vpack.c.bf16 %v13127_v4, %v13127_v4  ;;  %6590 = vmatprep.subr.bf16.mxu1 %v9940_v56 }
 0xc39   : > { %8921 = vmatmul.mubr.bf16.vlgmr.msra.gmra.mrb[48].mxu0 %v6270_v3  ;;  %v9951_v3 = vld [vmem:[#allocation38 + $0x8] sm:$0xff]  }
 0xc3a   : > { %6651 = vmatprep.mubr.bf16.mxu0 %v11168_v51  ;;  %6620 = vmatpush1.bf16.msra.mxu0 %v9905_v40  ;;  %v9956_v40 = vld [vmem:[#allocation38 + $0x30] sm:$0xff]  }
 0xc3b   : > { %6621 = vmatprep.subr.bf16.mxu0 %v9913_v27  ;;  %6591 = vmatpush1.bf16.msra.mxu1 %v9938_v12  ;;  %v10069_v12 = vld [vmem:[%s12017_s17] sm:$0xff] }
 0xc3c   : > { %6592 = vmatprep.subr.bf16.mxu1 %v9946_v26  ;;  %v1746_v26 = vld [vmem:[%s11921_s18 + $0x58] sm:$0xff] }
 0xc3e   : > { %6622 = vmatpush1.bf16.msra.mxu0 %v9911_v6 }
 0xc3f   : > { %6623 = vmatprep.subr.bf16.mxu0 %v9919_v41  ;;  %6593 = vmatpush1.bf16.msra.mxu1 %v9944_v46 }
 0xc40   : > { %8924 = vmatprep.subr.bf16.mxu1 %v11170_v61 }
 0xc42   : > { %6624 = vmatpush1.bf16.msra.mxu0 %v9917_v20 }
 0xc43   : > { %6625 = vmatprep.subr.bf16.mxu0 %v9925_v21 }
 0xc46   : > { %6626 = vmatpush1.bf16.msra.mxu0 %v9923_v31 }
 0xc47   : > { %6627 = vmatprep.subr.bf16.mxu0 %v9931_v30 }
 0xc4a   : > { %6628 = vmatpush1.bf16.msra.mxu0 %v9929_v16 }
 0xc4b   : > { %6629 = vmatprep.subr.bf16.mxu0 %v9937_v63 }
 0xc4e   : > { %6630 = vmatpush1.bf16.msra.mxu0 %v9935_v54 }
 0xc4f   : > { %6631 = vmatprep.subr.bf16.mxu0 %v9943_v8 }
 0xc52   : > { %6632 = vmatpush1.bf16.msra.mxu0 %v9941_v57 }
 0xc53   : > { %6633 = vmatprep.subr.bf16.mxu0 %v9949_v36 }
 0xc56   : > { %6634 = vmatpush1.bf16.msra.mxu0 %v9947_v7 }
 0xc57   : > { %8944 = vmatprep.subr.bf16.mxu0 %v11170_v61 }
 0xd0c   : > { %v6369_v55 = vpop.f32.mrb[48].mxu0 }
 0xd0d   : > { %v8637_v35 = vmul.f32 -1.442695, %v6369_v55  ;;  %v8922_v39 = vpop.f32.mrb[49].mxu0 }
 0xd0e   : > { %v6372_v50 = vpop.f32.mrb[50].mxu0  ;;  %v9960_v39 = vld [vmem:[#allocation39 + $0x10] sm:$0xff]  }
 0xd0f   : > { %10040 = vpow2.f32 %v8637_v35  ;;  %v8923_v1 = vpop.f32.mrb[51].mxu0  ;;  %v9959_v35 = vld [vmem:[#allocation39 + $0x8] sm:$0xff]   ;;  %v9961_v50 = vld [vmem:[#allocation39 + $0x18] sm:$0xff]  }
 0xd10   : > { %v9962_v1 = vld [vmem:[#allocation39 + $0x20] sm:$0xff]  }
 0xd19   : > { %v10041_v34 = vpop.eup %10040 }
 0xd1a   : > { %v6378_v9 = vadd.f32 1.0, %v10041_v34  ;;  %v9963_v34 = vld [vmem:[#allocation39 + $0x28] sm:$0xff]  }
 0xd1c   : > { %10042 = vrcp.f32 %v6378_v9  ;;  %v9964_v9 = vld [vmem:[#allocation39 + $0x30] sm:$0xff]  }
 0xd26   : > { %v10043_v33 = vpop.eup %10042 }
 0xd27   : > { %v6381_v17 = vmul.f32 %v10043_v33, %v13127_v4  ;;  %v9952_v4 = vld [vmem:[#allocation38 + $0x10] sm:$0xff]   ;;  %v9965_v33 = vld [vmem:[#allocation39 + $0x38] sm:$0xff]  }
 0xd29   : > { %v6382_v10 = vadd.f32 %v6381_v17, %v1745_v15  ;;  %v9966_v15 = vld [vmem:[#allocation41] sm:$0xff]   ;;  %v9967_v17 = vld [vmem:[#allocation41 + $0x8] sm:$0xff]  }
 0xd2b   : > { %v8638_v47 = vclamps-f32 %v6382_v10, 1.0 }
 0xd2d   : > { %v6385_v37 = vpack.c.bf16 %v8638_v47, %v8638_v47 }
 0xd2f   : > { %6611 = vmatmul.mubr.bf16.vlgmr.msra.gmra.mrb[48].mxu1 %v6385_v37  ;;  %6652 = vmatmul.mubr.bf16.vlgmr.msra.gmra.mrb[52].mxu0 %v6385_v37 }
 0xd30   : > { %8940 = vmatprep.mubr.msk.bf16.mxu1 %vm11171_vm9, %v11170_v61  ;;  %8960 = vmatprep.mubr.msk.bf16.mxu0 %vm11171_vm9, %v11170_v61 }
 0xd31   : > { %8925 = vmatpush3.bf16.msra.mxu1 %v9950_v52 }
 0xd32   : > { %8926 = vmatprep.subr.bf16.mxu1 %v11170_v61 }
 0xd35   : > { %8927 = vmatpush3.bf16.msra.mxu1 %v9951_v3 }
 0xd36   : > { %8928 = vmatprep.subr.bf16.mxu1 %v11170_v61 }
 0xd39   : > { %8929 = vmatpush3.bf16.msra.mxu1 %v9952_v4 }
 0xd3a   : > { %8930 = vmatprep.subr.bf16.mxu1 %v11170_v61 }
 0xd3d   : > { %8931 = vmatpush3.bf16.msra.mxu1 %v9953_v53 }
 0xd3e   : > { %8932 = vmatprep.subr.bf16.mxu1 %v11170_v61 }
 0xd41   : > { %8933 = vmatpush3.bf16.msra.mxu1 %v9954_v14 }
 0xd42   : > { %8934 = vmatprep.subr.bf16.mxu1 %v11170_v61 }
 0xd45   : > { %8935 = vmatpush3.bf16.msra.mxu1 %v9955_v13  ;;  %v1747_v13 = vld [vmem:[%s11921_s18 + $0x60] sm:$0xff] }
 0xd46   : > { %8936 = vmatprep.subr.bf16.mxu1 %v11170_v61 }
 0xd49   : > { %8937 = vmatpush3.bf16.msra.mxu1 %v9956_v40 }
 0xd4a   : > { %8938 = vmatprep.subr.bf16.mxu1 %v11170_v61 }
 0xd4d   : > { %8939 = vmatpush3.bf16.msra.mxu1 %v9957_v49 }
 0xd4e   : > { %8964 = vmatprep.subr.bf16.mxu1 %v11170_v61 }
 0xe02   : > { %v6612_v27 = vpop.f32.mrb[48].mxu1  ;;  %v6653_v23 = vpop.f32.mrb[52].mxu0 }
 0xe03   : > { %v6667_v6 = vadd.f32 %v13051_v60, %v6612_v27  ;;  %v6669_v45 = vadd.f32 %v13054_v62, %v6653_v23  ;;  %v6614_v41 = vpop.f32.mrb[49].mxu1  ;;  %v6655_v19 = vpop.f32.mrb[53].mxu0 }
 0xe04   : > { %v6668_v20 = vadd.f32 %v13064_v5, %v6614_v41  ;;  %v13152_v22 = vadd.f32 %v6655_v19, %v13120_v43  ;;  %v6616_v21 = vpop.f32.mrb[50].mxu1  ;;  %v6657_v24 = vpop.f32.mrb[54].mxu0  ;;  %v9970_v41 = vld [vmem:[#allocation41 + $0x20] sm:$0xff]   ;;  %v9971_v19 = vld [vmem:[#allocation41 + $0x28] sm:$0xff]  }
 0xe05   : > { %v6670_v31 = vadd.f32 %v6667_v6, %v12995_v25  ;;  %v6672_v32 = vadd.f32 %v6669_v45, %v13001_v38  ;;  %v6617_v30 = vpop.f32.mrb[51].mxu1  ;;  %v6658_v59 = vpop.f32.mrb[55].mxu0  ;;  %v9968_v6 = vld [vmem:[#allocation41 + $0x10] sm:$0xff]   ;;  %v9969_v45 = vld [vmem:[#allocation41 + $0x18] sm:$0xff]  }
 0xe06   : > { %v6671_v16 = vadd.f32 %v6668_v20, %v12997_v42  ;;  %v9972_v20 = vld [vmem:[#allocation41 + $0x30] sm:$0xff]   ;;  %v9973_v21 = vld [vmem:[#allocation41 + $0x38] sm:$0xff]   ;;  %v6923_v24 = vpop.permute.xlu0 %6922 }
 0xe07   : > { %v6673_v60 = vadd.f32 %v6670_v31, %v12939_v0 }
 0xe08   : > { %v6680_v62 = vadd.f32 %v6671_v16, %v12941_v2  ;;  %v6925_v16 = vmul.f32 %v6923_v24, %v12987_v58  ;;  %v9975_v58 = vld [vmem:[%s13741_s21 + $0x8] sm:$0xff]   ;;  %v8742_v24 = vld [vmem:[%s12777_s11 + $0xf8] sm:$0xff] (!%p8715_p2) }
 0xe09   : > { %v8671_v28 = vmul.f32 -1.442695, %v6673_v60 }
 0xe0a   : > { %v8672_v5 = vmul.f32 -1.442695, %v6680_v62 }
 0xe0b   : > { %10044 = vpow2.f32 %v8671_v28 }
 0xe0c   : > { %10046 = vpow2.f32 %v8672_v5 }
 0xe15   : > { %v10045_v43 = vpop.eup %10044 }
 0xe16   : > { %v6677_v63 = vadd.f32 1.0, %v10045_v43  ;;  %v10047_v25 = vpop.eup %10046  ;;  %v1748_v43 = vld [vmem:[%s11921_s18 + $0x68] sm:$0xff]  ;;  %s13742_s18 = sld [smem:[#allocation128_spill]] }
 0xe17   : > { %v6684_v38 = vadd.f32 1.0, %v10047_v25 }
 0xe18   : > { %10048 = vrcp.f32 %v6677_v63 }
 0xe19   : > { %10050 = vrcp.f32 %v6684_v38 }
 0xe1c   : > { %s7156_s22 = scalar_lea.vmem %s13742_s18, %s8269_s13 }
 0xe22   : > { %v10049_v18 = vpop.eup %10048 }
 0xe23   : > { %v6687_v54 = vmul.f32 %v10049_v18, %v12945_v11  ;;  %v10051_v0 = vpop.eup %10050  ;;  %v9958_v11 = vld [vmem:[#allocation39] sm:$0xff]  }
 0xe24   : > { %v6690_v2 = vsub.f32 1.0, %v10051_v0  ;;  %v6692_v57 = vmul.f32 %v10069_v12, %v10051_v0  ;;  %8945 = vmatpush3.bf16.msra.mxu0 %v9958_v11  ;;  %v9974_v18 = vld [vmem:[%s13740_s7] sm:$0xff]   ;;  %v9980_v0 = vld [vmem:[%s13741_s21 + $0x30] sm:$0xff]  }
 0xe25   : > { %v6688_v42 = vadd.f32 %v6687_v54, %v6672_v32  ;;  %8946 = vmatprep.subr.bf16.mxu0 %v11170_v61  ;;  %v9978_v54 = vld [vmem:[%s13741_s21 + $0x20] sm:$0xff]  }
 0xe27   : > { %10052 = vtanh.f32 %v6688_v42  ;;  %v9979_v42 = vld [vmem:[%s13741_s21 + $0x28] sm:$0xff]  }
 0xe28   : > { %8947 = vmatpush3.bf16.msra.mxu0 %v9959_v35 }
 0xe29   : > { %8948 = vmatprep.subr.bf16.mxu0 %v11170_v61 }
 0xe2c   : > { %8949 = vmatpush3.bf16.msra.mxu0 %v9960_v39 }
 0xe2d   : > { %8950 = vmatprep.subr.bf16.mxu0 %v11170_v61 }
 0xe30   : > { %8951 = vmatpush3.bf16.msra.mxu0 %v9961_v50 }
 0xe31   : > { %v10053_v56 = vpop.eup %10052  ;;  %8952 = vmatprep.subr.bf16.mxu0 %v11170_v61 }
 0xe32   : > { %v6691_v8 = vmul.f32 %v10053_v56, %v6690_v2  ;;  %v9981_v2 = vld [vmem:[%s13741_s21 + $0x38] sm:$0xff]  }
 0xe34   : > { %v6693_v36 = vadd.f32 %v6692_v57, %v6691_v8  ;;  %8953 = vmatpush3.bf16.msra.mxu0 %v9962_v1 }
 0xe35   : > { %8954 = vmatprep.subr.bf16.mxu0 %v11170_v61 }
 0xe36   : > { %6694 = vst [vmem:[%s12017_s17] sm:$0xff] %v6693_v36  ;;  %v6695_v46 = vadd.f32 %v6693_v36, %v1746_v26 }
 0xe38   : > { %v8673_v7 = vclamps-f32 %v6695_v46, 1.0  ;;  %8955 = vmatpush3.bf16.msra.mxu0 %v9963_v34 }
 0xe39   : > { %8956 = vmatprep.subr.bf16.mxu0 %v11170_v61 }
 0xe3a   : > { %v6698_v55 = vpack.c.bf16 %v8673_v7, %v8673_v7 }
 0xe3c   : > { %8941 = vmatmul.mubr.bf16.vlgmr.msra.gmra.mrb[52].mxu1 %v6698_v55  ;;  %8957 = vmatpush3.bf16.msra.mxu0 %v9964_v9 }
 0xe3d   : > { %8980 = vmatprep.mubr.msk.bf16.mxu1 %vm11171_vm9, %v11170_v61  ;;  %8958 = vmatprep.subr.bf16.mxu0 %v11170_v61 }
 0xe3e   : > { %8965 = vmatpush3.bf16.msra.mxu1 %v9966_v15 }
 0xe3f   : > { %8966 = vmatprep.subr.bf16.mxu1 %v11170_v61 }
 0xe40   : > { %8959 = vmatpush3.bf16.msra.mxu0 %v9965_v33 }
 0xe41   : > { %8984 = vmatprep.subr.bf16.mxu0 %v11170_v61 }
 0xe42   : > { %8967 = vmatpush3.bf16.msra.mxu1 %v9967_v17 }
 0xe43   : > { %8968 = vmatprep.subr.bf16.mxu1 %v11170_v61 }
 0xe46   : > { %8969 = vmatpush3.bf16.msra.mxu1 %v9968_v6  ;;  %v8739_v6 = vld [vmem:[%s12777_s11 + $0xe0] sm:$0xff] (!%p8715_p2) }
 0xe47   : > { %8970 = vmatprep.subr.bf16.mxu1 %v11170_v61 }
 0xe4a   : > { %8971 = vmatpush3.bf16.msra.mxu1 %v9969_v45  ;;  %v8723_v45 = vld [vmem:[%s12777_s11 + $0x60] sm:$0xff] (!%p8715_p2) }
 0xe4b   : > { %8972 = vmatprep.subr.bf16.mxu1 %v11170_v61 }
 0xe4e   : > { %8973 = vmatpush3.bf16.msra.mxu1 %v9970_v41  ;;  %v8740_v41 = vld [vmem:[%s12777_s11 + $0xe8] sm:$0xff] (!%p8715_p2) }
 0xe4f   : > { %8974 = vmatprep.subr.bf16.mxu1 %v11170_v61 }
 0xe52   : > { %8975 = vmatpush3.bf16.msra.mxu1 %v9971_v19  ;;  %v8724_v19 = vld [vmem:[%s12777_s11 + $0x68] sm:$0xff] (!%p8715_p2) }
 0xe53   : > { %8976 = vmatprep.subr.bf16.mxu1 %v11170_v61 }
 0xe56   : > { %8977 = vmatpush3.bf16.msra.mxu1 %v9972_v20  ;;  %v8741_v20 = vld [vmem:[%s12777_s11 + $0xf0] sm:$0xff] (!%p8715_p2) }
 0xe57   : > { %8978 = vmatprep.subr.bf16.mxu1 %v11170_v61 }
 0xe5a   : > { %8979 = vmatpush3.bf16.msra.mxu1 %v9973_v21  ;;  %v8725_v21 = vld [vmem:[%s12777_s11 + $0x70] sm:$0xff] (!%p8715_p2) }
 0xf0f   : > { %v6797_v10 = vpop.f32.mrb[52].mxu1 }
 0xf10   : > { %v8682_v47 = vmul.f32 -1.442695, %v6797_v10  ;;  %v8942_v37 = vpop.f32.mrb[53].mxu1 }
 0xf11   : > { %v6800_v52 = vpop.f32.mrb[54].mxu1  ;;  %v8717_v37 = vld [vmem:[%s12777_s11 + $0x30] sm:$0xff] (!%p8715_p2) }
 0xf12   : > { %10054 = vpow2.f32 %v8682_v47  ;;  %v8943_v3 = vpop.f32.mrb[55].mxu1  ;;  %v8733_v47 = vld [vmem:[%s12777_s11 + $0xb0] sm:$0xff] (!%p8715_p2)  ;;  %v8734_v52 = vld [vmem:[%s12777_s11 + $0xb8] sm:$0xff] (!%p8715_p2) }
 0xf13   : > { %v8718_v3 = vld [vmem:[%s12777_s11 + $0x38] sm:$0xff] (!%p8715_p2) }
 0xf1c   : > { %v10055_v4 = vpop.eup %10054 }
 0xf1d   : > { %v6806_v53 = vadd.f32 1.0, %v10055_v4  ;;  %v8735_v4 = vld [vmem:[%s12777_s11 + $0xc0] sm:$0xff] (!%p8715_p2) }
 0xf1f   : > { %10056 = vrcp.f32 %v6806_v53  ;;  %v8719_v53 = vld [vmem:[%s12777_s11 + $0x40] sm:$0xff] (!%p8715_p2) }
 0xf29   : > { %v10057_v14 = vpop.eup %10056 }
 0xf2a   : > { %v6809_v40 = vmul.f32 %v10057_v14, %v8673_v7  ;;  %v8736_v14 = vld [vmem:[%s12777_s11 + $0xc8] sm:$0xff] (!%p8715_p2) }
 0xf2c   : > { %v6810_v49 = vadd.f32 %v6809_v40, %v1747_v13  ;;  %v8720_v13 = vld [vmem:[%s12777_s11 + $0x48] sm:$0xff] (!%p8715_p2)  ;;  %v8737_v40 = vld [vmem:[%s12777_s11 + $0xd0] sm:$0xff] (!%p8715_p2) }
 0xf2e   : > { %v8683_v27 = vclamps-f32 %v6810_v49, 1.0  ;;  %v8721_v49 = vld [vmem:[%s12777_s11 + $0x50] sm:$0xff] (!%p8715_p2) }
 0xf30   : > { %v6814_v23 = vpack.c.bf16 %v8683_v27, %v8683_v27  ;;  %v8738_v27 = vld [vmem:[%s12777_s11 + $0xd8] sm:$0xff] (!%p8715_p2) }
 0xf32   : > { %8961 = vmatmul.mubr.bf16.vlgmr.msra.gmra.mrb[56].mxu0 %v6814_v23  ;;  %v8722_v23 = vld [vmem:[%s12777_s11 + $0x58] sm:$0xff] (!%p8715_p2) }
 0xf33   : > { %9000 = vmatprep.mubr.msk.bf16.mxu0 %vm11171_vm9, %v11170_v61  ;;  %8985 = vmatpush3.bf16.msra.mxu0 %v9974_v18 }
 0xf34   : > { %8986 = vmatprep.subr.bf16.mxu0 %v11170_v61 }
 0xf37   : > { %8987 = vmatpush3.bf16.msra.mxu0 %v9975_v58 }
 0xf38   : > { %8988 = vmatprep.subr.bf16.mxu0 %v11170_v61 }
0x1005   : > { %v6913_v31 = vpop.f32.mrb[56].mxu0 }
0x1006   : > { %v6919_v32 = vadd.f32 %v6913_v31, %v13152_v22  ;;  %v8962_v30 = vpop.f32.mrb[57].mxu0  ;;  %v8726_v31 = vld [vmem:[%s12777_s11 + $0x78] sm:$0xff] (!%p8715_p2) }
0x1007   : > { %v6916_v59 = vpop.f32.mrb[58].mxu0  ;;  %v8727_v30 = vld [vmem:[%s12777_s11 + $0x80] sm:$0xff] (!%p8715_p2) }
0x1008   : > { %v6920_v60 = vadd.f32 %v6919_v32, %v13036_v29  ;;  %v8963_v62 = vpop.f32.mrb[59].mxu0  ;;  %v9977_v29 = vld [vmem:[%s13741_s21 + $0x18] sm:$0xff]  }
0x1009   : > { %v8729_v62 = vld [vmem:[%s12777_s11 + $0x90] sm:$0xff] (!%p8715_p2) }
0x100a   : > { %v6926_v28 = vadd.f32 %v6925_v16, %v6920_v60  ;;  %v8728_v16 = vld [vmem:[%s12777_s11 + $0x88] sm:$0xff] (!%p8715_p2) }
0x100c   : > { %v6927_v5 = vadd.f32 %v6926_v28, %v12999_v44  ;;  %v9976_v44 = vld [vmem:[%s13741_s21 + $0x10] sm:$0xff]  }
0x100d   : > { %8989 = vmatpush3.bf16.msra.mxu0 %v9976_v44 }
0x100e   : > { %10058 = vtanh.f32 %v6927_v5  ;;  %8990 = vmatprep.subr.bf16.mxu0 %v11170_v61  ;;  %v8730_v5 = vld [vmem:[%s12777_s11 + $0x98] sm:$0xff] (!%p8715_p2) }
0x1011   : > { %8991 = vmatpush3.bf16.msra.mxu0 %v9977_v29 }
0x1012   : > { %8992 = vmatprep.subr.bf16.mxu0 %v11170_v61 }
0x1015   : > { %8993 = vmatpush3.bf16.msra.mxu0 %v9978_v54 }
0x1016   : > { %8994 = vmatprep.subr.bf16.mxu0 %v11170_v61 }
0x1018   : > { %v10059_v63 = vpop.eup %10058 }
0x1019   : > { %v6929_v25 = vadd.f32 %v10059_v63, %v1748_v43  ;;  %8995 = vmatpush3.bf16.msra.mxu0 %v9979_v42  ;;  %v8731_v63 = vld [vmem:[%s12777_s11 + $0xa0] sm:$0xff] (!%p8715_p2) }
0x101a   : > { %8996 = vmatprep.subr.bf16.mxu0 %v11170_v61 }
0x101b   : > { %v8692_v38 = vclamps-f32 %v6929_v25, 1.0 }
0x101d   : > { %v6932_v22 = vpack.c.bf16 %v8692_v38, %v8692_v38  ;;  %8997 = vmatpush3.bf16.msra.mxu0 %v9980_v0 }
0x101e   : > { %8998 = vmatprep.subr.bf16.mxu0 %v11170_v61 }
0x101f   : > { %8981 = vmatmul.mubr.bf16.vlgmr.msra.gmra.mrb[56].mxu1 %v6932_v22 }
0x1021   : > { %8999 = vmatpush3.bf16.msra.mxu0 %v9981_v2 }
0x10f2   : > { %v7031_v56 = vpop.f32.mrb[56].mxu1 }
0x10f3   : > { %v8701_v8 = vmul.f32 -1.442695, %v7031_v56  ;;  %v8982_v12 = vpop.f32.mrb[57].mxu1 }
0x10f4   : > { %v7034_v57 = vpop.f32.mrb[58].mxu1 }
0x10f5   : > { %10060 = vpow2.f32 %v8701_v8  ;;  %v8983_v26 = vpop.f32.mrb[59].mxu1 }
0x10ff   : > { %v10061_v36 = vpop.eup %10060 }
0x1100   : > { %v7040_v46 = vadd.f32 1.0, %v10061_v36 }
0x1102   : > { %10062 = vrcp.f32 %v7040_v46 }
0x110c   : > { %v10063_v7 = vpop.eup %10062 }
0x110d   : > { %v7043_v55 = vmul.f32 %v10063_v7, %v8692_v38 }
0x110f   : > { %v7044_v11 = vpack.c.bf16 %v7043_v55, %v7043_v55 }
0x1111   : > { %9001 = vmatmul.mubr.bf16.vlgmr.msra.gmra.mrb[60].mxu0 %v7044_v11 }
0x11e4   : > { %v7143_v35 = vpop.f32.mrb[60].mxu0 }
0x11e5   : > { %10064 = vtanh.f32 %v7143_v35  ;;  %v9002_v61 = vpop.f32.mrb[61].mxu0 }
0x11e6   : > { %v7146_v39 = vpop.f32.mrb[62].mxu0 }
0x11e7   : > { %v9003_v50 = vpop.f32.mrb[63].mxu0 }
0x11ef   : > { %v10065_v1 = vpop.eup %10064 }
0x11f0   : > { %v7155_v34 = vmul.f32 %v10065_v1, %v13066_v48  ;;  %v8716_v48 = vld [vmem:[%s12777_s11 + $0x28] sm:$0xff] (!%p8715_p2) }
0x11f2   : > { %7159 = vxpose.xlu0.b32.start.end [1/1] (short) (narrow) %v7155_v34, 40  ;;  %7157 = vst.msk [vmem:[%s7156_s22] sm:$0xff] %vm3260_vm14, %v7155_v34 }
0x121b   : > { %9447 = vset.pattern.permute.xlu0 %v11168_v51  ;;  %v8732_v51 = vld [vmem:[%s12777_s11 + $0xa8] sm:$0xff] (!%p8715_p2) }
0x121c   : > { %7268 = vxpose.xlu1.b32.start [1/16] (narrow) (!%p8715_p2), %v8732_v51, 8 }
0x1220   : > { %7269 = vxpose.xlu1.b32.cont [2/16] (narrow) (!%p8715_p2), %v8733_v47, 8 }
0x1224   : > { %7270 = vxpose.xlu1.b32.cont [3/16] (narrow) (!%p8715_p2), %v8734_v52, 8 }
0x1228   : > { %7271 = vxpose.xlu1.b32.cont [4/16] (narrow) (!%p8715_p2), %v8735_v4, 8 }
0x122c   : > { %7272 = vxpose.xlu1.b32.cont [5/16] (narrow) (!%p8715_p2), %v8736_v14, 8 }
0x1230   : > { %7273 = vxpose.xlu1.b32.cont [6/16] (narrow) (!%p8715_p2), %v8737_v40, 8 }
0x1234   : > { %7274 = vxpose.xlu1.b32.cont [7/16] (narrow) (!%p8715_p2), %v8738_v27, 8 }
0x1238   : > { %7275 = vxpose.xlu1.b32.cont [8/16] (narrow) (!%p8715_p2), %v8739_v6, 8 }
0x1239   : > { %7236 = vxpose.xlu0.b32.start [1/16] (narrow) (!%p8715_p2), %v8716_v48, 8 }
0x123c   : > { %7276 = vxpose.xlu1.b32.cont [9/16] (narrow) (!%p8715_p2), %v8740_v41, 8 }
0x123d   : > { %7237 = vxpose.xlu0.b32.cont [2/16] (narrow) (!%p8715_p2), %v8717_v37, 8 }
0x1240   : > { %7277 = vxpose.xlu1.b32.cont [10/16] (narrow) (!%p8715_p2), %v8741_v20, 8 }
0x1241   : > { %7238 = vxpose.xlu0.b32.cont [3/16] (narrow) (!%p8715_p2), %v8718_v3, 8 }
0x1244   : > { %7278 = vxpose.xlu1.b32.cont [11/16] (narrow) (!%p8715_p2), %v8742_v24, 8 }
0x1245   : > { %7239 = vxpose.xlu0.b32.cont [4/16] (narrow) (!%p8715_p2), %v8719_v53, 8 }
0x1249   : > { %7240 = vxpose.xlu0.b32.cont [5/16] (narrow) (!%p8715_p2), %v8720_v13, 8 }
0x124d   : > { %7241 = vxpose.xlu0.b32.cont [6/16] (narrow) (!%p8715_p2), %v8721_v49, 8 }
0x1251   : > { %7242 = vxpose.xlu0.b32.cont [7/16] (narrow) (!%p8715_p2), %v8722_v23, 8 }
0x1255   : > { %7243 = vxpose.xlu0.b32.cont [8/16] (narrow) (!%p8715_p2), %v8723_v45, 8 }
0x1259   : > { %7244 = vxpose.xlu0.b32.cont [9/16] (narrow) (!%p8715_p2), %v8724_v19, 8 }
0x125d   : > { %7245 = vxpose.xlu0.b32.cont [10/16] (narrow) (!%p8715_p2), %v8725_v21, 8 }
0x1261   : > { %7246 = vxpose.xlu0.b32.cont [11/16] (narrow) (!%p8715_p2), %v8726_v31, 8 }
0x1265   : > { %7247 = vxpose.xlu0.b32.cont [12/16] (narrow) (!%p8715_p2), %v8727_v30, 8 }
0x1269   : > { %7248 = vxpose.xlu0.b32.cont [13/16] (narrow) (!%p8715_p2), %v8728_v16, 8 }
0x126d   : > { %7249 = vxpose.xlu0.b32.cont [14/16] (narrow) (!%p8715_p2), %v8729_v62, 8 }
0x1271   : > { %7250 = vxpose.xlu0.b32.cont [15/16] (narrow) (!%p8715_p2), %v8730_v5, 8 }
0x1272   : > { %v7175_v9 = vpop.trf.xlu0 }
0x1273   : > { %8710 = vst.msk [vmem:[%s12777_s11 + $0x100] sm:$0xff] %vm7192_vm4, %v7175_v9 }
0x1275   : > { %7251 = vxpose.xlu0.b32.end [16/16] (narrow) (!%p8715_p2), %v8731_v63, 8 }
0x1276   : > { %v7176_v33 = vpop.trf.xlu0 }
0x1277   : > { %8711 = vst.msk [vmem:[%s12777_s11 + $0x108] sm:$0xff] %vm7192_vm4, %v7176_v33 }
0x127a   : > { %v7177_v15 = vpop.trf.xlu0  ;;  %v8743_v32 = vld [vmem:[%s12777_s11 + $0x100] sm:$0xff] (!%p8715_p2) }
0x127b   : > { %8712 = vst.msk [vmem:[%s12777_s11 + $0x110] sm:$0xff] %vm7192_vm4, %v7177_v15  ;;  %7279 = vxpose.xlu1.b32.cont [12/16] (narrow) (!%p8715_p2), %v8743_v32, 8 }
0x127d   : > { %7201 = sbr.rel (%p8715_p2) target bundleno = 4817 (0x12d1), region = 236 }
0x127e   : > { %v7178_v17 = vpop.trf.xlu0  ;;  %v8744_v59 = vld [vmem:[%s12777_s11 + $0x108] sm:$0xff] (!%p8715_p2) }
0x127f   : > { %8713 = vst.msk [vmem:[%s12777_s11 + $0x118] sm:$0xff] %vm7192_vm4, %v7178_v17  ;;  %7280 = vxpose.xlu1.b32.cont [13/16] (narrow) (!%p8715_p2), %v8744_v59, 8 }
0x1282   : > { %v7179_v10 = vpop.trf.xlu0  ;;  %v8745_v60 = vld [vmem:[%s12777_s11 + $0x110] sm:$0xff] (!%p8715_p2) }
0x1283   : > { %8714 = vst.msk [vmem:[%s12777_s11 + $0x120] sm:$0xff] %vm7192_vm4, %v7179_v10  ;;  %7281 = vxpose.xlu1.b32.cont [14/16] (narrow) (!%p8715_p2), %v8745_v60, 8 }
0x1286   : > { %v8746_v28 = vld [vmem:[%s12777_s11 + $0x118] sm:$0xff] }
0x1287   : > { %7282 = vxpose.xlu1.b32.cont [15/16] (narrow) %v8746_v28, 8 }
0x128a   : > { %v8747_v43 = vld [vmem:[%s12777_s11 + $0x120] sm:$0xff] }
0x128b   : > { %7283 = vxpose.xlu1.b32.end [16/16] (narrow) %v8747_v43, 8 }
0x12b9   : > { %v7252_v38 = vpop.trf.xlu0 }
0x12ba   : > { %7300 = vst [vmem:[%s13743_s19] sm:$0xff] %v7252_v38 }
0x12cf   : > { %v7284_v25 = vpop.trf.xlu1 }
0x12d0   : > { %7301 = vst [vmem:[%s13743_s19 + $0x8] sm:$0xff] %v7284_v25 }
0x12d1 PF: > { %s13744_s1 = sld [smem:[#allocation111_spill]]  ;;  %s13745_s9 = sld [smem:[#allocation98_spill]] }
0x12d2   : > { %s13747_s29 = sld [smem:[#allocation129_spill]]  ;;  %s13748_s8 = sld [smem:[#allocation126_spill]] }
0x12d3   : > { %s13749_s27 = sld [smem:[#allocation118_spill]]  ;;  %s11178_s11 = smov [#allocation43]  }
0x12d4   : > { %s10743_s10 = sshll.u32 %s11178_s11, 4  ;;  %s10744_s10 = int_to_ptr.vmem [resolvable:$false] %s10743_s10 }
0x12d5   : > { %s10745_s6 = scalar_lea.vmem %s10744_s10, 1024 }
0x12d7   : > { %s13746_s15 = smov %s13745_s9  ;;  %s13250_s25 = sshll.u32 %s13744_s1, 7 }
0x12d8   : > { %s13254_s12 = scalar_lea.hbm %s13745_s9, %s13250_s25  ;;  %s7360_s26 = sshll.u32 %s13747_s29, 4  ;;  %s13257_s26 = int_to_ptr.vmem [resolvable:$true] %s7360_s26 }
0x12d9   : > { %s13260_s2 = sshll.u32 %s13744_s1, 8  ;;  %s7308_s5 = scalar_lea.sflag [#allocation44], %s13748_s8 }
0x12da   : > { %s10739_s0 = scalar_lea.vmem %s13257_s26, 512  ;;  %p13750_p8 = scmp.ne.s32.totalorder %s13749_s27, 0 }
0x12db   : > { %p10740_p5 = scmp.ne.s32.totalorder %s13257_s26, %s10739_s0  ;;  %p10746_p1 = scmp.lt.s32.totalorder %s13257_s26, %s10744_s10 }
0x12dc   : > { %p10747_p10 = scmp.lt.s32.totalorder %s10745_s6, %s10739_s0 }
0x12dd   : > { %p10741_p11 = pnand %p10740_p5, %p13750_p8 }
0x12de   : > { %p10748_p12 = por %p10747_p10, %p10746_p1 }
0x12df   : > { %p10742_p9 = pneg %p10741_p11 }
0x12e1   : > { %p10749_p13 = pnand %p10748_p12, %p10742_p9 }
0x12e3   : > { %10752 = shalt.err (!%p10749_p13)
}
0x12e4   : > { %s10753_s30 = scalar_lea.hbm %s13254_s12, 512  ;;  %s10757_s20 = scalar_lea.hbm %s13746_s15, 1024 }
0x12e5   : > { %p10754_p4 = scmp.ne.s32.totalorder %s13254_s12, %s10753_s30  ;;  %p10758_p0 = scmp.lt.u32.totalorder %s13254_s12, %s13746_s15 }
0x12e6   : > { %p10759_p3 = scmp.lt.u32.totalorder %s10757_s20, %s10753_s30  ;;  %p10761_p5 = scmp.lt.u32.totalorder %s10753_s30, %s13254_s12 }
0x12e7   : > { %p10755_p7 = pnand %p10754_p4, %p13750_p8 }
0x12e8   : > { %p10760_p2 = por %p10759_p3, %p10758_p0 }
0x12e9   : > { %p10756_p6 = pneg %p10755_p7 }
0x12ea   : > { %p10762_p11 = por %p10761_p5, %p10760_p2 }
0x12ec   : > { %p10763_p9 = pnand %p10762_p11, %p10756_p6 }
0x12ee   : > { %10766 = shalt.err (!%p10763_p9)
}
0x12ef   : > { %s11179_s3 = smov 128   ;;  %s13751_s23 = sld [smem:[#allocation100_spill]] }
0x12f0   : > { %s11180_s13 = smov 256   ;;  %s11181_s24 = smov 8  }
0x12f1   : > { %9127 = dma.vmem_to_hbm [thread:$0]  (%p13750_p8), %s13257_s26, 512, %s13254_s12, %s7308_s5, %s11179_s3, %s11180_s13, %s11181_s24  }
0x12f2   : > { %s7391_s7 = sshll.u32 %s12011_s14, 4  ;;  %s7318_s18 = scalar_lea.sflag [#allocation47], %s13748_s8  ;;  %s7392_s7 = int_to_ptr.vmem [resolvable:$true] %s7391_s7 }
0x12f3   : > { %s10767_s22 = scalar_lea.vmem %s7392_s7, 256  ;;  %s11182_s19 = smov [#allocation46]  }
0x12f4   : > { %p10768_p1 = scmp.ne.s32.totalorder %s7392_s7, %s10767_s22  ;;  %s10771_s1 = sshll.u32 %s11182_s19, 4  ;;  %s10772_s1 = int_to_ptr.vmem [resolvable:$false] %s10771_s1 }
0x12f5   : > { %s13287_s16 = scalar_lea.hbm %s13751_s23, %s13260_s2  ;;  %s10773_s9 = scalar_lea.vmem %s10772_s1, 512 }
0x12f6   : > { %p10769_p10 = pnand %p10768_p1, %p13750_p8  ;;  %p10774_p13 = scmp.lt.s32.totalorder %s7392_s7, %s10772_s1 }
0x12f7   : > { %p10775_p4 = scmp.lt.s32.totalorder %s10773_s9, %s10767_s22 }
0x12f8   : > { %p10770_p12 = pneg %p10769_p10 }
0x12f9   : > { %p10776_p7 = por %p10775_p4, %p10774_p13 }
0x12fb   : > { %p10777_p6 = pnand %p10776_p7, %p10770_p12 }
0x12fd   : > { %10780 = shalt.err (!%p10777_p6)
}
0x12fe   : > { %s10781_s14 = scalar_lea.hbm %s13287_s16, 256  ;;  %s10785_s29 = scalar_lea.hbm %s13751_s23, 512 }
0x12ff   : > { %p10782_p0 = scmp.ne.s32.totalorder %s13287_s16, %s10781_s14  ;;  %p10786_p5 = scmp.lt.u32.totalorder %s13287_s16, %s13751_s23 }
0x1300   : > { %p10787_p11 = scmp.lt.u32.totalorder %s10785_s29, %s10781_s14  ;;  %p10789_p1 = scmp.lt.u32.totalorder %s10781_s14, %s13287_s16 }
0x1301   : > { %p10783_p3 = pnand %p10782_p0, %p13750_p8 }
0x1302   : > { %p10788_p9 = por %p10787_p11, %p10786_p5 }
0x1303   : > { %p10784_p2 = pneg %p10783_p3 }
0x1304   : > { %p10790_p10 = por %p10789_p1, %p10788_p9 }
0x1306   : > { %p10791_p12 = pnand %p10790_p10, %p10784_p2 }
0x1308   : > { %10794 = shalt.err (!%p10791_p12)
}
0x1309   : > { %s13752_s12 = sld [smem:[#allocation102_spill]]  ;;  %s7417_s0 = sshll.u32 %s12017_s17, 4  ;;  %s7418_s0 = int_to_ptr.vmem [resolvable:$true] %s7417_s0 }
0x130a   : > { %9129 = dma.vmem_to_hbm [thread:$0]  (%p13750_p8), %s7392_s7, 256, %s13287_s16, %s7318_s18  }
0x130b   : > { %s13562_s11 = scalar_lea.sflag [#allocation50], %s13748_s8  ;;  %s10795_s10 = scalar_lea.vmem %s7418_s0, 128 }
0x130c   : > { %p10796_p13 = scmp.ne.s32.totalorder %s7418_s0, %s10795_s10  ;;  %s11183_s6 = smov [#allocation49]  }
0x130d   : > { %s10799_s30 = sshll.u32 %s11183_s6, 4  ;;  %s10800_s30 = int_to_ptr.vmem [resolvable:$false] %s10799_s30 }
0x130e   : > { %p10797_p4 = pnand %p10796_p13, %p13750_p8  ;;  %s10801_s20 = scalar_lea.vmem %s10800_s30, 256 }
0x130f   : > { %s13308_s26 = scalar_lea.hbm %s13752_s12, %s13250_s25  ;;  %p10802_p6 = scmp.lt.s32.totalorder %s7418_s0, %s10800_s30 }
0x1310   : > { %p10798_p7 = pneg %p10797_p4  ;;  %p10803_p0 = scmp.lt.s32.totalorder %s10801_s20, %s10795_s10 }
0x1312   : > { %p10804_p3 = por %p10803_p0, %p10802_p6 }
0x1314   : > { %p10805_p2 = pnand %p10804_p3, %p10798_p7 }
0x1316   : > { %10808 = shalt.err (!%p10805_p2)
}
0x1317   : > { %s10809_s17 = scalar_lea.hbm %s13308_s26, 128  ;;  %s10813_s16 = scalar_lea.hbm %s13752_s12, 256 }
0x1318   : > { %p10810_p5 = scmp.ne.s32.totalorder %s13308_s26, %s10809_s17  ;;  %p10814_p1 = scmp.lt.u32.totalorder %s13308_s26, %s13752_s12 }
0x1319   : > { %p10815_p10 = scmp.lt.u32.totalorder %s10813_s16, %s10809_s17  ;;  %p10817_p13 = scmp.lt.u32.totalorder %s10809_s17, %s13308_s26 }
0x131a   : > { %p10811_p11 = pnand %p10810_p5, %p13750_p8 }
0x131b   : > { %p10816_p12 = por %p10815_p10, %p10814_p1 }
0x131c   : > { %p10812_p9 = pneg %p10811_p11 }
0x131d   : > { %p10818_p4 = por %p10817_p13, %p10816_p12 }
0x131f   : > { %p10819_p7 = pnand %p10818_p4, %p10812_p9 }
0x1321   : > { %10822 = shalt.err (!%p10819_p7)
}
0x1322   : > { %s13753_s7 = sld [smem:[#allocation97_spill]]  ;;  %s13755_s22 = sld [smem:[#allocation128_spill]] }
0x1323   : > { %s13756_s1 = sld [smem:[#allocation99_spill]]  ;;  %s13758_s9 = sld [smem:[#allocation127_spill]] }
0x1324   : > { %9131 = dma.vmem_to_hbm [thread:$0]  (%p13750_p8), %s7418_s0, 128, %s13308_s26, %s13562_s11  }
0x1325   : > { %s11184_s17 = smov [#allocation42]  }
0x1326   : > { %s10827_s16 = sshll.u32 %s11184_s17, 4  ;;  %s10828_s16 = int_to_ptr.vmem [resolvable:$false] %s10827_s16 }
0x1327   : > { %s10829_s26 = scalar_lea.vmem %s10828_s16, 1024 }
0x1328   : > { %s13754_s19 = smov %s13753_s7  ;;  %s13329_s14 = scalar_lea.hbm %s13753_s7, %s13250_s25 }
0x1329   : > { %s13757_s29 = smov %s13756_s1  ;;  %s7345_s10 = sshll.u32 %s13755_s22, 4  ;;  %s13332_s10 = int_to_ptr.vmem [resolvable:$true] %s7345_s10 }
0x132a   : > { %s13336_s6 = scalar_lea.hbm %s13756_s1, %s13260_s2  ;;  %s7303_s30 = scalar_lea.sflag [#allocation6], %s13758_s9 }
0x132b   : > { %s10823_s20 = scalar_lea.vmem %s13332_s10, 512  ;;  %p10830_p2 = scmp.lt.s32.totalorder %s13332_s10, %s10828_s16 }
0x132c   : > { %p10824_p6 = scmp.ne.s32.totalorder %s13332_s10, %s10823_s20  ;;  %p10831_p5 = scmp.lt.s32.totalorder %s10829_s26, %s10823_s20 }
0x132e   : > { %p10825_p0 = pnand %p10824_p6, %p13750_p8  ;;  %p10832_p11 = por %p10831_p5, %p10830_p2 }
0x1330   : > { %p10826_p3 = pneg %p10825_p0 }
0x1332   : > { %p10833_p9 = pnand %p10832_p11, %p10826_p3 }
0x1334   : > { %10836 = shalt.err (!%p10833_p9)
}
0x1335   : > { %s10837_s0 = scalar_lea.hbm %s13329_s14, 512  ;;  %s10841_s7 = scalar_lea.hbm %s13754_s19, 1024 }
0x1336   : > { %p10838_p1 = scmp.ne.s32.totalorder %s13329_s14, %s10837_s0  ;;  %p10842_p13 = scmp.lt.u32.totalorder %s13329_s14, %s13754_s19 }
0x1337   : > { %p10843_p4 = scmp.lt.u32.totalorder %s10841_s7, %s10837_s0  ;;  %p10845_p6 = scmp.lt.u32.totalorder %s10837_s0, %s13329_s14 }
0x1338   : > { %p10839_p10 = pnand %p10838_p1, %p13750_p8 }
0x1339   : > { %p10844_p7 = por %p10843_p4, %p10842_p13 }
0x133a   : > { %p10840_p12 = pneg %p10839_p10 }
0x133b   : > { %p10846_p0 = por %p10845_p6, %p10844_p7 }
0x133d   : > { %p10847_p3 = pnand %p10846_p0, %p10840_p12 }
0x133f   : > { %10850 = shalt.err (!%p10847_p3)
}
0x1340   : > { %s13759_s22 = sld [smem:[#allocation130_spill]]  ;;  %s13760_s1 = sld [smem:[#allocation101_spill]] }
0x1341   : > { %9126 = dma.vmem_to_hbm [thread:$0]  (%p13750_p8), %s13332_s10, 512, %s13329_s14, %s7303_s30, %s11179_s3, %s11180_s13, %s11181_s24  }
0x1342   : > { %s7404_s26 = sshll.u32 %s12014_s28, 4  ;;  %s11185_s7 = smov [#allocation45]   ;;  %s7405_s26 = int_to_ptr.vmem [resolvable:$true] %s7404_s26 }
0x1343   : > { %s10855_s9 = sshll.u32 %s11185_s7, 4  ;;  %s10856_s9 = int_to_ptr.vmem [resolvable:$false] %s10855_s9 }
0x1344   : > { %s10857_s11 = scalar_lea.vmem %s10856_s9, 512 }
0x1346   : > { %s13761_s20 = smov %s13760_s1  ;;  %s7377_s17 = sshll.u32 %s13759_s22, 4  ;;  %s7378_s17 = int_to_ptr.vmem [resolvable:$true] %s7377_s17 }
0x1347   : > { %s13364_s16 = scalar_lea.hbm %s13760_s1, %s13250_s25  ;;  %s10851_s0 = scalar_lea.vmem %s7378_s17, 256 }
0x1348   : > { %p10852_p2 = scmp.ne.s32.totalorder %s7378_s17, %s10851_s0  ;;  %p10858_p9 = scmp.lt.s32.totalorder %s7378_s17, %s10856_s9 }
0x1349   : > { %p10859_p1 = scmp.lt.s32.totalorder %s10857_s11, %s10851_s0 }
0x134a   : > { %p10853_p5 = pnand %p10852_p2, %p13750_p8 }
0x134b   : > { %p10860_p10 = por %p10859_p1, %p10858_p9 }
0x134c   : > { %p10854_p11 = pneg %p10853_p5 }
0x134e   : > { %p10861_p12 = pnand %p10860_p10, %p10854_p11 }
0x1350   : > { %10864 = shalt.err (!%p10861_p12)
}
0x1351   : > { %s10865_s28 = scalar_lea.hbm %s13336_s6, 256  ;;  %s10869_s25 = scalar_lea.hbm %s13757_s29, 512 }
0x1352   : > { %p10866_p13 = scmp.ne.s32.totalorder %s13336_s6, %s10865_s28  ;;  %p10870_p6 = scmp.lt.u32.totalorder %s13336_s6, %s13757_s29 }
0x1353   : > { %p10871_p0 = scmp.lt.u32.totalorder %s10869_s25, %s10865_s28  ;;  %p10873_p2 = scmp.lt.u32.totalorder %s10865_s28, %s13336_s6 }
0x1354   : > { %p10867_p4 = pnand %p10866_p13, %p13750_p8 }
0x1355   : > { %p10872_p3 = por %p10871_p0, %p10870_p6 }
0x1356   : > { %p10868_p7 = pneg %p10867_p4 }
0x1357   : > { %p10874_p5 = por %p10873_p2, %p10872_p3 }
0x1359   : > { %p10875_p11 = pnand %p10874_p5, %p10868_p7 }
0x135b   : > { %10878 = shalt.err (!%p10875_p11)
}
0x135c   : > { %s13762_s3 = sld [smem:[#allocation103_spill]]  ;;  %s10879_s24 = scalar_lea.vmem %s7405_s26, 128 }
0x135d   : > { %9128 = dma.vmem_to_hbm [thread:$0]  (%p13750_p8), %s7378_s17, 256, %s13336_s6, %s7308_s5  }
0x135e   : > { %p10880_p9 = scmp.ne.s32.totalorder %s7405_s26, %s10879_s24  ;;  %s11186_s11 = smov [#allocation48]  }
0x135f   : > { %s10883_s14 = sshll.u32 %s11186_s11, 4  ;;  %s10884_s14 = int_to_ptr.vmem [resolvable:$false] %s10883_s14 }
0x1360   : > { %p10881_p1 = pnand %p10880_p9, %p13750_p8  ;;  %s10885_s10 = scalar_lea.vmem %s10884_s14, 256 }
0x1361   : > { %p10886_p12 = scmp.lt.s32.totalorder %s7405_s26, %s10884_s14  ;;  %p10887_p13 = scmp.lt.s32.totalorder %s10885_s10, %s10879_s24 }
0x1362   : > { %s13384_s13 = scalar_lea.hbm %s13762_s3, %s13260_s2  ;;  %p10882_p10 = pneg %p10881_p1 }
0x1363   : > { %p10888_p4 = por %p10887_p13, %p10886_p12 }
0x1365   : > { %p10889_p7 = pnand %p10888_p4, %p10882_p10 }
0x1367   : > { %10892 = shalt.err (!%p10889_p7)
}
0x1368   : > { %s10893_s2 = scalar_lea.hbm %s13364_s16, 128  ;;  %s10897_s5 = scalar_lea.hbm %s13761_s20, 256 }
0x1369   : > { %p10894_p6 = scmp.ne.s32.totalorder %s13364_s16, %s10893_s2  ;;  %p10898_p2 = scmp.lt.u32.totalorder %s13364_s16, %s13761_s20 }
0x136a   : > { %p10899_p5 = scmp.lt.u32.totalorder %s10897_s5, %s10893_s2  ;;  %p10901_p9 = scmp.lt.u32.totalorder %s10893_s2, %s13364_s16 }
0x136b   : > { %p10895_p0 = pnand %p10894_p6, %p13750_p8 }
0x136c   : > { %p10900_p11 = por %p10899_p5, %p10898_p2 }
0x136d   : > { %p10896_p3 = pneg %p10895_p0 }
0x136e   : > { %p10902_p1 = por %p10901_p9, %p10900_p11 }
0x1370   : > { %p10903_p10 = pnand %p10902_p1, %p10896_p3 }
0x1372   : > { %10906 = shalt.err (!%p10903_p10)
}
0x1373   : > { %s13763_s6 = sld [smem:[#allocation131_spill]]  ;;  %s11187_s1 = smov [#allocation51]  }
0x1374   : > { %9130 = dma.vmem_to_hbm [thread:$0]  (%p13750_p8), %s7405_s26, 128, %s13364_s16, %s7318_s18  }
0x1375   : > { %s10911_s17 = sshll.u32 %s11187_s1, 4  ;;  %s10912_s17 = int_to_ptr.vmem [resolvable:$false] %s10911_s17 }
0x1376   : > { %s10913_s0 = scalar_lea.vmem %s10912_s17, 512 }
0x1379   : > { %s7431_s30 = sshll.u32 %s13763_s6, 4  ;;  %s7432_s30 = int_to_ptr.vmem [resolvable:$true] %s7431_s30 }
0x137a   : > { %s10907_s22 = scalar_lea.vmem %s7432_s30, 256  ;;  %p10914_p7 = scmp.lt.s32.totalorder %s7432_s30, %s10912_s17 }
0x137b   : > { %p10908_p12 = scmp.ne.s32.totalorder %s7432_s30, %s10907_s22  ;;  %p10915_p6 = scmp.lt.s32.totalorder %s10913_s0, %s10907_s22 }
0x137d   : > { %p10909_p13 = pnand %p10908_p12, %p13750_p8  ;;  %p10916_p0 = por %p10915_p6, %p10914_p7 }
0x137f   : > { %p10910_p4 = pneg %p10909_p13 }
0x1381   : > { %p10917_p3 = pnand %p10916_p0, %p10910_p4 }
0x1383   : > { %10920 = shalt.err (!%p10917_p3)
}
0x1384   : > { %s10921_s18 = scalar_lea.hbm %s13384_s13, 256  ;;  %s10925_s16 = scalar_lea.hbm %s13762_s3, 512 }
0x1385   : > { %p10922_p2 = scmp.ne.s32.totalorder %s13384_s13, %s10921_s18  ;;  %p10926_p9 = scmp.lt.u32.totalorder %s13384_s13, %s13762_s3 }
0x1386   : > { %p10927_p1 = scmp.lt.u32.totalorder %s10925_s16, %s10921_s18  ;;  %p10929_p12 = scmp.lt.u32.totalorder %s10921_s18, %s13384_s13 }
0x1387   : > { %p10923_p5 = pnand %p10922_p2, %p13750_p8 }
0x1388   : > { %p10928_p10 = por %p10927_p1, %p10926_p9 }
0x1389   : > { %p10924_p11 = pneg %p10923_p5 }
0x138a   : > { %p10930_p13 = por %p10929_p12, %p10928_p10 }
0x138c   : > { %p10931_p4 = pnand %p10930_p13, %p10924_p11 }
0x138e   : > { %10934 = shalt.err (!%p10931_p4)
}
0x138f   : > { %s13764_s26 = scalar_lea.sflag [#allocation50], %s13748_s8 }
0x1390   : > { %9132 = dma.vmem_to_hbm [thread:$0]  (%p13750_p8), %s7432_s30, 256, %s13384_s13, %s13764_s26  }
0x1391 PF: > { %s13765_s7 = sld [smem:[#allocation114_spill]]  ;;  %s13766_s9 = sld [smem:[#allocation104_spill]] }
0x1392   : > { %s13767_s28 = sld [smem:[#allocation119_spill]] }
0x1397   : > { %p9273_p7 = scmp.ge.s32.totalorder %s13765_s7, 2  ;;  %s7443_s25 = sand.u32 1, %s13766_s9  }
0x1398   : > { %p13768_p6 = scmp.ne.s32.totalorder %s13767_s28, 0  ;;  %s7444_s24 = scalar_lea.sflag [#allocation6], %s7443_s25 }
0x139a   : > { %p9215_p0 = pnand %p9273_p7, %p13768_p6 }
0x139c   : > { %11036 = dma.done.wait (!%p9215_p0), %s7444_s24, 512  }
0x139d   : > { %11038 = vsyncadd (!%p9215_p0), %s7444_s24, 4294966784  ;;  %s13769_s11 = sadd.s32 4294967294, %s13765_s7  }
0x139e   : > { %s7452_s14 = sand.u32 1, %s13769_s11  }
0x139f   : > { %s7453_s10 = scalar_lea.sflag [#allocation44], %s7452_s14 }
0x13a0   : > { %11040 = dma.done.wait (!%p9215_p0), %s7453_s10, 768  }
0x13a1   : > { %11042 = vsyncadd (!%p9215_p0), %s7453_s10, 4294966528  ;;  %s7471_s8 = scalar_lea.sflag [#allocation47], %s7452_s14 }
0x13a2   : > { %11044 = dma.done.wait (!%p9215_p0), %s7471_s8, 384  }
0x13a3   : > { %11046 = vsyncadd (!%p9215_p0), %s7471_s8, 4294966912  ;;  %s7489_s27 = scalar_lea.sflag [#allocation50], %s7452_s14 }
0x13a4   : > { %11048 = dma.done.wait (!%p9215_p0), %s7489_s27, 384  }
0x13a5   : > { %11050 = vsyncadd (!%p9215_p0), %s7489_s27, 4294966912  ;;  %s115_s7 = sadd.s32 1, %s13765_s7   ;;  %s13770_s0 = sld [smem:[#allocation105_spill]] }
0x13a6   : > { %p112_p8 = scmp.ge.s32.totalorder %s115_s7, 10   ;;  %s13771_s14 = sld [smem:[#allocation106_spill]] }
0x13a7   : > { %s13772_s16 = sld [smem:[#allocation124_spill]]  ;;  %s13773_s18 = sld [smem:[#allocation108_spill]] }
0x13a8   : > { %s13774_s9 = sld [smem:[#allocation109_spill]]  ;;  %s13775_s22 = sld [smem:[#allocation125_spill]] }
0x13a9   : > { %s13776_s26 = sld [smem:[#allocation112_spill]]  ;;  %s13777_s28 = sld [smem:[#allocation113_spill]] }
0x13aa   : > { %s13778_s1 = sld [smem:[#allocation122_spill]]  ;;  %s13779_s2 = sld [smem:[#allocation123_spill]] }
0x13ab   :  { %114 = sbr.rel (!%p112_p8) target bundleno = 102 (0x66), region = 473 }
0x13b2   :  { %7503 = vsyncpa [#allocation5], 1 }
0x13b3   :  { %7505 = vsyncpa [#allocation5 + $0x1], 1 }
0x13b4   :  { %7506 = vsyncpa [#allocation10], 1 }
0x13b5   :  { %7508 = vsyncpa [#allocation10 + $0x1], 1 }
0x13b6   :  { %7509 = vsyncpa [#allocation13], 1 }
0x13b7   :  { %7511 = vsyncpa [#allocation13 + $0x1], 1 }
0x13b8   :  { %7512 = vsyncpa [#allocation16], 1 }
0x13b9   :  { %7514 = vsyncpa [#allocation16 + $0x1], 1 }
0x13ba   :  { %7515 = vsyncpa [#allocation19], 1 }
0x13bb   :  { %7516 = vsyncpa [#allocation22], 1 }
0x13bc   :  { %7517 = vsyncpa [#allocation25], 1 }
0x13bd   :  { %7518 = vsyncpa [#allocation28], 1 }
0x13be   :  { %7519 = vsyncpa [#allocation31], 1 }
0x13bf   :  { %7520 = vsyncpa [#allocation34], 1 }
0x13c0   :  { %7521 = vsyncpa [#allocation37], 1 }
0x13c1   :  { %7522 = vsyncpa [#allocation40], 1 }
0x13c2   :  { %7523 = vsyncpa [#allocation6], 1 }
0x13c3   :  { %7525 = vsyncpa [#allocation6 + $0x1], 1 }
0x13c4   :  { %7526 = vsyncpa [#allocation44], 1 }
0x13c5   :  { %7528 = vsyncpa [#allocation44 + $0x1], 1 }
0x13c6   :  { %7529 = vsyncpa [#allocation47], 1 }
0x13c7   :  { %7531 = vsyncpa [#allocation47 + $0x1], 1 }
0x13c8   :  { %7532 = vsyncpa [#allocation50], 1 }
0x13c9   :  { %7534 = vsyncpa [#allocation50 + $0x1], 1 }
0x13ca   :  { %7535 = vsyncpa [#allocation7], 1 }
0x13cb   :  { %7537 = vsyncpa [#allocation7 + $0x1], 1 }

</bundles_post_ra>
